<compile_context>
chip_gen: v7x
topology: tpu7x:2x2x1
jax: 0.10.0
libtpu: 0.0.40
codegen_flags: <defaults>
</compile_context>

<pallas_src>
import jax
import jax.numpy as jnp
from jax.experimental import pallas as pl
from jax.experimental.pallas import tpu as pltpu

EPS = 1e-5


def _bn_train_affine(y, gb_ref, inv_count):
    """Training-mode BatchNorm over the row axis of an (R, C) f32 tile.

    gb_ref holds [gamma; beta] stacked as (2, C).  Uses the centered variance
    (robust vs. E[x^2]-mean^2 cancellation) and the biased estimator, matching
    nn.BatchNorm2d's forward normalization in training mode.
    """
    mean = jnp.sum(y, axis=0, keepdims=True) * inv_count          # (1, C)
    yc = y - mean
    var = jnp.sum(yc * yc, axis=0, keepdims=True) * inv_count     # biased var
    scale = gb_ref[0:1, :] * jax.lax.rsqrt(var + EPS)
    return yc * scale + gb_ref[1:2, :]


def _resnext_fused_kernel(x_ref, w1_ref, w2_ref, w3_ref,
                          gb1_ref, gb2_ref, gb3_ref, o_ref, pad_ref):
    N, H, W, Cin = x_ref.shape
    C = w1_ref.shape[1]
    Cout = w3_ref.shape[1]
    R = N * H * W
    inv_r = 1.0 / float(R)

    x = x_ref[...]                                    # (N, H, W, Cin) f32
    x2d = x.reshape(R, Cin)

    # ---- conv1 (1x1) + BN1 + ReLU --------------------------------------
    y1 = jnp.dot(x2d.astype(jnp.bfloat16), w1_ref[...],
                 preferred_element_type=jnp.float32)              # (R, C)
    y1n = jnp.maximum(_bn_train_affine(y1, gb1_ref, inv_r), 0.0)  # f32

    # ---- grouped conv3x3, padding=1 -------------------------------------
    # Zero the padded scratch, store the interior once, load the whole slab
    # once and cast to bf16 once; then 9 accumulating MXU dots (one per tap)
    # against the per-tap block-diagonal (C, C) weights.
    pad_ref[...] = jnp.zeros(pad_ref.shape, pad_ref.dtype)
    pad_ref[:, 1:H + 1, 1:W + 1, :] = y1n.reshape(N, H, W, C)
    padv = pad_ref[...].astype(jnp.bfloat16)          # (N, H+2, W+2, C) bf16

    y2 = None
    for t in range(9):
        di, dj = divmod(t, 3)
        win = padv[:, di:di + H, dj:dj + W, :].reshape(R, C)
        contrib = jnp.dot(win, w2_ref[t], preferred_element_type=jnp.float32)
        y2 = contrib if y2 is None else y2 + contrib              # (R, C) f32

    # ---- BN2 + ReLU + conv3 (1x1, expansion=2) ---------------------------
    y2n = jnp.maximum(_bn_train_affine(y2, gb2_ref, inv_r), 0.0)
    y3 = jnp.dot(y2n.astype(jnp.bfloat16), w3_ref[...],
                 preferred_element_type=jnp.float32)              # (R, Cout)

    # ---- BN3 + residual add + ReLU ---------------------------------------
    out = jnp.maximum(_bn_train_affine(y3, gb3_ref, inv_r) + x2d, 0.0)
    o_ref[...] = out.reshape(N, H, W, Cout)


def resnext_block_forward_nhwc(x, params):
    """x: (N, H, W, Cin) f32 -> (N, H, W, Cout) f32 (Cout == Cin, stride=1)."""
    N, H, W, Cin = x.shape
    w1, w2, w3 = params["w1"], params["w2_taps"], params["w3"]
    gb1, gb2, gb3 = params["gb1"], params["gb2"], params["gb3"]
    C = w1.shape[1]
    Cout = w3.shape[1]

    return pl.pallas_call(
        _resnext_fused_kernel,
        out_shape=jax.ShapeDtypeStruct((N, H, W, Cout), jnp.float32),
        grid=(1,),
        in_specs=[
            pl.BlockSpec((N, H, W, Cin), lambda i: (0, 0, 0, 0)),   # x
            pl.BlockSpec((Cin, C), lambda i: (0, 0)),               # w1
            pl.BlockSpec((9, C, C), lambda i: (0, 0, 0)),           # w2 taps
            pl.BlockSpec((C, Cout), lambda i: (0, 0)),              # w3
            pl.BlockSpec((2, C), lambda i: (0, 0)),                 # gamma/beta 1
            pl.BlockSpec((2, C), lambda i: (0, 0)),                 # gamma/beta 2
            pl.BlockSpec((2, Cout), lambda i: (0, 0)),              # gamma/beta 3
        ],
        out_specs=pl.BlockSpec((N, H, W, Cout), lambda i: (0, 0, 0, 0)),
        scratch_shapes=[pltpu.VMEM((N, H + 2, W + 2, C), jnp.float32)],
        compiler_params=pltpu.CompilerParams(
            dimension_semantics=("arbitrary",),
            vmem_limit_bytes=48 * 1024 * 1024,      # safe on v5e/v6e/v7x
        ),
    )(x, w1, w2, w3, gb1, gb2, gb3)


def resnext_block_forward_nchw(x_nchw, params):
    """NCHW adapter matching the PyTorch module interface (not the hot path)."""
    x = jnp.transpose(x_nchw, (0, 2, 3, 1))
    return jnp.transpose(resnext_block_forward_nhwc(x, params), (0, 3, 1, 2))


def make_params(key, in_channels, cardinality, bwidth, expansion=2):
    C = cardinality * bwidth
    Cg = C // cardinality
    Cout = C * expansion
    assert in_channels == Cout, "identity_downsample=None requires Cin == Cout"

    k1, k2, k3 = jax.random.split(key, 3)
    # conv1: torch weight [C, Cin, 1, 1] -> matmul weight [Cin, C]
    w1 = jax.random.normal(k1, (in_channels, C), jnp.float32) * 0.1
    # conv2 (grouped): torch weight [C_out=C, C_in_per_group=Cg, 3, 3]
    w2 = jax.random.normal(k2, (C, Cg, 3, 3), jnp.float32) * 0.1
    # conv3: torch weight [Cout, C, 1, 1] -> matmul weight [C, Cout]
    w3 = jax.random.normal(k3, (C, Cout), jnp.float32) * 0.1

    # Per-tap block-diagonal (9, C_in, C_out) matmul weights for the grouped
    # 3x3 conv (dense block-diagonal: wastes MXU FLOPs by `cardinality`x,
    # acceptable at this problem size — see header scaling note).
    w2bd = jnp.zeros((3, 3, C, C), jnp.float32)
    for g in range(cardinality):
        blk = jnp.transpose(w2[g * Cg:(g + 1) * Cg], (2, 3, 1, 0))  # (3,3,Cg_in,Cg_out)
        w2bd = w2bd.at[:, :, g * Cg:(g + 1) * Cg, g * Cg:(g + 1) * Cg].set(blk)
    w2_taps = w2bd.reshape(9, C, C)

    # Conv biases intentionally omitted: training-mode BN mean subtraction
    # cancels per-channel constants exactly.  BN affine at PyTorch init:
    # gamma = 1, beta = 0, stacked as (2, C) [gamma; beta].
    def gb(c):
        return jnp.stack([jnp.ones((c,), jnp.float32),
                          jnp.zeros((c,), jnp.float32)])

    kernel_params = dict(
        w1=w1.astype(jnp.bfloat16),
        w2_taps=w2_taps.astype(jnp.bfloat16),
        w3=w3.astype(jnp.bfloat16),
        gb1=gb(C), gb2=gb(C), gb3=gb(Cout),
    )
    # Reference-only: torch-layout grouped-conv weight, rounded to bf16 so
    # the reference uses exactly the same weight values as the kernel.
    ref_params = dict(w2_groups=w2.astype(jnp.bfloat16), cardinality=cardinality)
    return kernel_params, ref_params


def resnext_block_reference(x, kernel_params, ref_params):
    """Pure-JAX NHWC f32 reference (independent grouped conv via lax.conv)."""
    w1 = kernel_params["w1"].astype(jnp.float32)
    w3 = kernel_params["w3"].astype(jnp.float32)
    w2g = ref_params["w2_groups"].astype(jnp.float32)      # (C, Cg, 3, 3)
    cardinality = ref_params["cardinality"]

    def bn(y, gb):
        mean = jnp.mean(y, axis=(0, 1, 2))
        var = jnp.mean(jnp.square(y - mean), axis=(0, 1, 2))
        return (y - mean) * (gb[0] * jax.lax.rsqrt(var + EPS)) + gb[1]

    y = jnp.einsum("nhwc,cd->nhwd", x, w1)
    y = jax.nn.relu(bn(y, kernel_params["gb1"]))
    y = jax.lax.conv_general_dilated(
        y, jnp.transpose(w2g, (2, 3, 1, 0)),                # HWIO (3,3,Cg,C)
        window_strides=(1, 1), padding="SAME",
        dimension_numbers=("NHWC", "HWIO", "NHWC"),
        feature_group_count=cardinality)
    y = jax.nn.relu(bn(y, kernel_params["gb2"]))
    y = jnp.einsum("nhwc,cd->nhwd", y, w3)
    y = bn(y, kernel_params["gb3"])
    return jax.nn.relu(y + x)


if __name__ == "__main__":
    # resnext_block(in_channels=256, cardinality=16, bwidth=8,
    #               idt_downsample=None, stride=1): C = 128, Cout = 256 = Cin.
    # Channel dims are multiples of 128 -> lane-dense vregs / MXU tiles.
    N, H, W = 2, 16, 16
    cardinality, bwidth, expansion = 16, 8, 2
    Cin = cardinality * bwidth * expansion          # 256 == Cout (residual add)

    key = jax.random.PRNGKey(0)
    kx, kp = jax.random.split(key)
    # NHWC end-to-end: no layout transposes in the hot path.
    x = jax.random.normal(kx, (N, H, W, Cin), jnp.float32)
    kernel_params, ref_params = make_params(kp, Cin, cardinality, bwidth,
                                            expansion)

    fwd = jax.jit(resnext_block_forward_nhwc)
    out = jax.block_until_ready(fwd(x, kernel_params))
    assert out.shape == (N, H, W, Cin)
    assert bool(jnp.all(jnp.isfinite(out)))

    # Correctness vs. an independent pure-JAX reference (bf16 MXU operands in
    # the kernel -> compare with a relative tolerance, per the review).
    ref = resnext_block_reference(x, kernel_params, ref_params)
    rel = float(jnp.linalg.norm((out - ref).ravel())
                / (jnp.linalg.norm(ref.ravel()) + 1e-6))
    assert rel < 3e-2, f"relative L2 error vs reference too large: {rel:.4f}"
    print("KERNEL_OK")
</pallas_src>

<mosaic_0001>
module attributes {stable_mosaic.version = 11 : i64} {
  func.func @_resnext_fused_kernel(%arg0: i32, %arg1: memref<2x16x16x256xf32, #tpu.memory_space<vmem>>, %arg2: memref<256x128xbf16, #tpu.memory_space<vmem>>, %arg3: memref<9x128x128xbf16, #tpu.memory_space<vmem>>, %arg4: memref<128x256xbf16, #tpu.memory_space<vmem>>, %arg5: memref<2x128xf32, #tpu.memory_space<vmem>>, %arg6: memref<2x128xf32, #tpu.memory_space<vmem>>, %arg7: memref<2x256xf32, #tpu.memory_space<vmem>>, %arg8: memref<2x16x16x256xf32, #tpu.memory_space<vmem>>, %arg9: memref<2x18x18x128xf32, #tpu.memory_space<vmem>>) attributes {dimension_semantics = [#tpu.dimension_semantics<arbitrary>], iteration_bounds = array<i64: 1>, scalar_prefetch = 0 : i64, scratch_operands = 1 : i64, tpu.core_type = #tpu.core_type<tc>, window_params = [{pipeline_mode = #tpu.pipeline_mode<synchronous>, transform_indices = @transform_0, window_bounds = array<i64: 2, 16, 16, 256>}, {pipeline_mode = #tpu.pipeline_mode<synchronous>, transform_indices = @transform_1, window_bounds = array<i64: 256, 128>}, {pipeline_mode = #tpu.pipeline_mode<synchronous>, transform_indices = @transform_2, window_bounds = array<i64: 9, 128, 128>}, {pipeline_mode = #tpu.pipeline_mode<synchronous>, transform_indices = @transform_3, window_bounds = array<i64: 128, 256>}, {pipeline_mode = #tpu.pipeline_mode<synchronous>, transform_indices = @transform_4, window_bounds = array<i64: 2, 128>}, {pipeline_mode = #tpu.pipeline_mode<synchronous>, transform_indices = @transform_5, window_bounds = array<i64: 2, 128>}, {pipeline_mode = #tpu.pipeline_mode<synchronous>, transform_indices = @transform_6, window_bounds = array<i64: 2, 256>}, {pipeline_mode = #tpu.pipeline_mode<synchronous>, transform_indices = @transform_7, window_bounds = array<i64: 2, 16, 16, 256>}]} {
    %c0 = arith.constant 0 : index
    %c0_0 = arith.constant 0 : index
    %c0_1 = arith.constant 0 : index
    %c0_2 = arith.constant 0 : index
    %0 = vector.load %arg1[%c0, %c0_0, %c0_1, %c0_2] : memref<2x16x16x256xf32, #tpu.memory_space<vmem>>, vector<2x16x16x256xf32>
    %1 = vector.shape_cast %0 : vector<2x16x16x256xf32> to vector<512x256xf32>
    %2 = arith.truncf %1 : vector<512x256xf32> to vector<512x256xbf16>
    %c0_3 = arith.constant 0 : index
    %c0_4 = arith.constant 0 : index
    %3 = vector.load %arg2[%c0_3, %c0_4] : memref<256x128xbf16, #tpu.memory_space<vmem>>, vector<256x128xbf16>
    %cst = arith.constant dense<0.000000e+00> : vector<512x128xf32>
    %4 = tpu.matmul %2, %3, %cst {dimension_numbers = #tpu.dot_dimension_numbers<[1], [0], [0], [1], [0, 0, 1, 1], [], []>} : vector<512x256xbf16>, vector<256x128xbf16>, vector<512x128xf32> -> vector<512x128xf32>
    %cst_5 = arith.constant dense<0.000000e+00> : vector<128xf32>
    %5 = vector.multi_reduction <add>, %4, %cst_5 [0] : vector<512x128xf32> to vector<128xf32>
    %6 = vector.shape_cast %5 : vector<128xf32> to vector<1x128xf32>
    %cst_6 = arith.constant 0.001953125 : f32
    %7 = vector.broadcast %cst_6 : f32 to vector<1x128xf32>
    %8 = arith.mulf %6, %7 : vector<1x128xf32>
    %9 = vector.broadcast %8 : vector<1x128xf32> to vector<512x128xf32>
    %10 = arith.subf %4, %9 : vector<512x128xf32>
    %11 = arith.mulf %10, %10 : vector<512x128xf32>
    %cst_7 = arith.constant dense<0.000000e+00> : vector<128xf32>
    %12 = vector.multi_reduction <add>, %11, %cst_7 [0] : vector<512x128xf32> to vector<128xf32>
    %13 = vector.shape_cast %12 : vector<128xf32> to vector<1x128xf32>
    %cst_8 = arith.constant 0.001953125 : f32
    %14 = vector.broadcast %cst_8 : f32 to vector<1x128xf32>
    %15 = arith.mulf %13, %14 : vector<1x128xf32>
    %c0_9 = arith.constant 0 : index
    %c0_10 = arith.constant 0 : index
    %16 = vector.load %arg5[%c0_9, %c0_10] : memref<2x128xf32, #tpu.memory_space<vmem>>, vector<1x128xf32>
    %cst_11 = arith.constant 9.99999974E-6 : f32
    %17 = vector.broadcast %cst_11 : f32 to vector<1x128xf32>
    %18 = arith.addf %15, %17 : vector<1x128xf32>
    %19 = math.rsqrt %18 : vector<1x128xf32>
    %20 = arith.mulf %16, %19 : vector<1x128xf32>
    %21 = vector.broadcast %20 : vector<1x128xf32> to vector<512x128xf32>
    %22 = arith.mulf %10, %21 : vector<512x128xf32>
    %c1 = arith.constant 1 : index
    %c0_12 = arith.constant 0 : index
    %23 = vector.load %arg5[%c1, %c0_12] : memref<2x128xf32, #tpu.memory_space<vmem>>, vector<1x128xf32>
    %24 = vector.broadcast %23 : vector<1x128xf32> to vector<512x128xf32>
    %25 = arith.addf %22, %24 : vector<512x128xf32>
    %cst_13 = arith.constant 0.000000e+00 : f32
    %26 = vector.broadcast %cst_13 : f32 to vector<512x128xf32>
    %27 = arith.maximumf %25, %26 : vector<512x128xf32>
    %cst_14 = arith.constant 0.000000e+00 : f32
    %28 = vector.broadcast %cst_14 : f32 to vector<2x18x18x128xf32>
    %c0_15 = arith.constant 0 : index
    %c0_16 = arith.constant 0 : index
    %c0_17 = arith.constant 0 : index
    %c0_18 = arith.constant 0 : index
    %29 = vector.load %arg9[%c0_15, %c0_16, %c0_17, %c0_18] : memref<2x18x18x128xf32, #tpu.memory_space<vmem>>, vector<2x18x18x128xf32>
    tpu.vector_store %arg9[%c0_15, %c0_16, %c0_17, %c0_18], %28 {strides = array<i32>} : memref<2x18x18x128xf32, #tpu.memory_space<vmem>>, vector<2x18x18x128xf32>,
    %30 = vector.shape_cast %27 : vector<512x128xf32> to vector<2x16x16x128xf32>
    %c0_19 = arith.constant 0 : index
    %c1_20 = arith.constant 1 : index
    %c1_21 = arith.constant 1 : index
    %c0_22 = arith.constant 0 : index
    %31 = vector.load %arg9[%c0_19, %c1_20, %c1_21, %c0_22] : memref<2x18x18x128xf32, #tpu.memory_space<vmem>>, vector<2x16x16x128xf32>
    tpu.vector_store %arg9[%c0_19, %c1_20, %c1_21, %c0_22], %30 {strides = array<i32>} : memref<2x18x18x128xf32, #tpu.memory_space<vmem>>, vector<2x16x16x128xf32>,
    %c0_23 = arith.constant 0 : index
    %c0_24 = arith.constant 0 : index
    %c0_25 = arith.constant 0 : index
    %c0_26 = arith.constant 0 : index
    %32 = vector.load %arg9[%c0_23, %c0_24, %c0_25, %c0_26] : memref<2x18x18x128xf32, #tpu.memory_space<vmem>>, vector<2x18x18x128xf32>
    %33 = arith.truncf %32 : vector<2x18x18x128xf32> to vector<2x18x18x128xbf16>
    %34 = vector.extract_strided_slice %33 {offsets = [0, 0, 0, 0], sizes = [2, 16, 16, 128], strides = [1, 1, 1, 1]} : vector<2x18x18x128xbf16> to vector<2x16x16x128xbf16>
    %35 = vector.shape_cast %34 : vector<2x16x16x128xbf16> to vector<512x128xbf16>
    %c0_27 = arith.constant 0 : index
    %c0_28 = arith.constant 0 : index
    %c0_29 = arith.constant 0 : index
    %36 = vector.load %arg3[%c0_27, %c0_28, %c0_29] : memref<9x128x128xbf16, #tpu.memory_space<vmem>>, vector<1x128x128xbf16>
    %37 = vector.shape_cast %36 : vector<1x128x128xbf16> to vector<128x128xbf16>
    %cst_30 = arith.constant dense<0.000000e+00> : vector<512x128xf32>
    %38 = tpu.matmul %35, %37, %cst_30 {dimension_numbers = #tpu.dot_dimension_numbers<[1], [0], [0], [1], [0, 0, 1, 1], [], []>} : vector<512x128xbf16>, vector<128x128xbf16>, vector<512x128xf32> -> vector<512x128xf32>
    %39 = vector.extract_strided_slice %33 {offsets = [0, 0, 1, 0], sizes = [2, 16, 16, 128], strides = [1, 1, 1, 1]} : vector<2x18x18x128xbf16> to vector<2x16x16x128xbf16>
    %40 = vector.shape_cast %39 : vector<2x16x16x128xbf16> to vector<512x128xbf16>
    %c1_31 = arith.constant 1 : index
    %c0_32 = arith.constant 0 : index
    %c0_33 = arith.constant 0 : index
    %41 = vector.load %arg3[%c1_31, %c0_32, %c0_33] : memref<9x128x128xbf16, #tpu.memory_space<vmem>>, vector<1x128x128xbf16>
    %42 = vector.shape_cast %41 : vector<1x128x128xbf16> to vector<128x128xbf16>
    %cst_34 = arith.constant dense<0.000000e+00> : vector<512x128xf32>
    %43 = tpu.matmul %40, %42, %cst_34 {dimension_numbers = #tpu.dot_dimension_numbers<[1], [0], [0], [1], [0, 0, 1, 1], [], []>} : vector<512x128xbf16>, vector<128x128xbf16>, vector<512x128xf32> -> vector<512x128xf32>
    %44 = arith.addf %38, %43 : vector<512x128xf32>
    %45 = vector.extract_strided_slice %33 {offsets = [0, 0, 2, 0], sizes = [2, 16, 16, 128], strides = [1, 1, 1, 1]} : vector<2x18x18x128xbf16> to vector<2x16x16x128xbf16>
    %46 = vector.shape_cast %45 : vector<2x16x16x128xbf16> to vector<512x128xbf16>
    %c2 = arith.constant 2 : index
    %c0_35 = arith.constant 0 : index
    %c0_36 = arith.constant 0 : index
    %47 = vector.load %arg3[%c2, %c0_35, %c0_36] : memref<9x128x128xbf16, #tpu.memory_space<vmem>>, vector<1x128x128xbf16>
    %48 = vector.shape_cast %47 : vector<1x128x128xbf16> to vector<128x128xbf16>
    %cst_37 = arith.constant dense<0.000000e+00> : vector<512x128xf32>
    %49 = tpu.matmul %46, %48, %cst_37 {dimension_numbers = #tpu.dot_dimension_numbers<[1], [0], [0], [1], [0, 0, 1, 1], [], []>} : vector<512x128xbf16>, vector<128x128xbf16>, vector<512x128xf32> -> vector<512x128xf32>
    %50 = arith.addf %44, %49 : vector<512x128xf32>
    %51 = vector.extract_strided_slice %33 {offsets = [0, 1, 0, 0], sizes = [2, 16, 16, 128], strides = [1, 1, 1, 1]} : vector<2x18x18x128xbf16> to vector<2x16x16x128xbf16>
    %52 = vector.shape_cast %51 : vector<2x16x16x128xbf16> to vector<512x128xbf16>
    %c3 = arith.constant 3 : index
    %c0_38 = arith.constant 0 : index
    %c0_39 = arith.constant 0 : index
    %53 = vector.load %arg3[%c3, %c0_38, %c0_39] : memref<9x128x128xbf16, #tpu.memory_space<vmem>>, vector<1x128x128xbf16>
    %54 = vector.shape_cast %53 : vector<1x128x128xbf16> to vector<128x128xbf16>
    %cst_40 = arith.constant dense<0.000000e+00> : vector<512x128xf32>
    %55 = tpu.matmul %52, %54, %cst_40 {dimension_numbers = #tpu.dot_dimension_numbers<[1], [0], [0], [1], [0, 0, 1, 1], [], []>} : vector<512x128xbf16>, vector<128x128xbf16>, vector<512x128xf32> -> vector<512x128xf32>
    %56 = arith.addf %50, %55 : vector<512x128xf32>
    %57 = vector.extract_strided_slice %33 {offsets = [0, 1, 1, 0], sizes = [2, 16, 16, 128], strides = [1, 1, 1, 1]} : vector<2x18x18x128xbf16> to vector<2x16x16x128xbf16>
    %58 = vector.shape_cast %57 : vector<2x16x16x128xbf16> to vector<512x128xbf16>
    %c4 = arith.constant 4 : index
    %c0_41 = arith.constant 0 : index
    %c0_42 = arith.constant 0 : index
    %59 = vector.load %arg3[%c4, %c0_41, %c0_42] : memref<9x128x128xbf16, #tpu.memory_space<vmem>>, vector<1x128x128xbf16>
    %60 = vector.shape_cast %59 : vector<1x128x128xbf16> to vector<128x128xbf16>
    %cst_43 = arith.constant dense<0.000000e+00> : vector<512x128xf32>
    %61 = tpu.matmul %58, %60, %cst_43 {dimension_numbers = #tpu.dot_dimension_numbers<[1], [0], [0], [1], [0, 0, 1, 1], [], []>} : vector<512x128xbf16>, vector<128x128xbf16>, vector<512x128xf32> -> vector<512x128xf32>
    %62 = arith.addf %56, %61 : vector<512x128xf32>
    %63 = vector.extract_strided_slice %33 {offsets = [0, 1, 2, 0], sizes = [2, 16, 16, 128], strides = [1, 1, 1, 1]} : vector<2x18x18x128xbf16> to vector<2x16x16x128xbf16>
    %64 = vector.shape_cast %63 : vector<2x16x16x128xbf16> to vector<512x128xbf16>
    %c5 = arith.constant 5 : index
    %c0_44 = arith.constant 0 : index
    %c0_45 = arith.constant 0 : index
    %65 = vector.load %arg3[%c5, %c0_44, %c0_45] : memref<9x128x128xbf16, #tpu.memory_space<vmem>>, vector<1x128x128xbf16>
    %66 = vector.shape_cast %65 : vector<1x128x128xbf16> to vector<128x128xbf16>
    %cst_46 = arith.constant dense<0.000000e+00> : vector<512x128xf32>
    %67 = tpu.matmul %64, %66, %cst_46 {dimension_numbers = #tpu.dot_dimension_numbers<[1], [0], [0], [1], [0, 0, 1, 1], [], []>} : vector<512x128xbf16>, vector<128x128xbf16>, vector<512x128xf32> -> vector<512x128xf32>
    %68 = arith.addf %62, %67 : vector<512x128xf32>
    %69 = vector.extract_strided_slice %33 {offsets = [0, 2, 0, 0], sizes = [2, 16, 16, 128], strides = [1, 1, 1, 1]} : vector<2x18x18x128xbf16> to vector<2x16x16x128xbf16>
    %70 = vector.shape_cast %69 : vector<2x16x16x128xbf16> to vector<512x128xbf16>
    %c6 = arith.constant 6 : index
    %c0_47 = arith.constant 0 : index
    %c0_48 = arith.constant 0 : index
    %71 = vector.load %arg3[%c6, %c0_47, %c0_48] : memref<9x128x128xbf16, #tpu.memory_space<vmem>>, vector<1x128x128xbf16>
    %72 = vector.shape_cast %71 : vector<1x128x128xbf16> to vector<128x128xbf16>
    %cst_49 = arith.constant dense<0.000000e+00> : vector<512x128xf32>
    %73 = tpu.matmul %70, %72, %cst_49 {dimension_numbers = #tpu.dot_dimension_numbers<[1], [0], [0], [1], [0, 0, 1, 1], [], []>} : vector<512x128xbf16>, vector<128x128xbf16>, vector<512x128xf32> -> vector<512x128xf32>
    %74 = arith.addf %68, %73 : vector<512x128xf32>
    %75 = vector.extract_strided_slice %33 {offsets = [0, 2, 1, 0], sizes = [2, 16, 16, 128], strides = [1, 1, 1, 1]} : vector<2x18x18x128xbf16> to vector<2x16x16x128xbf16>
    %76 = vector.shape_cast %75 : vector<2x16x16x128xbf16> to vector<512x128xbf16>
    %c7 = arith.constant 7 : index
    %c0_50 = arith.constant 0 : index
    %c0_51 = arith.constant 0 : index
    %77 = vector.load %arg3[%c7, %c0_50, %c0_51] : memref<9x128x128xbf16, #tpu.memory_space<vmem>>, vector<1x128x128xbf16>
    %78 = vector.shape_cast %77 : vector<1x128x128xbf16> to vector<128x128xbf16>
    %cst_52 = arith.constant dense<0.000000e+00> : vector<512x128xf32>
    %79 = tpu.matmul %76, %78, %cst_52 {dimension_numbers = #tpu.dot_dimension_numbers<[1], [0], [0], [1], [0, 0, 1, 1], [], []>} : vector<512x128xbf16>, vector<128x128xbf16>, vector<512x128xf32> -> vector<512x128xf32>
    %80 = arith.addf %74, %79 : vector<512x128xf32>
    %81 = vector.extract_strided_slice %33 {offsets = [0, 2, 2, 0], sizes = [2, 16, 16, 128], strides = [1, 1, 1, 1]} : vector<2x18x18x128xbf16> to vector<2x16x16x128xbf16>
    %82 = vector.shape_cast %81 : vector<2x16x16x128xbf16> to vector<512x128xbf16>
    %c8 = arith.constant 8 : index
    %c0_53 = arith.constant 0 : index
    %c0_54 = arith.constant 0 : index
    %83 = vector.load %arg3[%c8, %c0_53, %c0_54] : memref<9x128x128xbf16, #tpu.memory_space<vmem>>, vector<1x128x128xbf16>
    %84 = vector.shape_cast %83 : vector<1x128x128xbf16> to vector<128x128xbf16>
    %cst_55 = arith.constant dense<0.000000e+00> : vector<512x128xf32>
    %85 = tpu.matmul %82, %84, %cst_55 {dimension_numbers = #tpu.dot_dimension_numbers<[1], [0], [0], [1], [0, 0, 1, 1], [], []>} : vector<512x128xbf16>, vector<128x128xbf16>, vector<512x128xf32> -> vector<512x128xf32>
    %86 = arith.addf %80, %85 : vector<512x128xf32>
    %cst_56 = arith.constant dense<0.000000e+00> : vector<128xf32>
    %87 = vector.multi_reduction <add>, %86, %cst_56 [0] : vector<512x128xf32> to vector<128xf32>
    %88 = vector.shape_cast %87 : vector<128xf32> to vector<1x128xf32>
    %cst_57 = arith.constant 0.001953125 : f32
    %89 = vector.broadcast %cst_57 : f32 to vector<1x128xf32>
    %90 = arith.mulf %88, %89 : vector<1x128xf32>
    %91 = vector.broadcast %90 : vector<1x128xf32> to vector<512x128xf32>
    %92 = arith.subf %86, %91 : vector<512x128xf32>
    %93 = arith.mulf %92, %92 : vector<512x128xf32>
    %cst_58 = arith.constant dense<0.000000e+00> : vector<128xf32>
    %94 = vector.multi_reduction <add>, %93, %cst_58 [0] : vector<512x128xf32> to vector<128xf32>
    %95 = vector.shape_cast %94 : vector<128xf32> to vector<1x128xf32>
    %cst_59 = arith.constant 0.001953125 : f32
    %96 = vector.broadcast %cst_59 : f32 to vector<1x128xf32>
    %97 = arith.mulf %95, %96 : vector<1x128xf32>
    %c0_60 = arith.constant 0 : index
    %c0_61 = arith.constant 0 : index
    %98 = vector.load %arg6[%c0_60, %c0_61] : memref<2x128xf32, #tpu.memory_space<vmem>>, vector<1x128xf32>
    %cst_62 = arith.constant 9.99999974E-6 : f32
    %99 = vector.broadcast %cst_62 : f32 to vector<1x128xf32>
    %100 = arith.addf %97, %99 : vector<1x128xf32>
    %101 = math.rsqrt %100 : vector<1x128xf32>
    %102 = arith.mulf %98, %101 : vector<1x128xf32>
    %103 = vector.broadcast %102 : vector<1x128xf32> to vector<512x128xf32>
    %104 = arith.mulf %92, %103 : vector<512x128xf32>
    %c1_63 = arith.constant 1 : index
    %c0_64 = arith.constant 0 : index
    %105 = vector.load %arg6[%c1_63, %c0_64] : memref<2x128xf32, #tpu.memory_space<vmem>>, vector<1x128xf32>
    %106 = vector.broadcast %105 : vector<1x128xf32> to vector<512x128xf32>
    %107 = arith.addf %104, %106 : vector<512x128xf32>
    %cst_65 = arith.constant 0.000000e+00 : f32
    %108 = vector.broadcast %cst_65 : f32 to vector<512x128xf32>
    %109 = arith.maximumf %107, %108 : vector<512x128xf32>
    %110 = arith.truncf %109 : vector<512x128xf32> to vector<512x128xbf16>
    %c0_66 = arith.constant 0 : index
    %c0_67 = arith.constant 0 : index
    %111 = vector.load %arg4[%c0_66, %c0_67] : memref<128x256xbf16, #tpu.memory_space<vmem>>, vector<128x256xbf16>
    %cst_68 = arith.constant dense<0.000000e+00> : vector<512x256xf32>
    %112 = tpu.matmul %110, %111, %cst_68 {dimension_numbers = #tpu.dot_dimension_numbers<[1], [0], [0], [1], [0, 0, 1, 1], [], []>} : vector<512x128xbf16>, vector<128x256xbf16>, vector<512x256xf32> -> vector<512x256xf32>
    %cst_69 = arith.constant dense<0.000000e+00> : vector<256xf32>
    %113 = vector.multi_reduction <add>, %112, %cst_69 [0] : vector<512x256xf32> to vector<256xf32>
    %114 = vector.shape_cast %113 : vector<256xf32> to vector<1x256xf32>
    %cst_70 = arith.constant 0.001953125 : f32
    %115 = vector.broadcast %cst_70 : f32 to vector<1x256xf32>
    %116 = arith.mulf %114, %115 : vector<1x256xf32>
    %117 = vector.broadcast %116 : vector<1x256xf32> to vector<512x256xf32>
    %118 = arith.subf %112, %117 : vector<512x256xf32>
    %119 = arith.mulf %118, %118 : vector<512x256xf32>
    %cst_71 = arith.constant dense<0.000000e+00> : vector<256xf32>
    %120 = vector.multi_reduction <add>, %119, %cst_71 [0] : vector<512x256xf32> to vector<256xf32>
    %121 = vector.shape_cast %120 : vector<256xf32> to vector<1x256xf32>
    %cst_72 = arith.constant 0.001953125 : f32
    %122 = vector.broadcast %cst_72 : f32 to vector<1x256xf32>
    %123 = arith.mulf %121, %122 : vector<1x256xf32>
    %c0_73 = arith.constant 0 : index
    %c0_74 = arith.constant 0 : index
    %124 = vector.load %arg7[%c0_73, %c0_74] : memref<2x256xf32, #tpu.memory_space<vmem>>, vector<1x256xf32>
    %cst_75 = arith.constant 9.99999974E-6 : f32
    %125 = vector.broadcast %cst_75 : f32 to vector<1x256xf32>
    %126 = arith.addf %123, %125 : vector<1x256xf32>
    %127 = math.rsqrt %126 : vector<1x256xf32>
    %128 = arith.mulf %124, %127 : vector<1x256xf32>
    %129 = vector.broadcast %128 : vector<1x256xf32> to vector<512x256xf32>
    %130 = arith.mulf %118, %129 : vector<512x256xf32>
    %c1_76 = arith.constant 1 : index
    %c0_77 = arith.constant 0 : index
    %131 = vector.load %arg7[%c1_76, %c0_77] : memref<2x256xf32, #tpu.memory_space<vmem>>, vector<1x256xf32>
    %132 = vector.broadcast %131 : vector<1x256xf32> to vector<512x256xf32>
    %133 = arith.addf %130, %132 : vector<512x256xf32>
    %134 = arith.addf %133, %1 : vector<512x256xf32>
    %cst_78 = arith.constant 0.000000e+00 : f32
    %135 = vector.broadcast %cst_78 : f32 to vector<512x256xf32>
    %136 = arith.maximumf %134, %135 : vector<512x256xf32>
    %137 = vector.shape_cast %136 : vector<512x256xf32> to vector<2x16x16x256xf32>
    %c0_79 = arith.constant 0 : index
    %c0_80 = arith.constant 0 : index
    %c0_81 = arith.constant 0 : index
    %c0_82 = arith.constant 0 : index
    %138 = vector.load %arg8[%c0_79, %c0_80, %c0_81, %c0_82] : memref<2x16x16x256xf32, #tpu.memory_space<vmem>>, vector<2x16x16x256xf32>
    tpu.vector_store %arg8[%c0_79, %c0_80, %c0_81, %c0_82], %137 {strides = array<i32>} : memref<2x16x16x256xf32, #tpu.memory_space<vmem>>, vector<2x16x16x256xf32>,
    return
  }
  func.func @transform_0(%arg0: i32) -> (i32, i32, i32, i32) {
    %c0_i32 = arith.constant 0 : i32
    %c0_i32_0 = arith.constant 0 : i32
    %c0_i32_1 = arith.constant 0 : i32
    %c0_i32_2 = arith.constant 0 : i32
    %c0_i32_3 = arith.constant 0 : i32
    return %c0_i32, %c0_i32_0, %c0_i32_1, %c0_i32_2 : i32, i32, i32, i32
  }
  func.func @transform_1(%arg0: i32) -> (i32, i32) {
    %c0_i32 = arith.constant 0 : i32
    %c0_i32_0 = arith.constant 0 : i32
    %c0_i32_1 = arith.constant 0 : i32
    return %c0_i32, %c0_i32_0 : i32, i32
  }
  func.func @transform_2(%arg0: i32) -> (i32, i32, i32) {
    %c0_i32 = arith.constant 0 : i32
    %c0_i32_0 = arith.constant 0 : i32
    %c0_i32_1 = arith.constant 0 : i32
    %c0_i32_2 = arith.constant 0 : i32
    return %c0_i32, %c0_i32_0, %c0_i32_1 : i32, i32, i32
  }
  func.func @transform_3(%arg0: i32) -> (i32, i32) {
    %c0_i32 = arith.constant 0 : i32
    %c0_i32_0 = arith.constant 0 : i32
    %c0_i32_1 = arith.constant 0 : i32
    return %c0_i32, %c0_i32_0 : i32, i32
  }
  func.func @transform_4(%arg0: i32) -> (i32, i32) {
    %c0_i32 = arith.constant 0 : i32
    %c0_i32_0 = arith.constant 0 : i32
    %c0_i32_1 = arith.constant 0 : i32
    return %c0_i32, %c0_i32_0 : i32, i32
  }
  func.func @transform_5(%arg0: i32) -> (i32, i32) {
    %c0_i32 = arith.constant 0 : i32
    %c0_i32_0 = arith.constant 0 : i32
    %c0_i32_1 = arith.constant 0 : i32
    return %c0_i32, %c0_i32_0 : i32, i32
  }
  func.func @transform_6(%arg0: i32) -> (i32, i32) {
    %c0_i32 = arith.constant 0 : i32
    %c0_i32_0 = arith.constant 0 : i32
    %c0_i32_1 = arith.constant 0 : i32
    return %c0_i32, %c0_i32_0 : i32, i32
  }
  func.func @transform_7(%arg0: i32) -> (i32, i32, i32, i32) {
    %c0_i32 = arith.constant 0 : i32
    %c0_i32_0 = arith.constant 0 : i32
    %c0_i32_1 = arith.constant 0 : i32
    %c0_i32_2 = arith.constant 0 : i32
    %c0_i32_3 = arith.constant 0 : i32
    return %c0_i32, %c0_i32_0, %c0_i32_1, %c0_i32_2 : i32, i32, i32, i32
  }
}

</mosaic_0001>

<bundles_post_ra>
// kernel: resnext_block_forward_nhwc.1
= control target key start
LH: loop header
LB: loop body
LE: loop exit
PB: predicated region body
PF: predicated region fallthrough
CT: control target
= control target key end

     0   :  { %12 = vsyncpa [#allocation4], 0  ;;  %s16163_s0 = inlined_call_operand.hbm [shape: f32[2,16,16,256], index: 0, kind: input, shape index: {}]   ;;  %s16164_s1 = inlined_call_operand.hbm [shape: bf16[256,128], index: 1, kind: input, shape index: {}]   ;;  %s16165_s2 = inlined_call_operand.hbm [shape: bf16[9,128,128], index: 2, kind: input, shape index: {}]   ;;  %s16166_s3 = inlined_call_operand.hbm [shape: bf16[128,256], index: 3, kind: input, shape index: {}]   ;;  %s16167_s4 = inlined_call_operand.vmem [shape: f32[2,128], index: 4, kind: input, shape index: {}]   ;;  %s16168_s5 = inlined_call_operand.hbm [shape: f32[2,128], index: 5, kind: input, shape index: {}]   ;;  %s16169_s6 = inlined_call_operand.vmem [shape: f32[2,256], index: 6, kind: input, shape index: {}]   ;;  %s16170_s7 = inlined_call_operand.hbm [shape: f32[2,16,16,256], index: 7, kind: output, shape index: {}]  }
   0x1   :  { %13 = vsyncpa [#allocation7], 0 }
   0x2   :  { %14 = vsyncpa [#allocation10], 0 }
   0x3   :  { %15 = vsyncpa [#allocation5], 0  ;;  %s10173_s24 = smov [#allocation6]   ;;  %s10033_s28 = scalar_lea.hbm %s16164_s1, 2048 }
   0x4   :  { %s33_s25 = sshll.u32 %s10173_s24, 4  ;;  %p10034_p0 = scmp.ne.s32.totalorder %s16164_s1, %s10033_s28  ;;  %s34_s25 = int_to_ptr.vmem [resolvable:$true] %s33_s25 }
   0x5   :  { %p10037_p1 = scmp.lt.u32.totalorder %s10033_s28, %s16164_s1 }
   0x7   :  { %p10039_p2 = pnand %p10037_p1, %p10034_p0 }
   0x9   :  { %10042 = shalt.err (!%p10039_p2)
}
   0xa   :  { %s10043_s10 = scalar_lea.vmem %s34_s25, 2048  ;;  %p10048_p4 = scmp.lt.s32.totalorder %s34_s25, %s34_s25 }
   0xb   :  { %p10044_p3 = scmp.ne.s32.totalorder %s34_s25, %s10043_s10  ;;  %p10049_p5 = scmp.lt.s32.totalorder %s10043_s10, %s10043_s10 }
   0xd   :  { %p10050_p6 = por %p10049_p5, %p10048_p4 }
   0xf   :  { %p10051_p7 = pnand %p10050_p6, %p10044_p3 }
  0x11   :  { %10054 = shalt.err (!%p10051_p7)
}
  0x12   :  { %s10174_s11 = smov 64   ;;  %s10175_s12 = smov 4  }
  0x13   :  { %39 = dma.hbm_to_vmem [thread:$0]  %s16164_s1, 2048, %s34_s25, [#allocation7], %s10174_s11, %s10174_s11, %s10175_s12  }
  0x14   :  { %s10176_s15 = smov [#allocation9]   ;;  %s10055_s19 = scalar_lea.hbm %s16166_s3, 2048 }
  0x15   :  { %s57_s16 = sshll.u32 %s10176_s15, 4  ;;  %p10056_p8 = scmp.ne.s32.totalorder %s16166_s3, %s10055_s19  ;;  %s58_s16 = int_to_ptr.vmem [resolvable:$true] %s57_s16 }
  0x16   :  { %p10059_p9 = scmp.lt.u32.totalorder %s10055_s19, %s16166_s3 }
  0x18   :  { %p10061_p10 = pnand %p10059_p9, %p10056_p8 }
  0x1a   :  { %10064 = shalt.err (!%p10061_p10)
}
  0x1b   :  { %s10065_s24 = scalar_lea.vmem %s58_s16, 2048  ;;  %p10070_p12 = scmp.lt.s32.totalorder %s58_s16, %s58_s16 }
  0x1c   :  { %p10066_p11 = scmp.ne.s32.totalorder %s58_s16, %s10065_s24  ;;  %p10071_p13 = scmp.lt.s32.totalorder %s10065_s24, %s10065_s24 }
  0x1e   :  { %p10072_p0 = por %p10071_p13, %p10070_p12 }
  0x20   :  { %p10073_p1 = pnand %p10072_p0, %p10066_p11 }
  0x22   :  { %10076 = shalt.err (!%p10073_p1)
}
  0x23   :  { %s10177_s1 = smov 128   ;;  %s10178_s25 = smov 8  }
  0x24   :  { %63 = dma.hbm_to_vmem [thread:$0]  %s16166_s3, 2048, %s58_s16, [#allocation10], %s10177_s1, %s10177_s1, %s10178_s25  }
  0x25   :  { %s10179_s28 = smov [#allocation3]   ;;  %s10077_s9 = scalar_lea.hbm %s16163_s0, 16384 }
  0x26   :  { %s21_s29 = sshll.u32 %s10179_s28, 4  ;;  %p10078_p2 = scmp.ne.s32.totalorder %s16163_s0, %s10077_s9  ;;  %s22_s29 = int_to_ptr.vmem [resolvable:$true] %s21_s29 }
  0x27   :  { %p10081_p3 = scmp.lt.u32.totalorder %s10077_s9, %s16163_s0 }
  0x29   :  { %p10083_p4 = pnand %p10081_p3, %p10078_p2 }
  0x2b   :  { %10086 = shalt.err (!%p10083_p4)
}
  0x2c   :  { %s10087_s17 = scalar_lea.vmem %s22_s29, 16384  ;;  %p10092_p6 = scmp.lt.s32.totalorder %s22_s29, %s22_s29 }
  0x2d   :  { %p10088_p5 = scmp.ne.s32.totalorder %s22_s29, %s10087_s17  ;;  %p10093_p7 = scmp.lt.s32.totalorder %s10087_s17, %s10087_s17 }
  0x2f   :  { %p10094_p8 = por %p10093_p7, %p10092_p6 }
  0x31   :  { %p10095_p9 = pnand %p10094_p8, %p10088_p5 }
  0x33   :  { %10098 = shalt.err (!%p10095_p9)
}
  0x34   :  { %s10180_s3 = smov 256   ;;  %s10181_s16 = smov 16  }
  0x35   :  { %27 = dma.hbm_to_vmem [thread:$0]  %s16163_s0, 16384, %s22_s29, [#allocation4], %s10180_s3, %s10180_s3, %s10181_s16  }
  0x36   :  { %s10182_s20 = smov [#allocation8]   ;;  %s10183_s22 = smov [#allocation11]  }
  0x37   :  { %s45_s21 = sshll.u32 %s10182_s20, 4  ;;  %s72_s23 = sshll.u32 %s10183_s22, 4  ;;  %s46_s21 = int_to_ptr.vmem [resolvable:$true] %s45_s21  ;;  %s73_s23 = int_to_ptr.vmem [resolvable:$true] %s72_s23 }
  0x38   :  { %s10099_s25 = scalar_lea.hbm %s16165_s2, 9216 }
  0x39   :  { %p10100_p10 = scmp.ne.s32.totalorder %s16165_s2, %s10099_s25  ;;  %p10103_p11 = scmp.lt.u32.totalorder %s10099_s25, %s16165_s2 }
  0x3b   :  { %p10105_p12 = pnand %p10103_p11, %p10100_p10 }
  0x3d   :  { %10108 = shalt.err (!%p10105_p12)
}
  0x3e   :  { %s10109_s0 = scalar_lea.vmem %s46_s21, 9216  ;;  %p10114_p0 = scmp.lt.s32.totalorder %s46_s21, %s46_s21 }
  0x3f   :  { %p10110_p13 = scmp.ne.s32.totalorder %s46_s21, %s10109_s0  ;;  %p10115_p1 = scmp.lt.s32.totalorder %s10109_s0, %s10109_s0 }
  0x41   :  { %p10116_p2 = por %p10115_p1, %p10114_p0 }
  0x43   :  { %p10117_p3 = pnand %p10116_p2, %p10110_p13 }
  0x45   :  { %10120 = shalt.err (!%p10117_p3)
}
  0x46   :  { %51 = dma.hbm_to_vmem [thread:$0]  %s16165_s2, 9216, %s46_s21, [#allocation7], %s10174_s11, %s10174_s11, %s10175_s12  }
  0x47   :  { %s10121_s13 = scalar_lea.hbm %s16168_s5, 32 }
  0x48   :  { %p10122_p4 = scmp.ne.s32.totalorder %s16168_s5, %s10121_s13  ;;  %p10125_p5 = scmp.lt.u32.totalorder %s10121_s13, %s16168_s5 }
  0x4a   :  { %p10127_p6 = pnand %p10125_p5, %p10122_p4 }
  0x4c   :  { %10130 = shalt.err (!%p10127_p6)
}
  0x4d   :  { %s10131_s19 = scalar_lea.vmem %s73_s23, 32  ;;  %p10136_p8 = scmp.lt.s32.totalorder %s73_s23, %s73_s23 }
  0x4e   :  { %p10132_p7 = scmp.ne.s32.totalorder %s73_s23, %s10131_s19  ;;  %p10137_p9 = scmp.lt.s32.totalorder %s10131_s19, %s10131_s19 }
  0x50   :  { %p10138_p10 = por %p10137_p9, %p10136_p8 }
  0x52   :  { %p10139_p11 = pnand %p10138_p10, %p10132_p7 }
  0x54   :  { %10142 = shalt.err (!%p10139_p11)
}
  0x55   :  { %75 = dma.hbm_to_vmem [thread:$0]  %s16168_s5, 32, %s73_s23, [#allocation10]  }
  0x56   :  { %10165 = dma.done.wait [#allocation4], 16384  }
  0x57   :  { %10166 = vsyncadd [#allocation4], 4294950912 }
  0x58   :  { %10167 = dma.done.wait [#allocation7], 11264  }
  0x59   :  { %10168 = vsyncadd [#allocation7], 4294956032 }
  0x5a   :  { %10169 = dma.done.wait [#allocation10], 2080  }
  0x5b   :  { %10170 = vsyncadd [#allocation10], 4294965216  ;;  %v16171_v0 = vmov 0   ;;  %v9775_v1 = vld [vmem:[#allocation6] sm:$0xff]   ;;  %v9776_v2 = vld [vmem:[#allocation6 + $0x8] sm:$0xff]   ;;  %vm2717_vm1 = vcmask 1046528  }
  0x5c   :  { %414 = vmatprep.subr.bf16.mxu0 %v16171_v0  ;;  %v9777_v3 = vld [vmem:[#allocation6 + $0x10] sm:$0xff]   ;;  %v9778_v4 = vld [vmem:[#allocation6 + $0x18] sm:$0xff]   ;;  %v9779_v5 = vld [vmem:[#allocation6 + $0x20] sm:$0xff]   ;;  %vm1545_vm0 = vsmask.f32 7424 }
  0x5d   :  { %415 = vmatpush1.bf16.msra.mxu0 %v9775_v1  ;;  %v95_v6 = vld [vmem:[#allocation3 + $0x8] sm:$0xff]  ;;  %v97_v7 = vld [vmem:[#allocation3 + $0x18] sm:$0xff]  ;;  %v9781_v10 = vld [vmem:[#allocation6 + $0x30] sm:$0xff]  }
  0x5e   :  { %416 = vmatprep.subr.bf16.mxu0 %v16171_v0  ;;  %v223_v8 = vpack.c.bf16 %v97_v7, %v95_v6  ;;  %v9780_v9 = vld [vmem:[#allocation6 + $0x28] sm:$0xff]   ;;  %v9782_v11 = vld [vmem:[#allocation6 + $0x38] sm:$0xff]   ;;  %v9783_v12 = vld [vmem:[#allocation6 + $0x40] sm:$0xff]  }
  0x5f   :  { %v9784_v13 = vld [vmem:[#allocation6 + $0x48] sm:$0xff]   ;;  %v9785_v14 = vld [vmem:[#allocation6 + $0x50] sm:$0xff]   ;;  %v9786_v15 = vld [vmem:[#allocation6 + $0x58] sm:$0xff]  }
  0x60   :  { %446 = vmatprep.mubr.bf16.mxu0 %v223_v8  ;;  %v9787_v16 = vld [vmem:[#allocation6 + $0x60] sm:$0xff]   ;;  %v9788_v17 = vld [vmem:[#allocation6 + $0x68] sm:$0xff]   ;;  %v9789_v18 = vld [vmem:[#allocation6 + $0x70] sm:$0xff]  }
  0x61   :  { %417 = vmatpush1.bf16.msra.mxu0 %v9776_v2  ;;  %v9790_v19 = vld [vmem:[#allocation6 + $0x78] sm:$0xff]   ;;  %v94_v20 = vld [vmem:[#allocation3] sm:$0xff]  ;;  %v96_v21 = vld [vmem:[#allocation3 + $0x10] sm:$0xff] }
  0x62   :  { %418 = vmatprep.subr.bf16.mxu0 %v16171_v0  ;;  %v99_v22 = vld [vmem:[#allocation3 + $0x28] sm:$0xff]  ;;  %v101_v23 = vld [vmem:[#allocation3 + $0x38] sm:$0xff]  ;;  %v222_v24 = vpack.c.bf16 %v96_v21, %v94_v20  ;;  %v98_v26 = vld [vmem:[#allocation3 + $0x20] sm:$0xff] }
  0x63   :  { %v225_v25 = vpack.c.bf16 %v101_v23, %v99_v22  ;;  %v100_v27 = vld [vmem:[#allocation3 + $0x30] sm:$0xff]  ;;  %v103_v28 = vld [vmem:[#allocation3 + $0x48] sm:$0xff]  ;;  %v105_v29 = vld [vmem:[#allocation3 + $0x58] sm:$0xff] }
  0x64   :  { %v224_v30 = vpack.c.bf16 %v100_v27, %v98_v26  ;;  %v227_v31 = vpack.c.bf16 %v105_v29, %v103_v28  ;;  %v102_v32 = vld [vmem:[#allocation3 + $0x40] sm:$0xff]  ;;  %v104_v33 = vld [vmem:[#allocation3 + $0x50] sm:$0xff]  ;;  %v107_v34 = vld [vmem:[#allocation3 + $0x68] sm:$0xff]  ;;  %v10185_v28 = vmov 0.0  }
  0x65   :  { %419 = vmatpush1.bf16.msra.mxu0 %v9777_v3  ;;  %v109_v35 = vld [vmem:[#allocation3 + $0x78] sm:$0xff]  ;;  %v226_v36 = vpack.c.bf16 %v104_v33, %v102_v32  ;;  %v106_v38 = vld [vmem:[#allocation3 + $0x60] sm:$0xff]  ;;  %v108_v39 = vld [vmem:[#allocation3 + $0x70] sm:$0xff]  ;;  %1179 = vst [vmem:[#allocation2 + $0x18] sm:$0xff] %v10185_v28 }
  0x66   :  { %420 = vmatprep.subr.bf16.mxu0 %v16171_v0  ;;  %v229_v37 = vpack.c.bf16 %v109_v35, %v107_v34  ;;  %v111_v40 = vld [vmem:[#allocation3 + $0x88] sm:$0xff]  ;;  %v113_v41 = vld [vmem:[#allocation3 + $0x98] sm:$0xff]  ;;  %v228_v42 = vpack.c.bf16 %v108_v39, %v106_v38  ;;  %v110_v44 = vld [vmem:[#allocation3 + $0x80] sm:$0xff]  ;;  %1180 = vst [vmem:[#allocation2 + $0x20] sm:$0xff] %v10185_v28 }
  0x67   :  { %v231_v43 = vpack.c.bf16 %v113_v41, %v111_v40  ;;  %v112_v45 = vld [vmem:[#allocation3 + $0x90] sm:$0xff]  ;;  %v115_v46 = vld [vmem:[#allocation3 + $0xa8] sm:$0xff]  ;;  %v117_v47 = vld [vmem:[#allocation3 + $0xb8] sm:$0xff]  ;;  %1176 = vst [vmem:[#allocation2] sm:$0xff] %v10185_v28 }
  0x68   :  { %v230_v48 = vpack.c.bf16 %v112_v45, %v110_v44  ;;  %v233_v49 = vpack.c.bf16 %v117_v47, %v115_v46  ;;  %v114_v50 = vld [vmem:[#allocation3 + $0xa0] sm:$0xff]  ;;  %v116_v51 = vld [vmem:[#allocation3 + $0xb0] sm:$0xff]  ;;  %v119_v52 = vld [vmem:[#allocation3 + $0xc8] sm:$0xff]  ;;  %1178 = vst [vmem:[#allocation2 + $0x10] sm:$0x3] %v10185_v28 }
  0x69   :  { %421 = vmatpush1.bf16.msra.mxu0 %v9778_v4  ;;  %v121_v53 = vld [vmem:[#allocation3 + $0xd8] sm:$0xff]  ;;  %v232_v54 = vpack.c.bf16 %v116_v51, %v114_v50  ;;  %v118_v56 = vld [vmem:[#allocation3 + $0xc0] sm:$0xff]  ;;  %v120_v57 = vld [vmem:[#allocation3 + $0xd0] sm:$0xff]  ;;  %1181 = vst [vmem:[#allocation2 + $0x28] sm:$0x3] %v10185_v28 }
  0x6a   :  { %422 = vmatprep.subr.bf16.mxu0 %v16171_v0  ;;  %v235_v55 = vpack.c.bf16 %v121_v53, %v119_v52  ;;  %v123_v58 = vld [vmem:[#allocation3 + $0xe8] sm:$0xff]  ;;  %v125_v59 = vld [vmem:[#allocation3 + $0xf8] sm:$0xff]  ;;  %v234_v60 = vpack.c.bf16 %v120_v57, %v118_v56  ;;  %v122_v62 = vld [vmem:[#allocation3 + $0xe0] sm:$0xff]  ;;  %1182 = vst [vmem:[#allocation2 + $0x30] sm:$0xff] %v10185_v28 }
  0x6b   :  { %v237_v61 = vpack.c.bf16 %v125_v59, %v123_v58  ;;  %v124_v63 = vld [vmem:[#allocation3 + $0xf0] sm:$0xff]  ;;  %v127_v1 = vld [vmem:[#allocation3 + $0x108] sm:$0xff]  ;;  %v129_v2 = vld [vmem:[#allocation3 + $0x118] sm:$0xff]  ;;  %1183 = vst [vmem:[#allocation2 + $0x38] sm:$0xff] %v10185_v28 }
  0x6c   :  { %v236_v3 = vpack.c.bf16 %v124_v63, %v122_v62  ;;  %v239_v4 = vpack.c.bf16 %v129_v2, %v127_v1  ;;  %v128_v6 = vld [vmem:[#allocation3 + $0x110] sm:$0xff]  ;;  %v131_v7 = vld [vmem:[#allocation3 + $0x128] sm:$0xff]  ;;  %v133_v8 = vld [vmem:[#allocation3 + $0x138] sm:$0xff]  ;;  %1184 = vst [vmem:[#allocation2 + $0x40] sm:$0x3] %v10185_v28 }
  0x6d   :  { %423 = vmatpush1.bf16.msra.mxu0 %v9779_v5  ;;  %v126_v5 = vld [vmem:[#allocation3 + $0x100] sm:$0xff]  ;;  %v141_v20 = vld [vmem:[#allocation3 + $0x178] sm:$0xff]  ;;  %1185 = vst [vmem:[#allocation2 + $0x48] sm:$0xff] %v10185_v28  ;;  %1186 = vst [vmem:[#allocation2 + $0x50] sm:$0xff] %v10185_v28 }
  0x6e   :  { %424 = vmatprep.subr.bf16.mxu0 %v16171_v0  ;;  %v10313_v23 = vld [vmem:[#allocation3 + $0x160] sm:$0xff]  ;;  %v10319_v26 = vld [vmem:[#allocation3 + $0x198] sm:$0xff]  ;;  %1187 = vst [vmem:[#allocation2 + $0x58] sm:$0x3] %v10185_v28  ;;  %1188 = vst [vmem:[#allocation2 + $0x60] sm:$0xff] %v10185_v28 }
  0x6f   :  { %1189 = vst [vmem:[#allocation2 + $0x68] sm:$0xff] %v10185_v28  ;;  %1190 = vst [vmem:[#allocation2 + $0x70] sm:$0x3] %v10185_v28  ;;  %v147_v32 = vld [vmem:[#allocation3 + $0x1a8] sm:$0xff]  ;;  %v149_v33 = vld [vmem:[#allocation3 + $0x1b8] sm:$0xff] }
  0x70   :  { %1191 = vst [vmem:[#allocation2 + $0x78] sm:$0xff] %v10185_v28  ;;  %1192 = vst [vmem:[#allocation2 + $0x80] sm:$0xff] %v10185_v28  ;;  %v249_v35 = vpack.c.bf16 %v149_v33, %v147_v32  ;;  %v151_v38 = vld [vmem:[#allocation3 + $0x1c8] sm:$0xff]  ;;  %v153_v39 = vld [vmem:[#allocation3 + $0x1d8] sm:$0xff] }
  0x71   :  { %425 = vmatpush1.bf16.msra.mxu0 %v9780_v9  ;;  %v238_v9 = vpack.c.bf16 %v128_v6, %v126_v5  ;;  %1193 = vst [vmem:[#allocation2 + $0x88] sm:$0x3] %v10185_v28  ;;  %1194 = vst [vmem:[#allocation2 + $0x90] sm:$0xff] %v10185_v28  ;;  %v251_v41 = vpack.c.bf16 %v153_v39, %v151_v38  ;;  %v155_v44 = vld [vmem:[#allocation3 + $0x1e8] sm:$0xff]  ;;  %v157_v45 = vld [vmem:[#allocation3 + $0x1f8] sm:$0xff] }
  0x72   :  { %426 = vmatprep.subr.bf16.mxu0 %v16171_v0  ;;  %1195 = vst [vmem:[#allocation2 + $0x98] sm:$0xff] %v10185_v28  ;;  %1196 = vst [vmem:[#allocation2 + $0xa0] sm:$0x3] %v10185_v28  ;;  %v253_v47 = vpack.c.bf16 %v157_v45, %v155_v44  ;;  %v159_v50 = vld [vmem:[#allocation3 + $0x208] sm:$0xff]  ;;  %v161_v51 = vld [vmem:[#allocation3 + $0x218] sm:$0xff] }
  0x73   :  { %1197 = vst [vmem:[#allocation2 + $0xa8] sm:$0xff] %v10185_v28  ;;  %1198 = vst [vmem:[#allocation2 + $0xb0] sm:$0xff] %v10185_v28  ;;  %v255_v53 = vpack.c.bf16 %v161_v51, %v159_v50  ;;  %v163_v56 = vld [vmem:[#allocation3 + $0x228] sm:$0xff]  ;;  %v165_v57 = vld [vmem:[#allocation3 + $0x238] sm:$0xff] }
  0x74   :  { %1199 = vst [vmem:[#allocation2 + $0xb8] sm:$0x3] %v10185_v28  ;;  %1200 = vst [vmem:[#allocation2 + $0xc0] sm:$0xff] %v10185_v28  ;;  %v257_v59 = vpack.c.bf16 %v165_v57, %v163_v56  ;;  %v167_v62 = vld [vmem:[#allocation3 + $0x248] sm:$0xff]  ;;  %v169_v63 = vld [vmem:[#allocation3 + $0x258] sm:$0xff] }
  0x75   :  { %427 = vmatpush1.bf16.msra.mxu0 %v9781_v10  ;;  %v241_v10 = vpack.c.bf16 %v133_v8, %v131_v7  ;;  %1201 = vst [vmem:[#allocation2 + $0xc8] sm:$0xff] %v10185_v28  ;;  %1202 = vst [vmem:[#allocation2 + $0xd0] sm:$0x3] %v10185_v28  ;;  %v259_v2 = vpack.c.bf16 %v169_v63, %v167_v62  ;;  %v171_v5 = vld [vmem:[#allocation3 + $0x268] sm:$0xff]  ;;  %v173_v6 = vld [vmem:[#allocation3 + $0x278] sm:$0xff] }
  0x76   :  { %428 = vmatprep.subr.bf16.mxu0 %v16171_v0  ;;  %1203 = vst [vmem:[#allocation2 + $0xd8] sm:$0xff] %v10185_v28  ;;  %1204 = vst [vmem:[#allocation2 + $0xe0] sm:$0xff] %v10185_v28  ;;  %v261_v8 = vpack.c.bf16 %v173_v6, %v171_v5  ;;  %v186_v33 = vld [vmem:[#allocation3 + $0x2e0] sm:$0xff]  ;;  %v208_v6 = vld [vmem:[#allocation3 + $0x390] sm:$0xff] }
  0x77   :  { %1205 = vst [vmem:[#allocation2 + $0xe8] sm:$0x3] %v10185_v28  ;;  %1206 = vst [vmem:[#allocation2 + $0xf0] sm:$0xff] %v10185_v28  ;;  %v190_v39 = vld [vmem:[#allocation3 + $0x300] sm:$0xff] }
  0x78   :  { %1207 = vst [vmem:[#allocation2 + $0xf8] sm:$0xff] %v10185_v28  ;;  %1208 = vst [vmem:[#allocation2 + $0x100] sm:$0x3] %v10185_v28  ;;  %v194_v45 = vld [vmem:[#allocation3 + $0x320] sm:$0xff] }
  0x79   :  { %429 = vmatpush1.bf16.msra.mxu0 %v9782_v11  ;;  %v130_v11 = vld [vmem:[#allocation3 + $0x120] sm:$0xff]  ;;  %1209 = vst [vmem:[#allocation2 + $0x108] sm:$0xff] %v10185_v28  ;;  %1210 = vst [vmem:[#allocation2 + $0x110] sm:$0xff] %v10185_v28 }
  0x7a   :  { %430 = vmatprep.subr.bf16.mxu0 %v16171_v0  ;;  %1211 = vst [vmem:[#allocation2 + $0x118] sm:$0x3] %v10185_v28  ;;  %1212 = vst [vmem:[#allocation2 + $0x120] sm:$0xff] %v10185_v28  ;;  %v198_v51 = vld [vmem:[#allocation3 + $0x340] sm:$0xff] }
  0x7b   :  { %1213 = vst [vmem:[#allocation2 + $0x128] sm:$0xff] %v10185_v28  ;;  %1214 = vst [vmem:[#allocation2 + $0x130] sm:$0x3] %v10185_v28  ;;  %v202_v57 = vld [vmem:[#allocation3 + $0x360] sm:$0xff] }
  0x7c   :  { %1215 = vst [vmem:[#allocation2 + $0x138] sm:$0xff] %v10185_v28  ;;  %1216 = vst [vmem:[#allocation2 + $0x140] sm:$0xff] %v10185_v28  ;;  %v206_v5 = vld [vmem:[#allocation3 + $0x380] sm:$0xff] }
  0x7d   :  { %431 = vmatpush1.bf16.msra.mxu0 %v9783_v12  ;;  %v132_v12 = vld [vmem:[#allocation3 + $0x130] sm:$0xff]  ;;  %1217 = vst [vmem:[#allocation2 + $0x148] sm:$0x3] %v10185_v28  ;;  %1218 = vst [vmem:[#allocation2 + $0x150] sm:$0xff] %v10185_v28 }
  0x7e   :  { %432 = vmatprep.subr.bf16.mxu0 %v16171_v0  ;;  %1219 = vst [vmem:[#allocation2 + $0x158] sm:$0xff] %v10185_v28  ;;  %1220 = vst [vmem:[#allocation2 + $0x160] sm:$0x3] %v10185_v28 }
  0x7f   :  { %1221 = vst [vmem:[#allocation2 + $0x168] sm:$0xff] %v10185_v28  ;;  %1222 = vst [vmem:[#allocation2 + $0x170] sm:$0xff] %v10185_v28 }
  0x80   :  { %1223 = vst [vmem:[#allocation2 + $0x178] sm:$0x3] %v10185_v28  ;;  %1224 = vst [vmem:[#allocation2 + $0x180] sm:$0xff] %v10185_v28 }
  0x81   :  { %433 = vmatpush1.bf16.msra.mxu0 %v9784_v13  ;;  %v135_v13 = vld [vmem:[#allocation3 + $0x148] sm:$0xff]  ;;  %1225 = vst [vmem:[#allocation2 + $0x188] sm:$0xff] %v10185_v28  ;;  %1226 = vst [vmem:[#allocation2 + $0x190] sm:$0x3] %v10185_v28 }
  0x82   :  { %434 = vmatprep.subr.bf16.mxu0 %v16171_v0  ;;  %1229 = vst [vmem:[#allocation2 + $0x1a8] sm:$0x3] %v10185_v28  ;;  %1232 = vst [vmem:[#allocation2 + $0x1c0] sm:$0x3] %v10185_v28 }
  0x83   :  { %1233 = vst [vmem:[#allocation2 + $0x1c8] sm:$0xff] %v10185_v28  ;;  %1234 = vst [vmem:[#allocation2 + $0x1d0] sm:$0xff] %v10185_v28 }
  0x84   :  { %1235 = vst [vmem:[#allocation2 + $0x1d8] sm:$0x3] %v10185_v28  ;;  %1236 = vst [vmem:[#allocation2 + $0x1e0] sm:$0xff] %v10185_v28 }
  0x85   :  { %435 = vmatpush1.bf16.msra.mxu0 %v9785_v14  ;;  %v137_v14 = vld [vmem:[#allocation3 + $0x158] sm:$0xff]  ;;  %1237 = vst [vmem:[#allocation2 + $0x1e8] sm:$0xff] %v10185_v28  ;;  %1238 = vst [vmem:[#allocation2 + $0x1f0] sm:$0x3] %v10185_v28 }
  0x86   :  { %436 = vmatprep.subr.bf16.mxu0 %v16171_v0  ;;  %1239 = vst [vmem:[#allocation2 + $0x1f8] sm:$0xff] %v10185_v28  ;;  %1240 = vst [vmem:[#allocation2 + $0x200] sm:$0xff] %v10185_v28 }
  0x87   :  { %1241 = vst [vmem:[#allocation2 + $0x208] sm:$0x3] %v10185_v28  ;;  %1242 = vst [vmem:[#allocation2 + $0x210] sm:$0xff] %v10185_v28 }
  0x88   :  { %1243 = vst [vmem:[#allocation2 + $0x218] sm:$0xff] %v10185_v28  ;;  %1244 = vst [vmem:[#allocation2 + $0x220] sm:$0x3] %v10185_v28 }
  0x89   :  { %437 = vmatpush1.bf16.msra.mxu0 %v9786_v15  ;;  %v240_v15 = vpack.c.bf16 %v132_v12, %v130_v11  ;;  %1245 = vst [vmem:[#allocation2 + $0x228] sm:$0xff] %v10185_v28  ;;  %1246 = vst [vmem:[#allocation2 + $0x230] sm:$0xff] %v10185_v28  ;;  %v175_v11 = vld [vmem:[#allocation3 + $0x288] sm:$0xff]  ;;  %v177_v12 = vld [vmem:[#allocation3 + $0x298] sm:$0xff] }
  0x8a   :  { %438 = vmatprep.subr.bf16.mxu0 %v16171_v0  ;;  %1247 = vst [vmem:[#allocation2 + $0x238] sm:$0x3] %v10185_v28  ;;  %1248 = vst [vmem:[#allocation2 + $0x240] sm:$0xff] %v10185_v28 }
  0x8b   :  { %1249 = vst [vmem:[#allocation2 + $0x248] sm:$0xff] %v10185_v28  ;;  %1250 = vst [vmem:[#allocation2 + $0x250] sm:$0x3] %v10185_v28 }
  0x8c   :  { %1251 = vst [vmem:[#allocation2 + $0x258] sm:$0xff] %v10185_v28  ;;  %1252 = vst [vmem:[#allocation2 + $0x260] sm:$0xff] %v10185_v28 }
  0x8d   :  { %439 = vmatpush1.bf16.msra.mxu0 %v9787_v16  ;;  %v243_v16 = vpack.c.bf16 %v137_v14, %v135_v13  ;;  %1253 = vst [vmem:[#allocation2 + $0x268] sm:$0x3] %v10185_v28  ;;  %1254 = vst [vmem:[#allocation2 + $0x270] sm:$0xff] %v10185_v28  ;;  %v263_v14 = vpack.c.bf16 %v177_v12, %v175_v11  ;;  %v278_v12 = vpack.c.bf16 %v208_v6, %v206_v5 }
  0x8e   :  { %440 = vmatprep.subr.bf16.mxu0 %v16171_v0  ;;  %1255 = vst [vmem:[#allocation2 + $0x278] sm:$0xff] %v10185_v28  ;;  %1256 = vst [vmem:[#allocation2 + $0x280] sm:$0x3] %v10185_v28 }
  0x8f   :  { %1257 = vst [vmem:[#allocation2 + $0x288] sm:$0xff] %v10185_v28  ;;  %1258 = vst [vmem:[#allocation2 + $0x290] sm:$0xff] %v10185_v28 }
  0x90   :  { %1259 = vst [vmem:[#allocation2 + $0x298] sm:$0x3] %v10185_v28  ;;  %1260 = vst [vmem:[#allocation2 + $0x2a0] sm:$0xff] %v10185_v28 }
  0x91   :  { %441 = vmatpush1.bf16.msra.mxu0 %v9788_v17  ;;  %v134_v17 = vld [vmem:[#allocation3 + $0x140] sm:$0xff]  ;;  %1261 = vst [vmem:[#allocation2 + $0x2a8] sm:$0xff] %v10185_v28  ;;  %1262 = vst [vmem:[#allocation2 + $0x2b0] sm:$0x3] %v10185_v28 }
  0x92   :  { %442 = vmatprep.subr.bf16.mxu0 %v16171_v0  ;;  %1263 = vst [vmem:[#allocation2 + $0x2b8] sm:$0xff] %v10185_v28  ;;  %1264 = vst [vmem:[#allocation2 + $0x2c0] sm:$0xff] %v10185_v28 }
  0x93   :  { %1265 = vst [vmem:[#allocation2 + $0x2c8] sm:$0x3] %v10185_v28  ;;  %1266 = vst [vmem:[#allocation2 + $0x2d0] sm:$0xff] %v10185_v28 }
  0x94   :  { %1267 = vst [vmem:[#allocation2 + $0x2d8] sm:$0xff] %v10185_v28  ;;  %1268 = vst [vmem:[#allocation2 + $0x2e0] sm:$0x3] %v10185_v28 }
  0x95   :  { %443 = vmatpush1.bf16.msra.mxu0 %v9789_v18  ;;  %v136_v18 = vld [vmem:[#allocation3 + $0x150] sm:$0xff]  ;;  %1269 = vst [vmem:[#allocation2 + $0x2e8] sm:$0xff] %v10185_v28  ;;  %1270 = vst [vmem:[#allocation2 + $0x2f0] sm:$0xff] %v10185_v28 }
  0x96   :  { %444 = vmatprep.subr.bf16.mxu0 %v16171_v0  ;;  %v242_v21 = vpack.c.bf16 %v136_v18, %v134_v17  ;;  %1271 = vst [vmem:[#allocation2 + $0x2f8] sm:$0x3] %v10185_v28  ;;  %1272 = vst [vmem:[#allocation2 + $0x300] sm:$0xff] %v10185_v28  ;;  %v179_v17 = vld [vmem:[#allocation3 + $0x2a8] sm:$0xff]  ;;  %v181_v18 = vld [vmem:[#allocation3 + $0x2b8] sm:$0xff] }
  0x97   :  { %1273 = vst [vmem:[#allocation2 + $0x308] sm:$0xff] %v10185_v28  ;;  %1274 = vst [vmem:[#allocation2 + $0x310] sm:$0x3] %v10185_v28 }
  0x98   :  { %1275 = vst [vmem:[#allocation2 + $0x318] sm:$0xff] %v10185_v28  ;;  %1276 = vst [vmem:[#allocation2 + $0x320] sm:$0xff] %v10185_v28 }
  0x99   :  { %445 = vmatpush1.bf16.msra.mxu0 %v9790_v19  ;;  %v139_v19 = vld [vmem:[#allocation3 + $0x168] sm:$0xff]  ;;  %1277 = vst [vmem:[#allocation2 + $0x328] sm:$0x3] %v10185_v28  ;;  %1278 = vst [vmem:[#allocation2 + $0x330] sm:$0xff] %v10185_v28 }
  0x9a   :  { %v245_v22 = vpack.c.bf16 %v141_v20, %v139_v19  ;;  %1279 = vst [vmem:[#allocation2 + $0x338] sm:$0xff] %v10185_v28  ;;  %1280 = vst [vmem:[#allocation2 + $0x340] sm:$0x3] %v10185_v28  ;;  %v265_v20 = vpack.c.bf16 %v181_v18, %v179_v17  ;;  %v210_v17 = vld [vmem:[#allocation3 + $0x3a0] sm:$0xff]  ;;  %v212_v18 = vld [vmem:[#allocation3 + $0x3b0] sm:$0xff] }
  0x9b   :  { %1283 = vst [vmem:[#allocation2 + $0x358] sm:$0x3] %v10185_v28  ;;  %v184_v28 = vld [vmem:[#allocation3 + $0x2d0] sm:$0xff] }
  0x9c   :  { %447 = vmatmul.mubr.bf16.vlgmr.msra.gmra.mrb[0].mxu0 %v222_v24  ;;  %v10315_v24 = vld [vmem:[#allocation3 + $0x170] sm:$0xff] }
  0x9d   :  { %454 = vmatprep.mubr.bf16.mxu0 %v225_v25  ;;  %v10317_v25 = vld [vmem:[#allocation3 + $0x188] sm:$0xff]  ;;  %v244_v27 = vpack.c.bf16 %v10315_v24, %v10313_v23  ;;  %v185_v24 = vld [vmem:[#allocation3 + $0x2d8] sm:$0xff] }
  0x9e   :  { %v247_v29 = vpack.c.bf16 %v10319_v26, %v10317_v25  ;;  %v183_v23 = vld [vmem:[#allocation3 + $0x2c8] sm:$0xff] }
  0x9f   :  { %v267_v26 = vpack.c.bf16 %v185_v24, %v183_v23  ;;  %v280_v24 = vpack.c.bf16 %v212_v18, %v210_v17 }
  0xa4   :  { %455 = vmatmul.mubr.bf16.gmra.mrb[4].mxu0 %v224_v30  ;;  %v142_v30 = vld [vmem:[#allocation3 + $0x180] sm:$0xff] }
  0xa5   :  { %462 = vmatprep.mubr.bf16.mxu0 %v227_v31  ;;  %v144_v31 = vld [vmem:[#allocation3 + $0x190] sm:$0xff] }
  0xa6   :  { %v246_v34 = vpack.c.bf16 %v144_v31, %v142_v30  ;;  %v189_v30 = vld [vmem:[#allocation3 + $0x2f8] sm:$0xff] }
  0xac   :  { %463 = vmatmul.mubr.bf16.gmra.mrb[8].mxu0 %v226_v36  ;;  %v146_v36 = vld [vmem:[#allocation3 + $0x1a0] sm:$0xff] }
  0xad   :  { %470 = vmatprep.mubr.bf16.mxu0 %v229_v37  ;;  %v148_v37 = vld [vmem:[#allocation3 + $0x1b0] sm:$0xff] }
  0xae   :  { %v248_v40 = vpack.c.bf16 %v148_v37, %v146_v36  ;;  %v193_v36 = vld [vmem:[#allocation3 + $0x318] sm:$0xff] }
  0xb4   :  { %471 = vmatmul.mubr.bf16.gmra.mrb[12].mxu0 %v228_v42  ;;  %v150_v42 = vld [vmem:[#allocation3 + $0x1c0] sm:$0xff] }
  0xb5   :  { %478 = vmatprep.mubr.bf16.mxu0 %v231_v43  ;;  %v152_v43 = vld [vmem:[#allocation3 + $0x1d0] sm:$0xff] }
  0xb6   :  { %v250_v46 = vpack.c.bf16 %v152_v43, %v150_v42  ;;  %v197_v42 = vld [vmem:[#allocation3 + $0x338] sm:$0xff] }
  0xbc   :  { %479 = vmatmul.mubr.bf16.gmra.mrb[16].mxu0 %v230_v48  ;;  %v154_v48 = vld [vmem:[#allocation3 + $0x1e0] sm:$0xff] }
  0xbd   :  { %486 = vmatprep.mubr.bf16.mxu0 %v233_v49  ;;  %v156_v49 = vld [vmem:[#allocation3 + $0x1f0] sm:$0xff] }
  0xbe   :  { %v252_v52 = vpack.c.bf16 %v156_v49, %v154_v48  ;;  %v201_v48 = vld [vmem:[#allocation3 + $0x358] sm:$0xff] }
  0xc4   :  { %487 = vmatmul.mubr.bf16.gmra.mrb[20].mxu0 %v232_v54  ;;  %v158_v54 = vld [vmem:[#allocation3 + $0x200] sm:$0xff] }
  0xc5   :  { %494 = vmatprep.mubr.bf16.mxu0 %v235_v55  ;;  %v160_v55 = vld [vmem:[#allocation3 + $0x210] sm:$0xff] }
  0xc6   :  { %v254_v58 = vpack.c.bf16 %v160_v55, %v158_v54  ;;  %v205_v54 = vld [vmem:[#allocation3 + $0x378] sm:$0xff] }
  0xcc   :  { %495 = vmatmul.mubr.bf16.gmra.mrb[24].mxu0 %v234_v60  ;;  %v162_v60 = vld [vmem:[#allocation3 + $0x220] sm:$0xff] }
  0xcd   :  { %502 = vmatprep.mubr.bf16.mxu0 %v237_v61  ;;  %v164_v61 = vld [vmem:[#allocation3 + $0x230] sm:$0xff] }
  0xce   :  { %v256_v1 = vpack.c.bf16 %v164_v61, %v162_v60  ;;  %v209_v60 = vld [vmem:[#allocation3 + $0x398] sm:$0xff] }
  0xd4   :  { %503 = vmatmul.mubr.bf16.gmra.mrb[28].mxu0 %v236_v3  ;;  %v166_v3 = vld [vmem:[#allocation3 + $0x240] sm:$0xff] }
  0xd5   :  { %510 = vmatprep.mubr.bf16.mxu0 %v239_v4  ;;  %v168_v4 = vld [vmem:[#allocation3 + $0x250] sm:$0xff] }
  0xd6   :  { %v258_v7 = vpack.c.bf16 %v168_v4, %v166_v3 }
  0xdc   :  { %511 = vmatmul.mubr.bf16.gmra.mrb[32].mxu0 %v238_v9  ;;  %v170_v9 = vld [vmem:[#allocation3 + $0x260] sm:$0xff] }
  0xdd   :  { %518 = vmatprep.mubr.bf16.mxu0 %v241_v10  ;;  %v172_v10 = vld [vmem:[#allocation3 + $0x270] sm:$0xff] }
  0xde   :  { %v260_v13 = vpack.c.bf16 %v172_v10, %v170_v9 }
  0xe4   :  { %519 = vmatmul.mubr.bf16.gmra.mrb[36].mxu0 %v240_v15  ;;  %v174_v15 = vld [vmem:[#allocation3 + $0x280] sm:$0xff] }
  0xe5   :  { %526 = vmatprep.mubr.bf16.mxu0 %v243_v16  ;;  %v176_v16 = vld [vmem:[#allocation3 + $0x290] sm:$0xff] }
  0xe6   :  { %v262_v19 = vpack.c.bf16 %v176_v16, %v174_v15 }
  0xec   :  { %527 = vmatmul.mubr.bf16.gmra.mrb[40].mxu0 %v242_v21  ;;  %v178_v21 = vld [vmem:[#allocation3 + $0x2a0] sm:$0xff] }
  0xed   :  { %534 = vmatprep.mubr.bf16.mxu0 %v245_v22  ;;  %v180_v22 = vld [vmem:[#allocation3 + $0x2b0] sm:$0xff] }
  0xee   :  { %v264_v25 = vpack.c.bf16 %v180_v22, %v178_v21 }
  0xf4   :  { %535 = vmatmul.mubr.bf16.gmra.mrb[44].mxu0 %v244_v27  ;;  %v182_v27 = vld [vmem:[#allocation3 + $0x2c0] sm:$0xff] }
  0xf5   :  { %542 = vmatprep.mubr.bf16.mxu0 %v247_v29  ;;  %v187_v29 = vld [vmem:[#allocation3 + $0x2e8] sm:$0xff]  ;;  %v266_v31 = vpack.c.bf16 %v184_v28, %v182_v27 }
  0xf6   :  { %v269_v32 = vpack.c.bf16 %v189_v30, %v187_v29  ;;  %v214_v29 = vld [vmem:[#allocation3 + $0x3c0] sm:$0xff]  ;;  %v216_v30 = vld [vmem:[#allocation3 + $0x3d0] sm:$0xff] }
  0xfc   :  { %543 = vmatmul.mubr.bf16.gmra.mrb[48].mxu0 %v246_v34  ;;  %v188_v34 = vld [vmem:[#allocation3 + $0x2f0] sm:$0xff] }
  0xfd   :  { %550 = vmatprep.mubr.bf16.mxu0 %v249_v35  ;;  %v191_v35 = vld [vmem:[#allocation3 + $0x308] sm:$0xff]  ;;  %v268_v37 = vpack.c.bf16 %v188_v34, %v186_v33 }
  0xfe   :  { %v271_v38 = vpack.c.bf16 %v193_v36, %v191_v35  ;;  %v282_v36 = vpack.c.bf16 %v216_v30, %v214_v29 }
 0x104   :  { %551 = vmatmul.mubr.bf16.gmra.mrb[52].mxu0 %v248_v40  ;;  %v192_v40 = vld [vmem:[#allocation3 + $0x310] sm:$0xff] }
 0x105   :  { %558 = vmatprep.mubr.bf16.mxu0 %v251_v41  ;;  %v195_v41 = vld [vmem:[#allocation3 + $0x328] sm:$0xff]  ;;  %v270_v43 = vpack.c.bf16 %v192_v40, %v190_v39 }
 0x106   :  { %v273_v44 = vpack.c.bf16 %v197_v42, %v195_v41  ;;  %v218_v41 = vld [vmem:[#allocation3 + $0x3e0] sm:$0xff]  ;;  %v220_v42 = vld [vmem:[#allocation3 + $0x3f0] sm:$0xff] }
 0x10c   :  { %559 = vmatmul.mubr.bf16.gmra.mrb[56].mxu0 %v250_v46  ;;  %v196_v46 = vld [vmem:[#allocation3 + $0x330] sm:$0xff] }
 0x10d   :  { %566 = vmatprep.mubr.bf16.mxu0 %v253_v47  ;;  %v199_v47 = vld [vmem:[#allocation3 + $0x348] sm:$0xff]  ;;  %v272_v49 = vpack.c.bf16 %v196_v46, %v194_v45  ;;  %v284_v46 = vpack.c.bf16 %v220_v42, %v218_v41 }
 0x10e   :  { %v275_v50 = vpack.c.bf16 %v201_v48, %v199_v47 }
 0x114   :  { %567 = vmatmul.mubr.bf16.gmra.mrb[60].mxu0 %v252_v52  ;;  %v200_v52 = vld [vmem:[#allocation3 + $0x350] sm:$0xff] }
 0x115   :  { %574 = vmatprep.mubr.bf16.mxu0 %v255_v53  ;;  %v203_v53 = vld [vmem:[#allocation3 + $0x368] sm:$0xff]  ;;  %v274_v55 = vpack.c.bf16 %v200_v52, %v198_v51 }
 0x116   :  { %v277_v56 = vpack.c.bf16 %v205_v54, %v203_v53 }
 0x11c   :  { %575 = vmatmul.mubr.bf16.gmra.mrb[64].mxu0 %v254_v58  ;;  %v204_v58 = vld [vmem:[#allocation3 + $0x370] sm:$0xff] }
 0x11d   :  { %582 = vmatprep.mubr.bf16.mxu0 %v257_v59  ;;  %v207_v59 = vld [vmem:[#allocation3 + $0x388] sm:$0xff]  ;;  %v276_v63 = vpack.c.bf16 %v204_v58, %v202_v57 }
 0x124   :  { %583 = vmatmul.mubr.bf16.gmra.mrb[68].mxu0 %v256_v1 }
 0x125   :  { %590 = vmatprep.mubr.bf16.mxu0 %v259_v2  ;;  %v279_v2 = vpack.c.bf16 %v209_v60, %v207_v59 }
 0x12c   :  { %591 = vmatmul.mubr.bf16.gmra.mrb[72].mxu0 %v258_v7  ;;  %v211_v7 = vld [vmem:[#allocation3 + $0x3a8] sm:$0xff] }
 0x12d   :  { %598 = vmatprep.mubr.bf16.mxu0 %v261_v8  ;;  %v213_v8 = vld [vmem:[#allocation3 + $0x3b8] sm:$0xff] }
 0x134   :  { %599 = vmatmul.mubr.bf16.gmra.mrb[76].mxu0 %v260_v13 }
 0x135   :  { %606 = vmatprep.mubr.bf16.mxu0 %v263_v14  ;;  %v281_v14 = vpack.c.bf16 %v213_v8, %v211_v7 }
 0x13c   :  { %607 = vmatmul.mubr.bf16.gmra.mrb[80].mxu0 %v262_v19  ;;  %v215_v19 = vld [vmem:[#allocation3 + $0x3c8] sm:$0xff] }
 0x13d   :  { %614 = vmatprep.mubr.bf16.mxu0 %v265_v20  ;;  %v217_v20 = vld [vmem:[#allocation3 + $0x3d8] sm:$0xff] }
 0x144   :  { %615 = vmatmul.mubr.bf16.gmra.mrb[84].mxu0 %v264_v25 }
 0x145   :  { %622 = vmatprep.mubr.bf16.mxu0 %v267_v26  ;;  %v283_v26 = vpack.c.bf16 %v217_v20, %v215_v19 }
 0x14c   :  { %623 = vmatmul.mubr.bf16.gmra.mrb[88].mxu0 %v266_v31  ;;  %v219_v31 = vld [vmem:[#allocation3 + $0x3e8] sm:$0xff] }
 0x14d   :  { %630 = vmatprep.mubr.bf16.mxu0 %v269_v32  ;;  %v221_v32 = vld [vmem:[#allocation3 + $0x3f8] sm:$0xff] }
 0x154   :  { %631 = vmatmul.mubr.bf16.gmra.mrb[92].mxu0 %v268_v37 }
 0x155   :  { %638 = vmatprep.mubr.bf16.mxu0 %v271_v38  ;;  %v285_v38 = vpack.c.bf16 %v221_v32, %v219_v31 }
 0x15c   :  { %639 = vmatmul.mubr.bf16.gmra.mrb[96].mxu0 %v270_v43 }
 0x15d   :  { %646 = vmatprep.mubr.bf16.mxu0 %v273_v44 }
 0x164   :  { %647 = vmatmul.mubr.bf16.gmra.mrb[100].mxu0 %v272_v49 }
 0x165   :  { %654 = vmatprep.mubr.bf16.mxu0 %v275_v50 }
 0x16c   :  { %655 = vmatmul.mubr.bf16.gmra.mrb[104].mxu0 %v274_v55 }
 0x16d   :  { %662 = vmatprep.mubr.bf16.mxu0 %v277_v56 }
 0x16f   :  { %v10429_v61 = vpop.f32.mrb[0].mxu0 }
 0x170   :  { %v450_v62 = vpop.f32.mrb[1].mxu0 }
 0x171   :  { %v10431_v1 = vpop.f32.mrb[2].mxu0 }
 0x172   :  { %v703_v3 = vadd.f32 %v10431_v1, %v10429_v61  ;;  %v453_v4 = vpop.f32.mrb[3].mxu0 }
 0x174   :  { %663 = vmatmul.mubr.bf16.gmra.mrb[108].mxu0 %v276_v63 }
 0x175   :  { %670 = vmatprep.mubr.bf16.mxu0 %v279_v2 }
 0x177   :  { %v10435_v9 = vpop.f32.mrb[4].mxu0 }
 0x178   :  { %v704_v10 = vadd.f32 %v703_v3, %v10435_v9  ;;  %v458_v11 = vpop.f32.mrb[5].mxu0 }
 0x179   :  { %v10438_v13 = vpop.f32.mrb[6].mxu0 }
 0x17a   :  { %v705_v15 = vadd.f32 %v704_v10, %v10438_v13  ;;  %v461_v16 = vpop.f32.mrb[7].mxu0 }
 0x17c   :  { %671 = vmatmul.mubr.bf16.gmra.mrb[112].mxu0 %v278_v12 }
 0x17d   :  { %678 = vmatprep.mubr.bf16.mxu0 %v281_v14 }
 0x17f   :  { %v10441_v21 = vpop.f32.mrb[8].mxu0 }
 0x180   :  { %v706_v22 = vadd.f32 %v705_v15, %v10441_v21  ;;  %v466_v23 = vpop.f32.mrb[9].mxu0 }
 0x181   :  { %v10444_v25 = vpop.f32.mrb[10].mxu0 }
 0x182   :  { %v707_v27 = vadd.f32 %v706_v22, %v10444_v25  ;;  %v469_v28 = vpop.f32.mrb[11].mxu0 }
 0x184   :  { %679 = vmatmul.mubr.bf16.gmra.mrb[116].mxu0 %v280_v24 }
 0x185   :  { %686 = vmatprep.mubr.bf16.mxu0 %v283_v26 }
 0x187   :  { %v10447_v33 = vpop.f32.mrb[12].mxu0 }
 0x188   :  { %v708_v34 = vadd.f32 %v707_v27, %v10447_v33  ;;  %v474_v35 = vpop.f32.mrb[13].mxu0 }
 0x189   :  { %v10450_v37 = vpop.f32.mrb[14].mxu0 }
 0x18a   :  { %v709_v39 = vadd.f32 %v708_v34, %v10450_v37  ;;  %v477_v40 = vpop.f32.mrb[15].mxu0 }
 0x18c   :  { %687 = vmatmul.mubr.bf16.gmra.mrb[120].mxu0 %v282_v36 }
 0x18d   :  { %694 = vmatprep.mubr.bf16.mxu0 %v285_v38 }
 0x18f   :  { %v10453_v43 = vpop.f32.mrb[16].mxu0 }
 0x190   :  { %v710_v44 = vadd.f32 %v709_v39, %v10453_v43  ;;  %v482_v45 = vpop.f32.mrb[17].mxu0 }
 0x191   :  { %v10456_v47 = vpop.f32.mrb[18].mxu0 }
 0x192   :  { %v711_v48 = vadd.f32 %v710_v44, %v10456_v47  ;;  %v485_v49 = vpop.f32.mrb[19].mxu0 }
 0x194   :  { %695 = vmatmul.mubr.bf16.gmra.mrb[124].mxu0 %v284_v46 }
 0x197   :  { %v10459_v50 = vpop.f32.mrb[20].mxu0 }
 0x198   :  { %v712_v51 = vadd.f32 %v711_v48, %v10459_v50  ;;  %v490_v52 = vpop.f32.mrb[21].mxu0 }
 0x199   :  { %v10462_v53 = vpop.f32.mrb[22].mxu0 }
 0x19a   :  { %v713_v54 = vadd.f32 %v712_v51, %v10462_v53  ;;  %v493_v55 = vpop.f32.mrb[23].mxu0 }
 0x19f   :  { %v10465_v56 = vpop.f32.mrb[24].mxu0 }
 0x1a0   :  { %v714_v57 = vadd.f32 %v713_v54, %v10465_v56  ;;  %v498_v58 = vpop.f32.mrb[25].mxu0 }
 0x1a1   :  { %v10468_v59 = vpop.f32.mrb[26].mxu0 }
 0x1a2   :  { %v715_v60 = vadd.f32 %v714_v57, %v10468_v59  ;;  %v501_v62 = vpop.f32.mrb[27].mxu0 }
 0x1a7   :  { %v10471_v63 = vpop.f32.mrb[28].mxu0 }
 0x1a8   :  { %v716_v2 = vadd.f32 %v715_v60, %v10471_v63  ;;  %v506_v3 = vpop.f32.mrb[29].mxu0 }
 0x1a9   :  { %v10474_v4 = vpop.f32.mrb[30].mxu0 }
 0x1aa   :  { %v717_v5 = vadd.f32 %v716_v2, %v10474_v4  ;;  %v509_v6 = vpop.f32.mrb[31].mxu0 }
 0x1af   :  { %v10477_v7 = vpop.f32.mrb[32].mxu0 }
 0x1b0   :  { %v718_v8 = vadd.f32 %v717_v5, %v10477_v7  ;;  %v514_v10 = vpop.f32.mrb[33].mxu0 }
 0x1b1   :  { %v10480_v11 = vpop.f32.mrb[34].mxu0 }
 0x1b2   :  { %v719_v12 = vadd.f32 %v718_v8, %v10480_v11  ;;  %v517_v14 = vpop.f32.mrb[35].mxu0 }
 0x1b7   :  { %v10483_v15 = vpop.f32.mrb[36].mxu0 }
 0x1b8   :  { %v720_v16 = vadd.f32 %v719_v12, %v10483_v15  ;;  %v522_v17 = vpop.f32.mrb[37].mxu0 }
 0x1b9   :  { %v10486_v18 = vpop.f32.mrb[38].mxu0 }
 0x1ba   :  { %v721_v19 = vadd.f32 %v720_v16, %v10486_v18  ;;  %v525_v20 = vpop.f32.mrb[39].mxu0 }
 0x1bf   :  { %v10489_v22 = vpop.f32.mrb[40].mxu0 }
 0x1c0   :  { %v722_v23 = vadd.f32 %v721_v19, %v10489_v22  ;;  %v530_v24 = vpop.f32.mrb[41].mxu0 }
 0x1c1   :  { %v10492_v26 = vpop.f32.mrb[42].mxu0 }
 0x1c2   :  { %v723_v27 = vadd.f32 %v722_v23, %v10492_v26  ;;  %v533_v28 = vpop.f32.mrb[43].mxu0 }
 0x1c7   :  { %v10495_v29 = vpop.f32.mrb[44].mxu0 }
 0x1c8   :  { %v724_v30 = vadd.f32 %v723_v27, %v10495_v29  ;;  %v538_v31 = vpop.f32.mrb[45].mxu0 }
 0x1c9   :  { %v10498_v32 = vpop.f32.mrb[46].mxu0 }
 0x1ca   :  { %v725_v34 = vadd.f32 %v724_v30, %v10498_v32  ;;  %v541_v35 = vpop.f32.mrb[47].mxu0 }
 0x1cf   :  { %v10501_v36 = vpop.f32.mrb[48].mxu0 }
 0x1d0   :  { %v726_v38 = vadd.f32 %v725_v34, %v10501_v36  ;;  %v546_v39 = vpop.f32.mrb[49].mxu0 }
 0x1d1   :  { %v10504_v40 = vpop.f32.mrb[50].mxu0 }
 0x1d2   :  { %v727_v41 = vadd.f32 %v726_v38, %v10504_v40  ;;  %v549_v42 = vpop.f32.mrb[51].mxu0 }
 0x1d7   :  { %v10507_v44 = vpop.f32.mrb[52].mxu0 }
 0x1d8   :  { %v728_v45 = vadd.f32 %v727_v41, %v10507_v44  ;;  %v554_v46 = vpop.f32.mrb[53].mxu0 }
 0x1d9   :  { %v10510_v48 = vpop.f32.mrb[54].mxu0 }
 0x1da   :  { %v729_v49 = vadd.f32 %v728_v45, %v10510_v48  ;;  %v557_v51 = vpop.f32.mrb[55].mxu0 }
 0x1df   :  { %v10513_v52 = vpop.f32.mrb[56].mxu0 }
 0x1e0   :  { %v730_v54 = vadd.f32 %v729_v49, %v10513_v52  ;;  %v562_v55 = vpop.f32.mrb[57].mxu0 }
 0x1e1   :  { %v10516_v57 = vpop.f32.mrb[58].mxu0 }
 0x1e2   :  { %v731_v58 = vadd.f32 %v730_v54, %v10516_v57  ;;  %v565_v60 = vpop.f32.mrb[59].mxu0 }
 0x1e7   :  { %v10519_v62 = vpop.f32.mrb[60].mxu0 }
 0x1e8   :  { %v732_v2 = vadd.f32 %v731_v58, %v10519_v62  ;;  %v570_v3 = vpop.f32.mrb[61].mxu0 }
 0x1e9   :  { %v10522_v5 = vpop.f32.mrb[62].mxu0 }
 0x1ea   :  { %v733_v6 = vadd.f32 %v732_v2, %v10522_v5  ;;  %v573_v8 = vpop.f32.mrb[63].mxu0 }
 0x1ef   :  { %v10525_v10 = vpop.f32.mrb[64].mxu0 }
 0x1f0   :  { %v734_v12 = vadd.f32 %v733_v6, %v10525_v10  ;;  %v578_v14 = vpop.f32.mrb[65].mxu0 }
 0x1f1   :  { %v10528_v16 = vpop.f32.mrb[66].mxu0 }
 0x1f2   :  { %v735_v17 = vadd.f32 %v734_v12, %v10528_v16  ;;  %v581_v19 = vpop.f32.mrb[67].mxu0 }
 0x1f7   :  { %v10531_v20 = vpop.f32.mrb[68].mxu0 }
 0x1f8   :  { %v736_v23 = vadd.f32 %v735_v17, %v10531_v20  ;;  %v586_v24 = vpop.f32.mrb[69].mxu0 }
 0x1f9   :  { %v10534_v27 = vpop.f32.mrb[70].mxu0 }
 0x1fa   :  { %v737_v28 = vadd.f32 %v736_v23, %v10534_v27  ;;  %v589_v30 = vpop.f32.mrb[71].mxu0 }
 0x1ff   :  { %v10537_v31 = vpop.f32.mrb[72].mxu0 }
 0x200   :  { %v738_v34 = vadd.f32 %v737_v28, %v10537_v31  ;;  %v594_v35 = vpop.f32.mrb[73].mxu0 }
 0x201   :  { %v10540_v38 = vpop.f32.mrb[74].mxu0 }
 0x202   :  { %v739_v39 = vadd.f32 %v738_v34, %v10540_v38  ;;  %v597_v41 = vpop.f32.mrb[75].mxu0 }
 0x207   :  { %v10543_v42 = vpop.f32.mrb[76].mxu0 }
 0x208   :  { %v740_v45 = vadd.f32 %v739_v39, %v10543_v42  ;;  %v602_v46 = vpop.f32.mrb[77].mxu0 }
 0x209   :  { %v10546_v49 = vpop.f32.mrb[78].mxu0 }
 0x20a   :  { %v741_v51 = vadd.f32 %v740_v45, %v10546_v49  ;;  %v605_v54 = vpop.f32.mrb[79].mxu0 }
 0x20f   :  { %v10549_v55 = vpop.f32.mrb[80].mxu0 }
 0x210   :  { %v742_v58 = vadd.f32 %v741_v51, %v10549_v55  ;;  %v610_v60 = vpop.f32.mrb[81].mxu0 }
 0x211   :  { %v10552_v2 = vpop.f32.mrb[82].mxu0 }
 0x212   :  { %v743_v3 = vadd.f32 %v742_v58, %v10552_v2  ;;  %v613_v6 = vpop.f32.mrb[83].mxu0 }
 0x217   :  { %v10555_v8 = vpop.f32.mrb[84].mxu0 }
 0x218   :  { %v744_v12 = vadd.f32 %v743_v3, %v10555_v8  ;;  %v618_v14 = vpop.f32.mrb[85].mxu0 }
 0x219   :  { %v10558_v17 = vpop.f32.mrb[86].mxu0 }
 0x21a   :  { %v745_v19 = vadd.f32 %v744_v12, %v10558_v17  ;;  %v621_v23 = vpop.f32.mrb[87].mxu0 }
 0x21f   :  { %v10561_v24 = vpop.f32.mrb[88].mxu0 }
 0x220   :  { %v746_v28 = vadd.f32 %v745_v19, %v10561_v24  ;;  %v626_v30 = vpop.f32.mrb[89].mxu0 }
 0x221   :  { %v10564_v34 = vpop.f32.mrb[90].mxu0 }
 0x222   :  { %v747_v35 = vadd.f32 %v746_v28, %v10564_v34  ;;  %v629_v39 = vpop.f32.mrb[91].mxu0 }
 0x227   :  { %v10567_v41 = vpop.f32.mrb[92].mxu0 }
 0x228   :  { %v748_v45 = vadd.f32 %v747_v35, %v10567_v41  ;;  %v634_v46 = vpop.f32.mrb[93].mxu0 }
 0x229   :  { %v10570_v51 = vpop.f32.mrb[94].mxu0 }
 0x22a   :  { %16525 = vst [vmem:[#allocation17_spill] sm:$0xff] %v10570_v51  ;;  %v749_v54 = vadd.f32 %v748_v45, %v10570_v51  ;;  %v637_v58 = vpop.f32.mrb[95].mxu0 }
 0x22f   :  { %v10573_v60 = vpop.f32.mrb[96].mxu0 }
 0x230   :  { %16526 = vst [vmem:[#allocation18_spill] sm:$0xff] %v10573_v60  ;;  %v750_v3 = vadd.f32 %v749_v54, %v10573_v60  ;;  %v642_v6 = vpop.f32.mrb[97].mxu0 }
 0x231   :  { %v10576_v12 = vpop.f32.mrb[98].mxu0 }
 0x232   :  { %16527 = vst [vmem:[#allocation19_spill] sm:$0xff] %v10576_v12  ;;  %v751_v14 = vadd.f32 %v750_v3, %v10576_v12  ;;  %v645_v19 = vpop.f32.mrb[99].mxu0 }
 0x237   :  { %v10579_v23 = vpop.f32.mrb[100].mxu0 }
 0x238   :  { %16528 = vst [vmem:[#allocation20_spill] sm:$0xff] %v10579_v23  ;;  %v752_v28 = vadd.f32 %v751_v14, %v10579_v23  ;;  %v650_v30 = vpop.f32.mrb[101].mxu0 }
 0x239   :  { %v10582_v35 = vpop.f32.mrb[102].mxu0 }
 0x23a   :  { %16529 = vst [vmem:[#allocation21_spill] sm:$0xff] %v10582_v35  ;;  %v753_v39 = vadd.f32 %v752_v28, %v10582_v35  ;;  %v653_v45 = vpop.f32.mrb[103].mxu0 }
 0x23f   :  { %v10585_v46 = vpop.f32.mrb[104].mxu0 }
 0x240   :  { %16530 = vst [vmem:[#allocation22_spill] sm:$0xff] %v10585_v46  ;;  %v754_v54 = vadd.f32 %v753_v39, %v10585_v46  ;;  %v658_v58 = vpop.f32.mrb[105].mxu0 }
 0x241   :  { %v10588_v6 = vpop.f32.mrb[106].mxu0 }
 0x242   :  { %16531 = vst [vmem:[#allocation23_spill] sm:$0xff] %v10588_v6  ;;  %v755_v3 = vadd.f32 %v754_v54, %v10588_v6  ;;  %v661_v19 = vpop.f32.mrb[107].mxu0 }
 0x247   :  { %v10591_v0 = vpop.f32.mrb[108].mxu0 }
 0x248   :  { %16532 = vst [vmem:[#allocation24_spill] sm:$0xff] %v10591_v0  ;;  %v756_v14 = vadd.f32 %v755_v3, %v10591_v0  ;;  %v666_v30 = vpop.f32.mrb[109].mxu0 }
 0x249   :  { %v10594_v23 = vpop.f32.mrb[110].mxu0 }
 0x24a   :  { %16533 = vst [vmem:[#allocation25_spill] sm:$0xff] %v10594_v23  ;;  %v757_v28 = vadd.f32 %v756_v14, %v10594_v23  ;;  %v669_v45 = vpop.f32.mrb[111].mxu0 }
 0x24f   :  { %v10597_v35 = vpop.f32.mrb[112].mxu0 }
 0x250   :  { %16534 = vst [vmem:[#allocation26_spill] sm:$0xff] %v10597_v35  ;;  %v758_v39 = vadd.f32 %v757_v28, %v10597_v35  ;;  %v674_v58 = vpop.f32.mrb[113].mxu0 }
 0x251   :  { %v10600_v46 = vpop.f32.mrb[114].mxu0 }
 0x252   :  { %16535 = vst [vmem:[#allocation27_spill] sm:$0xff] %v10600_v46  ;;  %v759_v54 = vadd.f32 %v758_v39, %v10600_v46  ;;  %v677_v19 = vpop.f32.mrb[115].mxu0 }
 0x257   :  { %v10603_v6 = vpop.f32.mrb[116].mxu0 }
 0x258   :  { %16536 = vst [vmem:[#allocation28_spill] sm:$0xff] %v10603_v6  ;;  %v760_v3 = vadd.f32 %v759_v54, %v10603_v6  ;;  %v682_v30 = vpop.f32.mrb[117].mxu0 }
 0x259   :  { %v10606_v0 = vpop.f32.mrb[118].mxu0 }
 0x25a   :  { %16537 = vst [vmem:[#allocation29_spill] sm:$0xff] %v10606_v0  ;;  %v761_v14 = vadd.f32 %v760_v3, %v10606_v0  ;;  %v685_v45 = vpop.f32.mrb[119].mxu0 }
 0x25f   :  { %v10609_v23 = vpop.f32.mrb[120].mxu0 }
 0x260   :  { %16538 = vst [vmem:[#allocation30_spill] sm:$0xff] %v10609_v23  ;;  %v762_v28 = vadd.f32 %v761_v14, %v10609_v23  ;;  %v690_v58 = vpop.f32.mrb[121].mxu0 }
 0x261   :  { %v10612_v35 = vpop.f32.mrb[122].mxu0 }
 0x262   :  { %v763_v39 = vadd.f32 %v762_v28, %v10612_v35  ;;  %v693_v19 = vpop.f32.mrb[123].mxu0 }
 0x267   :  { %v10615_v46 = vpop.f32.mrb[124].mxu0 }
 0x268   :  { %v764_v54 = vadd.f32 %v763_v39, %v10615_v46  ;;  %v698_v30 = vpop.f32.mrb[125].mxu0 }
 0x269   :  { %v10618_v6 = vpop.f32.mrb[126].mxu0  ;;  %v16553_v30 = vld [vmem:[#allocation20_spill] sm:$0xff] }
 0x26a   :  { %v765_v3 = vadd.f32 %v764_v54, %v10618_v6  ;;  %v701_v45 = vpop.f32.mrb[127].mxu0  ;;  %v16551_v54 = vld [vmem:[#allocation19_spill] sm:$0xff] }
 0x26b   :  { %v16557_v45 = vld [vmem:[#allocation22_spill] sm:$0xff] }
 0x26c   :  { %v766_v0 = vrot.slane %v765_v3, 4 }
 0x26e   :  { %v767_v12 = vadd.f32 %v766_v0, %v765_v3  ;;  %v16555_v3 = vld [vmem:[#allocation21_spill] sm:$0xff] }
 0x270   :  { %v768_v60 = vrot.slane %v767_v12, 2 }
 0x272   :  { %v769_v14 = vadd.f32 %v768_v60, %v767_v12  ;;  %v16548_v12 = vld [vmem:[#allocation17_spill] sm:$0xff] }
 0x274   :  { %v770_v58 = vrot.slane %v769_v14, 1 }
 0x276   :  { %v771_v23 = vadd.f32 %v770_v58, %v769_v14  ;;  %v16559_v58 = vld [vmem:[#allocation23_spill] sm:$0xff] }
 0x278   :  { %v10621_v51 = vmul.f32 0.001953125, %v771_v23  ;;  %v16549_v23 = vld [vmem:[#allocation18_spill] sm:$0xff] }
 0x27a   :  { %v10625_v28 = vsub.f32 %v10429_v61, %v10621_v51  ;;  %v10629_v39 = vsub.f32 %v10431_v1, %v10621_v51  ;;  %v10633_v19 = vsub.f32 %v10435_v9, %v10621_v51  ;;  %v10637_v0 = vsub.f32 %v10438_v13, %v10621_v51 }
 0x27b   :  { %v10641_v60 = vsub.f32 %v10441_v21, %v10621_v51  ;;  %v10645_v61 = vsub.f32 %v10444_v25, %v10621_v51  ;;  %v10649_v1 = vsub.f32 %v10447_v33, %v10621_v51  ;;  %v10653_v9 = vsub.f32 %v10450_v37, %v10621_v51 }
 0x27c   :  { %16539 = vst [vmem:[#allocation31_spill] sm:$0xff] %v10625_v28  ;;  %16540 = vst [vmem:[#allocation32_spill] sm:$0xff] %v10629_v39  ;;  %v10657_v13 = vsub.f32 %v10453_v43, %v10621_v51  ;;  %v10661_v21 = vsub.f32 %v10456_v47, %v10621_v51  ;;  %v10665_v25 = vsub.f32 %v10459_v50, %v10621_v51 }
 0x27d   :  { %16541 = vst [vmem:[#allocation33_spill] sm:$0xff] %v10633_v19  ;;  %v10669_v33 = vsub.f32 %v10462_v53, %v10621_v51  ;;  %v10673_v37 = vsub.f32 %v10465_v56, %v10621_v51  ;;  %v10677_v43 = vsub.f32 %v10468_v59, %v10621_v51  ;;  %v10681_v47 = vsub.f32 %v10471_v63, %v10621_v51 }
 0x27e   :  { %v10685_v50 = vsub.f32 %v10474_v4, %v10621_v51  ;;  %v10689_v53 = vsub.f32 %v10477_v7, %v10621_v51  ;;  %v10693_v56 = vsub.f32 %v10480_v11, %v10621_v51  ;;  %v10697_v59 = vsub.f32 %v10483_v15, %v10621_v51 }
 0x27f   :  { %v10701_v63 = vsub.f32 %v10486_v18, %v10621_v51  ;;  %v10705_v4 = vsub.f32 %v10489_v22, %v10621_v51  ;;  %v10709_v7 = vsub.f32 %v10492_v26, %v10621_v51  ;;  %v10713_v11 = vsub.f32 %v10495_v29, %v10621_v51 }
 0x280   :  { %v10717_v15 = vsub.f32 %v10498_v32, %v10621_v51  ;;  %v10721_v18 = vsub.f32 %v10501_v36, %v10621_v51  ;;  %v10725_v22 = vsub.f32 %v10504_v40, %v10621_v51  ;;  %v10729_v26 = vsub.f32 %v10507_v44, %v10621_v51 }
 0x281   :  { %v10733_v29 = vsub.f32 %v10510_v48, %v10621_v51  ;;  %v10737_v32 = vsub.f32 %v10513_v52, %v10621_v51  ;;  %v10741_v36 = vsub.f32 %v10516_v57, %v10621_v51  ;;  %v10745_v40 = vsub.f32 %v10519_v62, %v10621_v51 }
 0x282   :  { %v10749_v44 = vsub.f32 %v10522_v5, %v10621_v51  ;;  %v10753_v48 = vsub.f32 %v10525_v10, %v10621_v51  ;;  %v10757_v52 = vsub.f32 %v10528_v16, %v10621_v51  ;;  %v10761_v57 = vsub.f32 %v10531_v20, %v10621_v51 }
 0x283   :  { %16542 = vst [vmem:[#allocation34_spill] sm:$0xff] %v10737_v32  ;;  %v10765_v62 = vsub.f32 %v10534_v27, %v10621_v51  ;;  %v10769_v5 = vsub.f32 %v10537_v31, %v10621_v51  ;;  %v10773_v10 = vsub.f32 %v10540_v38, %v10621_v51  ;;  %v10777_v16 = vsub.f32 %v10543_v42, %v10621_v51 }
 0x284   :  { %v10781_v20 = vsub.f32 %v10546_v49, %v10621_v51  ;;  %v10785_v27 = vsub.f32 %v10549_v55, %v10621_v51  ;;  %v10789_v31 = vsub.f32 %v10552_v2, %v10621_v51  ;;  %v10793_v38 = vsub.f32 %v10555_v8, %v10621_v51 }
 0x285   :  { %v10797_v42 = vsub.f32 %v10558_v17, %v10621_v51  ;;  %v10801_v49 = vsub.f32 %v10561_v24, %v10621_v51  ;;  %v10805_v55 = vsub.f32 %v10564_v34, %v10621_v51  ;;  %v10809_v2 = vsub.f32 %v10567_v41, %v10621_v51 }
 0x286   :  { %16543 = vst [vmem:[#allocation35_spill] sm:$0xff] %v10789_v31  ;;  %16544 = vst [vmem:[#allocation36_spill] sm:$0xff] %v10793_v38  ;;  %v10813_v8 = vsub.f32 %v16548_v12, %v10621_v51  ;;  %v10817_v17 = vsub.f32 %v16549_v23, %v10621_v51  ;;  %v10821_v24 = vsub.f32 %v16551_v54, %v10621_v51  ;;  %v16561_v23 = vld [vmem:[#allocation24_spill] sm:$0xff] }
 0x287   :  { %16545 = vst [vmem:[#allocation37_spill] sm:$0xff] %v10801_v49  ;;  %16546 = vst [vmem:[#allocation38_spill] sm:$0xff] %v10805_v55  ;;  %v10825_v34 = vsub.f32 %v16553_v30, %v10621_v51  ;;  %v10829_v41 = vsub.f32 %v16555_v3, %v10621_v51  ;;  %v10833_v14 = vsub.f32 %v16557_v45, %v10621_v51 }
 0x288   :  { %16547 = vst [vmem:[#allocation39_spill] sm:$0xff] %v10809_v2  ;;  %16550 = vst [vmem:[#allocation17_spill] sm:$0xff] %v10817_v17  ;;  %v10837_v12 = vsub.f32 %v16559_v58, %v10621_v51  ;;  %v10841_v54 = vsub.f32 %v16561_v23, %v10621_v51 }
 0x289   :  { %16552 = vst [vmem:[#allocation18_spill] sm:$0xff] %v10821_v24  ;;  %16554 = vst [vmem:[#allocation19_spill] sm:$0xff] %v10825_v34  ;;  %v16563_v24 = vld [vmem:[#allocation25_spill] sm:$0xff]  ;;  %v16565_v34 = vld [vmem:[#allocation26_spill] sm:$0xff] }
 0x28a   :  { %16556 = vst [vmem:[#allocation20_spill] sm:$0xff] %v10829_v41  ;;  %16558 = vst [vmem:[#allocation21_spill] sm:$0xff] %v10833_v14  ;;  %v10845_v30 = vsub.f32 %v16563_v24, %v10621_v51  ;;  %v10849_v3 = vsub.f32 %v16565_v34, %v10621_v51  ;;  %v16567_v41 = vld [vmem:[#allocation27_spill] sm:$0xff]  ;;  %v16569_v14 = vld [vmem:[#allocation28_spill] sm:$0xff]  ;;  %v10869_v34 = vsub.f32 %v10612_v35, %v10621_v51 }
 0x28b   :  { %16560 = vst [vmem:[#allocation22_spill] sm:$0xff] %v10837_v12  ;;  %16562 = vst [vmem:[#allocation23_spill] sm:$0xff] %v10841_v54  ;;  %v10853_v45 = vsub.f32 %v16567_v41, %v10621_v51  ;;  %v10857_v58 = vsub.f32 %v16569_v14, %v10621_v51  ;;  %v16571_v12 = vld [vmem:[#allocation29_spill] sm:$0xff]  ;;  %v16573_v54 = vld [vmem:[#allocation30_spill] sm:$0xff]  ;;  %v10873_v41 = vsub.f32 %v10615_v46, %v10621_v51 }
 0x28c   :  { %16564 = vst [vmem:[#allocation24_spill] sm:$0xff] %v10845_v30  ;;  %16566 = vst [vmem:[#allocation25_spill] sm:$0xff] %v10849_v3  ;;  %v10861_v23 = vsub.f32 %v16571_v12, %v10621_v51  ;;  %v10865_v24 = vsub.f32 %v16573_v54, %v10621_v51  ;;  %v10877_v14 = vsub.f32 %v10618_v6, %v10621_v51 }
 0x28d   :  { %16568 = vst [vmem:[#allocation26_spill] sm:$0xff] %v10853_v45  ;;  %16570 = vst [vmem:[#allocation27_spill] sm:$0xff] %v10857_v58  ;;  %v837_v12 = vmul.f32 %v10625_v28, %v10625_v28  ;;  %v839_v54 = vmul.f32 %v10633_v19, %v10633_v19  ;;  %v840_v35 = vmul.f32 %v10637_v0, %v10637_v0 }
 0x28e   :  { %16572 = vst [vmem:[#allocation28_spill] sm:$0xff] %v10861_v23  ;;  %16574 = vst [vmem:[#allocation29_spill] sm:$0xff] %v10865_v24  ;;  %v838_v23 = vmul.f32 %v10629_v39, %v10629_v39  ;;  %v841_v46 = vmul.f32 %v10641_v60, %v10641_v60  ;;  %v842_v51 = vmul.f32 %v10645_v61, %v10645_v61 }
 0x28f   :  { %16575 = vst [vmem:[#allocation30_spill] sm:$0xff] %v10869_v34  ;;  %16576 = vst [vmem:[#allocation40_spill] sm:$0xff] %v10873_v41  ;;  %v843_v28 = vmul.f32 %v10649_v1, %v10649_v1  ;;  %v844_v19 = vmul.f32 %v10653_v9, %v10653_v9 }
 0x290   :  { %v901_v24 = vadd.f32 %v838_v23, %v837_v12  ;;  %v845_v12 = vmul.f32 %v10657_v13, %v10657_v13 }
 0x292   :  { %v902_v34 = vadd.f32 %v901_v24, %v839_v54  ;;  %v846_v54 = vmul.f32 %v10661_v21, %v10661_v21 }
 0x294   :  { %v903_v41 = vadd.f32 %v902_v34, %v840_v35  ;;  %v847_v35 = vmul.f32 %v10665_v25, %v10665_v25 }
 0x296   :  { %v904_v6 = vadd.f32 %v903_v41, %v841_v46  ;;  %v848_v46 = vmul.f32 %v10669_v33, %v10669_v33 }
 0x298   :  { %v905_v39 = vadd.f32 %v904_v6, %v842_v51  ;;  %v849_v6 = vmul.f32 %v10673_v37, %v10673_v37 }
 0x29a   :  { %v906_v23 = vadd.f32 %v905_v39, %v843_v28  ;;  %v850_v39 = vmul.f32 %v10677_v43, %v10677_v43 }
 0x29c   :  { %v907_v24 = vadd.f32 %v906_v23, %v844_v19  ;;  %v851_v23 = vmul.f32 %v10681_v47, %v10681_v47 }
 0x29e   :  { %v908_v34 = vadd.f32 %v907_v24, %v845_v12  ;;  %v852_v24 = vmul.f32 %v10685_v50, %v10685_v50 }
 0x2a0   :  { %v909_v41 = vadd.f32 %v908_v34, %v846_v54  ;;  %v853_v34 = vmul.f32 %v10689_v53, %v10689_v53 }
 0x2a2   :  { %v910_v51 = vadd.f32 %v909_v41, %v847_v35  ;;  %v854_v41 = vmul.f32 %v10693_v56, %v10693_v56 }
 0x2a4   :  { %v911_v28 = vadd.f32 %v910_v51, %v848_v46  ;;  %v855_v51 = vmul.f32 %v10697_v59, %v10697_v59 }
 0x2a6   :  { %v912_v19 = vadd.f32 %v911_v28, %v849_v6  ;;  %v856_v28 = vmul.f32 %v10701_v63, %v10701_v63 }
 0x2a8   :  { %v913_v12 = vadd.f32 %v912_v19, %v850_v39  ;;  %v857_v19 = vmul.f32 %v10705_v4, %v10705_v4 }
 0x2aa   :  { %v914_v54 = vadd.f32 %v913_v12, %v851_v23  ;;  %v858_v12 = vmul.f32 %v10709_v7, %v10709_v7 }
 0x2ac   :  { %v915_v35 = vadd.f32 %v914_v54, %v852_v24  ;;  %v859_v54 = vmul.f32 %v10713_v11, %v10713_v11 }
 0x2ae   :  { %v916_v46 = vadd.f32 %v915_v35, %v853_v34  ;;  %v860_v35 = vmul.f32 %v10717_v15, %v10717_v15 }
 0x2b0   :  { %v917_v6 = vadd.f32 %v916_v46, %v854_v41  ;;  %v861_v46 = vmul.f32 %v10721_v18, %v10721_v18 }
 0x2b2   :  { %v918_v39 = vadd.f32 %v917_v6, %v855_v51  ;;  %v9791_v6 = vld [vmem:[#allocation8 + $0x80] sm:$0xff]  }
 0x2b3   :  { %9232 = vmatprep.subr.bf16.mxu1 %v9791_v6 }
 0x2b4   :  { %v919_v23 = vadd.f32 %v918_v39, %v856_v28  ;;  %v862_v28 = vmul.f32 %v10725_v22, %v10725_v22  ;;  %9240 = vmatpush3.bf16.msra.mxu1 %v9791_v6 }
 0x2b6   :  { %v920_v24 = vadd.f32 %v919_v23, %v857_v19  ;;  %v863_v19 = vmul.f32 %v10729_v26, %v10729_v26 }
 0x2b8   :  { %v921_v34 = vadd.f32 %v920_v24, %v858_v12  ;;  %v864_v12 = vmul.f32 %v10733_v29, %v10733_v29 }
 0x2ba   :  { %v922_v41 = vadd.f32 %v921_v34, %v859_v54  ;;  %v865_v54 = vmul.f32 %v10737_v32, %v10737_v32  ;;  %v9793_v32 = vld [vmem:[#allocation8 + $0x88] sm:$0xff]  }
 0x2bb   :  { %9233 = vmatprep.subr.bf16.mxu1 %v9793_v32 }
 0x2bc   :  { %v923_v51 = vadd.f32 %v922_v41, %v860_v35  ;;  %v866_v35 = vmul.f32 %v10741_v36, %v10741_v36  ;;  %9241 = vmatpush3.bf16.msra.mxu1 %v9793_v32  ;;  %v9797_v32 = vld [vmem:[#allocation8 + $0x98] sm:$0xff]  }
 0x2be   :  { %v924_v39 = vadd.f32 %v923_v51, %v861_v46  ;;  %v867_v46 = vmul.f32 %v10745_v40, %v10745_v40 }
 0x2c0   :  { %v925_v23 = vadd.f32 %v924_v39, %v862_v28  ;;  %v868_v28 = vmul.f32 %v10749_v44, %v10749_v44  ;;  %v869_v39 = vmul.f32 %v10753_v48, %v10753_v48 }
 0x2c2   :  { %v926_v24 = vadd.f32 %v925_v23, %v863_v19  ;;  %v9792_v23 = vld [vmem:[#allocation8 + $0x40] sm:$0xff]  }
 0x2c3   :  { %8512 = vmatprep.subr.bf16.mxu0 %v9792_v23 }
 0x2c4   :  { %v927_v34 = vadd.f32 %v926_v24, %v864_v12  ;;  %v870_v12 = vmul.f32 %v10757_v52, %v10757_v52  ;;  %8513 = vmatpush3.bf16.msra.mxu0 %v9792_v23 }
 0x2c6   :  { %v928_v41 = vadd.f32 %v927_v34, %v865_v54  ;;  %v871_v54 = vmul.f32 %v10761_v57, %v10761_v57 }
 0x2c8   :  { %v929_v51 = vadd.f32 %v928_v41, %v866_v35  ;;  %v9794_v35 = vld [vmem:[#allocation8 + $0x48] sm:$0xff]   ;;  %v872_v41 = vmul.f32 %v10765_v62, %v10765_v62 }
 0x2c9   :  { %8514 = vmatprep.subr.bf16.mxu0 %v9794_v35 }
 0x2ca   :  { %v930_v6 = vadd.f32 %v929_v51, %v867_v46  ;;  %v9795_v51 = vld [vmem:[#allocation8 + $0x90] sm:$0xff]   ;;  %8515 = vmatpush3.bf16.msra.mxu0 %v9794_v35 }
 0x2cb   :  { %9234 = vmatprep.subr.bf16.mxu1 %v9795_v51 }
 0x2cc   :  { %v931_v19 = vadd.f32 %v930_v6, %v868_v28  ;;  %v873_v28 = vmul.f32 %v10769_v5, %v10769_v5  ;;  %9242 = vmatpush3.bf16.msra.mxu1 %v9795_v51 }
 0x2cd   :  { %9235 = vmatprep.subr.bf16.mxu1 %v9797_v32 }
 0x2ce   :  { %v932_v24 = vadd.f32 %v931_v19, %v869_v39  ;;  %v9796_v39 = vld [vmem:[#allocation8 + $0x50] sm:$0xff]   ;;  %v874_v19 = vmul.f32 %v10773_v10, %v10773_v10 }
 0x2cf   :  { %8516 = vmatprep.subr.bf16.mxu0 %v9796_v39 }
 0x2d0   :  { %v933_v34 = vadd.f32 %v932_v24, %v870_v12  ;;  %v875_v12 = vmul.f32 %v10777_v16, %v10777_v16  ;;  %8517 = vmatpush3.bf16.msra.mxu0 %v9796_v39  ;;  %9243 = vmatpush3.bf16.msra.mxu1 %v9797_v32  ;;  %v9803_v32 = vld [vmem:[#allocation8 + $0xb0] sm:$0xff]  }
 0x2d2   :  { %v934_v46 = vadd.f32 %v933_v34, %v871_v54  ;;  %v9798_v54 = vld [vmem:[#allocation8 + $0x58] sm:$0xff]   ;;  %v876_v34 = vmul.f32 %v10781_v20, %v10781_v20 }
 0x2d3   :  { %8518 = vmatprep.subr.bf16.mxu0 %v9798_v54 }
 0x2d4   :  { %v935_v6 = vadd.f32 %v934_v46, %v872_v41  ;;  %v9799_v41 = vld [vmem:[#allocation8 + $0xa0] sm:$0xff]   ;;  %v877_v46 = vmul.f32 %v10785_v27, %v10785_v27  ;;  %8519 = vmatpush3.bf16.msra.mxu0 %v9798_v54  ;;  %v880_v54 = vmul.f32 %v10797_v42, %v10797_v42 }
 0x2d5   :  { %9236 = vmatprep.subr.bf16.mxu1 %v9799_v41 }
 0x2d6   :  { %v936_v23 = vadd.f32 %v935_v6, %v873_v28  ;;  %9244 = vmatpush3.bf16.msra.mxu1 %v9799_v41  ;;  %v9800_v28 = vld [vmem:[#allocation8 + $0x60] sm:$0xff]   ;;  %v878_v6 = vmul.f32 %v10789_v31, %v10789_v31  ;;  %v9805_v41 = vld [vmem:[#allocation8 + $0xb8] sm:$0xff]  }
 0x2d7   :  { %8520 = vmatprep.subr.bf16.mxu0 %v9800_v28 }
 0x2d8   :  { %v937_v24 = vadd.f32 %v936_v23, %v874_v19  ;;  %v9801_v19 = vld [vmem:[#allocation8 + $0xa8] sm:$0xff]   ;;  %8521 = vmatpush3.bf16.msra.mxu0 %v9800_v28 }
 0x2d9   :  { %v9802_v23 = vld [vmem:[#allocation8 + $0x68] sm:$0xff]   ;;  %9237 = vmatprep.subr.bf16.mxu1 %v9801_v19 }
 0x2da   :  { %v938_v35 = vadd.f32 %v937_v24, %v875_v12  ;;  %v879_v12 = vmul.f32 %v10793_v38, %v10793_v38  ;;  %9245 = vmatpush3.bf16.msra.mxu1 %v9801_v19  ;;  %8522 = vmatprep.subr.bf16.mxu0 %v9802_v23  ;;  %v9806_v38 = vld [vmem:[#allocation8 + $0x78] sm:$0xff]   ;;  %v882_v19 = vmul.f32 %v10805_v55, %v10805_v55 }
 0x2db   :  { %9238 = vmatprep.subr.bf16.mxu1 %v9803_v32 }
 0x2dc   :  { %v939_v51 = vadd.f32 %v938_v35, %v876_v34  ;;  %v9804_v34 = vld [vmem:[#allocation8 + $0x70] sm:$0xff]   ;;  %8523 = vmatpush3.bf16.msra.mxu0 %v9802_v23 }
 0x2dd   :  { %8524 = vmatprep.subr.bf16.mxu0 %v9804_v34 }
 0x2de   :  { %v940_v39 = vadd.f32 %v939_v51, %v877_v46  ;;  %v881_v46 = vmul.f32 %v10801_v49, %v10801_v49  ;;  %9246 = vmatpush3.bf16.msra.mxu1 %v9803_v32  ;;  %v883_v32 = vmul.f32 %v10809_v2, %v10809_v2  ;;  %v885_v2 = vmul.f32 %v10817_v17, %v10817_v17  ;;  %v16586_v17 = vld [vmem:[#allocation23_spill] sm:$0xff] }
 0x2df   :  { %9239 = vmatprep.subr.bf16.mxu1 %v9805_v41 }
 0x2e0   :  { %v941_v24 = vadd.f32 %v940_v39, %v878_v6  ;;  %v1351_v6 = vld [vmem:[#allocation2 + $0x10] sm:$0x3]  ;;  %v9895_v39 = vld [vmem:[#allocation2 + $0x18] sm:$0xff]  ;;  %8525 = vmatpush3.bf16.msra.mxu0 %v9804_v34 }
 0x2e1   :  { %v10969_v28 = vpack.c.bf16 %v9895_v39, %v9895_v39  ;;  %8526 = vmatprep.subr.bf16.mxu0 %v9806_v38 }
 0x2e2   :  { %v942_v35 = vadd.f32 %v941_v24, %v879_v12  ;;  %v10973_v12 = vld [vmem:[#allocation8 + $0xc0] sm:$0xff]   ;;  %v10975_v24 = vpack.c.bf16 %v1351_v6, %v1351_v6  ;;  %9247 = vmatpush3.bf16.msra.mxu1 %v9805_v41  ;;  %v16581_v41 = vld [vmem:[#allocation18_spill] sm:$0xff] }
 0x2e3   :  { %16577 = vst [vmem:[#allocation41_spill] sm:$0xff] %v10969_v28  ;;  %16578 = vst [vmem:[#allocation42_spill] sm:$0xff] %v10973_v12  ;;  %v1547_v49 = vshrl.u32 %v10969_v28, 16  ;;  %v1549_v23 = vshll.u32 %v10969_v28, 16  ;;  %8752 = vmatprep.subr.bf16.mxu1 %v10973_v12  ;;  %v16584_v12 = vld [vmem:[#allocation21_spill] sm:$0xff]  ;;  %v16609_v28 = vld [vmem:[#allocation23_spill] sm:$0xff] }
 0x2e4   :  { %v943_v51 = vadd.f32 %v942_v35, %v880_v54  ;;  %16579 = vst [vmem:[#allocation43_spill] sm:$0xff] %v10975_v24  ;;  %v1554_v35 = vshll.u32 %v10975_v24, 16  ;;  %8527 = vmatpush3.bf16.msra.mxu0 %v9806_v38 }
 0x2e5   :  { %v1551_v39 = vrot.slane %v1549_v23, 1 }
 0x2e6   :  { %v944_v31 = vadd.f32 %v943_v51, %v881_v46  ;;  %v884_v46 = vmul.f32 %v10813_v8, %v10813_v8  ;;  %v1556_v6 = vrot.slane %v1554_v35, 1  ;;  %v16583_v35 = vld [vmem:[#allocation20_spill] sm:$0xff] }
 0x2e7   :  { %v10985_v55 = vor.u32 %v1551_v39, %v1547_v49  ;;  %v888_v49 = vmul.f32 %v16583_v35, %v16583_v35 }
 0x2e8   :  { %v945_v54 = vadd.f32 %v944_v31, %v882_v19  ;;  %v886_v19 = vmul.f32 %v16581_v41, %v16581_v41 }
 0x2e9   :  { %16580 = vst [vmem:[#allocation44_spill] sm:$0xff] %v10985_v55  ;;  %v1557_v34 = vsel %vm1545_vm0, %v10985_v55, %v1556_v6 }
 0x2ea   :  { %v946_v51 = vadd.f32 %v945_v54, %v883_v32  ;;  %8528 = vmatprep.mubr.bf16.mxu0 %v1557_v34  ;;  %v16582_v32 = vld [vmem:[#allocation19_spill] sm:$0xff]  ;;  %v892_v34 = vmul.f32 %v10845_v30, %v10845_v30 }
 0x2eb   :  { %v887_v54 = vmul.f32 %v16582_v32, %v16582_v32 }
 0x2ec   :  { %v947_v31 = vadd.f32 %v946_v51, %v884_v46  ;;  %v889_v46 = vmul.f32 %v16584_v12, %v16584_v12  ;;  %v16585_v51 = vld [vmem:[#allocation22_spill] sm:$0xff] }
 0x2ed   :  { %v890_v6 = vmul.f32 %v16585_v51, %v16585_v51 }
 0x2ee   :  { %v948_v23 = vadd.f32 %v947_v31, %v885_v2  ;;  %v891_v2 = vmul.f32 %v16586_v17, %v16586_v17 }
 0x2f0   :  { %v949_v24 = vadd.f32 %v948_v23, %v886_v19  ;;  %v893_v23 = vmul.f32 %v10849_v3, %v10849_v3 }
 0x2f2   :  { %v950_v39 = vadd.f32 %v949_v24, %v887_v54  ;;  %v894_v54 = vmul.f32 %v10853_v45, %v10853_v45 }
 0x2f4   :  { %v951_v38 = vadd.f32 %v950_v39, %v888_v49  ;;  %v895_v39 = vmul.f32 %v10857_v58, %v10857_v58 }
 0x2f6   :  { %v952_v55 = vadd.f32 %v951_v38, %v889_v46  ;;  %v16587_v38 = vld [vmem:[#allocation28_spill] sm:$0xff] }
 0x2f7   :  { %v896_v17 = vmul.f32 %v16587_v38, %v16587_v38 }
 0x2f8   :  { %v953_v31 = vadd.f32 %v952_v55, %v890_v6  ;;  %v16588_v6 = vld [vmem:[#allocation29_spill] sm:$0xff] }
 0x2f9   :  { %v897_v30 = vmul.f32 %v16588_v6, %v16588_v6 }
 0x2fa   :  { %v954_v19 = vadd.f32 %v953_v31, %v891_v2  ;;  %v16589_v31 = vld [vmem:[#allocation30_spill] sm:$0xff] }
 0x2fb   :  { %v898_v3 = vmul.f32 %v16589_v31, %v16589_v31  ;;  %v975_v31 = vlaneseq }
 0x2fc   :  { %v955_v24 = vadd.f32 %v954_v19, %v892_v34  ;;  %v16590_v19 = vld [vmem:[#allocation40_spill] sm:$0xff] }
 0x2fd   :  { %v899_v45 = vmul.f32 %v16590_v19, %v16590_v19 }
 0x2fe   :  { %v956_v49 = vadd.f32 %v955_v24, %v893_v23  ;;  %v900_v24 = vmul.f32 %v10877_v14, %v10877_v14 }
 0x300   :  { %v957_v46 = vadd.f32 %v956_v49, %v894_v54 }
 0x302   :  { %v958_v55 = vadd.f32 %v957_v46, %v895_v39 }
 0x304   :  { %v959_v2 = vadd.f32 %v958_v55, %v896_v17 }
 0x306   :  { %v960_v34 = vadd.f32 %v959_v2, %v897_v30  ;;  %v11021_v30 = vshrl.u32 %v975_v31, 7  ;;  %v1405_v2 = vld [vmem:[#allocation2 + $0x1c0] sm:$0x3]  ;;  %v16601_v31 = vld [vmem:[#allocation38_spill] sm:$0xff] }
 0x308   :  { %v961_v23 = vadd.f32 %v960_v34, %v898_v3  ;;  %16591 = vst [vmem:[#allocation18_spill] sm:$0xff] %v11021_v30  ;;  %v971_v3 = vld [vmem:[%s16167_s4] sm:$0x1] }
 0x30a   :  { %v962_v54 = vadd.f32 %v961_v23, %v899_v45  ;;  %v11027_v45 = vsub.s32 0, %v11021_v30  ;;  %v16602_v23 = vld [vmem:[#allocation39_spill] sm:$0xff]  ;;  %v16603_v30 = vld [vmem:[#allocation17_spill] sm:$0xff] }
 0x30c   :  { %v963_v49 = vadd.f32 %v962_v54, %v900_v24  ;;  %16592 = vst [vmem:[#allocation19_spill] sm:$0xff] %v11027_v45  ;;  %v16594_v54 = vld [vmem:[#allocation31_spill] sm:$0xff] }
 0x30e   :  { %v964_v58 = vrot.slane %v963_v49, 4 }
 0x310   :  { %v965_v38 = vadd.f32 %v964_v58, %v963_v49  ;;  %v11029_v58 = vpack.c.bf16 %v1405_v2, %v1405_v2 }
 0x312   :  { %v966_v39 = vrot.slane %v965_v38, 2  ;;  %16593 = vst [vmem:[#allocation20_spill] sm:$0xff] %v11029_v58  ;;  %v16611_v58 = vld [vmem:[#allocation24_spill] sm:$0xff] }
 0x314   :  { %v967_v46 = vadd.f32 %v966_v39, %v965_v38  ;;  %v16595_v39 = vld [vmem:[#allocation32_spill] sm:$0xff] }
 0x316   :  { %v968_v51 = vrot.slane %v967_v46, 1 }
 0x318   :  { %v969_v6 = vadd.f32 %v968_v51, %v967_v46 }
 0x31a   :  { %v970_v17 = vmul.f32 0.001953125, %v969_v6  ;;  %v11037_v6 = vld [vmem:[%s16167_s4 + $0x1] ss:$0 sm:$0xff] }
 0x31c   :  { %v972_v55 = vadd.f32 1e-05, %v970_v17  ;;  %v16596_v17 = vld [vmem:[#allocation33_spill] sm:$0xff] }
 0x31e   :  { %9887 = vrsqrt.f32 %v972_v55 }
 0x328   :  { %v9888_v34 = vpop.eup %9887 }
 0x329   :  { %v974_v38 = vmul.f32 %v9888_v34, %v971_v3 }
 0x32b   :  { %v11032_v51 = vrot.slane %v974_v38, %v11027_v45  ;;  %v16607_v45 = vld [vmem:[#allocation22_spill] sm:$0xff] }
 0x32d   :  { %v1042_v24 = vmul.f32 %v11032_v51, %v10877_v14  ;;  %v11045_v49 = vmul.f32 %v11032_v51, %v16594_v54  ;;  %v11049_v46 = vmul.f32 %v11032_v51, %v16595_v39  ;;  %v11053_v55 = vmul.f32 %v11032_v51, %v16596_v17  ;;  %v16597_v39 = vld [vmem:[#allocation34_spill] sm:$0xff] }
 0x32e   :  { %v11057_v2 = vmul.f32 %v11032_v51, %v10637_v0  ;;  %v11061_v3 = vmul.f32 %v11032_v51, %v10641_v60  ;;  %v11065_v14 = vmul.f32 %v11032_v51, %v10645_v61  ;;  %v11069_v34 = vmul.f32 %v11032_v51, %v10649_v1 }
 0x32f   :  { %v1111_v38 = vadd.f32 %v11037_v6, %v1042_v24  ;;  %v11074_v54 = vmul.f32 %v11032_v51, %v10653_v9  ;;  %v11078_v0 = vmul.f32 %v11032_v51, %v10657_v13  ;;  %v11082_v60 = vmul.f32 %v11032_v51, %v10661_v21 }
 0x330   :  { %v11086_v61 = vmul.f32 %v11032_v51, %v10665_v25  ;;  %v11090_v1 = vmul.f32 %v11032_v51, %v10669_v33  ;;  %v11094_v9 = vmul.f32 %v11032_v51, %v10673_v37  ;;  %v11098_v13 = vmul.f32 %v11032_v51, %v10677_v43 }
 0x331   :  { %v1175_v24 = vmax.f32 %v1111_v38, 0.0  ;;  %v11102_v21 = vmul.f32 %v11032_v51, %v10681_v47  ;;  %v11106_v25 = vmul.f32 %v11032_v51, %v10685_v50  ;;  %v11110_v33 = vmul.f32 %v11032_v51, %v10689_v53  ;;  %v16598_v38 = vld [vmem:[#allocation35_spill] sm:$0xff] }
 0x332   :  { %v11114_v37 = vmul.f32 %v11032_v51, %v10693_v56  ;;  %v11118_v43 = vmul.f32 %v11032_v51, %v10697_v59  ;;  %v11122_v47 = vmul.f32 %v11032_v51, %v10701_v63  ;;  %v11126_v50 = vmul.f32 %v11032_v51, %v10705_v4 }
 0x333   :  { %1348 = vst [vmem:[#allocation2 + $0x339] sm:$0xff] %v1175_v24  ;;  %v11130_v53 = vmul.f32 %v11032_v51, %v10709_v7  ;;  %v11134_v56 = vmul.f32 %v11032_v51, %v10713_v11  ;;  %v11138_v59 = vmul.f32 %v11032_v51, %v10717_v15  ;;  %v11142_v63 = vmul.f32 %v11032_v51, %v10721_v18  ;;  %v16599_v24 = vld [vmem:[#allocation36_spill] sm:$0xff] }
 0x334   :  { %v11146_v4 = vmul.f32 %v11032_v51, %v10725_v22  ;;  %v11150_v7 = vmul.f32 %v11032_v51, %v10729_v26  ;;  %v11154_v11 = vmul.f32 %v11032_v51, %v10733_v29  ;;  %v11158_v15 = vmul.f32 %v11032_v51, %v16597_v39  ;;  %v16600_v39 = vld [vmem:[#allocation37_spill] sm:$0xff] }
 0x335   :  { %v11162_v18 = vmul.f32 %v11032_v51, %v10741_v36  ;;  %v11166_v22 = vmul.f32 %v11032_v51, %v10745_v40  ;;  %v11170_v26 = vmul.f32 %v11032_v51, %v10749_v44  ;;  %v11174_v29 = vmul.f32 %v11032_v51, %v10753_v48 }
 0x336   :  { %v11178_v17 = vmul.f32 %v11032_v51, %v10757_v52  ;;  %v11182_v36 = vmul.f32 %v11032_v51, %v10761_v57  ;;  %v11186_v40 = vmul.f32 %v11032_v51, %v10765_v62  ;;  %v11190_v44 = vmul.f32 %v11032_v51, %v10769_v5 }
 0x337   :  { %v11194_v48 = vmul.f32 %v11032_v51, %v10773_v10  ;;  %v11198_v52 = vmul.f32 %v11032_v51, %v10777_v16  ;;  %v11202_v57 = vmul.f32 %v11032_v51, %v10781_v20  ;;  %v11206_v62 = vmul.f32 %v11032_v51, %v10785_v27 }
 0x338   :  { %v11210_v5 = vmul.f32 %v11032_v51, %v16598_v38  ;;  %v11214_v10 = vmul.f32 %v11032_v51, %v16599_v24  ;;  %v11218_v16 = vmul.f32 %v11032_v51, %v10797_v42  ;;  %v11222_v20 = vmul.f32 %v11032_v51, %v16600_v39 }
 0x339   :  { %v11226_v27 = vmul.f32 %v11032_v51, %v16601_v31  ;;  %v11230_v38 = vmul.f32 %v11032_v51, %v16602_v23  ;;  %v11234_v24 = vmul.f32 %v11032_v51, %v10813_v8  ;;  %v11238_v42 = vmul.f32 %v11032_v51, %v16603_v30 }
 0x33a   :  { %v11242_v39 = vmul.f32 %v11032_v51, %v16581_v41  ;;  %v11246_v31 = vmul.f32 %v11032_v51, %v16582_v32  ;;  %v11250_v23 = vmul.f32 %v11032_v51, %v16583_v35  ;;  %v11254_v8 = vmul.f32 %v11032_v51, %v16584_v12 }
 0x33b   :  { %v11258_v30 = vmul.f32 %v11032_v51, %v16607_v45  ;;  %v11262_v41 = vmul.f32 %v11032_v51, %v16609_v28  ;;  %v11266_v32 = vmul.f32 %v11032_v51, %v16611_v58 }
 0x33c   :  { %16604 = vst [vmem:[#allocation21_spill] sm:$0xff] %v11246_v31  ;;  %16605 = vst [vmem:[#allocation40_spill] sm:$0xff] %v11250_v23  ;;  %v16613_v31 = vld [vmem:[#allocation25_spill] sm:$0xff]  ;;  %v16614_v23 = vld [vmem:[#allocation26_spill] sm:$0xff] }
 0x33d   :  { %16606 = vst [vmem:[#allocation31_spill] sm:$0xff] %v11254_v8  ;;  %16608 = vst [vmem:[#allocation32_spill] sm:$0xff] %v11258_v30  ;;  %v11270_v35 = vmul.f32 %v11032_v51, %v16613_v31  ;;  %v11274_v12 = vmul.f32 %v11032_v51, %v16614_v23  ;;  %v16615_v8 = vld [vmem:[#allocation27_spill] sm:$0xff]  ;;  %v16616_v30 = vld [vmem:[#allocation28_spill] sm:$0xff]  ;;  %v11294_v23 = vmul.f32 %v11032_v51, %v16590_v19 }
 0x33e   :  { %16610 = vst [vmem:[#allocation33_spill] sm:$0xff] %v11262_v41  ;;  %16612 = vst [vmem:[#allocation34_spill] sm:$0xff] %v11266_v32  ;;  %v11278_v45 = vmul.f32 %v11032_v51, %v16615_v8  ;;  %v11282_v28 = vmul.f32 %v11032_v51, %v16616_v30  ;;  %v16617_v41 = vld [vmem:[#allocation29_spill] sm:$0xff]  ;;  %v16618_v32 = vld [vmem:[#allocation30_spill] sm:$0xff]  ;;  %v11298_v8 = vadd.f32 %v11037_v6, %v11045_v49 }
 0x33f   :  { %v11286_v58 = vmul.f32 %v11032_v51, %v16617_v41  ;;  %v11290_v31 = vmul.f32 %v11032_v51, %v16618_v32  ;;  %v11302_v30 = vadd.f32 %v11037_v6, %v11049_v46  ;;  %v11306_v41 = vadd.f32 %v11037_v6, %v11053_v55 }
 0x340   :  { %v11310_v32 = vadd.f32 %v11037_v6, %v11057_v2  ;;  %v11314_v19 = vadd.f32 %v11037_v6, %v11061_v3  ;;  %v11318_v51 = vadd.f32 %v11037_v6, %v11065_v14  ;;  %v11322_v49 = vadd.f32 %v11037_v6, %v11069_v34 }
 0x341   :  { %v11326_v46 = vadd.f32 %v11037_v6, %v11074_v54  ;;  %v11330_v55 = vadd.f32 %v11037_v6, %v11078_v0  ;;  %v11334_v2 = vadd.f32 %v11037_v6, %v11082_v60  ;;  %v11338_v3 = vadd.f32 %v11037_v6, %v11086_v61 }
 0x342   :  { %v11342_v14 = vadd.f32 %v11037_v6, %v11090_v1  ;;  %v11346_v34 = vadd.f32 %v11037_v6, %v11094_v9  ;;  %v11350_v54 = vadd.f32 %v11037_v6, %v11098_v13  ;;  %v11354_v0 = vadd.f32 %v11037_v6, %v11102_v21 }
 0x343   :  { %v11358_v60 = vadd.f32 %v11037_v6, %v11106_v25  ;;  %v11362_v61 = vadd.f32 %v11037_v6, %v11110_v33  ;;  %v11366_v1 = vadd.f32 %v11037_v6, %v11114_v37  ;;  %v11370_v9 = vadd.f32 %v11037_v6, %v11118_v43 }
 0x344   :  { %v11374_v13 = vadd.f32 %v11037_v6, %v11122_v47  ;;  %v11378_v21 = vadd.f32 %v11037_v6, %v11126_v50  ;;  %v11382_v25 = vadd.f32 %v11037_v6, %v11130_v53  ;;  %v11386_v33 = vadd.f32 %v11037_v6, %v11134_v56 }
 0x345   :  { %v11390_v37 = vadd.f32 %v11037_v6, %v11138_v59  ;;  %v11394_v43 = vadd.f32 %v11037_v6, %v11142_v63  ;;  %v11398_v47 = vadd.f32 %v11037_v6, %v11146_v4  ;;  %v11402_v50 = vadd.f32 %v11037_v6, %v11150_v7 }
 0x346   :  { %v11406_v53 = vadd.f32 %v11037_v6, %v11154_v11  ;;  %v11410_v56 = vadd.f32 %v11037_v6, %v11158_v15  ;;  %v11414_v59 = vadd.f32 %v11037_v6, %v11162_v18  ;;  %v11418_v63 = vadd.f32 %v11037_v6, %v11166_v22 }
 0x347   :  { %v11422_v4 = vadd.f32 %v11037_v6, %v11170_v26  ;;  %v11426_v7 = vadd.f32 %v11037_v6, %v11174_v29  ;;  %v11430_v11 = vadd.f32 %v11037_v6, %v11178_v17  ;;  %v11434_v15 = vadd.f32 %v11037_v6, %v11182_v36 }
 0x348   :  { %v11438_v18 = vadd.f32 %v11037_v6, %v11186_v40  ;;  %v11442_v22 = vadd.f32 %v11037_v6, %v11190_v44  ;;  %v11446_v26 = vadd.f32 %v11037_v6, %v11194_v48  ;;  %v11450_v29 = vadd.f32 %v11037_v6, %v11198_v52  ;;  %v11464_v44 = vld [vmem:[#allocation8] sm:$0xff]  }
 0x349   :  { %v11454_v17 = vadd.f32 %v11037_v6, %v11202_v57  ;;  %v11458_v36 = vadd.f32 %v11037_v6, %v11206_v62  ;;  %v11462_v40 = vadd.f32 %v11037_v6, %v11210_v5  ;;  %16619 = vst [vmem:[#allocation35_spill] sm:$0xff] %v11464_v44  ;;  %v11468_v48 = vadd.f32 %v11037_v6, %v11214_v10 }
 0x34a   :  { %v11472_v52 = vadd.f32 %v11037_v6, %v11218_v16  ;;  %v11476_v57 = vadd.f32 %v11037_v6, %v11222_v20  ;;  %v11480_v62 = vadd.f32 %v11037_v6, %v11226_v27  ;;  %v11484_v5 = vadd.f32 %v11037_v6, %v11230_v38  ;;  %8592 = vmatprep.subr.bf16.mxu0 %v11464_v44  ;;  %v16625_v27 = vld [vmem:[#allocation21_spill] sm:$0xff]  ;;  %v16626_v38 = vld [vmem:[#allocation40_spill] sm:$0xff]  ;;  %v16630_v44 = vld [vmem:[#allocation34_spill] sm:$0xff] }
 0x34b   :  { %v11488_v10 = vadd.f32 %v11037_v6, %v11234_v24  ;;  %v11492_v16 = vadd.f32 %v11037_v6, %v11238_v42  ;;  %v11496_v20 = vadd.f32 %v11037_v6, %v11242_v39  ;;  %v16627_v24 = vld [vmem:[#allocation31_spill] sm:$0xff]  ;;  %v16628_v42 = vld [vmem:[#allocation32_spill] sm:$0xff]  ;;  %v16629_v39 = vld [vmem:[#allocation33_spill] sm:$0xff] }
 0x34c   :  { %16620 = vst [vmem:[#allocation36_spill] sm:$0xff] %v11480_v62  ;;  %16621 = vst [vmem:[#allocation37_spill] sm:$0xff] %v11484_v5  ;;  %v11501_v62 = vadd.f32 %v11037_v6, %v16625_v27  ;;  %v11505_v5 = vadd.f32 %v11037_v6, %v16626_v38  ;;  %v11521_v27 = vadd.f32 %v11037_v6, %v16630_v44 }
 0x34d   :  { %16622 = vst [vmem:[#allocation38_spill] sm:$0xff] %v11488_v10  ;;  %16623 = vst [vmem:[#allocation39_spill] sm:$0xff] %v11492_v16  ;;  %v11509_v10 = vadd.f32 %v11037_v6, %v16627_v24  ;;  %v11513_v16 = vadd.f32 %v11037_v6, %v16628_v42  ;;  %v11525_v38 = vadd.f32 %v11037_v6, %v11270_v35 }
 0x34e   :  { %16624 = vst [vmem:[#allocation17_spill] sm:$0xff] %v11496_v20  ;;  %v11517_v20 = vadd.f32 %v11037_v6, %v16629_v39  ;;  %v11529_v24 = vadd.f32 %v11037_v6, %v11274_v12  ;;  %v11533_v42 = vadd.f32 %v11037_v6, %v11278_v45  ;;  %v11537_v39 = vadd.f32 %v11037_v6, %v11282_v28 }
 0x34f   :  { %v11541_v44 = vadd.f32 %v11037_v6, %v11286_v58  ;;  %v11545_v35 = vadd.f32 %v11037_v6, %v11290_v31  ;;  %v11549_v12 = vadd.f32 %v11037_v6, %v11294_v23  ;;  %v1113_v45 = vmax.f32 %v11302_v30, 0.0 }
 0x350   :  { %16631 = vst [vmem:[#allocation22_spill] sm:$0xff] %v11529_v24  ;;  %16632 = vst [vmem:[#allocation23_spill] sm:$0xff] %v11533_v42  ;;  %v1112_v24 = vmax.f32 %v11298_v8, 0.0  ;;  %v1114_v42 = vmax.f32 %v11306_v41, 0.0  ;;  %v1115_v28 = vmax.f32 %v11310_v32, 0.0  ;;  %v1117_v58 = vmax.f32 %v11318_v51, 0.0 }
 0x351   :  { %16633 = vst [vmem:[#allocation24_spill] sm:$0xff] %v11537_v39  ;;  %16634 = vst [vmem:[#allocation25_spill] sm:$0xff] %v11541_v44  ;;  %v1116_v39 = vmax.f32 %v11314_v19, 0.0  ;;  %v1118_v44 = vmax.f32 %v11322_v49, 0.0  ;;  %v1119_v31 = vmax.f32 %v11326_v46, 0.0  ;;  %v1121_v6 = vmax.f32 %v11334_v2, 0.0 }
 0x352   :  { %16635 = vst [vmem:[#allocation26_spill] sm:$0xff] %v11545_v35  ;;  %v1120_v35 = vmax.f32 %v11330_v55, 0.0  ;;  %v1122_v23 = vmax.f32 %v11338_v3, 0.0  ;;  %1285 = vst [vmem:[#allocation2 + $0x19] sm:$0xff] %v1112_v24  ;;  %v1123_v8 = vmax.f32 %v11342_v14, 0.0  ;;  %v1124_v30 = vmax.f32 %v11346_v34, 0.0 }
 0x353   :  { %1286 = vst [vmem:[#allocation2 + $0x21] sm:$0xff] %v1113_v45  ;;  %1287 = vst [vmem:[#allocation2 + $0x31] sm:$0xff] %v1114_v42  ;;  %v1125_v41 = vmax.f32 %v11350_v54, 0.0  ;;  %v1126_v32 = vmax.f32 %v11354_v0, 0.0  ;;  %v1127_v19 = vmax.f32 %v11358_v60, 0.0  ;;  %v1128_v51 = vmax.f32 %v11362_v61, 0.0 }
 0x354   :  { %1288 = vst [vmem:[#allocation2 + $0x39] sm:$0xff] %v1115_v28  ;;  %1289 = vst [vmem:[#allocation2 + $0x49] sm:$0xff] %v1116_v39  ;;  %v1129_v49 = vmax.f32 %v11366_v1, 0.0  ;;  %v1130_v46 = vmax.f32 %v11370_v9, 0.0  ;;  %v1131_v55 = vmax.f32 %v11374_v13, 0.0  ;;  %v1132_v2 = vmax.f32 %v11378_v21, 0.0 }
 0x355   :  { %1290 = vst [vmem:[#allocation2 + $0x51] sm:$0xff] %v1117_v58  ;;  %1291 = vst [vmem:[#allocation2 + $0x61] sm:$0xff] %v1118_v44  ;;  %v1133_v3 = vmax.f32 %v11382_v25, 0.0  ;;  %v1134_v14 = vmax.f32 %v11386_v33, 0.0  ;;  %v1135_v34 = vmax.f32 %v11390_v37, 0.0  ;;  %v1136_v54 = vmax.f32 %v11394_v43, 0.0 }
 0x356   :  { %1292 = vst [vmem:[#allocation2 + $0x69] sm:$0xff] %v1119_v31  ;;  %1293 = vst [vmem:[#allocation2 + $0x79] sm:$0xff] %v1120_v35  ;;  %v1137_v0 = vmax.f32 %v11398_v47, 0.0  ;;  %v1138_v60 = vmax.f32 %v11402_v50, 0.0  ;;  %v1139_v61 = vmax.f32 %v11406_v53, 0.0  ;;  %v1140_v1 = vmax.f32 %v11410_v56, 0.0 }
 0x357   :  { %1294 = vst [vmem:[#allocation2 + $0x81] sm:$0xff] %v1121_v6  ;;  %1295 = vst [vmem:[#allocation2 + $0x91] sm:$0xff] %v1122_v23  ;;  %v1141_v9 = vmax.f32 %v11414_v59, 0.0  ;;  %v1142_v13 = vmax.f32 %v11418_v63, 0.0  ;;  %v1143_v21 = vmax.f32 %v11422_v4, 0.0  ;;  %v1144_v25 = vmax.f32 %v11426_v7, 0.0 }
 0x358   :  { %1296 = vst [vmem:[#allocation2 + $0x99] sm:$0xff] %v1123_v8  ;;  %1297 = vst [vmem:[#allocation2 + $0xa9] sm:$0xff] %v1124_v30  ;;  %v1145_v33 = vmax.f32 %v11430_v11, 0.0  ;;  %v1146_v37 = vmax.f32 %v11434_v15, 0.0  ;;  %v1147_v43 = vmax.f32 %v11438_v18, 0.0  ;;  %v1148_v47 = vmax.f32 %v11442_v22, 0.0 }
 0x359   :  { %1298 = vst [vmem:[#allocation2 + $0xb1] sm:$0xff] %v1125_v41  ;;  %1299 = vst [vmem:[#allocation2 + $0xc1] sm:$0xff] %v1126_v32  ;;  %v1149_v50 = vmax.f32 %v11446_v26, 0.0  ;;  %v1150_v53 = vmax.f32 %v11450_v29, 0.0  ;;  %v1151_v56 = vmax.f32 %v11454_v17, 0.0  ;;  %v1152_v59 = vmax.f32 %v11458_v36, 0.0 }
 0x35a   :  { %1300 = vst [vmem:[#allocation2 + $0xc9] sm:$0xff] %v1127_v19  ;;  %1301 = vst [vmem:[#allocation2 + $0xd9] sm:$0xff] %v1128_v51  ;;  %v1153_v63 = vmax.f32 %v11462_v40, 0.0  ;;  %v1154_v4 = vmax.f32 %v11468_v48, 0.0  ;;  %v1155_v7 = vmax.f32 %v11472_v52, 0.0  ;;  %v1156_v11 = vmax.f32 %v11476_v57, 0.0 }
 0x35b   :  { %1302 = vst [vmem:[#allocation2 + $0xe1] sm:$0xff] %v1129_v49  ;;  %1303 = vst [vmem:[#allocation2 + $0xf1] sm:$0xff] %v1130_v46  ;;  %v16636_v15 = vld [vmem:[#allocation36_spill] sm:$0xff]  ;;  %v16637_v22 = vld [vmem:[#allocation37_spill] sm:$0xff]  ;;  %v1162_v52 = vmax.f32 %v11501_v62, 0.0  ;;  %v1163_v45 = vmax.f32 %v11505_v5, 0.0 }
 0x35c   :  { %1304 = vst [vmem:[#allocation2 + $0xf9] sm:$0xff] %v1131_v55  ;;  %1305 = vst [vmem:[#allocation2 + $0x109] sm:$0xff] %v1132_v2  ;;  %v1157_v18 = vmax.f32 %v16636_v15, 0.0  ;;  %v1158_v26 = vmax.f32 %v16637_v22, 0.0  ;;  %v1352_v29 = vld [vmem:[#allocation2 + $0x18] sm:$0xff]  ;;  %v1353_v17 = vld [vmem:[#allocation2 + $0x20] sm:$0xff] }
 0x35d   :  { %1306 = vst [vmem:[#allocation2 + $0x111] sm:$0xff] %v1133_v3  ;;  %1307 = vst [vmem:[#allocation2 + $0x121] sm:$0xff] %v1134_v14  ;;  %v1354_v36 = vld [vmem:[#allocation2 + $0x28] sm:$0x3]  ;;  %v16638_v40 = vld [vmem:[#allocation38_spill] sm:$0xff]  ;;  %v1164_v28 = vmax.f32 %v11509_v10, 0.0 }
 0x35e   :  { %1308 = vst [vmem:[#allocation2 + $0x129] sm:$0xff] %v1135_v34  ;;  %1309 = vst [vmem:[#allocation2 + $0x139] sm:$0xff] %v1136_v54  ;;  %v1159_v48 = vmax.f32 %v16638_v40, 0.0  ;;  %v16639_v24 = vld [vmem:[#allocation39_spill] sm:$0xff]  ;;  %v16640_v39 = vld [vmem:[#allocation17_spill] sm:$0xff]  ;;  %v1165_v58 = vmax.f32 %v11513_v16, 0.0  ;;  %v11616_v34 = vpack.c.bf16 %v1353_v17, %v1352_v29  ;;  %v11618_v54 = vpack.c.bf16 %v1354_v36, %v1354_v36 }
 0x35f   :  { %1310 = vst [vmem:[#allocation2 + $0x141] sm:$0xff] %v1137_v0  ;;  %1311 = vst [vmem:[#allocation2 + $0x151] sm:$0xff] %v1138_v60  ;;  %v1160_v42 = vmax.f32 %v16639_v24, 0.0  ;;  %v1161_v44 = vmax.f32 %v16640_v39, 0.0  ;;  %v1355_v57 = vld [vmem:[#allocation2 + $0x30] sm:$0xff]  ;;  %v1356_v35 = vld [vmem:[#allocation2 + $0x38] sm:$0xff] }
 0x360   :  { %1312 = vst [vmem:[#allocation2 + $0x159] sm:$0xff] %v1139_v61  ;;  %1313 = vst [vmem:[#allocation2 + $0x169] sm:$0xff] %v1140_v1  ;;  %v1166_v31 = vmax.f32 %v11517_v20, 0.0  ;;  %v1357_v6 = vld [vmem:[#allocation2 + $0x40] sm:$0x3]  ;;  %v1167_v62 = vmax.f32 %v11521_v27, 0.0 }
 0x361   :  { %1314 = vst [vmem:[#allocation2 + $0x171] sm:$0xff] %v1141_v9  ;;  %1315 = vst [vmem:[#allocation2 + $0x181] sm:$0xff] %v1142_v13  ;;  %v1168_v23 = vmax.f32 %v11525_v38, 0.0  ;;  %v16641_v8 = vld [vmem:[#allocation22_spill] sm:$0xff]  ;;  %v16642_v41 = vld [vmem:[#allocation23_spill] sm:$0xff]  ;;  %v1174_v46 = vmax.f32 %v11549_v12, 0.0  ;;  %v11620_v12 = vpack.c.bf16 %v1356_v35, %v1355_v57 }
 0x362   :  { %1316 = vst [vmem:[#allocation2 + $0x189] sm:$0xff] %v1143_v21  ;;  %1317 = vst [vmem:[#allocation2 + $0x1c9] sm:$0xff] %v1144_v25  ;;  %v1169_v30 = vmax.f32 %v16641_v8, 0.0  ;;  %v1170_v32 = vmax.f32 %v16642_v41, 0.0  ;;  %v16643_v10 = vld [vmem:[#allocation24_spill] sm:$0xff]  ;;  %v16644_v20 = vld [vmem:[#allocation25_spill] sm:$0xff]  ;;  %v11628_v21 = vpack.c.bf16 %v1357_v6, %v1357_v6 }
 0x363   :  { %1318 = vst [vmem:[#allocation2 + $0x1d1] sm:$0xff] %v1145_v33  ;;  %1319 = vst [vmem:[#allocation2 + $0x1e1] sm:$0xff] %v1146_v37  ;;  %v1171_v16 = vmax.f32 %v16643_v10, 0.0  ;;  %v1172_v19 = vmax.f32 %v16644_v20, 0.0  ;;  %v16645_v51 = vld [vmem:[#allocation26_spill] sm:$0xff]  ;;  %v1566_v22 = vshll.u32 %v11618_v54, 16 }
 0x364   :  { %1320 = vst [vmem:[#allocation2 + $0x1e9] sm:$0xff] %v1147_v43  ;;  %1321 = vst [vmem:[#allocation2 + $0x1f9] sm:$0xff] %v1148_v47  ;;  %v1385_v5 = vld [vmem:[#allocation2 + $0x120] sm:$0xff]  ;;  %v1173_v49 = vmax.f32 %v16645_v51, 0.0  ;;  %v1559_v43 = vshrl.u32 %v11616_v34, 16  ;;  %v1358_v47 = vld [vmem:[#allocation2 + $0x48] sm:$0xff] }
 0x365   :  { %1322 = vst [vmem:[#allocation2 + $0x201] sm:$0xff] %v1149_v50  ;;  %1323 = vst [vmem:[#allocation2 + $0x211] sm:$0xff] %v1150_v53  ;;  %v1386_v27 = vld [vmem:[#allocation2 + $0x128] sm:$0xff]  ;;  %v1388_v38 = vld [vmem:[#allocation2 + $0x138] sm:$0xff]  ;;  %v1578_v57 = vshll.u32 %v11628_v21, 16 }
 0x366   :  { %1324 = vst [vmem:[#allocation2 + $0x219] sm:$0xff] %v1151_v56  ;;  %1325 = vst [vmem:[#allocation2 + $0x229] sm:$0xff] %v1152_v59  ;;  %v1387_v55 = vld [vmem:[#allocation2 + $0x130] sm:$0x3]  ;;  %v11614_v2 = vpack.c.bf16 %v1386_v27, %v1385_v5  ;;  %v1389_v3 = vld [vmem:[#allocation2 + $0x140] sm:$0xff] }
 0x367   :  { %1326 = vst [vmem:[#allocation2 + $0x231] sm:$0xff] %v1153_v63  ;;  %1327 = vst [vmem:[#allocation2 + $0x241] sm:$0xff] %v1154_v4  ;;  %v1390_v14 = vld [vmem:[#allocation2 + $0x148] sm:$0x3]  ;;  %v11622_v0 = vpack.c.bf16 %v1387_v55, %v1387_v55  ;;  %v11624_v60 = vpack.c.bf16 %v1389_v3, %v1388_v38  ;;  %v1391_v1 = vld [vmem:[#allocation2 + $0x150] sm:$0xff]  ;;  %v1561_v63 = vshll.u32 %v11616_v34, 16 }
 0x368   :  { %1328 = vst [vmem:[#allocation2 + $0x249] sm:$0xff] %v1155_v7  ;;  %1329 = vst [vmem:[#allocation2 + $0x259] sm:$0xff] %v1156_v11  ;;  %v11626_v61 = vpack.c.bf16 %v1390_v14, %v1390_v14  ;;  %v1392_v9 = vld [vmem:[#allocation2 + $0x158] sm:$0xff]  ;;  %v1393_v13 = vld [vmem:[#allocation2 + $0x160] sm:$0x3]  ;;  %v2754_v25 = vrot.slane %v11614_v2, 1 }
 0x369   :  { %1330 = vst [vmem:[#allocation2 + $0x261] sm:$0xff] %v1157_v18  ;;  %1331 = vst [vmem:[#allocation2 + $0x271] sm:$0xff] %v1158_v26  ;;  %v11631_v33 = vpack.c.bf16 %v1392_v9, %v1391_v1  ;;  %v11633_v37 = vpack.c.bf16 %v1393_v13, %v1393_v13  ;;  %v1359_v50 = vld [vmem:[#allocation2 + $0x50] sm:$0xff]  ;;  %v2755_v53 = vrot.slane %v11622_v0, 1  ;;  %v2757_v56 = vrot.slane %v11624_v60, 1  ;;  %v1394_v4 = vld [vmem:[#allocation2 + $0x168] sm:$0xff] }
 0x36a   :  { %1332 = vst [vmem:[#allocation2 + $0x279] sm:$0xff] %v1159_v48  ;;  %1333 = vst [vmem:[#allocation2 + $0x289] sm:$0xff] %v1160_v42  ;;  %v2758_v59 = vrot.slane %v11626_v61, 1  ;;  %v1395_v7 = vld [vmem:[#allocation2 + $0x170] sm:$0xff]  ;;  %v9808_v11 = vld [vmem:[#allocation8 + $0xc8] sm:$0xff]   ;;  %v1571_v26 = vshrl.u32 %v11620_v12, 16 }
 0x36b   :  { %1334 = vst [vmem:[#allocation2 + $0x291] sm:$0xff] %v1161_v44  ;;  %1335 = vst [vmem:[#allocation2 + $0x2a1] sm:$0xff] %v1162_v52  ;;  %v2760_v15 = vrot.slane %v11631_v33, 1  ;;  %v2761_v18 = vrot.slane %v11633_v37, 1  ;;  %v1396_v29 = vld [vmem:[#allocation2 + $0x178] sm:$0x3]  ;;  %v11645_v17 = vsel %vm2717_vm1, %v2754_v25, %v2755_v53  ;;  %v11656_v35 = vpack.c.bf16 %v1395_v7, %v1394_v4 }
 0x36c   :  { %1336 = vst [vmem:[#allocation2 + $0x2a9] sm:$0xff] %v1163_v45  ;;  %1337 = vst [vmem:[#allocation2 + $0x2b9] sm:$0xff] %v1164_v28  ;;  %v11648_v36 = vsel %vm2717_vm1, %v2757_v56, %v2758_v59  ;;  %v1563_v40 = vrot.slane %v1561_v63, 1  ;;  %v1573_v48 = vshll.u32 %v11620_v12, 16  ;;  %v1360_v24 = vld [vmem:[#allocation2 + $0x58] sm:$0x3]  ;;  %8712 = vmatprep.mubr.bf16.mxu1 %v11645_v17 }
 0x36d   :  { %1338 = vst [vmem:[#allocation2 + $0x2c1] sm:$0xff] %v1165_v58  ;;  %1339 = vst [vmem:[#allocation2 + $0x2d1] sm:$0xff] %v1166_v31  ;;  %v1361_v42 = vld [vmem:[#allocation2 + $0x60] sm:$0xff]  ;;  %v1362_v39 = vld [vmem:[#allocation2 + $0x68] sm:$0xff]  ;;  %v11653_v44 = vsel %vm2717_vm1, %v2760_v15, %v2761_v18  ;;  %v1568_v52 = vrot.slane %v1566_v22, 1  ;;  %8713 = vmatmul.mubr.bf16.vlgmr.msra.gmra.mrb[0].mxu1 %v11648_v36  ;;  %v11659_v58 = vpack.c.bf16 %v1396_v29, %v1396_v29  ;;  %v2763_v20 = vrot.slane %v11656_v35, 1 }
 0x36e   :  { %1340 = vst [vmem:[#allocation2 + $0x2d9] sm:$0xff] %v1167_v62  ;;  %1341 = vst [vmem:[#allocation2 + $0x2e9] sm:$0xff] %v1168_v23  ;;  %v1564_v45 = vor.u32 %v1563_v40, %v1559_v43  ;;  %v1575_v28 = vrot.slane %v1573_v48, 1  ;;  %v11661_v31 = vpack.c.bf16 %v1359_v50, %v1358_v47  ;;  %v1363_v6 = vld [vmem:[#allocation2 + $0x70] sm:$0x3]  ;;  %8716 = vmatprep.mubr.bf16.mxu1 %v11653_v44  ;;  %v1409_v51 = vld [vmem:[#allocation2 + $0x1e0] sm:$0xff] }
 0x36f   :  { %1342 = vst [vmem:[#allocation2 + $0x2f1] sm:$0xff] %v1169_v30  ;;  %1343 = vst [vmem:[#allocation2 + $0x301] sm:$0xff] %v1170_v32  ;;  %v16652_v62 = vld [vmem:[#allocation42_spill] sm:$0xff]  ;;  %v11665_v23 = vpack.c.bf16 %v1360_v24, %v1360_v24  ;;  %v11667_v8 = vpack.c.bf16 %v1362_v39, %v1361_v42  ;;  %v11677_v55 = vpack.c.bf16 %v1363_v6, %v1363_v6  ;;  %v16657_v13 = vld [vmem:[#allocation20_spill] sm:$0xff] }
 0x370   :  { %16646 = vst [vmem:[#allocation27_spill] sm:$0xff] %v11618_v54  ;;  %1344 = vst [vmem:[#allocation2 + $0x309] sm:$0xff] %v1171_v16  ;;  %8753 = vmatpush3.bf16.msra.mxu1 %v16652_v62  ;;  %v1406_v30 = vld [vmem:[#allocation2 + $0x1c8] sm:$0xff]  ;;  %v1407_v41 = vld [vmem:[#allocation2 + $0x1d0] sm:$0xff]  ;;  %v11670_v5 = vsel %vm1545_vm0, %v1564_v45, %v1568_v52  ;;  %v1576_v10 = vor.u32 %v1575_v28, %v1571_v26  ;;  %v1580_v16 = vrot.slane %v1578_v57, 1  ;;  %v1585_v27 = vshll.u32 %v11661_v31, 16 }
 0x371   :  { %1345 = vst [vmem:[#allocation2 + $0x319] sm:$0xff] %v1172_v19  ;;  %1346 = vst [vmem:[#allocation2 + $0x321] sm:$0xff] %v1173_v49  ;;  %v9809_v32 = vld [vmem:[#allocation8 + $0xd0] sm:$0xff]   ;;  %8754 = vmatprep.subr.bf16.mxu1 %v9808_v11  ;;  %v1408_v19 = vld [vmem:[#allocation2 + $0x1d8] sm:$0x3]  ;;  %8529 = vmatmul.mubr.bf16.vlgmr.msra.gmra.mrb[128].mxu0 %v11670_v5  ;;  %v1590_v38 = vshll.u32 %v11665_v23, 16  ;;  %v11688_v53 = vpack.c.bf16 %v1407_v41, %v1406_v30 }
 0x372   :  { %1347 = vst [vmem:[#allocation2 + $0x331] sm:$0xff] %v1174_v46  ;;  %16647 = vst [vmem:[#allocation28_spill] sm:$0xff] %v11628_v21  ;;  %v9818_v49 = vld [vmem:[#allocation8 + $0x8] sm:$0xff]   ;;  %v2764_v46 = vrot.slane %v11659_v58, 1  ;;  %v1411_v14 = vld [vmem:[#allocation2 + $0x1f0] sm:$0x3]  ;;  %v11680_v1 = vsel %vm1545_vm0, %v1576_v10, %v1580_v16  ;;  %v11694_v18 = vpack.c.bf16 %v1408_v19, %v1408_v19 }
 0x373   :  { %16648 = vst [vmem:[#allocation29_spill] sm:$0xff] %v11631_v33  ;;  %16649 = vst [vmem:[#allocation30_spill] sm:$0xff] %v11645_v17  ;;  %v1410_v3 = vld [vmem:[#allocation2 + $0x1e8] sm:$0xff]  ;;  %v1597_v9 = vshll.u32 %v11667_v8, 16  ;;  %v16658_v25 = vrot.slane %v16657_v13, 1  ;;  %v1364_v56 = vld [vmem:[#allocation2 + $0x78] sm:$0xff]  ;;  %8532 = vmatprep.mubr.bf16.mxu0 %v11680_v1  ;;  %v11699_v48 = vpack.c.bf16 %v1411_v14, %v1411_v14 }
 0x374   :  { %16650 = vst [vmem:[#allocation21_spill] sm:$0xff] %v11648_v36  ;;  %16651 = vst [vmem:[#allocation40_spill] sm:$0xff] %v11653_v44  ;;  %v16659_v43 = vld [vmem:[#allocation41_spill] sm:$0xff]  ;;  %v16661_v63 = vld [vmem:[#allocation35_spill] sm:$0xff]  ;;  %8755 = vmatpush3.bf16.msra.mxu1 %v9808_v11  ;;  %v1583_v4 = vshrl.u32 %v11661_v31, 16  ;;  %v1587_v7 = vrot.slane %v1585_v27, 1  ;;  %v11697_v40 = vpack.c.bf16 %v1410_v3, %v1409_v51  ;;  %v11702_v11 = vsel %vm2717_vm1, %v2763_v20, %v2764_v46 }
 0x375   :  { %16653 = vst [vmem:[#allocation31_spill] sm:$0xff] %v11665_v23  ;;  %16654 = vst [vmem:[#allocation32_spill] sm:$0xff] %v11670_v5  ;;  %v16660_v47 = vrot.slane %v16659_v43, 1  ;;  %v1365_v59 = vld [vmem:[#allocation2 + $0x80] sm:$0xff]  ;;  %8593 = vmatpush3.bf16.msra.mxu0 %v16661_v63  ;;  %v1602_v15 = vshll.u32 %v11677_v55, 16  ;;  %v1595_v26 = vshrl.u32 %v11667_v8, 16  ;;  %8756 = vmatprep.subr.bf16.mxu1 %v9809_v32 }
 0x376   :  { %16655 = vst [vmem:[#allocation33_spill] sm:$0xff] %v11677_v55  ;;  %16656 = vst [vmem:[#allocation34_spill] sm:$0xff] %v11680_v1  ;;  %v1366_v22 = vld [vmem:[#allocation2 + $0x88] sm:$0x3]  ;;  %v1599_v29 = vrot.slane %v1597_v9, 1  ;;  %v9810_v24 = vld [vmem:[#allocation8 + $0xd8] sm:$0xff]   ;;  %8594 = vmatprep.subr.bf16.mxu0 %v9818_v49  ;;  %v1588_v39 = vor.u32 %v1587_v7, %v1583_v4  ;;  %v11704_v57 = vpack.c.bf16 %v1365_v59, %v1364_v56  ;;  %8717 = vmatmul.mubr.bf16.gmra.mrb[4].mxu1 %v11702_v11 }
 0x377   :  { %v2768_v50 = vsel %vm2717_vm1, %v16660_v47, %v16658_v25  ;;  %16662 = vst [vmem:[#allocation36_spill] sm:$0xff] %v11697_v40  ;;  %v9819_v42 = vld [vmem:[#allocation8 + $0x10] sm:$0xff]   ;;  %16663 = vst [vmem:[#allocation37_spill] sm:$0xff] %v11702_v11  ;;  %v1592_v52 = vrot.slane %v1590_v38, 1  ;;  %v1368_v28 = vld [vmem:[#allocation2 + $0x98] sm:$0xff]  ;;  %v1604_v30 = vrot.slane %v1602_v15, 1  ;;  %v11708_v10 = vpack.c.bf16 %v1366_v22, %v1366_v22 }
 0x378   :  { %v1367_v45 = vld [vmem:[#allocation2 + $0x90] sm:$0xff]  ;;  %v1369_v6 = vld [vmem:[#allocation2 + $0xa0] sm:$0x3]  ;;  %v1600_v62 = vor.u32 %v1599_v29, %v1595_v26  ;;  %v2769_v41 = vrot.slane %v11688_v53, 1  ;;  %v1412_v16 = vld [vmem:[#allocation2 + $0x1f8] sm:$0xff]  ;;  %8720 = vmatprep.mubr.bf16.mxu1 %v2768_v50  ;;  %v2770_v20 = vrot.slane %v11694_v18, 1  ;;  %8757 = vmatpush3.bf16.msra.mxu1 %v9809_v32 }
 0x379   :  { %16664 = vst [vmem:[#allocation38_spill] sm:$0xff] %v11708_v10  ;;  %v1413_v19 = vld [vmem:[#allocation2 + $0x200] sm:$0xff]  ;;  %v1414_v51 = vld [vmem:[#allocation2 + $0x208] sm:$0x3]  ;;  %8595 = vmatpush3.bf16.msra.mxu0 %v9818_v49  ;;  %v2772_v46 = vrot.slane %v11697_v40, 1  ;;  %v2773_v27 = vrot.slane %v11699_v48, 1  ;;  %v11715_v14 = vsel %vm1545_vm0, %v1588_v39, %v1592_v52  ;;  %v11721_v49 = vpack.c.bf16 %v1368_v28, %v1367_v45  ;;  %8758 = vmatprep.subr.bf16.mxu1 %v9810_v24 }
 0x37a   :  { %v1609_v38 = vshll.u32 %v11704_v57, 16  ;;  %v9820_v3 = vld [vmem:[#allocation8 + $0x18] sm:$0xff]   ;;  %16665 = vst [vmem:[#allocation39_spill] sm:$0xff] %v11715_v14  ;;  %v11718_v9 = vsel %vm1545_vm0, %v1600_v62, %v1604_v30  ;;  %v1614_v25 = vshll.u32 %v11708_v10, 16  ;;  %v9811_v47 = vld [vmem:[#allocation8 + $0xe0] sm:$0xff]   ;;  %8596 = vmatprep.subr.bf16.mxu0 %v9819_v42  ;;  %8533 = vmatmul.mubr.bf16.gmra.mrb[132].mxu0 %v11715_v14  ;;  %v11724_v56 = vpack.c.bf16 %v1369_v6, %v1369_v6  ;;  %v1370_v63 = vld [vmem:[#allocation2 + $0xa8] sm:$0xff] }
 0x37b   :  { %16666 = vst [vmem:[#allocation17_spill] sm:$0xff] %v11718_v9  ;;  %v11726_v32 = vpack.c.bf16 %v1413_v19, %v1412_v16  ;;  %v11728_v59 = vpack.c.bf16 %v1414_v51, %v1414_v51  ;;  %v1371_v4 = vld [vmem:[#allocation2 + $0xb0] sm:$0xff]  ;;  %8536 = vmatprep.mubr.bf16.mxu0 %v11718_v9  ;;  %v1607_v7 = vshrl.u32 %v11704_v57, 16  ;;  %v1621_v15 = vshll.u32 %v11721_v49, 16  ;;  %v1416_v26 = vld [vmem:[#allocation2 + $0x218] sm:$0xff]  ;;  %v9812_v6 = vld [vmem:[#allocation8 + $0xe8] sm:$0xff]  }
 0x37c   :  { %v1611_v50 = vrot.slane %v1609_v38, 1  ;;  %16667 = vst [vmem:[#allocation22_spill] sm:$0xff] %v11724_v56  ;;  %v1415_v22 = vld [vmem:[#allocation2 + $0x210] sm:$0xff]  ;;  %v11734_v29 = vsel %vm2717_vm1, %v2769_v41, %v2770_v20  ;;  %v11737_v39 = vsel %vm2717_vm1, %v2772_v46, %v2773_v27  ;;  %v1626_v52 = vshll.u32 %v11724_v56, 16  ;;  %v1417_v45 = vld [vmem:[#allocation2 + $0x220] sm:$0x3]  ;;  %8759 = vmatpush3.bf16.msra.mxu1 %v9810_v24 }
 0x37d   :  { %8597 = vmatpush3.bf16.msra.mxu0 %v9819_v42  ;;  %16668 = vst [vmem:[#allocation23_spill] sm:$0xff] %v11734_v29  ;;  %16669 = vst [vmem:[#allocation24_spill] sm:$0xff] %v11737_v39  ;;  %v1372_v28 = vld [vmem:[#allocation2 + $0xb8] sm:$0x3]  ;;  %v1619_v30 = vshrl.u32 %v11721_v49, 16  ;;  %v1623_v16 = vrot.slane %v1621_v15, 1  ;;  %v11741_v19 = vpack.c.bf16 %v1371_v4, %v1370_v63  ;;  %8760 = vmatprep.subr.bf16.mxu1 %v9811_v47 }
 0x37e   :  { %8598 = vmatprep.subr.bf16.mxu0 %v9820_v3  ;;  %v1612_v62 = vor.u32 %v1611_v50, %v1607_v7  ;;  %v1373_v42 = vld [vmem:[#allocation2 + $0xc0] sm:$0xff]  ;;  %v1374_v51 = vld [vmem:[#allocation2 + $0xc8] sm:$0xff]  ;;  %v1375_v41 = vld [vmem:[#allocation2 + $0xd0] sm:$0x3]  ;;  %v1616_v20 = vrot.slane %v1614_v25, 1  ;;  %v2775_v46 = vrot.slane %v11726_v32, 1  ;;  %v11745_v38 = vpack.c.bf16 %v1416_v26, %v1415_v22  ;;  %8721 = vmatmul.mubr.bf16.gmra.mrb[8].mxu1 %v11734_v29 }
 0x37f   :  { %v2776_v27 = vrot.slane %v11728_v59, 1  ;;  %v1624_v24 = vor.u32 %v1623_v16, %v1619_v30  ;;  %v11748_v50 = vpack.c.bf16 %v1417_v45, %v1417_v45  ;;  %v11750_v7 = vpack.c.bf16 %v1372_v28, %v1372_v28  ;;  %8724 = vmatprep.mubr.bf16.mxu1 %v11737_v39  ;;  %v1418_v11 = vld [vmem:[#allocation2 + $0x228] sm:$0xff]  ;;  %v1419_v22 = vld [vmem:[#allocation2 + $0x230] sm:$0xff]  ;;  %v1420_v28 = vld [vmem:[#allocation2 + $0x238] sm:$0x3] }
 0x380   :  { %v1633_v63 = vshll.u32 %v11741_v19, 16  ;;  %v1628_v4 = vrot.slane %v1626_v52, 1  ;;  %v11754_v25 = vpack.c.bf16 %v1374_v51, %v1373_v42  ;;  %v11756_v15 = vpack.c.bf16 %v1375_v41, %v1375_v41  ;;  %8761 = vmatpush3.bf16.msra.mxu1 %v9811_v47  ;;  %v9813_v26 = vld [vmem:[#allocation8 + $0xf0] sm:$0xff]   ;;  %v1376_v16 = vld [vmem:[#allocation2 + $0xd8] sm:$0xff]  ;;  %v1377_v29 = vld [vmem:[#allocation2 + $0xe0] sm:$0xff] }
 0x381   :  { %16670 = vst [vmem:[#allocation25_spill] sm:$0xff] %v11750_v7  ;;  %8599 = vmatpush3.bf16.msra.mxu0 %v9820_v3  ;;  %v11759_v30 = vsel %vm1545_vm0, %v1612_v62, %v1616_v20  ;;  %8762 = vmatprep.subr.bf16.mxu1 %v9812_v6  ;;  %v2778_v52 = vrot.slane %v11745_v38, 1  ;;  %v1421_v51 = vld [vmem:[#allocation2 + $0x240] sm:$0xff]  ;;  %v1422_v47 = vld [vmem:[#allocation2 + $0x248] sm:$0xff]  ;;  %v1423_v41 = vld [vmem:[#allocation2 + $0x250] sm:$0x3]  ;;  %v11769_v62 = vsel %vm2717_vm1, %v2775_v46, %v2776_v27 }
 0x382   :  { %16671 = vst [vmem:[#allocation26_spill] sm:$0xff] %v11756_v15  ;;  %16672 = vst [vmem:[#allocation42_spill] sm:$0xff] %v11759_v30  ;;  %v1635_v45 = vrot.slane %v1633_v63, 1  ;;  %8537 = vmatmul.mubr.bf16.gmra.mrb[136].mxu0 %v11759_v30  ;;  %v11763_v3 = vsel %vm1545_vm0, %v1624_v24, %v1628_v4  ;;  %v1645_v42 = vshll.u32 %v11754_v25, 16  ;;  %v2779_v20 = vrot.slane %v11748_v50, 1  ;;  %v9822_v4 = vld [vmem:[#allocation8 + $0x20] sm:$0xff]  }
 0x383   :  { %16673 = vst [vmem:[#allocation20_spill] sm:$0xff] %v11763_v3  ;;  %8540 = vmatprep.mubr.bf16.mxu0 %v11763_v3  ;;  %16674 = vst [vmem:[#allocation41_spill] sm:$0xff] %v11769_v62  ;;  %v1631_v63 = vshrl.u32 %v11741_v19, 16  ;;  %v1638_v39 = vshll.u32 %v11750_v7, 16  ;;  %v1378_v24 = vld [vmem:[#allocation2 + $0xe8] sm:$0x3]  ;;  %v11776_v56 = vpack.c.bf16 %v1377_v29, %v1376_v16  ;;  %v11778_v23 = vpack.c.bf16 %v1419_v22, %v1418_v11 }
 0x384   :  { %v1643_v44 = vshrl.u32 %v11754_v25, 16  ;;  %v1647_v36 = vrot.slane %v1645_v42, 1  ;;  %v1650_v17 = vshll.u32 %v11756_v15, 16  ;;  %v1379_v10 = vld [vmem:[#allocation2 + $0xf0] sm:$0xff]  ;;  %v1380_v55 = vld [vmem:[#allocation2 + $0xf8] sm:$0xff]  ;;  %8763 = vmatpush3.bf16.msra.mxu1 %v9812_v6  ;;  %v9823_v46 = vld [vmem:[#allocation8 + $0x28] sm:$0xff]   ;;  %v11780_v21 = vpack.c.bf16 %v1420_v28, %v1420_v28  ;;  %8600 = vmatprep.subr.bf16.mxu0 %v9822_v4 }
 0x385   :  { %v1636_v27 = vor.u32 %v1635_v45, %v1631_v63  ;;  %v1381_v54 = vld [vmem:[#allocation2 + $0x100] sm:$0x3]  ;;  %8764 = vmatprep.subr.bf16.mxu1 %v9813_v26  ;;  %v9814_v7 = vld [vmem:[#allocation8 + $0xf8] sm:$0xff]   ;;  %v11782_v30 = vpack.c.bf16 %v1422_v47, %v1421_v51  ;;  %v11784_v42 = vpack.c.bf16 %v1423_v41, %v1423_v41  ;;  %v1657_v29 = vshll.u32 %v11776_v56, 16  ;;  %8601 = vmatpush3.bf16.msra.mxu0 %v9822_v4  ;;  %v1382_v28 = vld [vmem:[#allocation2 + $0x108] sm:$0xff] }
 0x386   :  { %v1648_v3 = vor.u32 %v1647_v36, %v1643_v44  ;;  %8725 = vmatmul.mubr.bf16.gmra.mrb[12].mxu1 %v11769_v62  ;;  %v11789_v6 = vsel %vm2717_vm1, %v2778_v52, %v2779_v20  ;;  %v1640_v11 = vrot.slane %v1638_v39, 1  ;;  %v11791_v22 = vpack.c.bf16 %v1378_v24, %v1378_v24  ;;  %8602 = vmatprep.subr.bf16.mxu0 %v9823_v46  ;;  %v1383_v16 = vld [vmem:[#allocation2 + $0x110] sm:$0xff]  ;;  %v1425_v63 = vld [vmem:[#allocation2 + $0x260] sm:$0xff]  ;;  %v1426_v24 = vld [vmem:[#allocation2 + $0x268] sm:$0x3] }
 0x387   :  { %16675 = vst [vmem:[#allocation35_spill] sm:$0xff] %v11789_v6  ;;  %v11793_v45 = vpack.c.bf16 %v1380_v55, %v1379_v10  ;;  %8728 = vmatprep.mubr.bf16.mxu1 %v11789_v6  ;;  %v1652_v36 = vrot.slane %v1650_v17, 1  ;;  %v11796_v44 = vpack.c.bf16 %v1381_v54, %v1381_v54  ;;  %v9824_v51 = vld [vmem:[#allocation8 + $0x30] sm:$0xff]   ;;  %v2781_v52 = vrot.slane %v11778_v23, 1  ;;  %v1424_v55 = vld [vmem:[#allocation2 + $0x258] sm:$0xff]  ;;  %v11803_v10 = vld [vmem:[#allocation8 + $0x100] sm:$0xff]  }
 0x388   :  { %16676 = vst [vmem:[#allocation45_spill] sm:$0xff] %v11791_v22  ;;  %8765 = vmatpush3.bf16.msra.mxu1 %v9813_v26  ;;  %v11799_v47 = vsel %vm1545_vm0, %v1636_v27, %v1640_v11  ;;  %v1659_v39 = vrot.slane %v1657_v29, 1  ;;  %v2782_v17 = vrot.slane %v11780_v21, 1  ;;  %v2784_v26 = vrot.slane %v11782_v30, 1  ;;  %v1427_v11 = vld [vmem:[#allocation2 + $0x270] sm:$0xff]  ;;  %v1428_v15 = vld [vmem:[#allocation2 + $0x278] sm:$0xff] }
 0x389   :  { %16677 = vst [vmem:[#allocation46_spill] sm:$0xff] %v11796_v44  ;;  %16678 = vst [vmem:[#allocation47_spill] sm:$0xff] %v11799_v47  ;;  %v1669_v41 = vshll.u32 %v11793_v45, 16  ;;  %8766 = vmatprep.subr.bf16.mxu1 %v9814_v7  ;;  %v11807_v54 = vsel %vm1545_vm0, %v1648_v3, %v1652_v36  ;;  %v2785_v20 = vrot.slane %v11784_v42, 1  ;;  %v1655_v4 = vshrl.u32 %v11776_v56, 16  ;;  %8603 = vmatpush3.bf16.msra.mxu0 %v9823_v46  ;;  %v9825_v9 = vld [vmem:[#allocation8 + $0x38] sm:$0xff]  }
 0x38a   :  { %8541 = vmatmul.mubr.bf16.gmra.mrb[140].mxu0 %v11799_v47  ;;  %16679 = vst [vmem:[#allocation48_spill] sm:$0xff] %v11807_v54  ;;  %v1662_v27 = vshll.u32 %v11791_v22, 16  ;;  %v1429_v6 = vld [vmem:[#allocation2 + $0x280] sm:$0x3]  ;;  %v11815_v62 = vpack.c.bf16 %v1383_v16, %v1382_v28  ;;  %v1667_v3 = vshrl.u32 %v11793_v45, 16  ;;  %v1674_v36 = vshll.u32 %v11796_v44, 16  ;;  %8604 = vmatprep.subr.bf16.mxu0 %v9824_v51 }
 0x38b   :  { %8544 = vmatprep.mubr.bf16.mxu0 %v11807_v54  ;;  %v1671_v29 = vrot.slane %v1669_v41, 1  ;;  %v1384_v47 = vld [vmem:[#allocation2 + $0x118] sm:$0x3]  ;;  %v1660_v54 = vor.u32 %v1659_v39, %v1655_v4  ;;  %v11819_v14 = vpack.c.bf16 %v1425_v63, %v1424_v55  ;;  %v11821_v1 = vpack.c.bf16 %v1426_v24, %v1426_v24 }
 0x38c   :  { %8767 = vmatpush3.bf16.msra.mxu1 %v9814_v7  ;;  %v1681_v41 = vshll.u32 %v11815_v62, 16  ;;  %v11826_v46 = vsel %vm2717_vm1, %v2781_v52, %v2782_v17  ;;  %v11829_v28 = vsel %vm2717_vm1, %v2784_v26, %v2785_v20  ;;  %v1693_v7 = vshll.u32 %v11614_v2, 16 }
 0x38d   :  { %8832 = vmatprep.subr.bf16.mxu1 %v11803_v10  ;;  %16680 = vst [vmem:[#allocation49_spill] sm:$0xff] %v11826_v46  ;;  %16681 = vst [vmem:[#allocation50_spill] sm:$0xff] %v11829_v28  ;;  %v1672_v16 = vor.u32 %v1671_v29, %v1667_v3  ;;  %v1664_v39 = vrot.slane %v1662_v27, 1  ;;  %v11833_v55 = vpack.c.bf16 %v1428_v15, %v1427_v11  ;;  %8605 = vmatpush3.bf16.msra.mxu0 %v9824_v51  ;;  %v1431_v51 = vld [vmem:[#allocation2 + $0x290] sm:$0xff]  ;;  %v1432_v3 = vld [vmem:[#allocation2 + $0x298] sm:$0x3] }
 0x38e   :  { %8729 = vmatmul.mubr.bf16.gmra.mrb[16].mxu1 %v11826_v46  ;;  %v11835_v63 = vpack.c.bf16 %v1429_v6, %v1429_v6  ;;  %v11837_v24 = vpack.c.bf16 %v1384_v47, %v1384_v47  ;;  %v1676_v52 = vrot.slane %v1674_v36, 1  ;;  %8606 = vmatprep.subr.bf16.mxu0 %v9825_v9  ;;  %v2787_v26 = vrot.slane %v11819_v14, 1  ;;  %v1430_v47 = vld [vmem:[#allocation2 + $0x288] sm:$0xff] }
 0x38f   :  { %8732 = vmatprep.mubr.bf16.mxu1 %v11829_v28  ;;  %v11841_v17 = vsel %vm1545_vm0, %v1660_v54, %v1664_v39  ;;  %v2788_v20 = vrot.slane %v11821_v1, 1  ;;  %v1683_v4 = vrot.slane %v1681_v41, 1  ;;  %v1695_v6 = vrot.slane %v1693_v7, 1  ;;  %v1434_v7 = vld [vmem:[#allocation2 + $0x2a8] sm:$0xff]  ;;  %v1435_v39 = vld [vmem:[#allocation2 + $0x2b0] sm:$0x3] }
 0x390   :  { %16682 = vst [vmem:[#allocation51_spill] sm:$0xff] %v11837_v24  ;;  %16683 = vst [vmem:[#allocation52_spill] sm:$0xff] %v11841_v17  ;;  %v11847_v15 = vsel %vm1545_vm0, %v1672_v16, %v1676_v52  ;;  %v2790_v27 = vrot.slane %v11833_v55, 1  ;;  %v2791_v54 = vrot.slane %v11835_v63, 1  ;;  %v1679_v29 = vshrl.u32 %v11815_v62, 16  ;;  %v1433_v16 = vld [vmem:[#allocation2 + $0x2a0] sm:$0xff] }
 0x391   :  { %16684 = vst [vmem:[#allocation53_spill] sm:$0xff] %v11847_v15  ;;  %v1686_v11 = vshll.u32 %v11837_v24, 16  ;;  %8607 = vmatpush3.bf16.msra.mxu0 %v9825_v9  ;;  %v1691_v36 = vshrl.u32 %v11614_v2, 16  ;;  %v1698_v41 = vshll.u32 %v11622_v0, 16  ;;  %v11856_v52 = vld [vmem:[#allocation8 + $0x80] sm:$0xff]   ;;  %v11860_v28 = vsel %vm2717_vm1, %v2787_v26, %v2788_v20 }
 0x392   :  { %8545 = vmatmul.mubr.bf16.gmra.mrb[144].mxu0 %v11841_v17  ;;  %16685 = vst [vmem:[#allocation54_spill] sm:$0xff] %v11856_v52  ;;  %8672 = vmatprep.subr.bf16.mxu0 %v11856_v52  ;;  %16686 = vst [vmem:[#allocation55_spill] sm:$0xff] %v11860_v28  ;;  %v1684_v46 = vor.u32 %v1683_v4, %v1679_v29  ;;  %v1705_v44 = vshll.u32 %v11624_v60, 16  ;;  %v11863_v22 = vpack.c.bf16 %v1431_v51, %v1430_v47  ;;  %v1436_v29 = vld [vmem:[#allocation2 + $0x2b8] sm:$0xff] }
 0x393   :  { %8548 = vmatprep.mubr.bf16.mxu0 %v11847_v15  ;;  %v1696_v24 = vor.u32 %v1695_v6, %v1691_v36  ;;  %v11865_v9 = vpack.c.bf16 %v1432_v3, %v1432_v3  ;;  %v1717_v0 = vshll.u32 %v11631_v33, 16  ;;  %v11870_v15 = vsel %vm2717_vm1, %v2790_v27, %v2791_v54  ;;  %v1438_v36 = vld [vmem:[#allocation2 + $0x2c8] sm:$0x3] }
 0x394   :  { %16687 = vst [vmem:[#allocation56_spill] sm:$0xff] %v11870_v15  ;;  %v1688_v17 = vrot.slane %v1686_v11, 1  ;;  %v11872_v5 = vpack.c.bf16 %v1434_v7, %v1433_v16  ;;  %v11874_v26 = vpack.c.bf16 %v1435_v39, %v1435_v39  ;;  %v1700_v20 = vrot.slane %v1698_v41, 1  ;;  %v1437_v11 = vld [vmem:[#allocation2 + $0x2c0] sm:$0xff]  ;;  %v1439_v16 = vld [vmem:[#allocation2 + $0x2d0] sm:$0xff]  ;;  %v1440_v7 = vld [vmem:[#allocation2 + $0x2d8] sm:$0xff] }
 0x395   :  { %v1707_v6 = vrot.slane %v1705_v44, 1  ;;  %v2793_v51 = vrot.slane %v11863_v22, 1  ;;  %v2794_v27 = vrot.slane %v11865_v9, 1  ;;  %v1719_v54 = vrot.slane %v1717_v0, 1  ;;  %v1441_v39 = vld [vmem:[#allocation2 + $0x2e0] sm:$0x3] }
 0x396   :  { %8733 = vmatmul.mubr.bf16.gmra.mrb[20].mxu1 %v11860_v28  ;;  %v11878_v4 = vsel %vm1545_vm0, %v1684_v46, %v1688_v17  ;;  %v11882_v47 = vsel %vm1545_vm0, %v1696_v24, %v1700_v20  ;;  %v2796_v3 = vrot.slane %v11872_v5, 1  ;;  %v2797_v46 = vrot.slane %v11874_v26, 1 }
 0x397   :  { %8736 = vmatprep.mubr.bf16.mxu1 %v11870_v15  ;;  %16688 = vst [vmem:[#allocation57_spill] sm:$0xff] %v11878_v4  ;;  %16689 = vst [vmem:[#allocation58_spill] sm:$0xff] %v11882_v47  ;;  %v1703_v44 = vshrl.u32 %v11624_v60, 16  ;;  %v1710_v17 = vshll.u32 %v11626_v61, 16  ;;  %v1715_v24 = vshrl.u32 %v11631_v33, 16  ;;  %v1722_v41 = vshll.u32 %v11633_v37, 16 }
 0x398   :  { %v1729_v20 = vshll.u32 %v11656_v35, 16  ;;  %v11895_v15 = vsel %vm2717_vm1, %v2793_v51, %v2794_v27  ;;  %v11903_v61 = vsel %vm2717_vm1, %v2796_v3, %v2797_v46  ;;  %v11905_v52 = vpack.c.bf16 %v1440_v7, %v1439_v16  ;;  %v1442_v46 = vld [vmem:[#allocation2 + $0x2e8] sm:$0xff]  ;;  %v1445_v16 = vld [vmem:[#allocation2 + $0x300] sm:$0xff]  ;;  %v1447_v7 = vld [vmem:[#allocation2 + $0x310] sm:$0x3] }
 0x399   :  { %v1708_v0 = vor.u32 %v1707_v6, %v1703_v44  ;;  %16690 = vst [vmem:[#allocation59_spill] sm:$0xff] %v11895_v15  ;;  %v1720_v28 = vor.u32 %v1719_v54, %v1715_v24  ;;  %16691 = vst [vmem:[#allocation60_spill] sm:$0xff] %v11903_v61  ;;  %v1712_v37 = vrot.slane %v1710_v17, 1  ;;  %v11907_v33 = vpack.c.bf16 %v1441_v39, %v1441_v39  ;;  %v1443_v44 = vld [vmem:[#allocation2 + $0x2f0] sm:$0xff]  ;;  %v1444_v17 = vld [vmem:[#allocation2 + $0x2f8] sm:$0x3] }
 0x39a   :  { %8549 = vmatmul.mubr.bf16.gmra.mrb[148].mxu0 %v11878_v4  ;;  %v11899_v4 = vpack.c.bf16 %v1438_v36, %v1438_v36  ;;  %v1724_v6 = vrot.slane %v1722_v41, 1  ;;  %v1746_v51 = vshll.u32 %v16657_v13, 16  ;;  %v1731_v54 = vrot.slane %v1729_v20, 1 }
 0x39b   :  { %8552 = vmatprep.mubr.bf16.mxu0 %v11882_v47  ;;  %v11897_v47 = vpack.c.bf16 %v1437_v11, %v1436_v29  ;;  %v11912_v27 = vsel %vm1545_vm0, %v1708_v0, %v1712_v37  ;;  %v2802_v13 = vrot.slane %v11905_v52, 1  ;;  %v2803_v36 = vrot.slane %v11907_v33, 1 }
 0x39c   :  { %16692 = vst [vmem:[#allocation61_spill] sm:$0xff] %v11912_v27  ;;  %v11916_v29 = vsel %vm1545_vm0, %v1720_v28, %v1724_v6  ;;  %v2800_v3 = vrot.slane %v11899_v4, 1  ;;  %v1727_v24 = vshrl.u32 %v11656_v35, 16  ;;  %v1734_v41 = vshll.u32 %v11659_v58, 16  ;;  %v1446_v28 = vld [vmem:[#allocation2 + $0x308] sm:$0xff] }
 0x39d   :  { %16693 = vst [vmem:[#allocation62_spill] sm:$0xff] %v11916_v29  ;;  %v2799_v11 = vrot.slane %v11897_v47, 1  ;;  %v1748_v39 = vrot.slane %v1746_v51, 1  ;;  %v11925_v20 = vpack.c.bf16 %v1443_v44, %v1442_v46  ;;  %v11927_v37 = vpack.c.bf16 %v1444_v17, %v1444_v17 }
 0x39e   :  { %8737 = vmatmul.mubr.bf16.gmra.mrb[24].mxu1 %v11895_v15  ;;  %v1732_v0 = vor.u32 %v1731_v54, %v1727_v24  ;;  %v1753_v6 = vshll.u32 %v11688_v53, 16  ;;  %v1765_v15 = vshll.u32 %v11697_v40, 16  ;;  %v11936_v58 = vsel %vm2717_vm1, %v2802_v13, %v2803_v36  ;;  %v16697_v54 = vld [vmem:[#allocation44_spill] sm:$0xff] }
 0x39f   :  { %8740 = vmatprep.mubr.bf16.mxu1 %v11903_v61  ;;  %v11931_v61 = vsel %vm2717_vm1, %v2799_v11, %v2800_v3  ;;  %16695 = vst [vmem:[#allocation64_spill] sm:$0xff] %v11936_v58  ;;  %v11940_v51 = vpack.c.bf16 %v1447_v7, %v1447_v7  ;;  %v1749_v46 = vsel %vm1545_vm0, %v16697_v54, %v1748_v39  ;;  %v2805_v3 = vrot.slane %v11925_v20, 1  ;;  %v1448_v36 = vld [vmem:[#allocation2 + $0x318] sm:$0xff]  ;;  %v1449_v24 = vld [vmem:[#allocation2 + $0x320] sm:$0xff]  ;;  %v1450_v7 = vld [vmem:[#allocation2 + $0x328] sm:$0x3] }
 0x3a0   :  { %16694 = vst [vmem:[#allocation63_spill] sm:$0xff] %v11931_v61  ;;  %v2806_v44 = vrot.slane %v11927_v37, 1  ;;  %v1755_v17 = vrot.slane %v1753_v6, 1  ;;  %v1767_v13 = vrot.slane %v1765_v15, 1  ;;  %v1763_v39 = vshrl.u32 %v11697_v40, 16 }
 0x3a1   :  { %v1777_v54 = vshll.u32 %v11726_v32, 16 }
 0x3a2   :  { %8553 = vmatmul.mubr.bf16.gmra.mrb[152].mxu0 %v11912_v27  ;;  %v11938_v27 = vpack.c.bf16 %v1446_v28, %v1445_v16  ;;  %v2809_v16 = vrot.slane %v11940_v51, 1  ;;  %v1751_v28 = vshrl.u32 %v11688_v53, 16  ;;  %v11958_v6 = vsel %vm2717_vm1, %v2805_v3, %v2806_v44 }
 0x3a3   :  { %8556 = vmatprep.mubr.bf16.mxu0 %v11916_v29  ;;  %v1736_v29 = vrot.slane %v1734_v41, 1  ;;  %v1779_v44 = vrot.slane %v1777_v54, 1 }
 0x3a4   :  { %16696 = vst [vmem:[#allocation65_spill] sm:$0xff] %v11938_v27  ;;  %v2808_v41 = vrot.slane %v11938_v27, 1  ;;  %v1756_v15 = vor.u32 %v1755_v17, %v1751_v28  ;;  %v1794_v28 = vshll.u32 %v11748_v50, 16 }
 0x3a5   :  { %v11946_v11 = vsel %vm1545_vm0, %v1732_v0, %v1736_v29  ;;  %v1758_v29 = vshll.u32 %v11694_v18, 16  ;;  %v1770_v0 = vshll.u32 %v11699_v48, 16 }
 0x3a6   :  { %8741 = vmatmul.mubr.bf16.gmra.mrb[28].mxu1 %v11931_v61  ;;  %16698 = vst [vmem:[#allocation44_spill] sm:$0xff] %v11946_v11  ;;  %v11961_v61 = vpack.c.bf16 %v1449_v24, %v1448_v36  ;;  %v11968_v18 = vsel %vm2717_vm1, %v2808_v41, %v2809_v16  ;;  %v1775_v41 = vshrl.u32 %v11726_v32, 16  ;;  %v1782_v16 = vshll.u32 %v11728_v59, 16 }
 0x3a7   :  { %8744 = vmatprep.mubr.bf16.mxu1 %v11936_v58  ;;  %v1768_v58 = vor.u32 %v1767_v13, %v1763_v39  ;;  %16700 = vst [vmem:[#allocation67_spill] sm:$0xff] %v11968_v18  ;;  %v1760_v40 = vrot.slane %v1758_v29, 1  ;;  %v1772_v48 = vrot.slane %v1770_v0, 1  ;;  %v1813_v0 = vshll.u32 %v11782_v30, 16 }
 0x3a8   :  { %16699 = vst [vmem:[#allocation66_spill] sm:$0xff] %v11961_v61  ;;  %v2811_v13 = vrot.slane %v11961_v61, 1  ;;  %v1780_v29 = vor.u32 %v1779_v44, %v1775_v41  ;;  %v1796_v54 = vrot.slane %v1794_v28, 1  ;;  %v1799_v44 = vshrl.u32 %v11778_v23, 16 }
 0x3a9   :  { %v11972_v3 = vsel %vm1545_vm0, %v1756_v15, %v1760_v40  ;;  %v11976_v17 = vsel %vm1545_vm0, %v1768_v58, %v1772_v48  ;;  %v1787_v40 = vshrl.u32 %v11745_v38, 16  ;;  %v1784_v15 = vrot.slane %v1782_v16, 1 }
 0x3aa   :  { %8557 = vmatmul.mubr.bf16.gmra.mrb[156].mxu0 %v11946_v11  ;;  %v11963_v11 = vpack.c.bf16 %v1450_v7, %v1450_v7  ;;  %v1801_v7 = vshll.u32 %v11778_v23, 16  ;;  %v1815_v48 = vrot.slane %v1813_v0, 1  ;;  %v1825_v16 = vshll.u32 %v11819_v14, 16 }
 0x3ab   :  { %8560 = vmatprep.mubr.bf16.mxu0 %v1749_v46  ;;  %v1789_v46 = vshll.u32 %v11745_v38, 16  ;;  %v11993_v59 = vsel %vm1545_vm0, %v1780_v29, %v1784_v15  ;;  %v1837_v29 = vshll.u32 %v11833_v55, 16 }
 0x3ac   :  { %v2812_v36 = vrot.slane %v11963_v11, 1  ;;  %16702 = vst [vmem:[#allocation69_spill] sm:$0xff] %v11993_v59  ;;  %v1827_v0 = vrot.slane %v1825_v16, 1  ;;  %v1861_v16 = vshll.u32 %v11872_v5, 16 }
 0x3ad   :  { %v1791_v24 = vrot.slane %v1789_v46, 1  ;;  %v1803_v46 = vrot.slane %v1801_v7, 1 }
 0x3ae   :  { %8745 = vmatmul.mubr.bf16.gmra.mrb[32].mxu1 %v11958_v6  ;;  %v11987_v58 = vsel %vm2717_vm1, %v2811_v13, %v2812_v36  ;;  %v1806_v13 = vshll.u32 %v11780_v21, 16  ;;  %v1811_v36 = vshrl.u32 %v11782_v30, 16 }
 0x3af   :  { %8748 = vmatprep.mubr.bf16.mxu1 %v11968_v18  ;;  %16701 = vst [vmem:[#allocation68_spill] sm:$0xff] %v11987_v58  ;;  %v1792_v39 = vor.u32 %v1791_v24, %v1787_v40  ;;  %v1818_v24 = vshll.u32 %v11784_v42, 16  ;;  %v1804_v41 = vor.u32 %v1803_v46, %v1799_v44  ;;  %v9816_v40 = vld [vmem:[#allocation8 + $0x108] sm:$0xff]   ;;  %v9821_v42 = vld [vmem:[#allocation8 + $0x110] sm:$0xff]   ;;  %v1823_v46 = vshrl.u32 %v11819_v14, 16 }
 0x3b0   :  { %v1816_v28 = vor.u32 %v1815_v48, %v1811_v36  ;;  %v1808_v7 = vrot.slane %v1806_v13, 1  ;;  %v1835_v48 = vshrl.u32 %v11833_v55, 16  ;;  %v1842_v44 = vshll.u32 %v11835_v63, 16 }
 0x3b1   :  { %v11997_v50 = vsel %vm1545_vm0, %v1792_v39, %v1796_v54  ;;  %v1820_v39 = vrot.slane %v1818_v24, 1  ;;  %v1839_v54 = vrot.slane %v1837_v29, 1  ;;  %v1828_v13 = vor.u32 %v1827_v0, %v1823_v46  ;;  %v9826_v24 = vld [vmem:[#allocation8 + $0x118] sm:$0xff]  }
 0x3b2   :  { %8561 = vmatmul.mubr.bf16.gmra.mrb[160].mxu0 %v11972_v3  ;;  %16703 = vst [vmem:[#allocation70_spill] sm:$0xff] %v11997_v50  ;;  %v12010_v21 = vsel %vm1545_vm0, %v1804_v41, %v1808_v7  ;;  %v1849_v36 = vshll.u32 %v11863_v22, 16  ;;  %v1844_v29 = vrot.slane %v1842_v44, 1  ;;  %v1847_v0 = vshrl.u32 %v11863_v22, 16  ;;  %v9828_v44 = vld [vmem:[#allocation8 + $0x128] sm:$0xff]  }
 0x3b3   :  { %8564 = vmatprep.mubr.bf16.mxu0 %v11976_v17  ;;  %v12014_v15 = vsel %vm1545_vm0, %v1816_v28, %v1820_v39  ;;  %v1840_v41 = vor.u32 %v1839_v54, %v1835_v48  ;;  %v1863_v39 = vrot.slane %v1861_v16, 1  ;;  %v1854_v54 = vshll.u32 %v11865_v9, 16 }
 0x3b4   :  { %v1851_v63 = vrot.slane %v1849_v36, 1  ;;  %v1866_v46 = vshll.u32 %v11874_v26, 16  ;;  %v1873_v48 = vshll.u32 %v11897_v47, 16  ;;  %v1885_v36 = vshll.u32 %v11905_v52, 16 }
 0x3b5   :  { %v12030_v7 = vsel %vm1545_vm0, %v1840_v41, %v1844_v29  ;;  %v1856_v41 = vrot.slane %v1854_v54, 1 }
 0x3b6   :  { %8749 = vmatmul.mubr.bf16.gmra.mrb[36].mxu1 %v11987_v58  ;;  %v1868_v16 = vrot.slane %v1866_v46, 1  ;;  %v1875_v26 = vrot.slane %v1873_v48, 1  ;;  %v1887_v29 = vrot.slane %v1885_v36, 1  ;;  %v9830_v46 = vld [vmem:[#allocation8 + $0x138] sm:$0xff]   ;;  %v1909_v48 = vshll.u32 %v11938_v27, 16 }
 0x3b7   :  { %8768 = vmatprep.mubr.bf16.mxu1 %v11616_v34 }
 0x3ba   :  { %8565 = vmatmul.mubr.bf16.gmra.mrb[164].mxu0 %v11993_v59 }
 0x3bb   :  { %8568 = vmatprep.mubr.bf16.mxu0 %v11997_v50 }
 0x3be   :  { %8769 = vmatmul.mubr.bf16.vlgmr.msra.gmra.mrb[40].mxu1 %v11620_v12 }
 0x3bf   :  { %8833 = vmatpush3.bf16.msra.mxu1 %v11803_v10  ;;  %8772 = vmatprep.mubr.bf16.mxu1 %v11661_v31  ;;  %v1830_v10 = vshll.u32 %v11821_v1, 16 }
 0x3c0   :  { %8834 = vmatprep.subr.bf16.mxu1 %v9816_v40 }
 0x3c1   :  { %v1832_v28 = vrot.slane %v1830_v10, 1  ;;  %v1852_v10 = vor.u32 %v1851_v63, %v1847_v0  ;;  %v1871_v63 = vshrl.u32 %v11897_v47, 16  ;;  %v1890_v0 = vshll.u32 %v11907_v33, 16 }
 0x3c2   :  { %8569 = vmatmul.mubr.bf16.gmra.mrb[168].mxu0 %v12010_v21 }
 0x3c3   :  { %8572 = vmatprep.mubr.bf16.mxu0 %v12014_v15  ;;  %8835 = vmatpush3.bf16.msra.mxu1 %v9816_v40  ;;  %v12026_v1 = vsel %vm1545_vm0, %v1828_v13, %v1832_v28  ;;  %v9827_v40 = vld [vmem:[#allocation8 + $0x120] sm:$0xff]   ;;  %v12042_v9 = vsel %vm1545_vm0, %v1852_v10, %v1856_v41  ;;  %v1876_v54 = vor.u32 %v1875_v26, %v1871_v63  ;;  %v1892_v36 = vrot.slane %v1890_v0, 1 }
 0x3c4   :  { %8836 = vmatprep.subr.bf16.mxu1 %v9821_v42  ;;  %v1895_v26 = vshrl.u32 %v11925_v20, 16  ;;  %v1914_v63 = vshll.u32 %v11940_v51, 16 }
 0x3c6   :  { %8773 = vmatmul.mubr.bf16.gmra.mrb[44].mxu1 %v11667_v8 }
 0x3c7   :  { %8776 = vmatprep.mubr.bf16.mxu1 %v11704_v57  ;;  %8837 = vmatpush3.bf16.msra.mxu1 %v9821_v42  ;;  %v1859_v42 = vshrl.u32 %v11872_v5, 16 }
 0x3c8   :  { %8838 = vmatprep.subr.bf16.mxu1 %v9826_v24 }
 0x3c9   :  { %v1864_v13 = vor.u32 %v1863_v39, %v1859_v42  ;;  %v1878_v39 = vshll.u32 %v11899_v4, 16  ;;  %v1897_v42 = vshll.u32 %v11925_v20, 16 }
 0x3ca   :  { %8573 = vmatmul.mubr.bf16.gmra.mrb[172].mxu0 %v12026_v1 }
 0x3cb   :  { %8576 = vmatprep.mubr.bf16.mxu0 %v12030_v7  ;;  %8839 = vmatpush3.bf16.msra.mxu1 %v9826_v24  ;;  %v9829_v24 = vld [vmem:[#allocation8 + $0x130] sm:$0xff]   ;;  %v12046_v28 = vsel %vm1545_vm0, %v1864_v13, %v1868_v16  ;;  %v1880_v13 = vrot.slane %v1878_v39, 1  ;;  %v1899_v33 = vrot.slane %v1897_v42, 1  ;;  %v1911_v16 = vrot.slane %v1909_v48, 1 }
 0x3cc   :  { %8840 = vmatprep.subr.bf16.mxu1 %v9827_v40  ;;  %v1916_v42 = vrot.slane %v1914_v63, 1  ;;  %v1926_v48 = vshll.u32 %v11963_v11, 16  ;;  %v1397_v11 = vld [vmem:[#allocation2 + $0x180] sm:$0xff] }
 0x3cd   :  { %v12058_v4 = vsel %vm1545_vm0, %v1876_v54, %v1880_v13  ;;  %v1900_v39 = vor.u32 %v1899_v33, %v1895_v26  ;;  %v1398_v26 = vld [vmem:[#allocation2 + $0x188] sm:$0xff] }
 0x3ce   :  { %8777 = vmatmul.mubr.bf16.gmra.mrb[48].mxu1 %v11721_v49  ;;  %16704 = vst [vmem:[#allocation71_spill] sm:$0xff] %v12058_v4  ;;  %v12097_v63 = vpack.c.bf16 %v1398_v26, %v1397_v11  ;;  %v16709_v11 = vld [vmem:[#allocation32_spill] sm:$0xff]  ;;  %v9832_v26 = vld [vmem:[#allocation8 + $0x148] sm:$0xff]  }
 0x3cf   :  { %8780 = vmatprep.mubr.bf16.mxu1 %v11741_v19  ;;  %8841 = vmatpush3.bf16.msra.mxu1 %v9827_v40  ;;  %v1883_v40 = vshrl.u32 %v11905_v52, 16 }
 0x3d0   :  { %8842 = vmatprep.subr.bf16.mxu1 %v9828_v44 }
 0x3d1   :  { %v1888_v10 = vor.u32 %v1887_v29, %v1883_v40  ;;  %v1902_v29 = vshll.u32 %v11927_v37, 16  ;;  %v1921_v40 = vshll.u32 %v11961_v61, 16 }
 0x3d2   :  { %8577 = vmatmul.mubr.bf16.gmra.mrb[176].mxu0 %v12042_v9 }
 0x3d3   :  { %8580 = vmatprep.mubr.bf16.mxu0 %v12046_v28  ;;  %8843 = vmatpush3.bf16.msra.mxu1 %v9828_v44  ;;  %v12060_v44 = vld [vmem:[#allocation8 + $0x140] sm:$0xff]   ;;  %v12064_v41 = vsel %vm1545_vm0, %v1888_v10, %v1892_v36  ;;  %v1904_v54 = vrot.slane %v1902_v29, 1  ;;  %v1923_v37 = vrot.slane %v1921_v40, 1  ;;  %v1928_v36 = vrot.slane %v1926_v48, 1  ;;  %v16707_v29 = vld [vmem:[#allocation54_spill] sm:$0xff]  ;;  %v9899_v40 = vld [vmem:[#allocation8 + $0x98] sm:$0xff]  }
 0x3d4   :  { %8844 = vmatprep.subr.bf16.mxu1 %v9829_v24  ;;  %16705 = vst [vmem:[#allocation72_spill] sm:$0xff] %v12064_v41  ;;  %v1451_v48 = vld [vmem:[#allocation2 + $0x330] sm:$0xff] }
 0x3d5   :  { %v12076_v10 = vsel %vm1545_vm0, %v1900_v39, %v1904_v54  ;;  %v9898_v39 = vld [vmem:[#allocation8 + $0x90] sm:$0xff]   ;;  %v9900_v54 = vld [vmem:[#allocation8 + $0xa0] sm:$0xff]  }
 0x3d6   :  { %8781 = vmatmul.mubr.bf16.gmra.mrb[52].mxu1 %v11754_v25 }
 0x3d7   :  { %8784 = vmatprep.mubr.bf16.mxu1 %v11776_v56  ;;  %8845 = vmatpush3.bf16.msra.mxu1 %v9829_v24  ;;  %v1907_v24 = vshrl.u32 %v11938_v27, 16 }
 0x3d8   :  { %8846 = vmatprep.subr.bf16.mxu1 %v9830_v46 }
 0x3d9   :  { %v1912_v0 = vor.u32 %v1911_v16, %v1907_v24  ;;  %v16706_v16 = vld [vmem:[#allocation29_spill] sm:$0xff] }
 0x3da   :  { %8581 = vmatmul.mubr.bf16.gmra.mrb[180].mxu0 %v12058_v4  ;;  %v9897_v24 = vld [vmem:[#allocation8 + $0x88] sm:$0xff]  }
 0x3db   :  { %8584 = vmatprep.mubr.bf16.mxu0 %v12064_v41  ;;  %8847 = vmatpush3.bf16.msra.mxu1 %v9830_v46  ;;  %v12080_v51 = vsel %vm1545_vm0, %v1912_v0, %v1916_v42  ;;  %v1919_v46 = vshrl.u32 %v11961_v61, 16  ;;  %v16708_v0 = vld [vmem:[#allocation36_spill] sm:$0xff]  ;;  %v9901_v42 = vld [vmem:[#allocation8 + $0xa8] sm:$0xff]  }
 0x3dc   :  { %8912 = vmatprep.subr.bf16.mxu1 %v12060_v44 }
 0x3dd   :  { %v1924_v13 = vor.u32 %v1923_v37, %v1919_v46  ;;  %v9902_v37 = vld [vmem:[#allocation8 + $0xb0] sm:$0xff]   ;;  %v9903_v46 = vld [vmem:[#allocation8 + $0xb8] sm:$0xff]  }
 0x3de   :  { %8785 = vmatmul.mubr.bf16.gmra.mrb[56].mxu1 %v11793_v45 }
 0x3df   :  { %8788 = vmatprep.mubr.bf16.mxu1 %v11815_v62  ;;  %v12088_v33 = vsel %vm1545_vm0, %v1924_v13, %v1928_v36  ;;  %v1452_v13 = vld [vmem:[#allocation2 + $0x338] sm:$0xff] }
 0x3e0   :  { %v12131_v36 = vpack.c.bf16 %v1452_v13, %v1451_v48  ;;  %v9837_v48 = vld [vmem:[#allocation8 + $0x170] sm:$0xff]   ;;  %v9838_v13 = vld [vmem:[#allocation8 + $0x178] sm:$0xff]  }
 0x3e2   :  { %8585 = vmatmul.mubr.bf16.gmra.mrb[184].mxu0 %v12076_v10 }
 0x3e3   :  { %8588 = vmatprep.mubr.bf16.mxu0 %v12080_v51 }
 0x3e6   :  { %8789 = vmatmul.mubr.bf16.gmra.mrb[60].mxu1 %v11614_v2 }
 0x3e7   :  { %8792 = vmatprep.mubr.bf16.mxu1 %v11624_v60 }
 0x3ea   :  { %8589 = vmatmul.mubr.bf16.gmra.mrb[188].mxu0 %v12088_v33 }
 0x3eb   :  { %8608 = vmatprep.mubr.bf16.mxu0 %v16659_v43 }
 0x3ee   :  { %8793 = vmatmul.mubr.bf16.gmra.mrb[0].mxu1 %v16706_v16 }
 0x3ef   :  { %8796 = vmatprep.mubr.bf16.mxu1 %v11656_v35 }
 0x3f2   :  { %8609 = vmatmul.mubr.bf16.vlgmr.msra.gmra.mrb[128].mxu0 %v11616_v34 }
 0x3f3   :  { %8612 = vmatprep.mubr.bf16.mxu0 %v11620_v12  ;;  %8673 = vmatpush3.bf16.msra.mxu0 %v16707_v29  ;;  %v16710_v29 = vld [vmem:[#allocation34_spill] sm:$0xff] }
 0x3f4   :  { %8674 = vmatprep.subr.bf16.mxu0 %v9897_v24 }
 0x3f6   :  { %8797 = vmatmul.mubr.bf16.gmra.mrb[4].mxu1 %v12097_v63 }
 0x3f7   :  { %8675 = vmatpush3.bf16.msra.mxu0 %v9897_v24  ;;  %8800 = vmatprep.mubr.bf16.mxu1 %v11688_v53  ;;  %v9833_v24 = vld [vmem:[#allocation8 + $0x150] sm:$0xff]  }
 0x3f8   :  { %8676 = vmatprep.subr.bf16.mxu0 %v9898_v39 }
 0x3fa   :  { %8613 = vmatmul.mubr.bf16.gmra.mrb[132].mxu0 %v11661_v31 }
 0x3fb   :  { %8616 = vmatprep.mubr.bf16.mxu0 %v11667_v8  ;;  %8677 = vmatpush3.bf16.msra.mxu0 %v9898_v39  ;;  %v9834_v39 = vld [vmem:[#allocation8 + $0x158] sm:$0xff]  }
 0x3fc   :  { %8678 = vmatprep.subr.bf16.mxu0 %v9899_v40 }
 0x3fe   :  { %8801 = vmatmul.mubr.bf16.gmra.mrb[8].mxu1 %v16708_v0 }
 0x3ff   :  { %8679 = vmatpush3.bf16.msra.mxu0 %v9899_v40  ;;  %8804 = vmatprep.mubr.bf16.mxu1 %v11726_v32  ;;  %v16712_v40 = vld [vmem:[#allocation17_spill] sm:$0xff] }
 0x400   :  { %8680 = vmatprep.subr.bf16.mxu0 %v9900_v54 }
 0x402   :  { %8617 = vmatmul.mubr.bf16.gmra.mrb[136].mxu0 %v11704_v57 }
 0x403   :  { %8620 = vmatprep.mubr.bf16.mxu0 %v11721_v49  ;;  %8681 = vmatpush3.bf16.msra.mxu0 %v9900_v54  ;;  %v16713_v54 = vld [vmem:[#allocation42_spill] sm:$0xff] }
 0x404   :  { %8682 = vmatprep.subr.bf16.mxu0 %v9901_v42 }
 0x406   :  { %8805 = vmatmul.mubr.bf16.gmra.mrb[12].mxu1 %v11745_v38 }
 0x407   :  { %8683 = vmatpush3.bf16.msra.mxu0 %v9901_v42  ;;  %8808 = vmatprep.mubr.bf16.mxu1 %v11778_v23  ;;  %v9835_v42 = vld [vmem:[#allocation8 + $0x160] sm:$0xff]  }
 0x408   :  { %8684 = vmatprep.subr.bf16.mxu0 %v9902_v37 }
 0x40a   :  { %8621 = vmatmul.mubr.bf16.gmra.mrb[140].mxu0 %v11741_v19 }
 0x40b   :  { %8624 = vmatprep.mubr.bf16.mxu0 %v11754_v25  ;;  %8685 = vmatpush3.bf16.msra.mxu0 %v9902_v37  ;;  %v16714_v37 = vld [vmem:[#allocation20_spill] sm:$0xff] }
 0x40c   :  { %8686 = vmatprep.subr.bf16.mxu0 %v9903_v46 }
 0x40e   :  { %8809 = vmatmul.mubr.bf16.gmra.mrb[16].mxu1 %v11782_v30 }
 0x40f   :  { %8687 = vmatpush3.bf16.msra.mxu0 %v9903_v46  ;;  %8812 = vmatprep.mubr.bf16.mxu1 %v11819_v14  ;;  %v16715_v46 = vld [vmem:[#allocation47_spill] sm:$0xff] }
 0x412   :  { %8625 = vmatmul.mubr.bf16.gmra.mrb[144].mxu0 %v11776_v56 }
 0x413   :  { %8628 = vmatprep.mubr.bf16.mxu0 %v11793_v45 }
 0x416   :  { %8813 = vmatmul.mubr.bf16.gmra.mrb[20].mxu1 %v11833_v55 }
 0x417   :  { %8816 = vmatprep.mubr.bf16.mxu1 %v11863_v22 }
 0x41a   :  { %8629 = vmatmul.mubr.bf16.gmra.mrb[148].mxu0 %v11815_v62 }
 0x41b   :  { %8632 = vmatprep.mubr.bf16.mxu0 %v11614_v2 }
 0x41e   :  { %8817 = vmatmul.mubr.bf16.gmra.mrb[24].mxu1 %v11872_v5 }
 0x41f   :  { %8820 = vmatprep.mubr.bf16.mxu1 %v11897_v47 }
 0x422   :  { %8633 = vmatmul.mubr.bf16.gmra.mrb[152].mxu0 %v11624_v60 }
 0x423   :  { %8636 = vmatprep.mubr.bf16.mxu0 %v16706_v16 }
 0x426   :  { %8821 = vmatmul.mubr.bf16.gmra.mrb[28].mxu1 %v11905_v52 }
 0x427   :  { %8824 = vmatprep.mubr.bf16.mxu1 %v11925_v20 }
 0x42a   :  { %8637 = vmatmul.mubr.bf16.gmra.mrb[156].mxu0 %v11656_v35 }
 0x42b   :  { %8640 = vmatprep.mubr.bf16.mxu0 %v16659_v43 }
 0x42e   :  { %8825 = vmatmul.mubr.bf16.gmra.mrb[32].mxu1 %v11938_v27 }
 0x42f   :  { %8828 = vmatprep.mubr.bf16.mxu1 %v11961_v61 }
 0x432   :  { %8641 = vmatmul.mubr.bf16.gmra.mrb[160].mxu0 %v11688_v53  ;;  %v16711_v53 = vld [vmem:[#allocation39_spill] sm:$0xff] }
 0x433   :  { %8644 = vmatprep.mubr.bf16.mxu0 %v16708_v0 }
 0x436   :  { %8829 = vmatmul.mubr.bf16.gmra.mrb[36].mxu1 %v12131_v36 }
 0x437   :  { %8848 = vmatprep.mubr.bf16.mxu1 %v16709_v11  ;;  %v16716_v11 = vld [vmem:[#allocation48_spill] sm:$0xff] }
 0x43a   :  { %8645 = vmatmul.mubr.bf16.gmra.mrb[164].mxu0 %v11726_v32 }
 0x43b   :  { %8648 = vmatprep.mubr.bf16.mxu0 %v11745_v38 }
 0x43e   :  { %8849 = vmatmul.mubr.bf16.vlgmr.msra.gmra.mrb[40].mxu1 %v16710_v29 }
 0x43f   :  { %8913 = vmatpush3.bf16.msra.mxu1 %v12060_v44  ;;  %8852 = vmatprep.mubr.bf16.mxu1 %v16711_v53  ;;  %v9836_v44 = vld [vmem:[#allocation8 + $0x168] sm:$0xff]   ;;  %v16725_v53 = vld [vmem:[#allocation28_spill] sm:$0xff] }
 0x440   :  { %8914 = vmatprep.subr.bf16.mxu1 %v9832_v26 }
 0x442   :  { %8649 = vmatmul.mubr.bf16.gmra.mrb[168].mxu0 %v11778_v23 }
 0x443   :  { %8652 = vmatprep.mubr.bf16.mxu0 %v11782_v30  ;;  %8915 = vmatpush3.bf16.msra.mxu1 %v9832_v26  ;;  %v16717_v26 = vld [vmem:[#allocation52_spill] sm:$0xff] }
 0x444   :  { %8916 = vmatprep.subr.bf16.mxu1 %v9833_v24 }
 0x446   :  { %8853 = vmatmul.mubr.bf16.gmra.mrb[44].mxu1 %v16712_v40  ;;  %v16724_v40 = vld [vmem:[#allocation27_spill] sm:$0xff] }
 0x447   :  { %8856 = vmatprep.mubr.bf16.mxu1 %v16713_v54  ;;  %8917 = vmatpush3.bf16.msra.mxu1 %v9833_v24  ;;  %v12152_v24 = vld [vmem:[#allocation8 + $0x180] sm:$0xff]   ;;  %v2721_v54 = vrot.slane %v11616_v34, 1 }
 0x448   :  { %8918 = vmatprep.subr.bf16.mxu1 %v9834_v39 }
 0x44a   :  { %8653 = vmatmul.mubr.bf16.gmra.mrb[172].mxu0 %v11819_v14 }
 0x44b   :  { %8656 = vmatprep.mubr.bf16.mxu0 %v11833_v55  ;;  %8919 = vmatpush3.bf16.msra.mxu1 %v9834_v39  ;;  %v16718_v39 = vld [vmem:[#allocation53_spill] sm:$0xff] }
 0x44c   :  { %8920 = vmatprep.subr.bf16.mxu1 %v9835_v42 }
 0x44e   :  { %8857 = vmatmul.mubr.bf16.gmra.mrb[48].mxu1 %v16714_v37  ;;  %v1399_v37 = vld [vmem:[#allocation2 + $0x190] sm:$0x3] }
 0x44f   :  { %8860 = vmatprep.mubr.bf16.mxu1 %v16715_v46  ;;  %8921 = vmatpush3.bf16.msra.mxu1 %v9835_v42  ;;  %v16719_v42 = vld [vmem:[#allocation57_spill] sm:$0xff]  ;;  %v16723_v46 = vrot.slane %v16659_v43, 1  ;;  %v16726_v43 = vld [vmem:[#allocation62_spill] sm:$0xff] }
 0x450   :  { %8922 = vmatprep.subr.bf16.mxu1 %v9836_v44 }
 0x452   :  { %8657 = vmatmul.mubr.bf16.gmra.mrb[176].mxu0 %v11863_v22 }
 0x453   :  { %8660 = vmatprep.mubr.bf16.mxu0 %v11872_v5  ;;  %8923 = vmatpush3.bf16.msra.mxu1 %v9836_v44  ;;  %v16720_v44 = vld [vmem:[#allocation43_spill] sm:$0xff] }
 0x454   :  { %8924 = vmatprep.subr.bf16.mxu1 %v9837_v48 }
 0x456   :  { %8861 = vmatmul.mubr.bf16.gmra.mrb[52].mxu1 %v16716_v11  ;;  %v16722_v11 = vld [vmem:[#allocation61_spill] sm:$0xff] }
 0x457   :  { %8864 = vmatprep.mubr.bf16.mxu1 %v16717_v26  ;;  %8925 = vmatpush3.bf16.msra.mxu1 %v9837_v48  ;;  %v2719_v48 = vrot.slane %v16720_v44, 1  ;;  %v16721_v26 = vld [vmem:[#allocation58_spill] sm:$0xff]  ;;  %v2722_v44 = vrot.slane %v16724_v40, 1 }
 0x458   :  { %8926 = vmatprep.subr.bf16.mxu1 %v9838_v13 }
 0x45a   :  { %8661 = vmatmul.mubr.bf16.gmra.mrb[180].mxu0 %v11897_v47 }
 0x45b   :  { %8664 = vmatprep.mubr.bf16.mxu0 %v11905_v52  ;;  %8927 = vmatpush3.bf16.msra.mxu1 %v9838_v13  ;;  %v2720_v13 = vsel %vm2717_vm1, %v16723_v46, %v2719_v48  ;;  %v16727_v46 = vld [vmem:[#allocation44_spill] sm:$0xff]  ;;  %v3683_v48 = vshrl.u32 %v12097_v63, 16 }
 0x45c   :  { %8992 = vmatprep.subr.bf16.mxu1 %v12152_v24 }
 0x45e   :  { %8865 = vmatmul.mubr.bf16.gmra.mrb[56].mxu1 %v16718_v39  ;;  %v3685_v39 = vshll.u32 %v12097_v63, 16 }
 0x45f   :  { %8868 = vmatprep.mubr.bf16.mxu1 %v16719_v42  ;;  %v12169_v42 = vpack.c.bf16 %v1399_v37, %v1399_v37  ;;  %v12180_v37 = vsel %vm2717_vm1, %v2721_v54, %v2722_v44  ;;  %v16729_v54 = vld [vmem:[#allocation33_spill] sm:$0xff] }
 0x460   :  { %v3687_v29 = vrot.slane %v3685_v39, 1  ;;  %v2727_v39 = vrot.slane %v11661_v31, 1  ;;  %v2731_v44 = vrot.slane %v16729_v54, 1 }
 0x462   :  { %8665 = vmatmul.mubr.bf16.gmra.mrb[184].mxu0 %v11925_v20  ;;  %v3688_v40 = vor.u32 %v3687_v29, %v3683_v48 }
 0x463   :  { %8668 = vmatprep.mubr.bf16.mxu0 %v11938_v27  ;;  %v2730_v27 = vrot.slane %v11667_v8, 1 }
 0x466   :  { %8869 = vmatmul.mubr.bf16.gmra.mrb[60].mxu1 %v16721_v26  ;;  %v2724_v26 = vrot.slane %v11620_v12, 1 }
 0x467   :  { %8872 = vmatprep.mubr.bf16.mxu1 %v16722_v11  ;;  %v2725_v11 = vrot.slane %v16725_v53, 1 }
 0x469   :  { %v12184_v34 = vsel %vm2717_vm1, %v2724_v26, %v2725_v11  ;;  %v2733_v11 = vrot.slane %v11704_v57, 1  ;;  %v16730_v26 = vld [vmem:[#allocation38_spill] sm:$0xff] }
 0x46a   :  { %8669 = vmatmul.mubr.bf16.gmra.mrb[188].mxu0 %v11961_v61  ;;  %v3690_v61 = vshll.u32 %v12169_v42, 16  ;;  %v2734_v48 = vrot.slane %v16730_v26, 1  ;;  %v16733_v26 = vld [vmem:[#allocation26_spill] sm:$0xff] }
 0x46b   :  { %8688 = vmatprep.mubr.bf16.mxu0 %v2720_v13  ;;  %v16728_v13 = vld [vmem:[#allocation31_spill] sm:$0xff] }
 0x46c   :  { %v3692_v53 = vrot.slane %v3690_v61, 1  ;;  %v12201_v61 = vsel %vm2717_vm1, %v2730_v27, %v2731_v44  ;;  %v2742_v44 = vrot.slane %v11754_v25, 1 }
 0x46e   :  { %8873 = vmatmul.mubr.bf16.gmra.mrb[0].mxu1 %v16726_v43  ;;  %v12190_v43 = vsel %vm1545_vm0, %v3688_v40, %v3692_v53  ;;  %v2736_v40 = vrot.slane %v11721_v49, 1  ;;  %v16731_v53 = vld [vmem:[#allocation22_spill] sm:$0xff] }
 0x46f   :  { %8876 = vmatprep.mubr.bf16.mxu1 %v16727_v46  ;;  %v2728_v46 = vrot.slane %v16728_v13, 1  ;;  %v2737_v13 = vrot.slane %v16731_v53, 1  ;;  %v2743_v53 = vrot.slane %v16733_v26, 1  ;;  %v2748_v26 = vrot.slane %v11793_v45, 1 }
 0x471   :  { %v12197_v29 = vsel %vm2717_vm1, %v2727_v39, %v2728_v46  ;;  %v12215_v27 = vsel %vm2717_vm1, %v2736_v40, %v2737_v13  ;;  %v2739_v46 = vrot.slane %v11741_v19, 1  ;;  %v16732_v39 = vld [vmem:[#allocation25_spill] sm:$0xff]  ;;  %v2745_v40 = vrot.slane %v11776_v56, 1 }
 0x472   :  { %8689 = vmatmul.mubr.bf16.vlgmr.msra.gmra.mrb[128].mxu0 %v12180_v37  ;;  %v2740_v54 = vrot.slane %v16732_v39, 1  ;;  %v16734_v13 = vld [vmem:[#allocation45_spill] sm:$0xff] }
 0x473   :  { %8692 = vmatprep.mubr.bf16.mxu0 %v12184_v34  ;;  %v2746_v39 = vrot.slane %v16734_v13, 1 }
 0x476   :  { %8877 = vmatmul.mubr.bf16.gmra.mrb[4].mxu1 %v12190_v43 }
 0x477   :  { %8880 = vmatprep.mubr.bf16.mxu1 %v11972_v3  ;;  %v12211_v3 = vsel %vm2717_vm1, %v2733_v11, %v2734_v48  ;;  %v12225_v11 = vsel %vm2717_vm1, %v2739_v46, %v2740_v54  ;;  %v12229_v48 = vsel %vm2717_vm1, %v2742_v44, %v2743_v53  ;;  %v12239_v46 = vsel %vm2717_vm1, %v2745_v40, %v2746_v39  ;;  %v16737_v53 = vld [vmem:[#allocation51_spill] sm:$0xff] }
 0x478   :  { %v2751_v44 = vrot.slane %v11815_v62, 1  ;;  %v2752_v13 = vrot.slane %v16737_v53, 1  ;;  %v16739_v40 = vmov 0   ;;  %v3697_v39 = vshll.u32 %v12131_v36, 16 }
 0x47a   :  { %8693 = vmatmul.mubr.bf16.gmra.mrb[132].mxu0 %v12197_v29  ;;  %v3699_v53 = vrot.slane %v3697_v39, 1  ;;  %v9841_v39 = vld [vmem:[#allocation8 + $0x190] sm:$0xff]  }
 0x47b   :  { %8696 = vmatprep.mubr.bf16.mxu0 %v12201_v61 }
 0x47e   :  { %8881 = vmatmul.mubr.bf16.gmra.mrb[8].mxu1 %v11976_v17 }
 0x47f   :  { %8884 = vmatprep.mubr.bf16.mxu1 %v11993_v59  ;;  %v16735_v59 = vld [vmem:[#allocation46_spill] sm:$0xff] }
 0x482   :  { %8697 = vmatmul.mubr.bf16.gmra.mrb[136].mxu0 %v12211_v3 }
 0x483   :  { %8700 = vmatprep.mubr.bf16.mxu0 %v12215_v27 }
 0x486   :  { %8885 = vmatmul.mubr.bf16.gmra.mrb[12].mxu1 %v11997_v50  ;;  %v2749_v50 = vrot.slane %v16735_v59, 1  ;;  %v12251_v59 = vsel %vm2717_vm1, %v2751_v44, %v2752_v13  ;;  %v3695_v44 = vshrl.u32 %v12131_v36, 16 }
 0x487   :  { %8888 = vmatprep.mubr.bf16.mxu1 %v12010_v21  ;;  %16738 = vst [vmem:[#allocation54_spill] sm:$0xff] %v12251_v59 }
 0x488   :  { %v12243_v54 = vsel %vm2717_vm1, %v2748_v26, %v2749_v50  ;;  %v1453_v50 = vld [vmem:[#allocation2 + $0x340] sm:$0x3] }
 0x489   :  { %16736 = vst [vmem:[#allocation29_spill] sm:$0xff] %v12243_v54  ;;  %v12260_v26 = vpack.c.bf16 %v1453_v50, %v1453_v50  ;;  %v9840_v50 = vld [vmem:[#allocation8 + $0x188] sm:$0xff]  }
 0x48a   :  { %8701 = vmatmul.mubr.bf16.gmra.mrb[140].mxu0 %v12225_v11 }
 0x48b   :  { %8704 = vmatprep.mubr.bf16.mxu0 %v12229_v48  ;;  %v3702_v13 = vshll.u32 %v12260_v26, 16 }
 0x48e   :  { %8889 = vmatmul.mubr.bf16.gmra.mrb[16].mxu1 %v12014_v15 }
 0x48f   :  { %8892 = vmatprep.mubr.bf16.mxu1 %v12026_v1 }
 0x492   :  { %8705 = vmatmul.mubr.bf16.gmra.mrb[144].mxu0 %v12239_v46 }
 0x493   :  { %8708 = vmatprep.mubr.bf16.mxu0 %v12243_v54 }
 0x496   :  { %8893 = vmatmul.mubr.bf16.gmra.mrb[20].mxu1 %v12030_v7 }
 0x497   :  { %8896 = vmatprep.mubr.bf16.mxu1 %v12042_v9 }
 0x49a   :  { %8709 = vmatmul.mubr.bf16.gmra.mrb[148].mxu0 %v12251_v59 }
 0x49b   :  { %6481 = vmatprep.mubr.bf16.mxu0 %v16739_v40  ;;  %v3700_v40 = vor.u32 %v3699_v53, %v3695_v44  ;;  %v9842_v53 = vld [vmem:[#allocation8 + $0x198] sm:$0xff]   ;;  %v12280_v44 = vld [vmem:[#allocation8 + $0x1c0] sm:$0xff]  }
 0x49e   :  { %8897 = vmatmul.mubr.bf16.gmra.mrb[24].mxu1 %v12046_v28 }
 0x49f   :  { %8900 = vmatprep.mubr.bf16.mxu1 %v12058_v4  ;;  %v3704_v4 = vrot.slane %v3702_v13, 1  ;;  %v16740_v13 = vld [vmem:[#allocation30_spill] sm:$0xff] }
 0x4a6   :  { %8901 = vmatmul.mubr.bf16.gmra.mrb[28].mxu1 %v12064_v41  ;;  %v12267_v41 = vsel %vm1545_vm0, %v3700_v40, %v3704_v4  ;;  %v9843_v4 = vld [vmem:[#allocation8 + $0x1a0] sm:$0xff]   ;;  %v9846_v40 = vld [vmem:[#allocation8 + $0x1b8] sm:$0xff]  }
 0x4a7   :  { %8904 = vmatprep.mubr.bf16.mxu1 %v12076_v10 }
 0x4ae   :  { %8905 = vmatmul.mubr.bf16.gmra.mrb[32].mxu1 %v12080_v51 }
 0x4af   :  { %8908 = vmatprep.mubr.bf16.mxu1 %v12088_v33 }
 0x4b6   :  { %8909 = vmatmul.mubr.bf16.gmra.mrb[36].mxu1 %v12267_v41 }
 0x4b7   :  { %8928 = vmatprep.mubr.bf16.mxu1 %v12180_v37  ;;  %v9844_v37 = vld [vmem:[#allocation8 + $0x1a8] sm:$0xff]  }
 0x4be   :  { %8929 = vmatmul.mubr.bf16.vlgmr.msra.gmra.mrb[40].mxu1 %v12184_v34 }
 0x4bf   :  { %8993 = vmatpush3.bf16.msra.mxu1 %v12152_v24  ;;  %8932 = vmatprep.mubr.bf16.mxu1 %v12197_v29  ;;  %v9845_v24 = vld [vmem:[#allocation8 + $0x1b0] sm:$0xff]  }
 0x4c0   :  { %8994 = vmatprep.subr.bf16.mxu1 %v9840_v50 }
 0x4c3   :  { %8995 = vmatpush3.bf16.msra.mxu1 %v9840_v50  ;;  %v16741_v50 = vld [vmem:[#allocation21_spill] sm:$0xff] }
 0x4c4   :  { %8996 = vmatprep.subr.bf16.mxu1 %v9841_v39 }
 0x4c6   :  { %8933 = vmatmul.mubr.bf16.gmra.mrb[44].mxu1 %v12201_v61 }
 0x4c7   :  { %8936 = vmatprep.mubr.bf16.mxu1 %v12211_v3  ;;  %8997 = vmatpush3.bf16.msra.mxu1 %v9841_v39  ;;  %v16742_v39 = vld [vmem:[#allocation40_spill] sm:$0xff] }
 0x4c8   :  { %8998 = vmatprep.subr.bf16.mxu1 %v9842_v53 }
 0x4cb   :  { %8999 = vmatpush3.bf16.msra.mxu1 %v9842_v53  ;;  %v16743_v53 = vld [vmem:[#allocation37_spill] sm:$0xff] }
 0x4cc   :  { %9000 = vmatprep.subr.bf16.mxu1 %v9843_v4 }
 0x4ce   :  { %8937 = vmatmul.mubr.bf16.gmra.mrb[48].mxu1 %v12215_v27 }
 0x4cf   :  { %8940 = vmatprep.mubr.bf16.mxu1 %v12225_v11  ;;  %9001 = vmatpush3.bf16.msra.mxu1 %v9843_v4  ;;  %v4130_v4 = vrot.slane %v12097_v63, 1 }
 0x4d0   :  { %9002 = vmatprep.subr.bf16.mxu1 %v9844_v37 }
 0x4d3   :  { %9003 = vmatpush3.bf16.msra.mxu1 %v9844_v37  ;;  %v4131_v37 = vrot.slane %v12169_v42, 1 }
 0x4d4   :  { %9004 = vmatprep.subr.bf16.mxu1 %v9845_v24 }
 0x4d6   :  { %8941 = vmatmul.mubr.bf16.gmra.mrb[52].mxu1 %v12229_v48 }
 0x4d7   :  { %8944 = vmatprep.mubr.bf16.mxu1 %v12239_v46  ;;  %9005 = vmatpush3.bf16.msra.mxu1 %v9845_v24 }
 0x4d8   :  { %9006 = vmatprep.subr.bf16.mxu1 %v9846_v40 }
 0x4db   :  { %9007 = vmatpush3.bf16.msra.mxu1 %v9846_v40 }
 0x4dc   :  { %9072 = vmatprep.subr.bf16.mxu1 %v12280_v44 }
 0x4de   :  { %8945 = vmatmul.mubr.bf16.gmra.mrb[56].mxu1 %v12243_v54  ;;  %v12296_v54 = vsel %vm2717_vm1, %v4130_v4, %v4131_v37  ;;  %v16755_v4 = vld [vmem:[#allocation41_spill] sm:$0xff] }
 0x4df   :  { %8948 = vmatprep.mubr.bf16.mxu1 %v12251_v59  ;;  %16746 = vst [vmem:[#allocation43_spill] sm:$0xff] %v12296_v54 }
 0x4e6   :  { %8949 = vmatmul.mubr.bf16.gmra.mrb[60].mxu1 %v16740_v13 }
 0x4e7   :  { %8952 = vmatprep.mubr.bf16.mxu1 %v16741_v50 }
 0x4ee   :  { %8953 = vmatmul.mubr.bf16.gmra.mrb[0].mxu1 %v16742_v39  ;;  %v16749_v39 = vld [vmem:[#allocation23_spill] sm:$0xff] }
 0x4ef   :  { %8956 = vmatprep.mubr.bf16.mxu1 %v16743_v53 }
 0x4f5   :  { %v12291_v24 = vpop.f32.mrb[152].mxu0 }
 0x4f6   :  { %16744 = vst [vmem:[#allocation36_spill] sm:$0xff] %v12291_v24  ;;  %v12293_v40 = vpop.f32.mrb[153].mxu0  ;;  %8957 = vmatmul.mubr.bf16.gmra.mrb[4].mxu1 %v12296_v54  ;;  %v16753_v24 = vld [vmem:[#allocation24_spill] sm:$0xff] }
 0x4f7   :  { %16745 = vst [vmem:[#allocation32_spill] sm:$0xff] %v12293_v40  ;;  %v12298_v59 = vpop.f32.mrb[154].mxu0  ;;  %8960 = vmatprep.mubr.bf16.mxu1 %v16749_v39 }
 0x4f8   :  { %16747 = vst [vmem:[#allocation27_spill] sm:$0xff] %v12298_v59  ;;  %v12301_v50 = vpop.f32.mrb[155].mxu0 }
 0x4f9   :  { %16748 = vst [vmem:[#allocation28_spill] sm:$0xff] %v12301_v50  ;;  %v16759_v50 = vld [vmem:[#allocation35_spill] sm:$0xff] }
 0x4fd   :  { %v12304_v53 = vpop.f32.mrb[156].mxu0 }
 0x4fe   :  { %16750 = vst [vmem:[#allocation31_spill] sm:$0xff] %v12304_v53  ;;  %v12306_v13 = vpop.f32.mrb[157].mxu0  ;;  %8961 = vmatmul.mubr.bf16.gmra.mrb[8].mxu1 %v16753_v24  ;;  %v16761_v53 = vld [vmem:[#allocation49_spill] sm:$0xff] }
 0x4ff   :  { %16751 = vst [vmem:[#allocation33_spill] sm:$0xff] %v12306_v13  ;;  %v12308_v42 = vpop.f32.mrb[158].mxu0  ;;  %8964 = vmatprep.mubr.bf16.mxu1 %v16755_v4 }
 0x500   :  { %16752 = vst [vmem:[#allocation38_spill] sm:$0xff] %v12308_v42  ;;  %v12311_v40 = vpop.f32.mrb[159].mxu0 }
 0x501   :  { %16754 = vst [vmem:[#allocation22_spill] sm:$0xff] %v12311_v40  ;;  %v16765_v40 = vld [vmem:[#allocation50_spill] sm:$0xff] }
 0x505   :  { %v12314_v37 = vpop.f32.mrb[160].mxu0 }
 0x506   :  { %16756 = vst [vmem:[#allocation25_spill] sm:$0xff] %v12314_v37  ;;  %v12316_v59 = vpop.f32.mrb[161].mxu0  ;;  %8965 = vmatmul.mubr.bf16.gmra.mrb[12].mxu1 %v16759_v50  ;;  %v16767_v37 = vld [vmem:[#allocation55_spill] sm:$0xff] }
 0x507   :  { %16757 = vst [vmem:[#allocation26_spill] sm:$0xff] %v12316_v59  ;;  %v12318_v54 = vpop.f32.mrb[162].mxu0  ;;  %8968 = vmatprep.mubr.bf16.mxu1 %v16761_v53 }
 0x508   :  { %16758 = vst [vmem:[#allocation45_spill] sm:$0xff] %v12318_v54  ;;  %v12321_v39 = vpop.f32.mrb[163].mxu0 }
 0x509   :  { %16760 = vst [vmem:[#allocation46_spill] sm:$0xff] %v12321_v39  ;;  %v16771_v39 = vld [vmem:[#allocation56_spill] sm:$0xff] }
 0x50d   :  { %v12324_v13 = vpop.f32.mrb[164].mxu0 }
 0x50e   :  { %16762 = vst [vmem:[#allocation51_spill] sm:$0xff] %v12324_v13  ;;  %v12326_v42 = vpop.f32.mrb[165].mxu0  ;;  %8969 = vmatmul.mubr.bf16.gmra.mrb[16].mxu1 %v16765_v40  ;;  %v16773_v13 = vld [vmem:[#allocation59_spill] sm:$0xff] }
 0x50f   :  { %16763 = vst [vmem:[#allocation23_spill] sm:$0xff] %v12326_v42  ;;  %v12328_v24 = vpop.f32.mrb[166].mxu0  ;;  %8972 = vmatprep.mubr.bf16.mxu1 %v16767_v37 }
 0x510   :  { %16764 = vst [vmem:[#allocation73_spill] sm:$0xff] %v12328_v24  ;;  %v12331_v4 = vpop.f32.mrb[167].mxu0 }
 0x511   :  { %16766 = vst [vmem:[#allocation74_spill] sm:$0xff] %v12331_v4  ;;  %v16777_v4 = vld [vmem:[#allocation60_spill] sm:$0xff] }
 0x515   :  { %v12334_v59 = vpop.f32.mrb[168].mxu0 }
 0x516   :  { %16768 = vst [vmem:[#allocation75_spill] sm:$0xff] %v12334_v59  ;;  %v12336_v54 = vpop.f32.mrb[169].mxu0  ;;  %8973 = vmatmul.mubr.bf16.gmra.mrb[20].mxu1 %v16771_v39  ;;  %v16779_v59 = vld [vmem:[#allocation63_spill] sm:$0xff] }
 0x517   :  { %16769 = vst [vmem:[#allocation76_spill] sm:$0xff] %v12336_v54  ;;  %v12338_v50 = vpop.f32.mrb[170].mxu0  ;;  %8976 = vmatprep.mubr.bf16.mxu1 %v16773_v13 }
 0x518   :  { %16770 = vst [vmem:[#allocation77_spill] sm:$0xff] %v12338_v50  ;;  %v12341_v53 = vpop.f32.mrb[171].mxu0 }
 0x519   :  { %16772 = vst [vmem:[#allocation78_spill] sm:$0xff] %v12341_v53  ;;  %v16783_v53 = vld [vmem:[#allocation64_spill] sm:$0xff] }
 0x51d   :  { %v12344_v42 = vpop.f32.mrb[172].mxu0 }
 0x51e   :  { %16774 = vst [vmem:[#allocation79_spill] sm:$0xff] %v12344_v42  ;;  %v12346_v24 = vpop.f32.mrb[173].mxu0  ;;  %8977 = vmatmul.mubr.bf16.gmra.mrb[24].mxu1 %v16777_v4 }
 0x51f   :  { %16775 = vst [vmem:[#allocation80_spill] sm:$0xff] %v12346_v24  ;;  %v12348_v40 = vpop.f32.mrb[174].mxu0  ;;  %8980 = vmatprep.mubr.bf16.mxu1 %v16779_v59 }
 0x520   :  { %16776 = vst [vmem:[#allocation81_spill] sm:$0xff] %v12348_v40  ;;  %v12351_v37 = vpop.f32.mrb[175].mxu0 }
 0x521   :  { %16778 = vst [vmem:[#allocation60_spill] sm:$0xff] %v12351_v37 }
 0x525   :  { %v12354_v54 = vpop.f32.mrb[176].mxu0 }
 0x526   :  { %16780 = vst [vmem:[#allocation63_spill] sm:$0xff] %v12354_v54  ;;  %v12356_v50 = vpop.f32.mrb[177].mxu0  ;;  %8981 = vmatmul.mubr.bf16.gmra.mrb[28].mxu1 %v16783_v53 }
 0x527   :  { %16781 = vst [vmem:[#allocation82_spill] sm:$0xff] %v12356_v50  ;;  %v12358_v39 = vpop.f32.mrb[178].mxu0  ;;  %8984 = vmatprep.mubr.bf16.mxu1 %v11958_v6  ;;  %v4134_v50 = vrot.slane %v12260_v26, 1 }
 0x528   :  { %16782 = vst [vmem:[#allocation83_spill] sm:$0xff] %v12358_v39  ;;  %v12361_v13 = vpop.f32.mrb[179].mxu0  ;;  %v4133_v39 = vrot.slane %v12131_v36, 1 }
 0x529   :  { %16784 = vst [vmem:[#allocation64_spill] sm:$0xff] %v12361_v13 }
 0x52d   :  { %v12364_v24 = vpop.f32.mrb[180].mxu0 }
 0x52e   :  { %16785 = vst [vmem:[#allocation84_spill] sm:$0xff] %v12364_v24  ;;  %v12366_v40 = vpop.f32.mrb[181].mxu0  ;;  %8985 = vmatmul.mubr.bf16.gmra.mrb[32].mxu1 %v11968_v18  ;;  %v12381_v24 = vsel %vm2717_vm1, %v4133_v39, %v4134_v50  ;;  %v9849_v39 = vld [vmem:[#allocation8 + $0x1d0] sm:$0xff]  }
 0x52f   :  { %16786 = vst [vmem:[#allocation85_spill] sm:$0xff] %v12366_v40  ;;  %v12368_v42 = vpop.f32.mrb[182].mxu0  ;;  %8988 = vmatprep.mubr.bf16.mxu1 %v11987_v58  ;;  %v9848_v58 = vld [vmem:[#allocation8 + $0x1c8] sm:$0xff]  }
 0x530   :  { %16787 = vst [vmem:[#allocation86_spill] sm:$0xff] %v12368_v42  ;;  %v12371_v37 = vpop.f32.mrb[183].mxu0 }
 0x531   :  { %16788 = vst [vmem:[#allocation87_spill] sm:$0xff] %v12371_v37 }
 0x535   :  { %v12376_v54 = vpop.f32.mrb[184].mxu0 }
 0x536   :  { %16789 = vst [vmem:[#allocation88_spill] sm:$0xff] %v12376_v54  ;;  %v12378_v13 = vpop.f32.mrb[185].mxu0  ;;  %8989 = vmatmul.mubr.bf16.gmra.mrb[36].mxu1 %v12381_v24 }
 0x537   :  { %16790 = vst [vmem:[#allocation89_spill] sm:$0xff] %v12378_v13  ;;  %v12383_v40 = vpop.f32.mrb[186].mxu0  ;;  %9008 = vmatprep.mubr.bf16.mxu1 %v11620_v12  ;;  %v9850_v12 = vld [vmem:[#allocation8 + $0x1d8] sm:$0xff]  }
 0x538   :  { %16791 = vst [vmem:[#allocation90_spill] sm:$0xff] %v12383_v40  ;;  %v12386_v42 = vpop.f32.mrb[187].mxu0 }
 0x539   :  { %16792 = vst [vmem:[#allocation91_spill] sm:$0xff] %v12386_v42 }
 0x53d   :  { %v12389_v37 = vpop.f32.mrb[188].mxu0 }
 0x53e   :  { %16793 = vst [vmem:[#allocation92_spill] sm:$0xff] %v12389_v37  ;;  %v12391_v18 = vpop.f32.mrb[189].mxu0  ;;  %9009 = vmatmul.mubr.bf16.vlgmr.msra.gmra.mrb[40].mxu1 %v11661_v31 }
 0x53f   :  { %16794 = vst [vmem:[#allocation93_spill] sm:$0xff] %v12391_v18  ;;  %v12393_v26 = vpop.f32.mrb[190].mxu0  ;;  %9073 = vmatpush3.bf16.msra.mxu1 %v12280_v44  ;;  %9012 = vmatprep.mubr.bf16.mxu1 %v11667_v8  ;;  %v9851_v8 = vld [vmem:[#allocation8 + $0x1e0] sm:$0xff]  }
 0x540   :  { %16795 = vst [vmem:[#allocation94_spill] sm:$0xff] %v12393_v26  ;;  %v12397_v50 = vpop.f32.mrb[191].mxu0  ;;  %9074 = vmatprep.subr.bf16.mxu1 %v9848_v58 }
 0x541   :  { %16796 = vst [vmem:[#allocation95_spill] sm:$0xff] %v12397_v50 }
 0x543   :  { %9075 = vmatpush3.bf16.msra.mxu1 %v9848_v58  ;;  %v9852_v58 = vld [vmem:[#allocation8 + $0x1e8] sm:$0xff]  }
 0x544   :  { %9076 = vmatprep.subr.bf16.mxu1 %v9849_v39 }
 0x545   :  { %v12400_v42 = vpop.f32.mrb[128].mxu0 }
 0x546   :  { %v12402_v37 = vpop.f32.mrb[129].mxu0  ;;  %9013 = vmatmul.mubr.bf16.gmra.mrb[44].mxu1 %v11704_v57  ;;  %v9853_v57 = vld [vmem:[#allocation8 + $0x1f0] sm:$0xff]  }
 0x547   :  { %v12404_v18 = vpop.f32.mrb[130].mxu0  ;;  %9016 = vmatprep.mubr.bf16.mxu1 %v11721_v49  ;;  %9077 = vmatpush3.bf16.msra.mxu1 %v9849_v39  ;;  %v9854_v39 = vld [vmem:[#allocation8 + $0x1f8] sm:$0xff]  }
 0x548   :  { %v12407_v31 = vpop.f32.mrb[131].mxu0  ;;  %9078 = vmatprep.subr.bf16.mxu1 %v9850_v12 }
 0x54b   :  { %9079 = vmatpush3.bf16.msra.mxu1 %v9850_v12 }
 0x54c   :  { %9080 = vmatprep.subr.bf16.mxu1 %v9851_v8 }
 0x54d   :  { %v12410_v44 = vpop.f32.mrb[132].mxu0 }
 0x54e   :  { %v12412_v50 = vpop.f32.mrb[133].mxu0  ;;  %9017 = vmatmul.mubr.bf16.gmra.mrb[48].mxu1 %v11741_v19  ;;  %v9855_v19 = vld [vmem:[#allocation8 + $0x200] sm:$0xff]  }
 0x54f   :  { %v12414_v26 = vpop.f32.mrb[134].mxu0  ;;  %9020 = vmatprep.mubr.bf16.mxu1 %v11754_v25  ;;  %9081 = vmatpush3.bf16.msra.mxu1 %v9851_v8 }
 0x550   :  { %v12417_v40 = vpop.f32.mrb[135].mxu0  ;;  %9082 = vmatprep.subr.bf16.mxu1 %v9852_v58 }
 0x553   :  { %9083 = vmatpush3.bf16.msra.mxu1 %v9852_v58 }
 0x554   :  { %9084 = vmatprep.subr.bf16.mxu1 %v9853_v57 }
 0x555   :  { %v12420_v49 = vpop.f32.mrb[136].mxu0 }
 0x556   :  { %v12422_v12 = vpop.f32.mrb[137].mxu0  ;;  %9021 = vmatmul.mubr.bf16.gmra.mrb[52].mxu1 %v11776_v56 }
 0x557   :  { %v12424_v13 = vpop.f32.mrb[138].mxu0  ;;  %9024 = vmatprep.mubr.bf16.mxu1 %v11793_v45  ;;  %9085 = vmatpush3.bf16.msra.mxu1 %v9853_v57 }
 0x558   :  { %16797 = vst [vmem:[#allocation96_spill] sm:$0xff] %v12424_v13  ;;  %v12427_v54 = vpop.f32.mrb[139].mxu0  ;;  %9086 = vmatprep.subr.bf16.mxu1 %v9854_v39 }
 0x55b   :  { %9087 = vmatpush3.bf16.msra.mxu1 %v9854_v39 }
 0x55c   :  { %9152 = vmatprep.subr.bf16.mxu1 %v9855_v19 }
 0x55d   :  { %v12430_v25 = vpop.f32.mrb[140].mxu0 }
 0x55e   :  { %v12432_v8 = vpop.f32.mrb[141].mxu0  ;;  %9025 = vmatmul.mubr.bf16.gmra.mrb[56].mxu1 %v11815_v62 }
 0x55f   :  { %16798 = vst [vmem:[#allocation97_spill] sm:$0xff] %v12432_v8  ;;  %v12434_v58 = vpop.f32.mrb[142].mxu0  ;;  %9028 = vmatprep.mubr.bf16.mxu1 %v11614_v2 }
 0x560   :  { %16799 = vst [vmem:[#allocation98_spill] sm:$0xff] %v12434_v58  ;;  %v12437_v13 = vpop.f32.mrb[143].mxu0 }
 0x565   :  { %v12440_v56 = vpop.f32.mrb[144].mxu0 }
 0x566   :  { %v12442_v45 = vpop.f32.mrb[145].mxu0  ;;  %9029 = vmatmul.mubr.bf16.gmra.mrb[60].mxu1 %v11624_v60  ;;  %v16802_v60 = vld [vmem:[#allocation65_spill] sm:$0xff] }
 0x567   :  { %16800 = vst [vmem:[#allocation99_spill] sm:$0xff] %v12442_v45  ;;  %v12444_v57 = vpop.f32.mrb[146].mxu0  ;;  %9032 = vmatprep.mubr.bf16.mxu1 %v16706_v16  ;;  %v9904_v45 = vld [vmem:[#allocation2] sm:$0xff] }
 0x568   :  { %16801 = vst [vmem:[#allocation100_spill] sm:$0xff] %v12444_v57  ;;  %v12447_v39 = vpop.f32.mrb[147].mxu0  ;;  %v12460_v57 = vpack.c.bf16 %v9904_v45, %v9904_v45  ;;  %v16810_v16 = vld [vmem:[#allocation48_spill] sm:$0xff]  ;;  %v16813_v45 = vld [vmem:[#allocation57_spill] sm:$0xff] }
 0x56d   :  { %v12450_v8 = vpop.f32.mrb[148].mxu0 }
 0x56e   :  { %v12452_v58 = vpop.f32.mrb[149].mxu0  ;;  %9033 = vmatmul.mubr.bf16.gmra.mrb[0].mxu1 %v11656_v35  ;;  %v16803_v35 = vld [vmem:[#allocation66_spill] sm:$0xff] }
 0x56f   :  { %v12454_v62 = vpop.f32.mrb[150].mxu0  ;;  %9036 = vmatprep.mubr.bf16.mxu1 %v12097_v63  ;;  %v9861_v63 = vld [vmem:[#allocation8 + $0x230] sm:$0xff]  }
 0x570   :  { %v12457_v2 = vpop.f32.mrb[151].mxu0 }
 0x576   :  { %9037 = vmatmul.mubr.bf16.gmra.mrb[4].mxu1 %v12460_v57 }
 0x577   :  { %9040 = vmatprep.mubr.bf16.mxu1 %v16708_v0  ;;  %v9862_v0 = vld [vmem:[#allocation8 + $0x238] sm:$0xff]  }
 0x57e   :  { %9041 = vmatmul.mubr.bf16.gmra.mrb[8].mxu1 %v11726_v32  ;;  %v16805_v32 = vld [vmem:[#allocation39_spill] sm:$0xff] }
 0x57f   :  { %9044 = vmatprep.mubr.bf16.mxu1 %v11745_v38  ;;  %v9857_v38 = vld [vmem:[#allocation8 + $0x210] sm:$0xff]  }
 0x586   :  { %9045 = vmatmul.mubr.bf16.gmra.mrb[12].mxu1 %v11778_v23  ;;  %v16804_v23 = vld [vmem:[#allocation34_spill] sm:$0xff] }
 0x587   :  { %9048 = vmatprep.mubr.bf16.mxu1 %v11782_v30  ;;  %v9858_v30 = vld [vmem:[#allocation8 + $0x218] sm:$0xff]  }
 0x58e   :  { %9049 = vmatmul.mubr.bf16.gmra.mrb[16].mxu1 %v11819_v14  ;;  %v9856_v14 = vld [vmem:[#allocation8 + $0x208] sm:$0xff]  }
 0x58f   :  { %9052 = vmatprep.mubr.bf16.mxu1 %v11833_v55  ;;  %v16808_v55 = vld [vmem:[#allocation20_spill] sm:$0xff] }
 0x596   :  { %9053 = vmatmul.mubr.bf16.gmra.mrb[20].mxu1 %v11863_v22  ;;  %v16807_v22 = vld [vmem:[#allocation42_spill] sm:$0xff] }
 0x597   :  { %9056 = vmatprep.mubr.bf16.mxu1 %v11872_v5  ;;  %v16806_v5 = vld [vmem:[#allocation17_spill] sm:$0xff] }
 0x59e   :  { %9057 = vmatmul.mubr.bf16.gmra.mrb[24].mxu1 %v11897_v47  ;;  %v9860_v47 = vld [vmem:[#allocation8 + $0x228] sm:$0xff]  }
 0x59f   :  { %9060 = vmatprep.mubr.bf16.mxu1 %v11905_v52  ;;  %v9859_v52 = vld [vmem:[#allocation8 + $0x220] sm:$0xff]  }
 0x5a6   :  { %9061 = vmatmul.mubr.bf16.gmra.mrb[28].mxu1 %v11925_v20  ;;  %v16809_v20 = vld [vmem:[#allocation47_spill] sm:$0xff] }
 0x5a7   :  { %9064 = vmatprep.mubr.bf16.mxu1 %v16802_v60  ;;  %v16814_v60 = vld [vmem:[#allocation58_spill] sm:$0xff] }
 0x5ae   :  { %9065 = vmatmul.mubr.bf16.gmra.mrb[32].mxu1 %v16803_v35  ;;  %v1402_v35 = vld [vmem:[#allocation2 + $0x1a8] sm:$0x3] }
 0x5af   :  { %9068 = vmatprep.mubr.bf16.mxu1 %v12131_v36  ;;  %v16811_v36 = vld [vmem:[#allocation52_spill] sm:$0xff] }
 0x5b6   :  { %9069 = vmatmul.mubr.bf16.gmra.mrb[36].mxu1 %v12460_v57 }
 0x5b7   :  { %9088 = vmatprep.mubr.bf16.mxu1 %v16804_v23  ;;  %v16815_v23 = vld [vmem:[#allocation61_spill] sm:$0xff] }
 0x5be   :  { %9089 = vmatmul.mubr.bf16.vlgmr.msra.gmra.mrb[40].mxu1 %v16805_v32  ;;  %v1492_v32 = vpack.c.bf16 %v1402_v35, %v1402_v35  ;;  %v16838_v35 = vld [vmem:[#allocation68_spill] sm:$0xff] }
 0x5bf   :  { %9153 = vmatpush3.bf16.msra.mxu1 %v9855_v19  ;;  %9092 = vmatprep.mubr.bf16.mxu1 %v16806_v5  ;;  %v16812_v19 = vld [vmem:[#allocation53_spill] sm:$0xff]  ;;  %v4977_v5 = vshll.u32 %v12460_v57, 16 }
 0x5c0   :  { %9154 = vmatprep.subr.bf16.mxu1 %v9856_v14 }
 0x5c3   :  { %9155 = vmatpush3.bf16.msra.mxu1 %v9856_v14  ;;  %v16816_v14 = vld [vmem:[#allocation62_spill] sm:$0xff] }
 0x5c4   :  { %9156 = vmatprep.subr.bf16.mxu1 %v9857_v38 }
 0x5c6   :  { %9093 = vmatmul.mubr.bf16.gmra.mrb[44].mxu1 %v16807_v22  ;;  %v4982_v22 = vshll.u32 %v1492_v32, 16 }
 0x5c7   :  { %9096 = vmatprep.mubr.bf16.mxu1 %v16808_v55  ;;  %9157 = vmatpush3.bf16.msra.mxu1 %v9857_v38  ;;  %v4975_v38 = vshrl.u32 %v12460_v57, 16  ;;  %v16817_v55 = vld [vmem:[#allocation44_spill] sm:$0xff] }
 0x5c8   :  { %9158 = vmatprep.subr.bf16.mxu1 %v9858_v30 }
 0x5cb   :  { %9159 = vmatpush3.bf16.msra.mxu1 %v9858_v30  ;;  %v4979_v30 = vrot.slane %v4977_v5, 1 }
 0x5cc   :  { %9160 = vmatprep.subr.bf16.mxu1 %v9859_v52 }
 0x5ce   :  { %9097 = vmatmul.mubr.bf16.gmra.mrb[48].mxu1 %v16809_v20 }
 0x5cf   :  { %9100 = vmatprep.mubr.bf16.mxu1 %v16810_v16  ;;  %9161 = vmatpush3.bf16.msra.mxu1 %v9859_v52  ;;  %v4980_v52 = vor.u32 %v4979_v30, %v4975_v38  ;;  %v16818_v16 = vld [vmem:[#allocation69_spill] sm:$0xff] }
 0x5d0   :  { %9162 = vmatprep.subr.bf16.mxu1 %v9860_v47 }
 0x5d3   :  { %9163 = vmatpush3.bf16.msra.mxu1 %v9860_v47  ;;  %v4984_v47 = vrot.slane %v4982_v22, 1 }
 0x5d4   :  { %9164 = vmatprep.subr.bf16.mxu1 %v9861_v63 }
 0x5d5   :  { %v4985_v20 = vsel %vm1545_vm0, %v4980_v52, %v4984_v47 }
 0x5d6   :  { %9101 = vmatmul.mubr.bf16.gmra.mrb[52].mxu1 %v16811_v36 }
 0x5d7   :  { %9104 = vmatprep.mubr.bf16.mxu1 %v16812_v19  ;;  %9165 = vmatpush3.bf16.msra.mxu1 %v9861_v63  ;;  %v16819_v63 = vld [vmem:[#allocation70_spill] sm:$0xff]  ;;  %v16834_v19 = vld [vmem:[#allocation55_spill] sm:$0xff] }
 0x5d8   :  { %9166 = vmatprep.subr.bf16.mxu1 %v9862_v0 }
 0x5db   :  { %9167 = vmatpush3.bf16.msra.mxu1 %v9862_v0  ;;  %v16821_v0 = vld [vmem:[#allocation72_spill] sm:$0xff] }
 0x5de   :  { %9105 = vmatmul.mubr.bf16.gmra.mrb[56].mxu1 %v16813_v45  ;;  %v16835_v45 = vld [vmem:[#allocation56_spill] sm:$0xff] }
 0x5df   :  { %9108 = vmatprep.mubr.bf16.mxu1 %v16814_v60  ;;  %v16836_v60 = vld [vmem:[#allocation59_spill] sm:$0xff] }
 0x5e6   :  { %9109 = vmatmul.mubr.bf16.gmra.mrb[60].mxu1 %v16815_v23 }
 0x5e7   :  { %9112 = vmatprep.mubr.bf16.mxu1 %v16816_v14 }
 0x5ee   :  { %9113 = vmatmul.mubr.bf16.gmra.mrb[0].mxu1 %v16817_v55 }
 0x5ef   :  { %9116 = vmatprep.mubr.bf16.mxu1 %v12190_v43  ;;  %v16820_v43 = vld [vmem:[#allocation71_spill] sm:$0xff] }
 0x5f6   :  { %9117 = vmatmul.mubr.bf16.gmra.mrb[4].mxu1 %v4985_v20 }
 0x5f7   :  { %9120 = vmatprep.mubr.bf16.mxu1 %v11976_v17  ;;  %v1456_v17 = vld [vmem:[#allocation2 + $0x358] sm:$0x3] }
 0x5fe   :  { %9121 = vmatmul.mubr.bf16.gmra.mrb[8].mxu1 %v16818_v16 }
 0x5ff   :  { %9124 = vmatprep.mubr.bf16.mxu1 %v16819_v63 }
 0x606   :  { %9125 = vmatmul.mubr.bf16.gmra.mrb[12].mxu1 %v12010_v21  ;;  %v1528_v21 = vpack.c.bf16 %v1456_v17, %v1456_v17 }
 0x607   :  { %9128 = vmatprep.mubr.bf16.mxu1 %v12014_v15 }
 0x608   :  { %v4994_v36 = vshll.u32 %v1528_v21, 16  ;;  %v5426_v23 = vrot.slane %v1528_v21, 1 }
 0x60a   :  { %v4996_v15 = vrot.slane %v4994_v36, 1 }
 0x60e   :  { %9129 = vmatmul.mubr.bf16.gmra.mrb[16].mxu1 %v12026_v1  ;;  %v4997_v1 = vsel %vm1545_vm0, %v4980_v52, %v4996_v15  ;;  %v16839_v15 = vld [vmem:[#allocation96_spill] sm:$0xff] }
 0x60f   :  { %9132 = vmatprep.mubr.bf16.mxu1 %v12030_v7  ;;  %v16822_v7 = vld [vmem:[#allocation29_spill] sm:$0xff] }
 0x616   :  { %9133 = vmatmul.mubr.bf16.gmra.mrb[20].mxu1 %v12042_v9  ;;  %v16823_v9 = vld [vmem:[#allocation54_spill] sm:$0xff] }
 0x617   :  { %9136 = vmatprep.mubr.bf16.mxu1 %v12046_v28  ;;  %v16824_v28 = vld [vmem:[#allocation30_spill] sm:$0xff] }
 0x61e   :  { %9137 = vmatmul.mubr.bf16.gmra.mrb[24].mxu1 %v16820_v43 }
 0x61f   :  { %9140 = vmatprep.mubr.bf16.mxu1 %v16821_v0 }
 0x626   :  { %9141 = vmatmul.mubr.bf16.gmra.mrb[28].mxu1 %v12076_v10  ;;  %v16826_v10 = vld [vmem:[#allocation40_spill] sm:$0xff] }
 0x627   :  { %9144 = vmatprep.mubr.bf16.mxu1 %v12080_v51  ;;  %v16827_v51 = vld [vmem:[#allocation37_spill] sm:$0xff] }
 0x62e   :  { %9145 = vmatmul.mubr.bf16.gmra.mrb[32].mxu1 %v12088_v33  ;;  %v16828_v33 = vld [vmem:[#allocation43_spill] sm:$0xff] }
 0x62f   :  { %9148 = vmatprep.mubr.bf16.mxu1 %v12267_v41  ;;  %v16825_v41 = vld [vmem:[#allocation21_spill] sm:$0xff] }
 0x636   :  { %9149 = vmatmul.mubr.bf16.gmra.mrb[36].mxu1 %v4997_v1 }
 0x637   :  { %9168 = vmatprep.mubr.bf16.mxu1 %v12184_v34  ;;  %v5422_v34 = vrot.slane %v12460_v57, 1  ;;  %v16837_v57 = vld [vmem:[#allocation67_spill] sm:$0xff] }
 0x639   :  { %v5427_v14 = vsel %vm2717_vm1, %v5422_v34, %v5426_v23 }
 0x63e   :  { %9169 = vmatmul.mubr.bf16.vlgmr.msra.gmra.mrb[40].mxu1 %v12197_v29  ;;  %v5423_v29 = vrot.slane %v1492_v32, 1 }
 0x63f   :  { %9172 = vmatprep.mubr.bf16.mxu1 %v12201_v61 }
 0x640   :  { %v5424_v61 = vsel %vm2717_vm1, %v5422_v34, %v5423_v29 }
 0x646   :  { %9173 = vmatmul.mubr.bf16.gmra.mrb[44].mxu1 %v12211_v3  ;;  %v16829_v3 = vld [vmem:[#allocation24_spill] sm:$0xff] }
 0x647   :  { %9176 = vmatprep.mubr.bf16.mxu1 %v12215_v27  ;;  %v16830_v27 = vld [vmem:[#allocation41_spill] sm:$0xff] }
 0x64e   :  { %9177 = vmatmul.mubr.bf16.gmra.mrb[48].mxu1 %v12225_v11  ;;  %v16831_v11 = vld [vmem:[#allocation35_spill] sm:$0xff] }
 0x64f   :  { %9180 = vmatprep.mubr.bf16.mxu1 %v12229_v48  ;;  %v16832_v48 = vld [vmem:[#allocation49_spill] sm:$0xff] }
 0x656   :  { %9181 = vmatmul.mubr.bf16.gmra.mrb[52].mxu1 %v12239_v46  ;;  %v16833_v46 = vld [vmem:[#allocation50_spill] sm:$0xff] }
 0x657   :  { %9184 = vmatprep.mubr.bf16.mxu1 %v16822_v7 }
 0x65e   :  { %9185 = vmatmul.mubr.bf16.gmra.mrb[56].mxu1 %v16823_v9 }
 0x65f   :  { %9188 = vmatprep.mubr.bf16.mxu1 %v16824_v28 }
 0x666   :  { %9189 = vmatmul.mubr.bf16.gmra.mrb[60].mxu1 %v16825_v41 }
 0x667   :  { %9192 = vmatprep.mubr.bf16.mxu1 %v16826_v10 }
 0x66e   :  { %9193 = vmatmul.mubr.bf16.gmra.mrb[0].mxu1 %v16827_v51  ;;  %v16840_v51 = vld [vmem:[#allocation97_spill] sm:$0xff] }
 0x66f   :  { %9196 = vmatprep.mubr.bf16.mxu1 %v16828_v33 }
 0x676   :  { %9197 = vmatmul.mubr.bf16.gmra.mrb[4].mxu1 %v5424_v61  ;;  %v16841_v61 = vld [vmem:[#allocation98_spill] sm:$0xff] }
 0x677   :  { %9200 = vmatprep.mubr.bf16.mxu1 %v16829_v3 }
 0x67e   :  { %9201 = vmatmul.mubr.bf16.gmra.mrb[8].mxu1 %v16830_v27 }
 0x67f   :  { %9204 = vmatprep.mubr.bf16.mxu1 %v16831_v11 }
 0x686   :  { %9205 = vmatmul.mubr.bf16.gmra.mrb[12].mxu1 %v16832_v48 }
 0x687   :  { %9208 = vmatprep.mubr.bf16.mxu1 %v16833_v46 }
 0x68e   :  { %9209 = vmatmul.mubr.bf16.gmra.mrb[16].mxu1 %v16834_v19 }
 0x68f   :  { %9212 = vmatprep.mubr.bf16.mxu1 %v16835_v45 }
 0x696   :  { %9213 = vmatmul.mubr.bf16.gmra.mrb[20].mxu1 %v16836_v60  ;;  %v16842_v60 = vld [vmem:[#allocation99_spill] sm:$0xff] }
 0x697   :  { %9216 = vmatprep.mubr.bf16.mxu1 %v16777_v4 }
 0x69e   :  { %9217 = vmatmul.mubr.bf16.gmra.mrb[24].mxu1 %v16779_v59 }
 0x69f   :  { %9220 = vmatprep.mubr.bf16.mxu1 %v16783_v53 }
 0x6a6   :  { %9221 = vmatmul.mubr.bf16.gmra.mrb[28].mxu1 %v11958_v6 }
 0x6a7   :  { %9224 = vmatprep.mubr.bf16.mxu1 %v16837_v57 }
 0x6ae   :  { %9225 = vmatmul.mubr.bf16.gmra.mrb[32].mxu1 %v16838_v35 }
 0x6af   :  { %9228 = vmatprep.mubr.bf16.mxu1 %v12381_v24 }
 0x6b6   :  { %9229 = vmatmul.mubr.bf16.gmra.mrb[36].mxu1 %v5427_v14  ;;  %v16843_v14 = vld [vmem:[#allocation100_spill] sm:$0xff] }
 0x711   :  { %v9170_v32 = vpop.f32.mrb[40].mxu1 }
 0x712   :  { %v12547_v5 = vadd.f32 %v9170_v32, %v12400_v42  ;;  %v5529_v4 = vpop.f32.mrb[41].mxu1 }
 0x713   :  { %v12550_v59 = vadd.f32 %v5529_v4, %v12402_v37  ;;  %v9171_v53 = vpop.f32.mrb[42].mxu1 }
 0x714   :  { %v12553_v6 = vadd.f32 %v9171_v53, %v12404_v18  ;;  %v5532_v38 = vpop.f32.mrb[43].mxu1 }
 0x715   :  { %v12556_v30 = vadd.f32 %v5532_v38, %v12407_v31 }
 0x717   :  { %v5848_v24 = vadd.f32 %v12556_v30, %v12550_v59 }
 0x719   :  { %v5849_v22 = vadd.f32 %v12547_v5, %v5848_v24  ;;  %v9174_v55 = vpop.f32.mrb[44].mxu1 }
 0x71a   :  { %v12562_v42 = vadd.f32 %v9174_v55, %v12410_v44  ;;  %v5545_v52 = vpop.f32.mrb[45].mxu1 }
 0x71b   :  { %v12565_v37 = vadd.f32 %v5545_v52, %v12412_v50  ;;  %v5850_v18 = vadd.f32 %v12553_v6, %v5849_v22  ;;  %v9175_v47 = vpop.f32.mrb[46].mxu1 }
 0x71c   :  { %v12569_v20 = vadd.f32 %v9175_v47, %v12414_v26  ;;  %v5548_v31 = vpop.f32.mrb[47].mxu1 }
 0x71d   :  { %v5851_v16 = vadd.f32 %v12565_v37, %v5850_v18  ;;  %v12573_v63 = vadd.f32 %v5548_v31, %v12417_v40 }
 0x71f   :  { %v5852_v43 = vadd.f32 %v12573_v63, %v5851_v16 }
 0x721   :  { %v5853_v44 = vadd.f32 %v12562_v42, %v5852_v43  ;;  %v9178_v0 = vpop.f32.mrb[48].mxu1 }
 0x722   :  { %v12578_v50 = vadd.f32 %v9178_v0, %v12420_v49  ;;  %v5561_v17 = vpop.f32.mrb[49].mxu1 }
 0x723   :  { %v12581_v21 = vadd.f32 %v5561_v17, %v12422_v12  ;;  %v5854_v26 = vadd.f32 %v12569_v20, %v5853_v44  ;;  %v9179_v36 = vpop.f32.mrb[50].mxu1  ;;  %v16844_v17 = vld [vmem:[#allocation36_spill] sm:$0xff] }
 0x724   :  { %v12585_v1 = vadd.f32 %v9179_v36, %v16839_v15  ;;  %v5564_v40 = vpop.f32.mrb[51].mxu1  ;;  %v16846_v36 = vld [vmem:[#allocation32_spill] sm:$0xff] }
 0x725   :  { %v5855_v7 = vadd.f32 %v12581_v21, %v5854_v26  ;;  %v12589_v9 = vadd.f32 %v5564_v40, %v12427_v54 }
 0x727   :  { %v5856_v28 = vadd.f32 %v12589_v9, %v5855_v7  ;;  %v16847_v7 = vld [vmem:[#allocation27_spill] sm:$0xff] }
 0x729   :  { %v5857_v49 = vadd.f32 %v12578_v50, %v5856_v28  ;;  %v9182_v41 = vpop.f32.mrb[52].mxu1 }
 0x72a   :  { %v12594_v12 = vadd.f32 %v9182_v41, %v12430_v25  ;;  %v5577_v10 = vpop.f32.mrb[53].mxu1  ;;  %v16849_v41 = vld [vmem:[#allocation28_spill] sm:$0xff] }
 0x72b   :  { %v12597_v33 = vadd.f32 %v5577_v10, %v16840_v51  ;;  %v5858_v34 = vadd.f32 %v12585_v1, %v5857_v49  ;;  %v9183_v29 = vpop.f32.mrb[54].mxu1 }
 0x72c   :  { %v12601_v3 = vadd.f32 %v9183_v29, %v16841_v61  ;;  %v5580_v54 = vpop.f32.mrb[55].mxu1  ;;  %v16850_v61 = vld [vmem:[#allocation31_spill] sm:$0xff] }
 0x72d   :  { %v5859_v27 = vadd.f32 %v12597_v33, %v5858_v34  ;;  %v12605_v11 = vadd.f32 %v5580_v54, %v12437_v13 }
 0x72f   :  { %v5860_v48 = vadd.f32 %v12605_v11, %v5859_v27 }
 0x731   :  { %v5861_v25 = vadd.f32 %v12594_v12, %v5860_v48  ;;  %v9186_v46 = vpop.f32.mrb[56].mxu1  ;;  %v16852_v48 = vld [vmem:[#allocation33_spill] sm:$0xff] }
 0x732   :  { %v12610_v19 = vadd.f32 %v9186_v46, %v12440_v56  ;;  %v5593_v45 = vpop.f32.mrb[57].mxu1 }
 0x733   :  { %v12613_v57 = vadd.f32 %v5593_v45, %v16842_v60  ;;  %v5862_v35 = vadd.f32 %v12601_v3, %v5861_v25  ;;  %v9187_v23 = vpop.f32.mrb[58].mxu1  ;;  %v16854_v60 = vld [vmem:[#allocation38_spill] sm:$0xff] }
 0x734   :  { %v12617_v32 = vadd.f32 %v9187_v23, %v16843_v14  ;;  %v5596_v13 = vpop.f32.mrb[59].mxu1 }
 0x735   :  { %v5863_v4 = vadd.f32 %v12613_v57, %v5862_v35  ;;  %v12621_v53 = vadd.f32 %v5596_v13, %v12447_v39  ;;  %v16856_v13 = vld [vmem:[#allocation22_spill] sm:$0xff] }
 0x737   :  { %v5864_v38 = vadd.f32 %v12621_v53, %v5863_v4 }
 0x739   :  { %v5865_v56 = vadd.f32 %v12610_v19, %v5864_v38  ;;  %v9190_v24 = vpop.f32.mrb[60].mxu1 }
 0x73a   :  { %v12626_v22 = vadd.f32 %v9190_v24, %v12450_v8  ;;  %v5609_v55 = vpop.f32.mrb[61].mxu1 }
 0x73b   :  { %v12629_v52 = vadd.f32 %v5609_v55, %v12452_v58  ;;  %v5866_v18 = vadd.f32 %v12617_v32, %v5865_v56  ;;  %v9191_v47 = vpop.f32.mrb[62].mxu1  ;;  %v16858_v55 = vld [vmem:[#allocation25_spill] sm:$0xff] }
 0x73c   :  { %v12633_v31 = vadd.f32 %v9191_v47, %v12454_v62  ;;  %v5612_v39 = vpop.f32.mrb[63].mxu1 }
 0x73d   :  { %v5867_v16 = vadd.f32 %v12629_v52, %v5866_v18  ;;  %v12637_v43 = vadd.f32 %v5612_v39, %v12457_v2  ;;  %v16860_v39 = vld [vmem:[#allocation26_spill] sm:$0xff] }
 0x73f   :  { %v5868_v44 = vadd.f32 %v12637_v43, %v5867_v16 }
 0x741   :  { %v5869_v8 = vadd.f32 %v12626_v22, %v5868_v44  ;;  %v9194_v0 = vpop.f32.mrb[0].mxu1 }
 0x742   :  { %v12642_v58 = vadd.f32 %v9194_v0, %v16844_v17  ;;  %v5625_v26 = vpop.f32.mrb[1].mxu1  ;;  %v16862_v0 = vld [vmem:[#allocation45_spill] sm:$0xff] }
 0x743   :  { %v12645_v15 = vadd.f32 %v5625_v26, %v16846_v36  ;;  %v5870_v62 = vadd.f32 %v12633_v31, %v5869_v8  ;;  %v9195_v40 = vpop.f32.mrb[2].mxu1 }
 0x744   :  { %16845 = vst [vmem:[#allocation65_spill] sm:$0xff] %v12642_v58  ;;  %v12649_v28 = vadd.f32 %v9195_v40, %v16847_v7  ;;  %v5628_v2 = vpop.f32.mrb[3].mxu1 }
 0x745   :  { %v5871_v49 = vadd.f32 %v12645_v15, %v5870_v62  ;;  %v12653_v10 = vadd.f32 %v5628_v2, %v16849_v41  ;;  %v16864_v62 = vld [vmem:[#allocation46_spill] sm:$0xff]  ;;  %v16866_v41 = vld [vmem:[#allocation51_spill] sm:$0xff] }
 0x746   :  { %16848 = vst [vmem:[#allocation66_spill] sm:$0xff] %v12649_v28 }
 0x747   :  { %v5872_v51 = vadd.f32 %v12653_v10, %v5871_v49 }
 0x749   :  { %v5873_v34 = vadd.f32 %v12642_v58, %v5872_v51  ;;  %v9198_v29 = vpop.f32.mrb[4].mxu1 }
 0x74a   :  { %v12658_v54 = vadd.f32 %v9198_v29, %v16850_v61  ;;  %v5641_v27 = vpop.f32.mrb[5].mxu1  ;;  %v16868_v29 = vld [vmem:[#allocation23_spill] sm:$0xff] }
 0x74b   :  { %v12661_v25 = vadd.f32 %v5641_v27, %v16852_v48  ;;  %v5874_v46 = vadd.f32 %v12649_v28, %v5873_v34  ;;  %v9199_v45 = vpop.f32.mrb[6].mxu1 }
 0x74c   :  { %16851 = vst [vmem:[#allocation34_spill] sm:$0xff] %v12658_v54  ;;  %v12665_v35 = vadd.f32 %v9199_v45, %v16854_v60  ;;  %v5644_v23 = vpop.f32.mrb[7].mxu1 }
 0x74d   :  { %16853 = vst [vmem:[#allocation39_spill] sm:$0xff] %v12661_v25  ;;  %v5875_v14 = vadd.f32 %v12661_v25, %v5874_v46  ;;  %v12669_v4 = vadd.f32 %v5644_v23, %v16856_v13  ;;  %v16870_v46 = vld [vmem:[#allocation73_spill] sm:$0xff]  ;;  %v16902_v25 = vld [vmem:[#allocation95_spill] sm:$0xff] }
 0x74e   :  { %16855 = vst [vmem:[#allocation17_spill] sm:$0xff] %v12665_v35 }
 0x74f   :  { %16857 = vst [vmem:[#allocation42_spill] sm:$0xff] %v12669_v4  ;;  %v5876_v38 = vadd.f32 %v12669_v4, %v5875_v14  ;;  %v16872_v14 = vld [vmem:[#allocation74_spill] sm:$0xff] }
 0x750   :  { %v16901_v4 = vld [vmem:[#allocation94_spill] sm:$0xff] }
 0x751   :  { %v5877_v56 = vadd.f32 %v12658_v54, %v5876_v38  ;;  %v9202_v24 = vpop.f32.mrb[8].mxu1 }
 0x752   :  { %v12674_v18 = vadd.f32 %v9202_v24, %v16858_v55  ;;  %v5657_v47 = vpop.f32.mrb[9].mxu1  ;;  %v16874_v55 = vld [vmem:[#allocation75_spill] sm:$0xff] }
 0x753   :  { %v12677_v16 = vadd.f32 %v5657_v47, %v16860_v39  ;;  %v5878_v44 = vadd.f32 %v12665_v35, %v5877_v56  ;;  %v9203_v8 = vpop.f32.mrb[10].mxu1 }
 0x754   :  { %16859 = vst [vmem:[#allocation20_spill] sm:$0xff] %v12674_v18  ;;  %v12681_v17 = vadd.f32 %v9203_v8, %v16862_v0  ;;  %v5660_v26 = vpop.f32.mrb[11].mxu1 }
 0x755   :  { %16861 = vst [vmem:[#allocation47_spill] sm:$0xff] %v12677_v16  ;;  %v5879_v36 = vadd.f32 %v12677_v16, %v5878_v44  ;;  %v12685_v40 = vadd.f32 %v5660_v26, %v16864_v62  ;;  %v16876_v44 = vld [vmem:[#allocation76_spill] sm:$0xff]  ;;  %v16898_v16 = vld [vmem:[#allocation91_spill] sm:$0xff] }
 0x756   :  { %16863 = vst [vmem:[#allocation48_spill] sm:$0xff] %v12681_v17 }
 0x757   :  { %16865 = vst [vmem:[#allocation52_spill] sm:$0xff] %v12685_v40  ;;  %v5880_v7 = vadd.f32 %v12685_v40, %v5879_v36  ;;  %v16878_v36 = vld [vmem:[#allocation77_spill] sm:$0xff]  ;;  %v16897_v40 = vld [vmem:[#allocation90_spill] sm:$0xff] }
 0x759   :  { %v5881_v2 = vadd.f32 %v12674_v18, %v5880_v7  ;;  %v9206_v49 = vpop.f32.mrb[12].mxu1 }
 0x75a   :  { %v12690_v51 = vadd.f32 %v9206_v49, %v16866_v41  ;;  %v5673_v34 = vpop.f32.mrb[13].mxu1  ;;  %v16880_v49 = vld [vmem:[#allocation78_spill] sm:$0xff] }
 0x75b   :  { %v12693_v61 = vadd.f32 %v5673_v34, %v16868_v29  ;;  %v5882_v27 = vadd.f32 %v12681_v17, %v5881_v2  ;;  %v9207_v48 = vpop.f32.mrb[14].mxu1 }
 0x75c   :  { %16867 = vst [vmem:[#allocation53_spill] sm:$0xff] %v12690_v51  ;;  %v12697_v45 = vadd.f32 %v9207_v48, %v16870_v46  ;;  %v5676_v60 = vpop.f32.mrb[15].mxu1  ;;  %v16882_v48 = vld [vmem:[#allocation79_spill] sm:$0xff] }
 0x75d   :  { %16869 = vst [vmem:[#allocation57_spill] sm:$0xff] %v12693_v61  ;;  %v5883_v23 = vadd.f32 %v12693_v61, %v5882_v27  ;;  %v12701_v13 = vadd.f32 %v5676_v60, %v16872_v14  ;;  %v16894_v61 = vld [vmem:[#allocation87_spill] sm:$0xff] }
 0x75e   :  { %16871 = vst [vmem:[#allocation58_spill] sm:$0xff] %v12697_v45 }
 0x75f   :  { %16873 = vst [vmem:[#allocation61_spill] sm:$0xff] %v12701_v13  ;;  %v5884_v38 = vadd.f32 %v12701_v13, %v5883_v23  ;;  %v16883_v23 = vld [vmem:[#allocation80_spill] sm:$0xff] }
 0x761   :  { %v5885_v56 = vadd.f32 %v12690_v51, %v5884_v38  ;;  %v9210_v24 = vpop.f32.mrb[16].mxu1 }
 0x762   :  { %v12706_v47 = vadd.f32 %v9210_v24, %v16874_v55  ;;  %v5689_v39 = vpop.f32.mrb[17].mxu1  ;;  %v16885_v24 = vld [vmem:[#allocation81_spill] sm:$0xff] }
 0x763   :  { %v12709_v8 = vadd.f32 %v5689_v39, %v16876_v44  ;;  %v5886_v0 = vadd.f32 %v12697_v45, %v5885_v56  ;;  %v9211_v26 = vpop.f32.mrb[18].mxu1  ;;  %v16892_v45 = vld [vmem:[#allocation85_spill] sm:$0xff] }
 0x764   :  { %16875 = vst [vmem:[#allocation62_spill] sm:$0xff] %v12706_v47  ;;  %v12713_v62 = vadd.f32 %v9211_v26, %v16878_v36  ;;  %v5692_v7 = vpop.f32.mrb[19].mxu1 }
 0x765   :  { %16877 = vst [vmem:[#allocation44_spill] sm:$0xff] %v12709_v8  ;;  %v5887_v2 = vadd.f32 %v12709_v8, %v5886_v0  ;;  %v12717_v41 = vadd.f32 %v5692_v7, %v16880_v49  ;;  %v16886_v0 = vld [vmem:[#allocation60_spill] sm:$0xff]  ;;  %v16887_v49 = vld [vmem:[#allocation63_spill] sm:$0xff] }
 0x766   :  { %16879 = vst [vmem:[#allocation69_spill] sm:$0xff] %v12713_v62 }
 0x767   :  { %16881 = vst [vmem:[#allocation70_spill] sm:$0xff] %v12717_v41  ;;  %v5888_v34 = vadd.f32 %v12717_v41, %v5887_v2  ;;  %v16890_v41 = vld [vmem:[#allocation64_spill] sm:$0xff] }
 0x769   :  { %v5889_v29 = vadd.f32 %v12706_v47, %v5888_v34  ;;  %v9214_v27 = vpop.f32.mrb[20].mxu1 }
 0x76a   :  { %v12722_v46 = vadd.f32 %v9214_v27, %v16882_v48  ;;  %v5705_v60 = vpop.f32.mrb[21].mxu1  ;;  %v16888_v48 = vld [vmem:[#allocation82_spill] sm:$0xff] }
 0x76b   :  { %v12725_v14 = vadd.f32 %v5705_v60, %v16883_v23  ;;  %v5890_v38 = vadd.f32 %v12713_v62, %v5889_v29  ;;  %v9215_v56 = vpop.f32.mrb[22].mxu1  ;;  %v16889_v62 = vld [vmem:[#allocation83_spill] sm:$0xff] }
 0x76c   :  { %v12729_v55 = vadd.f32 %v9215_v56, %v16885_v24  ;;  %v5708_v39 = vpop.f32.mrb[23].mxu1 }
 0x76d   :  { %16884 = vst [vmem:[#allocation71_spill] sm:$0xff] %v12725_v14  ;;  %v5891_v44 = vadd.f32 %v12725_v14, %v5890_v38  ;;  %v9295_v26 = vadd.f32 %v5708_v39, %v16886_v0  ;;  %v16891_v0 = vld [vmem:[#allocation84_spill] sm:$0xff] }
 0x76f   :  { %v5892_v36 = vadd.f32 %v9295_v26, %v5891_v44 }
 0x771   :  { %v5893_v7 = vadd.f32 %v12722_v46, %v5892_v36  ;;  %v9218_v2 = vpop.f32.mrb[24].mxu1 }
 0x772   :  { %v9296_v34 = vadd.f32 %v9218_v2, %v16887_v49  ;;  %v5721_v27 = vpop.f32.mrb[25].mxu1 }
 0x773   :  { %v9297_v60 = vadd.f32 %v5721_v27, %v16888_v48  ;;  %v5894_v29 = vadd.f32 %v12729_v55, %v5893_v7  ;;  %v9219_v23 = vpop.f32.mrb[26].mxu1  ;;  %v16893_v27 = vld [vmem:[#allocation86_spill] sm:$0xff] }
 0x774   :  { %v9298_v56 = vadd.f32 %v9219_v23, %v16889_v62  ;;  %v5724_v24 = vpop.f32.mrb[27].mxu1 }
 0x775   :  { %v5895_v47 = vadd.f32 %v9297_v60, %v5894_v29  ;;  %v9299_v38 = vadd.f32 %v5724_v24, %v16890_v41  ;;  %v16895_v41 = vld [vmem:[#allocation88_spill] sm:$0xff]  ;;  %v16896_v24 = vld [vmem:[#allocation89_spill] sm:$0xff] }
 0x777   :  { %v5896_v14 = vadd.f32 %v9299_v38, %v5895_v47 }
 0x779   :  { %v5897_v39 = vadd.f32 %v9296_v34, %v5896_v14  ;;  %v9222_v44 = vpop.f32.mrb[28].mxu1 }
 0x77a   :  { %v9300_v36 = vadd.f32 %v9222_v44, %v16891_v0  ;;  %v5737_v8 = vpop.f32.mrb[29].mxu1 }
 0x77b   :  { %v9301_v2 = vadd.f32 %v5737_v8, %v16892_v45  ;;  %v5898_v49 = vadd.f32 %v9298_v56, %v5897_v39  ;;  %v9223_v51 = vpop.f32.mrb[30].mxu1 }
 0x77c   :  { %v9302_v48 = vadd.f32 %v9223_v51, %v16893_v27  ;;  %v5740_v7 = vpop.f32.mrb[31].mxu1 }
 0x77d   :  { %v5899_v13 = vadd.f32 %v9301_v2, %v5898_v49  ;;  %v9303_v62 = vadd.f32 %v5740_v7, %v16894_v61  ;;  %v16899_v61 = vld [vmem:[#allocation92_spill] sm:$0xff] }
 0x77f   :  { %v5900_v23 = vadd.f32 %v9303_v62, %v5899_v13 }
 0x781   :  { %v5901_v29 = vadd.f32 %v9300_v36, %v5900_v23  ;;  %v9226_v17 = vpop.f32.mrb[32].mxu1  ;;  %v16900_v23 = vld [vmem:[#allocation93_spill] sm:$0xff] }
 0x782   :  { %v9304_v47 = vadd.f32 %v9226_v17, %v16895_v41  ;;  %v5753_v14 = vpop.f32.mrb[33].mxu1 }
 0x783   :  { %v9305_v18 = vadd.f32 %v5753_v14, %v16896_v24  ;;  %v5902_v44 = vadd.f32 %v9302_v48, %v5901_v29  ;;  %v9227_v0 = vpop.f32.mrb[34].mxu1 }
 0x784   :  { %v9306_v45 = vadd.f32 %v9227_v0, %v16897_v40  ;;  %v5756_v8 = vpop.f32.mrb[35].mxu1 }
 0x785   :  { %v5903_v39 = vadd.f32 %v9305_v18, %v5902_v44  ;;  %v9307_v51 = vadd.f32 %v5756_v8, %v16898_v16 }
 0x787   :  { %v5904_v27 = vadd.f32 %v9307_v51, %v5903_v39 }
 0x789   :  { %v5905_v49 = vadd.f32 %v9304_v47, %v5904_v27  ;;  %v9230_v35 = vpop.f32.mrb[36].mxu1 }
 0x78a   :  { %v9308_v13 = vadd.f32 %v9230_v35, %v16899_v61  ;;  %v5769_v7 = vpop.f32.mrb[37].mxu1 }
 0x78b   :  { %v9309_v54 = vadd.f32 %v5769_v7, %v16900_v23  ;;  %v5906_v17 = vadd.f32 %v9306_v45, %v5905_v49  ;;  %v9231_v41 = vpop.f32.mrb[38].mxu1 }
 0x78c   :  { %v9310_v14 = vadd.f32 %v9231_v41, %v16901_v4  ;;  %v5772_v29 = vpop.f32.mrb[39].mxu1 }
 0x78d   :  { %v5907_v24 = vadd.f32 %v9309_v54, %v5906_v17  ;;  %v9311_v40 = vadd.f32 %v5772_v29, %v16902_v25 }
 0x78f   :  { %v5908_v0 = vadd.f32 %v9311_v40, %v5907_v24 }
 0x791   :  { %v5909_v44 = vadd.f32 %v9308_v13, %v5908_v0 }
 0x793   :  { %v5910_v28 = vadd.f32 %v9310_v14, %v5909_v44 }
 0x795   :  { %v5911_v16 = vrot.slane %v5910_v28, 4 }
 0x797   :  { %v5912_v8 = vadd.f32 %v5911_v16, %v5910_v28 }
 0x799   :  { %v5913_v39 = vrot.slane %v5912_v8, 2 }
 0x79b   :  { %v5914_v27 = vadd.f32 %v5913_v39, %v5912_v8 }
 0x79d   :  { %v5915_v58 = vrot.slane %v5914_v27, 1 }
 0x79f   :  { %v5916_v35 = vadd.f32 %v5915_v58, %v5914_v27 }
 0x7a1   :  { %v12751_v61 = vmul.f32 0.001953125, %v5916_v35 }
 0x7a3   :  { %v12754_v49 = vsub.f32 %v9295_v26, %v12751_v61  ;;  %v12758_v4 = vsub.f32 %v12722_v46, %v12751_v61  ;;  %v12762_v25 = vsub.f32 %v12729_v55, %v12751_v61  ;;  %v12765_v7 = vsub.f32 %v9297_v60, %v12751_v61 }
 0x7a4   :  { %v12768_v28 = vsub.f32 %v9299_v38, %v12751_v61  ;;  %v12771_v58 = vsub.f32 %v9296_v34, %v12751_v61  ;;  %v12774_v26 = vsub.f32 %v9298_v56, %v12751_v61  ;;  %v12777_v23 = vsub.f32 %v9301_v2, %v12751_v61 }
 0x7a5   :  { %v12780_v46 = vsub.f32 %v9303_v62, %v12751_v61  ;;  %v12783_v55 = vsub.f32 %v9300_v36, %v12751_v61  ;;  %v12786_v60 = vsub.f32 %v9302_v48, %v12751_v61  ;;  %v12789_v38 = vsub.f32 %v9305_v18, %v12751_v61 }
 0x7a6   :  { %v12792_v34 = vsub.f32 %v9307_v51, %v12751_v61  ;;  %v12795_v56 = vsub.f32 %v9304_v47, %v12751_v61  ;;  %v12798_v2 = vsub.f32 %v9306_v45, %v12751_v61  ;;  %v12801_v62 = vsub.f32 %v9309_v54, %v12751_v61 }
 0x7a7   :  { %v12804_v36 = vsub.f32 %v9311_v40, %v12751_v61  ;;  %v12807_v48 = vsub.f32 %v9308_v13, %v12751_v61  ;;  %v12810_v18 = vsub.f32 %v9310_v14, %v12751_v61  ;;  %v12814_v51 = vsub.f32 %v12550_v59, %v12751_v61 }
 0x7a8   :  { %v12818_v47 = vsub.f32 %v12556_v30, %v12751_v61  ;;  %v12822_v54 = vsub.f32 %v12547_v5, %v12751_v61  ;;  %v12830_v17 = vsub.f32 %v12553_v6, %v12751_v61  ;;  %v12834_v59 = vsub.f32 %v12565_v37, %v12751_v61 }
 0x7a9   :  { %v5982_v45 = vmul.f32 %v12814_v51, %v12814_v51  ;;  %v12840_v5 = vsub.f32 %v12573_v63, %v12751_v61  ;;  %v12846_v6 = vsub.f32 %v12562_v42, %v12751_v61  ;;  %v12852_v40 = vsub.f32 %v12569_v20, %v12751_v61 }
 0x7aa   :  { %v5983_v13 = vmul.f32 %v12818_v47, %v12818_v47  ;;  %v5984_v30 = vmul.f32 %v12822_v54, %v12822_v54  ;;  %v5985_v14 = vmul.f32 %v12830_v17, %v12830_v17  ;;  %v5986_v37 = vmul.f32 %v12834_v59, %v12834_v59 }
 0x7ab   :  { %v5987_v63 = vmul.f32 %v12840_v5, %v12840_v5  ;;  %v12858_v44 = vsub.f32 %v12581_v21, %v12751_v61  ;;  %v5988_v42 = vmul.f32 %v12846_v6, %v12846_v6  ;;  %v12864_v8 = vsub.f32 %v12589_v9, %v12751_v61 }
 0x7ac   :  { %v6046_v41 = vadd.f32 %v5983_v13, %v5982_v45  ;;  %v5989_v20 = vmul.f32 %v12852_v40, %v12852_v40  ;;  %v12870_v27 = vsub.f32 %v12578_v50, %v12751_v61  ;;  %v12876_v45 = vsub.f32 %v12585_v1, %v12751_v61 }
 0x7ad   :  { %v5990_v21 = vmul.f32 %v12858_v44, %v12858_v44  ;;  %v5991_v9 = vmul.f32 %v12864_v8, %v12864_v8 }
 0x7ae   :  { %v6047_v29 = vadd.f32 %v6046_v41, %v5984_v30  ;;  %16903 = vst [vmem:[#allocation72_spill] sm:$0xff] %v12870_v27  ;;  %16904 = vst [vmem:[#allocation29_spill] sm:$0xff] %v12876_v45  ;;  %v12882_v30 = vsub.f32 %v12597_v33, %v12751_v61  ;;  %v5992_v50 = vmul.f32 %v12870_v27, %v12870_v27  ;;  %v9865_v27 = vld [vmem:[#allocation9 + $0x4] ss:$8 sps:$4 sm:$0xff]  }
 0x7af   :  { %v5993_v1 = vmul.f32 %v12876_v45, %v12876_v45  ;;  %6449 = vmatprep.subr.bf16.mxu0 %v9865_v27 }
 0x7b0   :  { %v6048_v24 = vadd.f32 %v6047_v29, %v5985_v14  ;;  %16905 = vst [vmem:[#allocation54_spill] sm:$0xff] %v12882_v30  ;;  %v12888_v14 = vsub.f32 %v12605_v11, %v12751_v61  ;;  %v5994_v33 = vmul.f32 %v12882_v30, %v12882_v30 }
 0x7b2   :  { %v6049_v0 = vadd.f32 %v6048_v24, %v5986_v37  ;;  %16906 = vst [vmem:[#allocation30_spill] sm:$0xff] %v12888_v14  ;;  %v12894_v37 = vsub.f32 %v12594_v12, %v12751_v61  ;;  %v5995_v11 = vmul.f32 %v12888_v14, %v12888_v14 }
 0x7b4   :  { %v6050_v16 = vadd.f32 %v6049_v0, %v5987_v63  ;;  %16907 = vst [vmem:[#allocation21_spill] sm:$0xff] %v12894_v37  ;;  %v12900_v63 = vsub.f32 %v12601_v3, %v12751_v61  ;;  %v5996_v12 = vmul.f32 %v12894_v37, %v12894_v37 }
 0x7b6   :  { %v6051_v39 = vadd.f32 %v6050_v16, %v5988_v42  ;;  %16908 = vst [vmem:[#allocation40_spill] sm:$0xff] %v12900_v63  ;;  %v12906_v42 = vsub.f32 %v12613_v57, %v12751_v61  ;;  %v5997_v3 = vmul.f32 %v12900_v63, %v12900_v63 }
 0x7b8   :  { %v6052_v35 = vadd.f32 %v6051_v39, %v5989_v20  ;;  %v12912_v20 = vsub.f32 %v12621_v53, %v12751_v61  ;;  %v5998_v57 = vmul.f32 %v12906_v42, %v12906_v42 }
 0x7ba   :  { %v6053_v13 = vadd.f32 %v6052_v35, %v5990_v21  ;;  %v12918_v21 = vsub.f32 %v12610_v19, %v12751_v61  ;;  %v5999_v53 = vmul.f32 %v12912_v20, %v12912_v20 }
 0x7bc   :  { %v6054_v41 = vadd.f32 %v6053_v13, %v5991_v9  ;;  %16909 = vst [vmem:[#allocation37_spill] sm:$0xff] %v12918_v21  ;;  %v12924_v9 = vsub.f32 %v12617_v32, %v12751_v61  ;;  %v6000_v19 = vmul.f32 %v12918_v21, %v12918_v21 }
 0x7be   :  { %v6055_v29 = vadd.f32 %v6054_v41, %v5992_v50  ;;  %16910 = vst [vmem:[#allocation43_spill] sm:$0xff] %v12924_v9  ;;  %v12930_v50 = vsub.f32 %v12629_v52, %v12751_v61  ;;  %v6001_v32 = vmul.f32 %v12924_v9, %v12924_v9  ;;  %v16942_v9 = vld [vmem:[#allocation19_spill] sm:$0xff] }
 0x7c0   :  { %v6056_v24 = vadd.f32 %v6055_v29, %v5993_v1  ;;  %16911 = vst [vmem:[#allocation24_spill] sm:$0xff] %v12930_v50  ;;  %v12936_v1 = vsub.f32 %v12637_v43, %v12751_v61  ;;  %v6002_v52 = vmul.f32 %v12930_v50, %v12930_v50  ;;  %v6116_v50 = vld [vmem:[#allocation11] sm:$0x1] }
 0x7c2   :  { %v6057_v0 = vadd.f32 %v6056_v24, %v5994_v33  ;;  %16912 = vst [vmem:[#allocation41_spill] sm:$0xff] %v12936_v1  ;;  %v12942_v33 = vsub.f32 %v12626_v22, %v12751_v61  ;;  %v6003_v43 = vmul.f32 %v12936_v1, %v12936_v1 }
 0x7c4   :  { %v6058_v16 = vadd.f32 %v6057_v0, %v5995_v11  ;;  %16913 = vst [vmem:[#allocation35_spill] sm:$0xff] %v12942_v33  ;;  %v12948_v11 = vsub.f32 %v12633_v31, %v12751_v61  ;;  %v6004_v22 = vmul.f32 %v12942_v33, %v12942_v33 }
 0x7c6   :  { %v6059_v39 = vadd.f32 %v6058_v16, %v5996_v12  ;;  %16914 = vst [vmem:[#allocation49_spill] sm:$0xff] %v12948_v11  ;;  %v12954_v12 = vsub.f32 %v12645_v15, %v12751_v61  ;;  %v6005_v31 = vmul.f32 %v12948_v11, %v12948_v11  ;;  %v9880_v11 = vld [vmem:[#allocation9 + $0x54] ss:$8 sps:$4 sm:$0xff]  }
 0x7c8   :  { %v6060_v35 = vadd.f32 %v6059_v39, %v5997_v3  ;;  %16915 = vst [vmem:[#allocation50_spill] sm:$0xff] %v12954_v12  ;;  %v12960_v3 = vsub.f32 %v12653_v10, %v12751_v61  ;;  %v6006_v15 = vmul.f32 %v12954_v12, %v12954_v12 }
 0x7ca   :  { %v6061_v13 = vadd.f32 %v6060_v35, %v5998_v57  ;;  %16916 = vst [vmem:[#allocation55_spill] sm:$0xff] %v12960_v3  ;;  %v16917_v57 = vld [vmem:[#allocation65_spill] sm:$0xff]  ;;  %v6007_v10 = vmul.f32 %v12960_v3, %v12960_v3 }
 0x7cb   :  { %v12966_v35 = vsub.f32 %v16917_v57, %v12751_v61 }
 0x7cc   :  { %v6062_v41 = vadd.f32 %v6061_v13, %v5999_v53  ;;  %v16919_v13 = vld [vmem:[#allocation66_spill] sm:$0xff] }
 0x7cd   :  { %16918 = vst [vmem:[#allocation56_spill] sm:$0xff] %v12966_v35 }
 0x7ce   :  { %v6063_v29 = vadd.f32 %v6062_v41, %v6000_v19  ;;  %v12972_v19 = vsub.f32 %v16919_v13, %v12751_v61 }
 0x7d0   :  { %v6064_v24 = vadd.f32 %v6063_v29, %v6001_v32  ;;  %16920 = vst [vmem:[#allocation59_spill] sm:$0xff] %v12972_v19  ;;  %v16921_v32 = vld [vmem:[#allocation39_spill] sm:$0xff] }
 0x7d1   :  { %v12978_v29 = vsub.f32 %v16921_v32, %v12751_v61  ;;  %v16929_v32 = vld [vmem:[#allocation47_spill] sm:$0xff] }
 0x7d2   :  { %v6065_v0 = vadd.f32 %v6064_v24, %v6002_v52  ;;  %v6008_v52 = vmul.f32 %v12966_v35, %v12966_v35 }
 0x7d3   :  { %16922 = vst [vmem:[#allocation67_spill] sm:$0xff] %v12978_v29  ;;  %v6010_v57 = vmul.f32 %v12978_v29, %v12978_v29 }
 0x7d4   :  { %v6066_v16 = vadd.f32 %v6065_v0, %v6003_v43  ;;  %v16923_v43 = vld [vmem:[#allocation42_spill] sm:$0xff] }
 0x7d5   :  { %v12984_v0 = vsub.f32 %v16923_v43, %v12751_v61  ;;  %v13002_v43 = vsub.f32 %v16929_v32, %v12751_v61  ;;  %v16932_v32 = vld [vmem:[#allocation48_spill] sm:$0xff] }
 0x7d6   :  { %v6067_v39 = vadd.f32 %v6066_v16, %v6004_v22  ;;  %v6009_v22 = vmul.f32 %v12972_v19, %v12972_v19  ;;  %v13020_v14 = vsub.f32 %v16932_v32, %v12751_v61  ;;  %v9863_v32 = vld [vmem:[#allocation9] ss:$8 sps:$4 sm:$0xff]  }
 0x7d7   :  { %16924 = vst [vmem:[#allocation68_spill] sm:$0xff] %v12984_v0  ;;  %6450 = vmatpush1.bf16.msra.mxu0 %v9863_v32  ;;  %v16938_v32 = vld [vmem:[#allocation70_spill] sm:$0xff] }
 0x7d8   :  { %v6068_v53 = vadd.f32 %v6067_v39, %v6005_v31  ;;  %v16925_v31 = vld [vmem:[#allocation34_spill] sm:$0xff] }
 0x7d9   :  { %v12990_v39 = vsub.f32 %v16925_v31, %v12751_v61  ;;  %v16930_v31 = vld [vmem:[#allocation52_spill] sm:$0xff] }
 0x7da   :  { %v6069_v41 = vadd.f32 %v6068_v53, %v6006_v15  ;;  %v16927_v53 = vld [vmem:[#allocation17_spill] sm:$0xff]  ;;  %v13008_v63 = vsub.f32 %v16930_v31, %v12751_v61 }
 0x7db   :  { %16926 = vst [vmem:[#allocation96_spill] sm:$0xff] %v12990_v39  ;;  %v12996_v13 = vsub.f32 %v16927_v53, %v12751_v61  ;;  %v16931_v53 = vld [vmem:[#allocation20_spill] sm:$0xff]  ;;  %v16933_v31 = vld [vmem:[#allocation57_spill] sm:$0xff] }
 0x7dc   :  { %v6070_v24 = vadd.f32 %v6069_v41, %v6007_v10  ;;  %v6011_v10 = vmul.f32 %v12984_v0, %v12984_v0  ;;  %v13014_v37 = vsub.f32 %v16931_v53, %v12751_v61  ;;  %v13026_v30 = vsub.f32 %v16933_v31, %v12751_v61  ;;  %v16934_v53 = vld [vmem:[#allocation61_spill] sm:$0xff] }
 0x7dd   :  { %16928 = vst [vmem:[#allocation97_spill] sm:$0xff] %v12996_v13  ;;  %v13032_v45 = vsub.f32 %v16934_v53, %v12751_v61  ;;  %v9871_v0 = vld [vmem:[#allocation9 + $0x24] ss:$8 sps:$4 sm:$0xff]  }
 0x7de   :  { %v6071_v16 = vadd.f32 %v6070_v24, %v6008_v52  ;;  %v6012_v52 = vmul.f32 %v12990_v39, %v12990_v39  ;;  %v6018_v31 = vmul.f32 %v13026_v30, %v13026_v30 }
 0x7e0   :  { %v6072_v15 = vadd.f32 %v6071_v16, %v6009_v22  ;;  %v6013_v22 = vmul.f32 %v12996_v13, %v12996_v13  ;;  %v9868_v13 = vld [vmem:[#allocation9 + $0x14] ss:$8 sps:$4 sm:$0xff]  }
 0x7e1   :  { %6451 = vmatprep.subr.bf16.mxu0 %v9868_v13  ;;  %v9874_v13 = vld [vmem:[#allocation9 + $0x34] ss:$8 sps:$4 sm:$0xff]  }
 0x7e2   :  { %v6073_v41 = vadd.f32 %v6072_v15, %v6010_v57  ;;  %v6014_v57 = vmul.f32 %v13002_v43, %v13002_v43 }
 0x7e4   :  { %v6074_v24 = vadd.f32 %v6073_v41, %v6011_v10  ;;  %v6015_v10 = vmul.f32 %v13008_v63, %v13008_v63 }
 0x7e6   :  { %v6075_v16 = vadd.f32 %v6074_v24, %v6012_v52  ;;  %v6016_v52 = vmul.f32 %v13014_v37, %v13014_v37 }
 0x7e8   :  { %v6076_v15 = vadd.f32 %v6075_v16, %v6013_v22  ;;  %v6017_v22 = vmul.f32 %v13020_v14, %v13020_v14 }
 0x7ea   :  { %v6077_v41 = vadd.f32 %v6076_v15, %v6014_v57  ;;  %v16935_v57 = vld [vmem:[#allocation53_spill] sm:$0xff] }
 0x7eb   :  { %v13038_v15 = vsub.f32 %v16935_v57, %v12751_v61  ;;  %v16937_v57 = vld [vmem:[#allocation44_spill] sm:$0xff] }
 0x7ec   :  { %v6078_v24 = vadd.f32 %v6077_v41, %v6015_v10  ;;  %v9866_v10 = vld [vmem:[#allocation9 + $0x10] ss:$8 sps:$4 sm:$0xff]   ;;  %v13050_v29 = vsub.f32 %v16937_v57, %v12751_v61 }
 0x7ed   :  { %v16936_v41 = vld [vmem:[#allocation58_spill] sm:$0xff]  ;;  %6452 = vmatpush1.bf16.msra.mxu0 %v9866_v10 }
 0x7ee   :  { %v6079_v16 = vadd.f32 %v6078_v24, %v6016_v52  ;;  %v13044_v53 = vsub.f32 %v16936_v41, %v12751_v61  ;;  %v6019_v52 = vmul.f32 %v13032_v45, %v13032_v45  ;;  %v13056_v41 = vsub.f32 %v16938_v32, %v12751_v61  ;;  %6453 = vmatprep.subr.bf16.mxu0 %v9871_v0  ;;  %v9872_v10 = vld [vmem:[#allocation9 + $0x30] ss:$8 sps:$4 sm:$0xff]   ;;  %v9877_v0 = vld [vmem:[#allocation9 + $0x44] ss:$8 sps:$4 sm:$0xff]  }
 0x7ef   :  { %v6022_v35 = vmul.f32 %v13050_v29, %v13050_v29 }
 0x7f0   :  { %v6080_v39 = vadd.f32 %v6079_v16, %v6017_v22  ;;  %v6020_v22 = vmul.f32 %v13038_v15, %v13038_v15  ;;  %v9869_v16 = vld [vmem:[#allocation9 + $0x20] ss:$8 sps:$4 sm:$0xff]   ;;  %v6021_v19 = vmul.f32 %v13044_v53, %v13044_v53  ;;  %v6023_v3 = vmul.f32 %v13056_v41, %v13056_v41 }
 0x7f1   :  { %6454 = vmatpush1.bf16.msra.mxu0 %v9869_v16  ;;  %v9875_v16 = vld [vmem:[#allocation9 + $0x40] ss:$8 sps:$4 sm:$0xff]  }
 0x7f2   :  { %v6081_v24 = vadd.f32 %v6080_v39, %v6018_v31  ;;  %v16939_v31 = vld [vmem:[#allocation62_spill] sm:$0xff]  ;;  %6455 = vmatprep.subr.bf16.mxu0 %v9874_v13 }
 0x7f3   :  { %v13062_v57 = vsub.f32 %v16939_v31, %v12751_v61 }
 0x7f4   :  { %v6082_v27 = vadd.f32 %v6081_v24, %v6019_v52  ;;  %v16940_v24 = vld [vmem:[#allocation69_spill] sm:$0xff] }
 0x7f5   :  { %v13068_v32 = vsub.f32 %v16940_v24, %v12751_v61  ;;  %v6024_v12 = vmul.f32 %v13062_v57, %v13062_v57  ;;  %6456 = vmatpush1.bf16.msra.mxu0 %v9872_v10  ;;  %v6028_v10 = vmul.f32 %v12758_v4, %v12758_v4 }
 0x7f6   :  { %v6083_v39 = vadd.f32 %v6082_v27, %v6020_v22  ;;  %v16941_v27 = vld [vmem:[#allocation71_spill] sm:$0xff]  ;;  %6457 = vmatprep.subr.bf16.mxu0 %v9877_v0  ;;  %v6029_v0 = vmul.f32 %v12762_v25, %v12762_v25 }
 0x7f7   :  { %v13074_v31 = vsub.f32 %v16941_v27, %v12751_v61  ;;  %v6027_v61 = vmul.f32 %v12754_v49, %v12754_v49 }
 0x7f8   :  { %v6084_v52 = vadd.f32 %v6083_v39, %v6021_v19  ;;  %v6025_v39 = vmul.f32 %v13068_v32, %v13068_v32 }
 0x7f9   :  { %6458 = vmatpush1.bf16.msra.mxu0 %v9875_v16  ;;  %v6030_v16 = vmul.f32 %v12765_v7, %v12765_v7 }
 0x7fa   :  { %v6085_v22 = vadd.f32 %v6084_v52, %v6022_v35  ;;  %v6026_v35 = vmul.f32 %v13074_v31, %v13074_v31  ;;  %v9878_v52 = vld [vmem:[#allocation9 + $0x50] ss:$8 sps:$4 sm:$0xff]   ;;  %6459 = vmatprep.subr.bf16.mxu0 %v9880_v11  ;;  %v6031_v11 = vmul.f32 %v12768_v28, %v12768_v28 }
 0x7fc   :  { %v6086_v19 = vadd.f32 %v6085_v22, %v6023_v3  ;;  %v9883_v3 = vld [vmem:[#allocation9 + $0x64] ss:$8 sps:$4 sm:$0xff]  }
 0x7fd   :  { %6460 = vmatpush1.bf16.msra.mxu0 %v9878_v52  ;;  %v6032_v52 = vmul.f32 %v12771_v58, %v12771_v58 }
 0x7fe   :  { %v6087_v24 = vadd.f32 %v6086_v19, %v6024_v12  ;;  %v9881_v12 = vld [vmem:[#allocation9 + $0x60] ss:$8 sps:$4 sm:$0xff]   ;;  %6461 = vmatprep.subr.bf16.mxu0 %v9883_v3 }
 0x800   :  { %v6088_v13 = vadd.f32 %v6087_v24, %v6025_v39  ;;  %v9886_v39 = vld [vmem:[#allocation9 + $0x74] ss:$8 sps:$4 sm:$0xff]  }
 0x801   :  { %6462 = vmatpush1.bf16.msra.mxu0 %v9881_v12  ;;  %v6035_v12 = vmul.f32 %v12780_v46, %v12780_v46 }
 0x802   :  { %v6089_v27 = vadd.f32 %v6088_v13, %v6026_v35  ;;  %v9884_v35 = vld [vmem:[#allocation9 + $0x70] ss:$8 sps:$4 sm:$0xff]   ;;  %6463 = vmatprep.subr.bf16.mxu0 %v9886_v39 }
 0x804   :  { %v6090_v22 = vadd.f32 %v6089_v27, %v6027_v61  ;;  %v6033_v27 = vmul.f32 %v12774_v26, %v12774_v26 }
 0x805   :  { %6464 = vmatpush1.bf16.msra.mxu0 %v9884_v35  ;;  %v6038_v35 = vmul.f32 %v12789_v38, %v12789_v38 }
 0x806   :  { %v6091_v19 = vadd.f32 %v6090_v22, %v6028_v10  ;;  %v6034_v10 = vmul.f32 %v12777_v23, %v12777_v23 }
 0x808   :  { %v6092_v24 = vadd.f32 %v6091_v19, %v6029_v0  ;;  %v6036_v19 = vmul.f32 %v12783_v55, %v12783_v55 }
 0x80a   :  { %v6093_v13 = vadd.f32 %v6092_v24, %v6030_v16  ;;  %v6037_v16 = vmul.f32 %v12786_v60, %v12786_v60 }
 0x80c   :  { %v6094_v61 = vadd.f32 %v6093_v13, %v6031_v11  ;;  %v6039_v13 = vmul.f32 %v12792_v34, %v12792_v34 }
 0x80e   :  { %v6095_v3 = vadd.f32 %v6094_v61, %v6032_v52  ;;  %v6040_v61 = vmul.f32 %v12795_v56, %v12795_v56 }
 0x810   :  { %v6096_v22 = vadd.f32 %v6095_v3, %v6033_v27  ;;  %v6041_v3 = vmul.f32 %v12798_v2, %v12798_v2 }
 0x812   :  { %v6097_v0 = vadd.f32 %v6096_v22, %v6034_v10  ;;  %v6042_v22 = vmul.f32 %v12801_v62, %v12801_v62 }
 0x814   :  { %v6098_v39 = vadd.f32 %v6097_v0, %v6035_v12  ;;  %v6043_v0 = vmul.f32 %v12804_v36, %v12804_v36 }
 0x816   :  { %v6099_v24 = vadd.f32 %v6098_v39, %v6036_v19  ;;  %v6044_v39 = vmul.f32 %v12807_v48, %v12807_v48 }
 0x818   :  { %v6100_v11 = vadd.f32 %v6099_v24, %v6037_v16  ;;  %v6045_v24 = vmul.f32 %v12810_v18, %v12810_v18 }
 0x81a   :  { %v6101_v52 = vadd.f32 %v6100_v11, %v6038_v35 }
 0x81c   :  { %v6102_v27 = vadd.f32 %v6101_v52, %v6039_v13 }
 0x81e   :  { %v6103_v10 = vadd.f32 %v6102_v27, %v6040_v61 }
 0x820   :  { %v6104_v12 = vadd.f32 %v6103_v10, %v6041_v3 }
 0x822   :  { %v6105_v19 = vadd.f32 %v6104_v12, %v6042_v22 }
 0x824   :  { %v6106_v16 = vadd.f32 %v6105_v19, %v6043_v0  ;;  %v13123_v0 = vld [vmem:[#allocation11 + $0x1] ss:$0 sm:$0xff] }
 0x826   :  { %v6107_v35 = vadd.f32 %v6106_v16, %v6044_v39 }
 0x828   :  { %v6108_v11 = vadd.f32 %v6107_v35, %v6045_v24 }
 0x82a   :  { %v6109_v13 = vrot.slane %v6108_v11, 4 }
 0x82c   :  { %v6110_v52 = vadd.f32 %v6109_v13, %v6108_v11 }
 0x82e   :  { %v6111_v61 = vrot.slane %v6110_v52, 2 }
 0x830   :  { %v6112_v27 = vadd.f32 %v6111_v61, %v6110_v52 }
 0x832   :  { %v6113_v33 = vrot.slane %v6112_v27, 1 }
 0x834   :  { %v6114_v1 = vadd.f32 %v6113_v33, %v6112_v27 }
 0x836   :  { %v6115_v3 = vmul.f32 0.001953125, %v6114_v1 }
 0x838   :  { %v6117_v10 = vadd.f32 1e-05, %v6115_v3 }
 0x83a   :  { %9889 = vrsqrt.f32 %v6117_v10 }
 0x844   :  { %v9890_v22 = vpop.eup %9889 }
 0x845   :  { %v6119_v12 = vmul.f32 %v9890_v22, %v6116_v50 }
 0x847   :  { %v13121_v21 = vrot.slane %v6119_v12, %v16942_v9 }
 0x849   :  { %v6184_v19 = vmul.f32 %v13121_v21, %v12801_v62  ;;  %v6185_v39 = vmul.f32 %v13121_v21, %v12804_v36  ;;  %v6124_v50 = vmul.f32 %v13121_v21, %v12814_v51  ;;  %v6125_v11 = vmul.f32 %v13121_v21, %v12818_v47 }
 0x84a   :  { %v13139_v62 = vmul.f32 %v13121_v21, %v12822_v54  ;;  %v13143_v36 = vmul.f32 %v13121_v21, %v12830_v17  ;;  %v13147_v13 = vmul.f32 %v13121_v21, %v12834_v59  ;;  %v13151_v52 = vmul.f32 %v13121_v21, %v12840_v5 }
 0x84b   :  { %v6253_v16 = vadd.f32 %v13123_v0, %v6184_v19  ;;  %v6254_v1 = vadd.f32 %v13123_v0, %v6185_v39  ;;  %v6156_v51 = vmul.f32 %v13121_v21, %v13002_v43  ;;  %v6157_v47 = vmul.f32 %v13121_v21, %v13008_v63 }
 0x84c   :  { %v6158_v54 = vmul.f32 %v13121_v21, %v13014_v37  ;;  %v6159_v17 = vmul.f32 %v13121_v21, %v13020_v14  ;;  %v6160_v59 = vmul.f32 %v13121_v21, %v13026_v30  ;;  %v6161_v61 = vmul.f32 %v13121_v21, %v13032_v45 }
 0x84d   :  { %v6317_v33 = vmax.f32 %v6253_v16, 0.0  ;;  %v6318_v24 = vmax.f32 %v6254_v1, 0.0  ;;  %v6162_v5 = vmul.f32 %v13121_v21, %v13038_v15  ;;  %v6163_v43 = vmul.f32 %v13121_v21, %v13044_v53 }
 0x84e   :  { %v6164_v63 = vmul.f32 %v13121_v21, %v13050_v29  ;;  %v6165_v37 = vmul.f32 %v13121_v21, %v13056_v41  ;;  %v6166_v14 = vmul.f32 %v13121_v21, %v13062_v57  ;;  %v6167_v30 = vmul.f32 %v13121_v21, %v13068_v32 }
 0x84f   :  { %v13131_v35 = vpack.c.bf16 %v6318_v24, %v6317_v33  ;;  %v6168_v45 = vmul.f32 %v13121_v21, %v13074_v31  ;;  %v6169_v15 = vmul.f32 %v13121_v21, %v12754_v49  ;;  %v6170_v53 = vmul.f32 %v13121_v21, %v12758_v4 }
 0x850   :  { %v6171_v29 = vmul.f32 %v13121_v21, %v12762_v25  ;;  %v6172_v41 = vmul.f32 %v13121_v21, %v12765_v7  ;;  %v6173_v57 = vmul.f32 %v13121_v21, %v12768_v28  ;;  %v6174_v32 = vmul.f32 %v13121_v21, %v12771_v58 }
 0x851   :  { %16943 = vst [vmem:[#allocation98_spill] sm:$0xff] %v13131_v35  ;;  %v6175_v31 = vmul.f32 %v13121_v21, %v12774_v26  ;;  %v6176_v49 = vmul.f32 %v13121_v21, %v12777_v23  ;;  %v6177_v4 = vmul.f32 %v13121_v21, %v12780_v46  ;;  %v6178_v25 = vmul.f32 %v13121_v21, %v12783_v55 }
 0x852   :  { %v6179_v7 = vmul.f32 %v13121_v21, %v12786_v60  ;;  %v6180_v28 = vmul.f32 %v13121_v21, %v12789_v38  ;;  %v6181_v58 = vmul.f32 %v13121_v21, %v12792_v34  ;;  %v6182_v26 = vmul.f32 %v13121_v21, %v12795_v56 }
 0x853   :  { %v6183_v23 = vmul.f32 %v13121_v21, %v12798_v2  ;;  %v6186_v46 = vmul.f32 %v13121_v21, %v12807_v48  ;;  %v6187_v55 = vmul.f32 %v13121_v21, %v12810_v18  ;;  %v13214_v60 = vadd.f32 %v13123_v0, %v6124_v50 }
 0x854   :  { %v13217_v38 = vadd.f32 %v13123_v0, %v6125_v11  ;;  %v13220_v34 = vadd.f32 %v13123_v0, %v6156_v51  ;;  %v13223_v56 = vadd.f32 %v13123_v0, %v6157_v47  ;;  %v13226_v2 = vadd.f32 %v13123_v0, %v6158_v54 }
 0x855   :  { %v6228_v48 = vadd.f32 %v13123_v0, %v6159_v17  ;;  %v6229_v27 = vadd.f32 %v13123_v0, %v6160_v59  ;;  %v6230_v18 = vadd.f32 %v13123_v0, %v6161_v61  ;;  %v6231_v3 = vadd.f32 %v13123_v0, %v6162_v5 }
 0x856   :  { %v6232_v10 = vadd.f32 %v13123_v0, %v6163_v43  ;;  %v6233_v22 = vadd.f32 %v13123_v0, %v6164_v63  ;;  %v6234_v12 = vadd.f32 %v13123_v0, %v6165_v37  ;;  %v6235_v19 = vadd.f32 %v13123_v0, %v6166_v14 }
 0x857   :  { %v6236_v39 = vadd.f32 %v13123_v0, %v6167_v30  ;;  %v6237_v16 = vadd.f32 %v13123_v0, %v6168_v45  ;;  %v6238_v1 = vadd.f32 %v13123_v0, %v6169_v15  ;;  %v6239_v33 = vadd.f32 %v13123_v0, %v6170_v53 }
 0x858   :  { %v6240_v24 = vadd.f32 %v13123_v0, %v6171_v29  ;;  %v6241_v50 = vadd.f32 %v13123_v0, %v6172_v41  ;;  %v6242_v11 = vadd.f32 %v13123_v0, %v6173_v57  ;;  %v6243_v51 = vadd.f32 %v13123_v0, %v6174_v32 }
 0x859   :  { %v6244_v47 = vadd.f32 %v13123_v0, %v6175_v31  ;;  %v6245_v54 = vadd.f32 %v13123_v0, %v6176_v49  ;;  %v6246_v17 = vadd.f32 %v13123_v0, %v6177_v4  ;;  %v6247_v59 = vadd.f32 %v13123_v0, %v6178_v25 }
 0x85a   :  { %v6248_v61 = vadd.f32 %v13123_v0, %v6179_v7  ;;  %v6249_v5 = vadd.f32 %v13123_v0, %v6180_v28  ;;  %v6250_v43 = vadd.f32 %v13123_v0, %v6181_v58  ;;  %v6251_v63 = vadd.f32 %v13123_v0, %v6182_v26 }
 0x85b   :  { %v6252_v37 = vadd.f32 %v13123_v0, %v6183_v23  ;;  %v6255_v14 = vadd.f32 %v13123_v0, %v6186_v46  ;;  %v6256_v30 = vadd.f32 %v13123_v0, %v6187_v55  ;;  %v6257_v45 = vmax.f32 %v13214_v60, 0.0 }
 0x85c   :  { %v6258_v15 = vmax.f32 %v13217_v38, 0.0  ;;  %v6289_v53 = vmax.f32 %v13220_v34, 0.0  ;;  %v6290_v29 = vmax.f32 %v13223_v56, 0.0  ;;  %v6291_v41 = vmax.f32 %v13226_v2, 0.0 }
 0x85d   :  { %v6292_v57 = vmax.f32 %v6228_v48, 0.0  ;;  %v6293_v32 = vmax.f32 %v6229_v27, 0.0  ;;  %v6294_v31 = vmax.f32 %v6230_v18, 0.0  ;;  %v6295_v49 = vmax.f32 %v6231_v3, 0.0 }
 0x85e   :  { %v6296_v4 = vmax.f32 %v6232_v10, 0.0  ;;  %v6297_v25 = vmax.f32 %v6233_v22, 0.0  ;;  %v6298_v7 = vmax.f32 %v6234_v12, 0.0  ;;  %v6299_v28 = vmax.f32 %v6235_v19, 0.0 }
 0x85f   :  { %v6300_v58 = vmax.f32 %v6236_v39, 0.0  ;;  %v6301_v26 = vmax.f32 %v6237_v16, 0.0  ;;  %v6302_v23 = vmax.f32 %v6238_v1, 0.0  ;;  %v6303_v46 = vmax.f32 %v6239_v33, 0.0 }
 0x860   :  { %v6304_v55 = vmax.f32 %v6240_v24, 0.0  ;;  %v6305_v60 = vmax.f32 %v6241_v50, 0.0  ;;  %v6306_v38 = vmax.f32 %v6242_v11, 0.0  ;;  %v6307_v34 = vmax.f32 %v6243_v51, 0.0 }
 0x861   :  { %v6308_v9 = vmax.f32 %v6244_v47, 0.0  ;;  %v6309_v56 = vmax.f32 %v6245_v54, 0.0  ;;  %v6310_v35 = vmax.f32 %v6246_v17, 0.0  ;;  %v6311_v2 = vmax.f32 %v6247_v59, 0.0 }
 0x862   :  { %v6312_v48 = vmax.f32 %v6248_v61, 0.0  ;;  %v6313_v27 = vmax.f32 %v6249_v5, 0.0  ;;  %v6314_v18 = vmax.f32 %v6250_v43, 0.0  ;;  %v6315_v3 = vmax.f32 %v6251_v63, 0.0 }
 0x863   :  { %v6316_v10 = vmax.f32 %v6252_v37, 0.0  ;;  %v6319_v22 = vmax.f32 %v6255_v14, 0.0  ;;  %v6320_v12 = vmax.f32 %v6256_v30, 0.0  ;;  %v6321_v19 = vpack.c.bf16 %v6258_v15, %v6257_v45 }
 0x864   :  { %v13260_v39 = vpack.c.bf16 %v6290_v29, %v6289_v53  ;;  %v13262_v16 = vpack.c.bf16 %v6292_v57, %v6291_v41  ;;  %v13264_v1 = vpack.c.bf16 %v6294_v31, %v6293_v32  ;;  %v13266_v33 = vpack.c.bf16 %v6296_v4, %v6295_v49  ;;  %v16947_v57 = vld [vmem:[#allocation24_spill] sm:$0xff]  ;;  %v16948_v32 = vld [vmem:[#allocation41_spill] sm:$0xff]  ;;  %v16949_v31 = vld [vmem:[#allocation35_spill] sm:$0xff] }
 0x865   :  { %v13268_v24 = vpack.c.bf16 %v6298_v7, %v6297_v25  ;;  %v13270_v50 = vpack.c.bf16 %v6300_v58, %v6299_v28  ;;  %v13272_v11 = vpack.c.bf16 %v6302_v23, %v6301_v26  ;;  %v13274_v51 = vpack.c.bf16 %v6304_v55, %v6303_v46  ;;  %6482 = vmatmul.mubr.bf16.vlgmr.msra.gmra.mrb[192].mxu0 %v6321_v19  ;;  %v16950_v25 = vld [vmem:[#allocation49_spill] sm:$0xff]  ;;  %v16951_v28 = vld [vmem:[#allocation50_spill] sm:$0xff]  ;;  %v16952_v26 = vld [vmem:[#allocation55_spill] sm:$0xff] }
 0x866   :  { %v13276_v47 = vpack.c.bf16 %v6306_v38, %v6305_v60  ;;  %v13278_v54 = vpack.c.bf16 %v6308_v9, %v6307_v34  ;;  %v13280_v17 = vpack.c.bf16 %v6310_v35, %v6309_v56  ;;  %v13282_v59 = vpack.c.bf16 %v6312_v48, %v6311_v2  ;;  %v16953_v46 = vld [vmem:[#allocation56_spill] sm:$0xff]  ;;  %v16954_v60 = vld [vmem:[#allocation59_spill] sm:$0xff] }
 0x867   :  { %v13284_v61 = vpack.c.bf16 %v6314_v18, %v6313_v27  ;;  %v13286_v5 = vpack.c.bf16 %v6316_v10, %v6315_v3  ;;  %v16944_v43 = vmov 0   ;;  %v13289_v63 = vpack.c.bf16 %v6320_v12, %v6319_v22  ;;  %v16955_v34 = vld [vmem:[#allocation67_spill] sm:$0xff]  ;;  %v16956_v2 = vld [vmem:[#allocation68_spill] sm:$0xff]  ;;  %v16958_v12 = vld [vmem:[#allocation97_spill] sm:$0xff] }
 0x868   :  { %6491 = vmatprep.mubr.bf16.mxu0 %v16944_v43  ;;  %v6195_v37 = vadd.f32 %v13123_v0, %v13139_v62  ;;  %v6196_v9 = vadd.f32 %v13123_v0, %v13143_v36  ;;  %v6130_v35 = vmul.f32 %v13121_v21, %v12846_v6  ;;  %v6131_v14 = vmul.f32 %v13121_v21, %v12852_v40  ;;  %v16945_v6 = vld [vmem:[#allocation37_spill] sm:$0xff]  ;;  %v16946_v40 = vld [vmem:[#allocation43_spill] sm:$0xff]  ;;  %v16957_v10 = vld [vmem:[#allocation96_spill] sm:$0xff] }
 0x869   :  { %v13301_v30 = vmul.f32 %v13121_v21, %v12858_v44  ;;  %v13305_v45 = vmul.f32 %v13121_v21, %v12864_v8  ;;  %v6140_v62 = vmul.f32 %v13121_v21, %v12906_v42  ;;  %v6141_v36 = vmul.f32 %v13121_v21, %v12912_v20 }
 0x86a   :  { %v6259_v15 = vmax.f32 %v6195_v37, 0.0  ;;  %v6260_v53 = vmax.f32 %v6196_v9, 0.0  ;;  %v6142_v29 = vmul.f32 %v13121_v21, %v16945_v6  ;;  %v6143_v41 = vmul.f32 %v13121_v21, %v16946_v40 }
 0x86b   :  { %v6197_v44 = vadd.f32 %v13123_v0, %v13147_v13  ;;  %v6198_v8 = vadd.f32 %v13123_v0, %v13151_v52  ;;  %v6144_v42 = vmul.f32 %v13121_v21, %v16947_v57  ;;  %v6145_v20 = vmul.f32 %v13121_v21, %v16948_v32 }
 0x86c   :  { %v6146_v49 = vmul.f32 %v13121_v21, %v16949_v31  ;;  %v6322_v4 = vpack.c.bf16 %v6260_v53, %v6259_v15  ;;  %v6147_v7 = vmul.f32 %v13121_v21, %v16950_v25  ;;  %v6148_v58 = vmul.f32 %v13121_v21, %v16951_v28 }
 0x86d   :  { %v6199_v13 = vadd.f32 %v13123_v0, %v6130_v35  ;;  %v6200_v52 = vadd.f32 %v13123_v0, %v6131_v14  ;;  %v6149_v23 = vmul.f32 %v13121_v21, %v16952_v26  ;;  %v6150_v55 = vmul.f32 %v13121_v21, %v16953_v46 }
 0x86e   :  { %v6151_v38 = vmul.f32 %v13121_v21, %v16954_v60  ;;  %v6152_v56 = vmul.f32 %v13121_v21, %v16955_v34  ;;  %6492 = vmatmul.mubr.bf16.gmra.mrb[196].mxu0 %v6322_v4  ;;  %v6153_v48 = vmul.f32 %v13121_v21, %v16956_v2  ;;  %v6261_v27 = vmax.f32 %v6197_v44, 0.0 }
 0x86f   :  { %6501 = vmatprep.mubr.bf16.mxu0 %v16944_v43  ;;  %v6262_v18 = vmax.f32 %v6198_v8, 0.0  ;;  %v6209_v3 = vadd.f32 %v13123_v0, %v6140_v62  ;;  %v6154_v22 = vmul.f32 %v13121_v21, %v16957_v10  ;;  %v6155_v19 = vmul.f32 %v13121_v21, %v16958_v12 }
 0x870   :  { %v6210_v37 = vadd.f32 %v13123_v0, %v6141_v36  ;;  %v6211_v9 = vadd.f32 %v13123_v0, %v6142_v29  ;;  %v6263_v35 = vmax.f32 %v6199_v13, 0.0  ;;  %v6264_v14 = vmax.f32 %v6200_v52, 0.0 }
 0x871   :  { %v6273_v15 = vmax.f32 %v6209_v3, 0.0  ;;  %v6212_v53 = vadd.f32 %v13123_v0, %v6143_v41  ;;  %v6213_v44 = vadd.f32 %v13123_v0, %v6144_v42  ;;  %v6214_v62 = vadd.f32 %v13123_v0, %v6145_v20 }
 0x872   :  { %v6274_v6 = vmax.f32 %v6210_v37, 0.0  ;;  %v6275_v40 = vmax.f32 %v6211_v9, 0.0  ;;  %v6323_v8 = vpack.c.bf16 %v6262_v18, %v6261_v27  ;;  %v6215_v32 = vadd.f32 %v13123_v0, %v6146_v49 }
 0x873   :  { %v6276_v57 = vmax.f32 %v6212_v53, 0.0  ;;  %v6216_v31 = vadd.f32 %v13123_v0, %v6147_v7  ;;  %v6277_v29 = vmax.f32 %v6213_v44, 0.0  ;;  %v6278_v4 = vmax.f32 %v6214_v62, 0.0  ;;  %v16960_v53 = vld [vmem:[#allocation29_spill] sm:$0xff] }
 0x874   :  { %v13354_v36 = vpack.c.bf16 %v6274_v6, %v6273_v15  ;;  %v6217_v25 = vadd.f32 %v13123_v0, %v6148_v58  ;;  %v6279_v41 = vmax.f32 %v6215_v32, 0.0  ;;  %v6218_v42 = vadd.f32 %v13123_v0, %v6149_v23 }
 0x875   :  { %v13357_v28 = vpack.c.bf16 %v6276_v57, %v6275_v40  ;;  %v6280_v13 = vmax.f32 %v6216_v31, 0.0  ;;  %v6331_v20 = vpack.c.bf16 %v6278_v4, %v6277_v29  ;;  %v6219_v26 = vadd.f32 %v13123_v0, %v6150_v55 }
 0x876   :  { %6502 = vmatmul.mubr.bf16.gmra.mrb[200].mxu0 %v6323_v8  ;;  %v6281_v52 = vmax.f32 %v6217_v25, 0.0  ;;  %v6220_v49 = vadd.f32 %v13123_v0, %v6151_v38  ;;  %v6282_v46 = vmax.f32 %v6218_v42, 0.0  ;;  %v6221_v60 = vadd.f32 %v13123_v0, %v6152_v56  ;;  %v16962_v8 = vld [vmem:[#allocation30_spill] sm:$0xff]  ;;  %v16964_v42 = vld [vmem:[#allocation40_spill] sm:$0xff] }
 0x877   :  { %6511 = vmatprep.mubr.bf16.mxu0 %v16944_v43  ;;  %v6332_v7 = vpack.c.bf16 %v6280_v13, %v6279_v41  ;;  %v6222_v58 = vadd.f32 %v13123_v0, %v6153_v48  ;;  %v6283_v34 = vmax.f32 %v6219_v26, 0.0  ;;  %v6223_v27 = vadd.f32 %v13123_v0, %v6154_v22  ;;  %v16959_v22 = vld [vmem:[#allocation72_spill] sm:$0xff]  ;;  %v16963_v41 = vld [vmem:[#allocation21_spill] sm:$0xff] }
 0x878   :  { %v6284_v2 = vmax.f32 %v6220_v49, 0.0  ;;  %v6224_v23 = vadd.f32 %v13123_v0, %v6155_v19  ;;  %v6333_v18 = vpack.c.bf16 %v6282_v46, %v6281_v52  ;;  %v6285_v3 = vmax.f32 %v6221_v60, 0.0 }
 0x879   :  { %v6286_v10 = vmax.f32 %v6222_v58, 0.0  ;;  %v6287_v12 = vmax.f32 %v6223_v27, 0.0  ;;  %v6324_v9 = vpack.c.bf16 %v6264_v14, %v6263_v35  ;;  %v6201_v15 = vadd.f32 %v13123_v0, %v13301_v30 }
 0x87a   :  { %v6334_v55 = vpack.c.bf16 %v6284_v2, %v6283_v34  ;;  %v6288_v38 = vmax.f32 %v6224_v23, 0.0  ;;  %v6202_v56 = vadd.f32 %v13123_v0, %v13305_v45  ;;  %v6134_v19 = vmul.f32 %v13121_v21, %v16959_v22  ;;  %v16961_v45 = vld [vmem:[#allocation54_spill] sm:$0xff] }
 0x87b   :  { %v6335_v37 = vpack.c.bf16 %v6286_v10, %v6285_v3  ;;  %v6135_v6 = vmul.f32 %v13121_v21, %v16960_v53  ;;  %v6265_v40 = vmax.f32 %v6201_v15, 0.0  ;;  %v6136_v14 = vmul.f32 %v13121_v21, %v16961_v45 }
 0x87c   :  { %v6336_v48 = vpack.c.bf16 %v6288_v38, %v6287_v12  ;;  %v6266_v44 = vmax.f32 %v6202_v56, 0.0  ;;  %v6203_v35 = vadd.f32 %v13123_v0, %v6134_v19  ;;  %v6137_v57 = vmul.f32 %v13121_v21, %v16962_v8 }
 0x87d   :  { %v6204_v30 = vadd.f32 %v13123_v0, %v6135_v6  ;;  %v6205_v4 = vadd.f32 %v13123_v0, %v6136_v14  ;;  %v6138_v13 = vmul.f32 %v13121_v21, %v16963_v41  ;;  %v6139_v52 = vmul.f32 %v13121_v21, %v16964_v42 }
 0x87e   :  { %6512 = vmatmul.mubr.bf16.gmra.mrb[204].mxu0 %v6324_v9  ;;  %v6325_v62 = vpack.c.bf16 %v6266_v44, %v6265_v40  ;;  %v6267_v32 = vmax.f32 %v6203_v35, 0.0  ;;  %v6206_v25 = vadd.f32 %v13123_v0, %v6137_v57 }
 0x87f   :  { %6521 = vmatprep.mubr.bf16.mxu0 %v16944_v43  ;;  %v6268_v31 = vmax.f32 %v6204_v30, 0.0  ;;  %v6269_v26 = vmax.f32 %v6205_v4, 0.0  ;;  %v6207_v60 = vadd.f32 %v13123_v0, %v6138_v13  ;;  %v6208_v58 = vadd.f32 %v13123_v0, %v6139_v52 }
 0x880   :  { %v6270_v49 = vmax.f32 %v6206_v25, 0.0 }
 0x881   :  { %v6326_v29 = vpack.c.bf16 %v6268_v31, %v6267_v32  ;;  %v6271_v34 = vmax.f32 %v6207_v60, 0.0  ;;  %v6272_v2 = vmax.f32 %v6208_v58, 0.0 }
 0x882   :  { %v6327_v46 = vpack.c.bf16 %v6270_v49, %v6269_v26 }
 0x883   :  { %v6328_v27 = vpack.c.bf16 %v6272_v2, %v6271_v34 }
 0x886   :  { %6522 = vmatmul.mubr.bf16.gmra.mrb[208].mxu0 %v6325_v62 }
 0x887   :  { %6531 = vmatprep.mubr.bf16.mxu0 %v16944_v43 }
 0x88e   :  { %6532 = vmatmul.mubr.bf16.gmra.mrb[212].mxu0 %v6326_v29 }
 0x88f   :  { %6541 = vmatprep.mubr.bf16.mxu0 %v16944_v43 }
 0x896   :  { %6542 = vmatmul.mubr.bf16.gmra.mrb[216].mxu0 %v6327_v46 }
 0x897   :  { %6551 = vmatprep.mubr.bf16.mxu0 %v16944_v43 }
 0x89e   :  { %6552 = vmatmul.mubr.bf16.gmra.mrb[220].mxu0 %v6328_v27 }
 0x89f   :  { %6561 = vmatprep.mubr.bf16.mxu0 %v16944_v43 }
 0x8a6   :  { %6562 = vmatmul.mubr.bf16.gmra.mrb[224].mxu0 %v13354_v36 }
 0x8a7   :  { %6571 = vmatprep.mubr.bf16.mxu0 %v16944_v43 }
 0x8ae   :  { %6572 = vmatmul.mubr.bf16.gmra.mrb[228].mxu0 %v13357_v28 }
 0x8af   :  { %6581 = vmatprep.mubr.bf16.mxu0 %v16944_v43 }
 0x8b6   :  { %6582 = vmatmul.mubr.bf16.gmra.mrb[232].mxu0 %v6331_v20 }
 0x8b7   :  { %6591 = vmatprep.mubr.bf16.mxu0 %v16944_v43 }
 0x8be   :  { %6592 = vmatmul.mubr.bf16.gmra.mrb[236].mxu0 %v6332_v7 }
 0x8bf   :  { %6601 = vmatprep.mubr.bf16.mxu0 %v16944_v43 }
 0x8c6   :  { %6602 = vmatmul.mubr.bf16.gmra.mrb[240].mxu0 %v6333_v18 }
 0x8c7   :  { %6611 = vmatprep.mubr.bf16.mxu0 %v16944_v43 }
 0x8ce   :  { %6612 = vmatmul.mubr.bf16.gmra.mrb[244].mxu0 %v6334_v55 }
 0x8cf   :  { %6621 = vmatprep.mubr.bf16.mxu0 %v16944_v43 }
 0x8d6   :  { %6622 = vmatmul.mubr.bf16.gmra.mrb[248].mxu0 %v6335_v37 }
 0x8d7   :  { %6631 = vmatprep.mubr.bf16.mxu0 %v16944_v43 }
 0x8de   :  { %6632 = vmatmul.mubr.bf16.gmra.mrb[252].mxu0 %v6336_v48  ;;  %v16973_v48 = vld [vmem:[#allocation98_spill] sm:$0xff] }
 0x8df   :  { %6641 = vmatprep.mubr.bf16.mxu0 %v16944_v43 }
 0x8e6   :  { %6642 = vmatmul.mubr.bf16.gmra.mrb[0].mxu0 %v13260_v39 }
 0x8e7   :  { %6651 = vmatprep.mubr.bf16.mxu0 %v16944_v43 }
 0x8ee   :  { %6652 = vmatmul.mubr.bf16.gmra.mrb[4].mxu0 %v13262_v16 }
 0x8ef   :  { %6661 = vmatprep.mubr.bf16.mxu0 %v16944_v43 }
 0x8f6   :  { %6662 = vmatmul.mubr.bf16.gmra.mrb[8].mxu0 %v13264_v1 }
 0x8f7   :  { %6671 = vmatprep.mubr.bf16.mxu0 %v16944_v43 }
 0x8fe   :  { %6672 = vmatmul.mubr.bf16.gmra.mrb[12].mxu0 %v13266_v33 }
 0x8ff   :  { %6681 = vmatprep.mubr.bf16.mxu0 %v16944_v43 }
 0x906   :  { %6682 = vmatmul.mubr.bf16.gmra.mrb[16].mxu0 %v13268_v24 }
 0x907   :  { %6691 = vmatprep.mubr.bf16.mxu0 %v16944_v43 }
 0x90e   :  { %6692 = vmatmul.mubr.bf16.gmra.mrb[20].mxu0 %v13270_v50 }
 0x90f   :  { %6701 = vmatprep.mubr.bf16.mxu0 %v16944_v43 }
 0x916   :  { %6702 = vmatmul.mubr.bf16.gmra.mrb[24].mxu0 %v13272_v11 }
 0x917   :  { %6711 = vmatprep.mubr.bf16.mxu0 %v16944_v43 }
 0x91e   :  { %6712 = vmatmul.mubr.bf16.gmra.mrb[28].mxu0 %v13274_v51 }
 0x91f   :  { %6721 = vmatprep.mubr.bf16.mxu0 %v16944_v43 }
 0x926   :  { %6722 = vmatmul.mubr.bf16.gmra.mrb[32].mxu0 %v13276_v47 }
 0x927   :  { %6731 = vmatprep.mubr.bf16.mxu0 %v16944_v43 }
 0x92e   :  { %6732 = vmatmul.mubr.bf16.gmra.mrb[36].mxu0 %v13278_v54 }
 0x92f   :  { %6741 = vmatprep.mubr.bf16.mxu0 %v16944_v43 }
 0x936   :  { %6742 = vmatmul.mubr.bf16.gmra.mrb[40].mxu0 %v13280_v17 }
 0x937   :  { %6751 = vmatprep.mubr.bf16.mxu0 %v16944_v43 }
 0x938   :  { %v13426_v21 = vpop.f32.mrb[192].mxu0 }
 0x939   :  { %v13428_v0 = vpop.f32.mrb[193].mxu0 }
 0x93a   :  { %16965 = vst [vmem:[#allocation99_spill] sm:$0xff] %v13428_v0  ;;  %v13430_v39 = vpop.f32.mrb[194].mxu0 }
 0x93b   :  { %v6802_v16 = vadd.f32 %v13430_v39, %v13426_v21  ;;  %v13434_v1 = vpop.f32.mrb[195].mxu0 }
 0x93c   :  { %16966 = vst [vmem:[#allocation100_spill] sm:$0xff] %v13434_v1  ;;  %v6871_v33 = vadd.f32 %v13434_v1, %v13428_v0 }
 0x93e   :  { %6752 = vmatmul.mubr.bf16.gmra.mrb[44].mxu0 %v13282_v59 }
 0x93f   :  { %6761 = vmatprep.mubr.bf16.mxu0 %v16944_v43 }
 0x941   :  { %v13440_v24 = vpop.f32.mrb[196].mxu0 }
 0x942   :  { %v6803_v50 = vadd.f32 %v6802_v16, %v13440_v24  ;;  %v13443_v11 = vpop.f32.mrb[197].mxu0 }
 0x943   :  { %16967 = vst [vmem:[#allocation36_spill] sm:$0xff] %v13443_v11  ;;  %v6872_v51 = vadd.f32 %v6871_v33, %v13443_v11  ;;  %v13446_v47 = vpop.f32.mrb[198].mxu0 }
 0x944   :  { %v6804_v54 = vadd.f32 %v6803_v50, %v13446_v47  ;;  %v13449_v17 = vpop.f32.mrb[199].mxu0 }
 0x945   :  { %16968 = vst [vmem:[#allocation32_spill] sm:$0xff] %v13449_v17  ;;  %v6873_v36 = vadd.f32 %v6872_v51, %v13449_v17 }
 0x946   :  { %6762 = vmatmul.mubr.bf16.gmra.mrb[48].mxu0 %v13284_v61 }
 0x947   :  { %6771 = vmatprep.mubr.bf16.mxu0 %v16944_v43 }
 0x949   :  { %v13454_v59 = vpop.f32.mrb[200].mxu0 }
 0x94a   :  { %v6805_v28 = vadd.f32 %v6804_v54, %v13454_v59  ;;  %v13457_v20 = vpop.f32.mrb[201].mxu0 }
 0x94b   :  { %16969 = vst [vmem:[#allocation27_spill] sm:$0xff] %v13457_v20  ;;  %v6874_v7 = vadd.f32 %v6873_v36, %v13457_v20  ;;  %v13460_v23 = vpop.f32.mrb[202].mxu0 }
 0x94c   :  { %v6806_v18 = vadd.f32 %v6805_v28, %v13460_v23  ;;  %v13463_v3 = vpop.f32.mrb[203].mxu0 }
 0x94d   :  { %16970 = vst [vmem:[#allocation28_spill] sm:$0xff] %v13463_v3  ;;  %v6875_v10 = vadd.f32 %v6874_v7, %v13463_v3 }
 0x94e   :  { %6772 = vmatmul.mubr.bf16.gmra.mrb[52].mxu0 %v13286_v5 }
 0x94f   :  { %6781 = vmatprep.mubr.bf16.mxu0 %v16944_v43 }
 0x951   :  { %v13468_v61 = vpop.f32.mrb[204].mxu0 }
 0x952   :  { %v6807_v55 = vadd.f32 %v6806_v18, %v13468_v61  ;;  %v13471_v12 = vpop.f32.mrb[205].mxu0 }
 0x953   :  { %16971 = vst [vmem:[#allocation31_spill] sm:$0xff] %v13471_v12  ;;  %v6876_v38 = vadd.f32 %v6875_v10, %v13471_v12  ;;  %v13474_v37 = vpop.f32.mrb[206].mxu0 }
 0x954   :  { %v6808_v9 = vadd.f32 %v6807_v55, %v13474_v37  ;;  %v13477_v15 = vpop.f32.mrb[207].mxu0 }
 0x955   :  { %16972 = vst [vmem:[#allocation33_spill] sm:$0xff] %v13477_v15  ;;  %v6877_v56 = vadd.f32 %v6876_v38, %v13477_v15 }
 0x956   :  { %6782 = vmatmul.mubr.bf16.gmra.mrb[56].mxu0 %v16973_v48 }
 0x957   :  { %6791 = vmatprep.mubr.bf16.mxu0 %v16944_v43 }
 0x959   :  { %v13482_v5 = vpop.f32.mrb[208].mxu0 }
 0x95a   :  { %v6809_v22 = vadd.f32 %v6808_v9, %v13482_v5  ;;  %v13485_v19 = vpop.f32.mrb[209].mxu0 }
 0x95b   :  { %16974 = vst [vmem:[#allocation38_spill] sm:$0xff] %v13485_v19  ;;  %v6878_v53 = vadd.f32 %v6877_v56, %v13485_v19  ;;  %v13488_v6 = vpop.f32.mrb[210].mxu0 }
 0x95c   :  { %v6810_v40 = vadd.f32 %v6809_v22, %v13488_v6  ;;  %v13491_v44 = vpop.f32.mrb[211].mxu0 }
 0x95d   :  { %16975 = vst [vmem:[#allocation22_spill] sm:$0xff] %v13491_v44  ;;  %v6879_v62 = vadd.f32 %v6878_v53, %v13491_v44 }
 0x95e   :  { %6792 = vmatmul.mubr.bf16.gmra.mrb[60].mxu0 %v13289_v63 }
 0x961   :  { %v13495_v35 = vpop.f32.mrb[212].mxu0 }
 0x962   :  { %v6811_v43 = vadd.f32 %v6810_v40, %v13495_v35  ;;  %v13498_v30 = vpop.f32.mrb[213].mxu0 }
 0x963   :  { %16976 = vst [vmem:[#allocation25_spill] sm:$0xff] %v13498_v30  ;;  %v6880_v45 = vadd.f32 %v6879_v62, %v13498_v30  ;;  %v13501_v14 = vpop.f32.mrb[214].mxu0 }
 0x964   :  { %v6812_v8 = vadd.f32 %v6811_v43, %v13501_v14  ;;  %v13504_v57 = vpop.f32.mrb[215].mxu0 }
 0x965   :  { %16977 = vst [vmem:[#allocation26_spill] sm:$0xff] %v13504_v57  ;;  %v6881_v32 = vadd.f32 %v6880_v45, %v13504_v57 }
 0x969   :  { %v13507_v31 = vpop.f32.mrb[216].mxu0 }
 0x96a   :  { %v6813_v63 = vadd.f32 %v6812_v8, %v13507_v31  ;;  %v13510_v29 = vpop.f32.mrb[217].mxu0 }
 0x96b   :  { %16978 = vst [vmem:[#allocation45_spill] sm:$0xff] %v13510_v29  ;;  %v6882_v4 = vadd.f32 %v6881_v32, %v13510_v29  ;;  %v13513_v25 = vpop.f32.mrb[218].mxu0 }
 0x96c   :  { %v6814_v41 = vadd.f32 %v6813_v63, %v13513_v25  ;;  %v13516_v13 = vpop.f32.mrb[219].mxu0 }
 0x96d   :  { %16979 = vst [vmem:[#allocation46_spill] sm:$0xff] %v13516_v13  ;;  %v6883_v42 = vadd.f32 %v6882_v4, %v13516_v13 }
 0x971   :  { %v13519_v52 = vpop.f32.mrb[220].mxu0 }
 0x972   :  { %v6815_v26 = vadd.f32 %v6814_v41, %v13519_v52  ;;  %v13522_v49 = vpop.f32.mrb[221].mxu0 }
 0x973   :  { %16980 = vst [vmem:[#allocation51_spill] sm:$0xff] %v13522_v49  ;;  %v6884_v46 = vadd.f32 %v6883_v42, %v13522_v49  ;;  %v13525_v60 = vpop.f32.mrb[222].mxu0 }
 0x974   :  { %v6816_v58 = vadd.f32 %v6815_v26, %v13525_v60  ;;  %v13528_v34 = vpop.f32.mrb[223].mxu0 }
 0x975   :  { %16981 = vst [vmem:[#allocation23_spill] sm:$0xff] %v13528_v34  ;;  %v6885_v2 = vadd.f32 %v6884_v46, %v13528_v34 }
 0x979   :  { %v13531_v27 = vpop.f32.mrb[224].mxu0 }
 0x97a   :  { %v6817_v16 = vadd.f32 %v6816_v58, %v13531_v27  ;;  %v13534_v33 = vpop.f32.mrb[225].mxu0 }
 0x97b   :  { %16982 = vst [vmem:[#allocation73_spill] sm:$0xff] %v13534_v33  ;;  %v6886_v50 = vadd.f32 %v6885_v2, %v13534_v33  ;;  %v13537_v51 = vpop.f32.mrb[226].mxu0 }
 0x97c   :  { %v6818_v54 = vadd.f32 %v6817_v16, %v13537_v51  ;;  %v13540_v36 = vpop.f32.mrb[227].mxu0 }
 0x97d   :  { %16983 = vst [vmem:[#allocation74_spill] sm:$0xff] %v13540_v36  ;;  %v6887_v28 = vadd.f32 %v6886_v50, %v13540_v36 }
 0x981   :  { %v13543_v7 = vpop.f32.mrb[228].mxu0 }
 0x982   :  { %v6819_v18 = vadd.f32 %v6818_v54, %v13543_v7  ;;  %v13546_v10 = vpop.f32.mrb[229].mxu0 }
 0x983   :  { %16984 = vst [vmem:[#allocation75_spill] sm:$0xff] %v13546_v10  ;;  %v6888_v55 = vadd.f32 %v6887_v28, %v13546_v10  ;;  %v13549_v38 = vpop.f32.mrb[230].mxu0 }
 0x984   :  { %v6820_v9 = vadd.f32 %v6819_v18, %v13549_v38  ;;  %v13552_v56 = vpop.f32.mrb[231].mxu0 }
 0x985   :  { %16985 = vst [vmem:[#allocation76_spill] sm:$0xff] %v13552_v56  ;;  %v6889_v48 = vadd.f32 %v6888_v55, %v13552_v56 }
 0x989   :  { %v13555_v22 = vpop.f32.mrb[232].mxu0 }
 0x98a   :  { %v6821_v53 = vadd.f32 %v6820_v9, %v13555_v22  ;;  %v13558_v40 = vpop.f32.mrb[233].mxu0 }
 0x98b   :  { %16986 = vst [vmem:[#allocation77_spill] sm:$0xff] %v13558_v40  ;;  %v6890_v62 = vadd.f32 %v6889_v48, %v13558_v40  ;;  %v13561_v43 = vpop.f32.mrb[234].mxu0 }
 0x98c   :  { %v6822_v45 = vadd.f32 %v6821_v53, %v13561_v43  ;;  %v13564_v8 = vpop.f32.mrb[235].mxu0 }
 0x98d   :  { %16987 = vst [vmem:[#allocation78_spill] sm:$0xff] %v13564_v8  ;;  %v6891_v32 = vadd.f32 %v6890_v62, %v13564_v8 }
 0x991   :  { %v13567_v63 = vpop.f32.mrb[236].mxu0 }
 0x992   :  { %v6823_v4 = vadd.f32 %v6822_v45, %v13567_v63  ;;  %v13570_v41 = vpop.f32.mrb[237].mxu0 }
 0x993   :  { %16988 = vst [vmem:[#allocation79_spill] sm:$0xff] %v13570_v41  ;;  %v6892_v42 = vadd.f32 %v6891_v32, %v13570_v41  ;;  %v13573_v26 = vpop.f32.mrb[238].mxu0 }
 0x994   :  { %v6824_v46 = vadd.f32 %v6823_v4, %v13573_v26  ;;  %v13576_v58 = vpop.f32.mrb[239].mxu0 }
 0x995   :  { %16989 = vst [vmem:[#allocation80_spill] sm:$0xff] %v13576_v58  ;;  %v6893_v2 = vadd.f32 %v6892_v42, %v13576_v58 }
 0x999   :  { %v13579_v16 = vpop.f32.mrb[240].mxu0 }
 0x99a   :  { %v6825_v50 = vadd.f32 %v6824_v46, %v13579_v16  ;;  %v13582_v54 = vpop.f32.mrb[241].mxu0 }
 0x99b   :  { %16990 = vst [vmem:[#allocation81_spill] sm:$0xff] %v13582_v54  ;;  %v6894_v28 = vadd.f32 %v6893_v2, %v13582_v54  ;;  %v13585_v18 = vpop.f32.mrb[242].mxu0 }
 0x99c   :  { %v6826_v55 = vadd.f32 %v6825_v50, %v13585_v18  ;;  %v13588_v9 = vpop.f32.mrb[243].mxu0 }
 0x99d   :  { %16991 = vst [vmem:[#allocation60_spill] sm:$0xff] %v13588_v9  ;;  %v6895_v48 = vadd.f32 %v6894_v28, %v13588_v9 }
 0x9a1   :  { %v13591_v53 = vpop.f32.mrb[244].mxu0 }
 0x9a2   :  { %v6827_v62 = vadd.f32 %v6826_v55, %v13591_v53  ;;  %v13594_v45 = vpop.f32.mrb[245].mxu0 }
 0x9a3   :  { %16992 = vst [vmem:[#allocation63_spill] sm:$0xff] %v13594_v45  ;;  %v6896_v32 = vadd.f32 %v6895_v48, %v13594_v45  ;;  %v13597_v4 = vpop.f32.mrb[246].mxu0 }
 0x9a4   :  { %v6828_v42 = vadd.f32 %v6827_v62, %v13597_v4  ;;  %v13600_v46 = vpop.f32.mrb[247].mxu0 }
 0x9a5   :  { %16993 = vst [vmem:[#allocation82_spill] sm:$0xff] %v13600_v46  ;;  %v6897_v2 = vadd.f32 %v6896_v32, %v13600_v46 }
 0x9a9   :  { %v13603_v50 = vpop.f32.mrb[248].mxu0 }
 0x9aa   :  { %v6829_v28 = vadd.f32 %v6828_v42, %v13603_v50  ;;  %v13606_v9 = vpop.f32.mrb[249].mxu0 }
 0x9ab   :  { %16994 = vst [vmem:[#allocation83_spill] sm:$0xff] %v13606_v9  ;;  %v6898_v55 = vadd.f32 %v6897_v2, %v13606_v9  ;;  %v13609_v54 = vpop.f32.mrb[250].mxu0 }
 0x9ac   :  { %v6830_v48 = vadd.f32 %v6829_v28, %v13609_v54  ;;  %v13612_v45 = vpop.f32.mrb[251].mxu0 }
 0x9ad   :  { %16995 = vst [vmem:[#allocation64_spill] sm:$0xff] %v13612_v45  ;;  %v6899_v62 = vadd.f32 %v6898_v55, %v13612_v45 }
 0x9b1   :  { %v13615_v58 = vpop.f32.mrb[252].mxu0 }
 0x9b2   :  { %v6831_v32 = vadd.f32 %v6830_v48, %v13615_v58  ;;  %v13618_v46 = vpop.f32.mrb[253].mxu0 }
 0x9b3   :  { %16996 = vst [vmem:[#allocation84_spill] sm:$0xff] %v13618_v46  ;;  %v6900_v42 = vadd.f32 %v6899_v62, %v13618_v46  ;;  %v13621_v41 = vpop.f32.mrb[254].mxu0 }
 0x9b4   :  { %v6832_v2 = vadd.f32 %v6831_v32, %v13621_v41  ;;  %v13624_v9 = vpop.f32.mrb[255].mxu0 }
 0x9b5   :  { %16997 = vst [vmem:[#allocation85_spill] sm:$0xff] %v13624_v9  ;;  %v6901_v28 = vadd.f32 %v6900_v42, %v13624_v9 }
 0x9b9   :  { %v13627_v8 = vpop.f32.mrb[0].mxu0 }
 0x9ba   :  { %v6833_v55 = vadd.f32 %v6832_v2, %v13627_v8  ;;  %v13630_v45 = vpop.f32.mrb[1].mxu0 }
 0x9bb   :  { %16998 = vst [vmem:[#allocation86_spill] sm:$0xff] %v13630_v45  ;;  %v6902_v48 = vadd.f32 %v6901_v28, %v13630_v45  ;;  %v13633_v40 = vpop.f32.mrb[2].mxu0 }
 0x9bc   :  { %v6834_v62 = vadd.f32 %v6833_v55, %v13633_v40  ;;  %v13636_v46 = vpop.f32.mrb[3].mxu0 }
 0x9bd   :  { %16999 = vst [vmem:[#allocation87_spill] sm:$0xff] %v13636_v46  ;;  %v6903_v32 = vadd.f32 %v6902_v48, %v13636_v46 }
 0x9c1   :  { %v13639_v56 = vpop.f32.mrb[4].mxu0 }
 0x9c2   :  { %v6835_v42 = vadd.f32 %v6834_v62, %v13639_v56  ;;  %v13642_v9 = vpop.f32.mrb[5].mxu0 }
 0x9c3   :  { %17000 = vst [vmem:[#allocation88_spill] sm:$0xff] %v13642_v9  ;;  %v6904_v2 = vadd.f32 %v6903_v32, %v13642_v9  ;;  %v13645_v10 = vpop.f32.mrb[6].mxu0 }
 0x9c4   :  { %v6836_v28 = vadd.f32 %v6835_v42, %v13645_v10  ;;  %v13648_v45 = vpop.f32.mrb[7].mxu0 }
 0x9c5   :  { %17001 = vst [vmem:[#allocation89_spill] sm:$0xff] %v13648_v45  ;;  %v6905_v55 = vadd.f32 %v6904_v2, %v13648_v45 }
 0x9c9   :  { %v13651_v36 = vpop.f32.mrb[8].mxu0 }
 0x9ca   :  { %v6837_v48 = vadd.f32 %v6836_v28, %v13651_v36  ;;  %v13654_v46 = vpop.f32.mrb[9].mxu0 }
 0x9cb   :  { %17002 = vst [vmem:[#allocation90_spill] sm:$0xff] %v13654_v46  ;;  %v6906_v62 = vadd.f32 %v6905_v55, %v13654_v46  ;;  %v13657_v33 = vpop.f32.mrb[10].mxu0 }
 0x9cc   :  { %v6838_v32 = vadd.f32 %v6837_v48, %v13657_v33  ;;  %v13660_v9 = vpop.f32.mrb[11].mxu0 }
 0x9cd   :  { %17003 = vst [vmem:[#allocation91_spill] sm:$0xff] %v13660_v9  ;;  %v6907_v42 = vadd.f32 %v6906_v62, %v13660_v9 }
 0x9d1   :  { %v13663_v34 = vpop.f32.mrb[12].mxu0 }
 0x9d2   :  { %v6839_v2 = vadd.f32 %v6838_v32, %v13663_v34  ;;  %v13666_v45 = vpop.f32.mrb[13].mxu0 }
 0x9d3   :  { %17004 = vst [vmem:[#allocation92_spill] sm:$0xff] %v13666_v45  ;;  %v6908_v28 = vadd.f32 %v6907_v42, %v13666_v45  ;;  %v13669_v49 = vpop.f32.mrb[14].mxu0 }
 0x9d4   :  { %v6840_v55 = vadd.f32 %v6839_v2, %v13669_v49  ;;  %v13672_v46 = vpop.f32.mrb[15].mxu0 }
 0x9d5   :  { %17005 = vst [vmem:[#allocation93_spill] sm:$0xff] %v13672_v46  ;;  %v6909_v48 = vadd.f32 %v6908_v28, %v13672_v46 }
 0x9d9   :  { %v13675_v13 = vpop.f32.mrb[16].mxu0 }
 0x9da   :  { %v6841_v62 = vadd.f32 %v6840_v55, %v13675_v13  ;;  %v13678_v9 = vpop.f32.mrb[17].mxu0 }
 0x9db   :  { %17006 = vst [vmem:[#allocation94_spill] sm:$0xff] %v13678_v9  ;;  %v6910_v32 = vadd.f32 %v6909_v48, %v13678_v9  ;;  %v13681_v29 = vpop.f32.mrb[18].mxu0 }
 0x9dc   :  { %v6842_v42 = vadd.f32 %v6841_v62, %v13681_v29  ;;  %v13684_v45 = vpop.f32.mrb[19].mxu0 }
 0x9dd   :  { %17007 = vst [vmem:[#allocation95_spill] sm:$0xff] %v13684_v45  ;;  %v6911_v2 = vadd.f32 %v6910_v32, %v13684_v45 }
 0x9e1   :  { %v13687_v57 = vpop.f32.mrb[20].mxu0 }
 0x9e2   :  { %v6843_v28 = vadd.f32 %v6842_v42, %v13687_v57  ;;  %v13690_v46 = vpop.f32.mrb[21].mxu0 }
 0x9e3   :  { %17008 = vst [vmem:[#allocation65_spill] sm:$0xff] %v13690_v46  ;;  %v6912_v55 = vadd.f32 %v6911_v2, %v13690_v46  ;;  %v13693_v30 = vpop.f32.mrb[22].mxu0 }
 0x9e4   :  { %v6844_v48 = vadd.f32 %v6843_v28, %v13693_v30  ;;  %v13696_v9 = vpop.f32.mrb[23].mxu0 }
 0x9e5   :  { %17009 = vst [vmem:[#allocation66_spill] sm:$0xff] %v13696_v9  ;;  %v6913_v62 = vadd.f32 %v6912_v55, %v13696_v9 }
 0x9e9   :  { %v13699_v44 = vpop.f32.mrb[24].mxu0 }
 0x9ea   :  { %v6845_v32 = vadd.f32 %v6844_v48, %v13699_v44  ;;  %v13702_v45 = vpop.f32.mrb[25].mxu0 }
 0x9eb   :  { %17010 = vst [vmem:[#allocation39_spill] sm:$0xff] %v13702_v45  ;;  %v6914_v42 = vadd.f32 %v6913_v62, %v13702_v45  ;;  %v13705_v19 = vpop.f32.mrb[26].mxu0 }
 0x9ec   :  { %v6846_v2 = vadd.f32 %v6845_v32, %v13705_v19  ;;  %v13708_v46 = vpop.f32.mrb[27].mxu0 }
 0x9ed   :  { %17011 = vst [vmem:[#allocation42_spill] sm:$0xff] %v13708_v46  ;;  %v6915_v28 = vadd.f32 %v6914_v42, %v13708_v46 }
 0x9f1   :  { %v13711_v15 = vpop.f32.mrb[28].mxu0 }
 0x9f2   :  { %v6847_v55 = vadd.f32 %v6846_v2, %v13711_v15  ;;  %v13714_v9 = vpop.f32.mrb[29].mxu0 }
 0x9f3   :  { %17012 = vst [vmem:[#allocation34_spill] sm:$0xff] %v13714_v9  ;;  %v6916_v48 = vadd.f32 %v6915_v28, %v13714_v9  ;;  %v13717_v12 = vpop.f32.mrb[30].mxu0 }
 0x9f4   :  { %17013 = vst [vmem:[#allocation17_spill] sm:$0xff] %v13717_v12  ;;  %v6848_v62 = vadd.f32 %v6847_v55, %v13717_v12  ;;  %v13720_v45 = vpop.f32.mrb[31].mxu0 }
 0x9f5   :  { %17014 = vst [vmem:[#allocation47_spill] sm:$0xff] %v13720_v45  ;;  %v6917_v32 = vadd.f32 %v6916_v48, %v13720_v45 }
 0x9f9   :  { %v13723_v3 = vpop.f32.mrb[32].mxu0 }
 0x9fa   :  { %17015 = vst [vmem:[#allocation52_spill] sm:$0xff] %v13723_v3  ;;  %v6849_v42 = vadd.f32 %v6848_v62, %v13723_v3  ;;  %v13726_v46 = vpop.f32.mrb[33].mxu0 }
 0x9fb   :  { %17016 = vst [vmem:[#allocation20_spill] sm:$0xff] %v13726_v46  ;;  %v6918_v2 = vadd.f32 %v6917_v32, %v13726_v46  ;;  %v13729_v20 = vpop.f32.mrb[34].mxu0 }
 0x9fc   :  { %17017 = vst [vmem:[#allocation48_spill] sm:$0xff] %v13729_v20  ;;  %v6850_v28 = vadd.f32 %v6849_v42, %v13729_v20  ;;  %v13732_v9 = vpop.f32.mrb[35].mxu0 }
 0x9fd   :  { %17018 = vst [vmem:[#allocation57_spill] sm:$0xff] %v13732_v9  ;;  %v6919_v55 = vadd.f32 %v6918_v2, %v13732_v9 }
 0xa01   :  { %v13735_v17 = vpop.f32.mrb[36].mxu0 }
 0xa02   :  { %17019 = vst [vmem:[#allocation61_spill] sm:$0xff] %v13735_v17  ;;  %v6851_v48 = vadd.f32 %v6850_v28, %v13735_v17  ;;  %v13738_v45 = vpop.f32.mrb[37].mxu0 }
 0xa03   :  { %17020 = vst [vmem:[#allocation53_spill] sm:$0xff] %v13738_v45  ;;  %v6920_v62 = vadd.f32 %v6919_v55, %v13738_v45  ;;  %v13741_v11 = vpop.f32.mrb[38].mxu0 }
 0xa04   :  { %17021 = vst [vmem:[#allocation58_spill] sm:$0xff] %v13741_v11  ;;  %v6852_v32 = vadd.f32 %v6851_v48, %v13741_v11  ;;  %v13744_v46 = vpop.f32.mrb[39].mxu0 }
 0xa05   :  { %17022 = vst [vmem:[#allocation44_spill] sm:$0xff] %v13744_v46  ;;  %v6921_v42 = vadd.f32 %v6920_v62, %v13744_v46 }
 0xa09   :  { %v13747_v1 = vpop.f32.mrb[40].mxu0 }
 0xa0a   :  { %17023 = vst [vmem:[#allocation70_spill] sm:$0xff] %v13747_v1  ;;  %v6853_v2 = vadd.f32 %v6852_v32, %v13747_v1  ;;  %v13750_v9 = vpop.f32.mrb[41].mxu0 }
 0xa0b   :  { %17024 = vst [vmem:[#allocation62_spill] sm:$0xff] %v13750_v9  ;;  %v6922_v28 = vadd.f32 %v6921_v42, %v13750_v9  ;;  %v13753_v0 = vpop.f32.mrb[42].mxu0 }
 0xa0c   :  { %17025 = vst [vmem:[#allocation69_spill] sm:$0xff] %v13753_v0  ;;  %v6854_v55 = vadd.f32 %v6853_v2, %v13753_v0  ;;  %v13756_v45 = vpop.f32.mrb[43].mxu0 }
 0xa0d   :  { %17026 = vst [vmem:[#allocation71_spill] sm:$0xff] %v13756_v45  ;;  %v6923_v48 = vadd.f32 %v6922_v28, %v13756_v45 }
 0xa11   :  { %v13759_v11 = vpop.f32.mrb[44].mxu0 }
 0xa12   :  { %17027 = vst [vmem:[#allocation37_spill] sm:$0xff] %v13759_v11  ;;  %v6855_v62 = vadd.f32 %v6854_v55, %v13759_v11  ;;  %v13762_v46 = vpop.f32.mrb[45].mxu0 }
 0xa13   :  { %17028 = vst [vmem:[#allocation43_spill] sm:$0xff] %v13762_v46  ;;  %v6924_v32 = vadd.f32 %v6923_v48, %v13762_v46  ;;  %v13765_v1 = vpop.f32.mrb[46].mxu0 }
 0xa14   :  { %17029 = vst [vmem:[#allocation24_spill] sm:$0xff] %v13765_v1  ;;  %v6856_v42 = vadd.f32 %v6855_v62, %v13765_v1  ;;  %v13768_v9 = vpop.f32.mrb[47].mxu0 }
 0xa15   :  { %17030 = vst [vmem:[#allocation41_spill] sm:$0xff] %v13768_v9  ;;  %v6925_v2 = vadd.f32 %v6924_v32, %v13768_v9 }
 0xa19   :  { %v13771_v0 = vpop.f32.mrb[48].mxu0 }
 0xa1a   :  { %17031 = vst [vmem:[#allocation35_spill] sm:$0xff] %v13771_v0  ;;  %v6857_v28 = vadd.f32 %v6856_v42, %v13771_v0  ;;  %v13774_v45 = vpop.f32.mrb[49].mxu0 }
 0xa1b   :  { %17032 = vst [vmem:[#allocation49_spill] sm:$0xff] %v13774_v45  ;;  %v6926_v55 = vadd.f32 %v6925_v2, %v13774_v45  ;;  %v13777_v11 = vpop.f32.mrb[50].mxu0 }
 0xa1c   :  { %17033 = vst [vmem:[#allocation50_spill] sm:$0xff] %v13777_v11  ;;  %v6858_v48 = vadd.f32 %v6857_v28, %v13777_v11  ;;  %v13780_v46 = vpop.f32.mrb[51].mxu0 }
 0xa1d   :  { %17034 = vst [vmem:[#allocation55_spill] sm:$0xff] %v13780_v46  ;;  %v6927_v62 = vadd.f32 %v6926_v55, %v13780_v46 }
 0xa21   :  { %v13783_v1 = vpop.f32.mrb[52].mxu0 }
 0xa22   :  { %17035 = vst [vmem:[#allocation56_spill] sm:$0xff] %v13783_v1  ;;  %v6859_v32 = vadd.f32 %v6858_v48, %v13783_v1  ;;  %v13786_v9 = vpop.f32.mrb[53].mxu0 }
 0xa23   :  { %17036 = vst [vmem:[#allocation59_spill] sm:$0xff] %v13786_v9  ;;  %v6928_v42 = vadd.f32 %v6927_v62, %v13786_v9  ;;  %v13789_v0 = vpop.f32.mrb[54].mxu0 }
 0xa24   :  { %17037 = vst [vmem:[#allocation67_spill] sm:$0xff] %v13789_v0  ;;  %v6860_v2 = vadd.f32 %v6859_v32, %v13789_v0  ;;  %v13792_v45 = vpop.f32.mrb[55].mxu0 }
 0xa25   :  { %17038 = vst [vmem:[#allocation68_spill] sm:$0xff] %v13792_v45  ;;  %v6929_v28 = vadd.f32 %v6928_v42, %v13792_v45 }
 0xa29   :  { %v13795_v11 = vpop.f32.mrb[56].mxu0 }
 0xa2a   :  { %17039 = vst [vmem:[#allocation96_spill] sm:$0xff] %v13795_v11  ;;  %v6861_v55 = vadd.f32 %v6860_v2, %v13795_v11  ;;  %v13798_v46 = vpop.f32.mrb[57].mxu0 }
 0xa2b   :  { %17040 = vst [vmem:[#allocation97_spill] sm:$0xff] %v13798_v46  ;;  %v6930_v48 = vadd.f32 %v6929_v28, %v13798_v46  ;;  %v13801_v1 = vpop.f32.mrb[58].mxu0 }
 0xa2c   :  { %17041 = vst [vmem:[#allocation72_spill] sm:$0xff] %v13801_v1  ;;  %v6862_v62 = vadd.f32 %v6861_v55, %v13801_v1  ;;  %v13804_v9 = vpop.f32.mrb[59].mxu0 }
 0xa2d   :  { %17042 = vst [vmem:[#allocation29_spill] sm:$0xff] %v13804_v9  ;;  %v6931_v32 = vadd.f32 %v6930_v48, %v13804_v9 }
 0xa31   :  { %v13807_v0 = vpop.f32.mrb[60].mxu0 }
 0xa32   :  { %17043 = vst [vmem:[#allocation54_spill] sm:$0xff] %v13807_v0  ;;  %v6863_v42 = vadd.f32 %v6862_v62, %v13807_v0  ;;  %v13810_v45 = vpop.f32.mrb[61].mxu0 }
 0xa33   :  { %v6932_v2 = vadd.f32 %v6931_v32, %v13810_v45  ;;  %v13813_v11 = vpop.f32.mrb[62].mxu0  ;;  %v17092_v32 = vld [vmem:[#allocation69_spill] sm:$0xff] }
 0xa34   :  { %v6864_v28 = vadd.f32 %v6863_v42, %v13813_v11  ;;  %v13816_v46 = vpop.f32.mrb[63].mxu0 }
 0xa35   :  { %v6933_v55 = vadd.f32 %v6932_v2, %v13816_v46 }
 0xa36   :  { %v6865_v1 = vrot.slane %v6864_v28, 4 }
 0xa37   :  { %v6934_v48 = vrot.slane %v6933_v55, 4 }
 0xa38   :  { %v6866_v17 = vadd.f32 %v6865_v1, %v6864_v28  ;;  %v17084_v28 = vld [vmem:[#allocation48_spill] sm:$0xff] }
 0xa39   :  { %v13819_v12 = vadd.f32 %v6934_v48, %v6933_v55  ;;  %v17086_v55 = vld [vmem:[#allocation61_spill] sm:$0xff]  ;;  %v17088_v48 = vld [vmem:[#allocation58_spill] sm:$0xff] }
 0xa3a   :  { %v6867_v20 = vrot.slane %v6866_v17, 2 }
 0xa3c   :  { %v6868_v9 = vadd.f32 %v6867_v20, %v6866_v17 }
 0xa3e   :  { %v6869_v3 = vrot.slane %v6868_v9, 1 }
 0xa40   :  { %v6870_v62 = vadd.f32 %v6869_v3, %v6868_v9 }
 0xa42   :  { %v13821_v0 = vmul.f32 0.001953125, %v6870_v62  ;;  %v17090_v62 = vld [vmem:[#allocation70_spill] sm:$0xff] }
 0xa44   :  { %v13826_v42 = vsub.f32 %v13426_v21, %v13821_v0  ;;  %v13830_v2 = vsub.f32 %v13430_v39, %v13821_v0  ;;  %v13834_v1 = vsub.f32 %v13440_v24, %v13821_v0  ;;  %v13838_v17 = vsub.f32 %v13446_v47, %v13821_v0 }
 0xa45   :  { %v13842_v20 = vsub.f32 %v13454_v59, %v13821_v0  ;;  %v13846_v21 = vsub.f32 %v13460_v23, %v13821_v0  ;;  %v13850_v39 = vsub.f32 %v13468_v61, %v13821_v0  ;;  %v13854_v24 = vsub.f32 %v13474_v37, %v13821_v0 }
 0xa46   :  { %17044 = vst [vmem:[#allocation30_spill] sm:$0xff] %v13826_v42  ;;  %17045 = vst [vmem:[#allocation21_spill] sm:$0xff] %v13830_v2  ;;  %v13858_v47 = vsub.f32 %v13482_v5, %v13821_v0  ;;  %v13862_v59 = vsub.f32 %v13488_v6, %v13821_v0  ;;  %v13866_v23 = vsub.f32 %v13495_v35, %v13821_v0 }
 0xa47   :  { %17046 = vst [vmem:[#allocation40_spill] sm:$0xff] %v13834_v1  ;;  %17047 = vst [vmem:[#allocation98_spill] sm:$0xff] %v13838_v17  ;;  %v13870_v3 = vsub.f32 %v13501_v14, %v13821_v0  ;;  %v13874_v61 = vsub.f32 %v13507_v31, %v13821_v0  ;;  %v13878_v37 = vsub.f32 %v13513_v25, %v13821_v0 }
 0xa48   :  { %17048 = vst [vmem:[#allocation101_spill] sm:$0xff] %v13842_v20  ;;  %17049 = vst [vmem:[#allocation102_spill] sm:$0xff] %v13846_v21  ;;  %v13882_v5 = vsub.f32 %v13519_v52, %v13821_v0  ;;  %v13886_v6 = vsub.f32 %v13525_v60, %v13821_v0  ;;  %v13890_v35 = vsub.f32 %v13531_v27, %v13821_v0 }
 0xa49   :  { %17050 = vst [vmem:[#allocation103_spill] sm:$0xff] %v13850_v39  ;;  %17051 = vst [vmem:[#allocation104_spill] sm:$0xff] %v13854_v24  ;;  %v13894_v14 = vsub.f32 %v13537_v51, %v13821_v0  ;;  %v13898_v31 = vsub.f32 %v13543_v7, %v13821_v0  ;;  %v13902_v25 = vsub.f32 %v13549_v38, %v13821_v0 }
 0xa4a   :  { %17052 = vst [vmem:[#allocation105_spill] sm:$0xff] %v13858_v47  ;;  %17053 = vst [vmem:[#allocation106_spill] sm:$0xff] %v13862_v59  ;;  %v13906_v52 = vsub.f32 %v13555_v22, %v13821_v0  ;;  %v13910_v60 = vsub.f32 %v13561_v43, %v13821_v0  ;;  %v13914_v27 = vsub.f32 %v13567_v63, %v13821_v0 }
 0xa4b   :  { %17054 = vst [vmem:[#allocation107_spill] sm:$0xff] %v13866_v23  ;;  %17055 = vst [vmem:[#allocation108_spill] sm:$0xff] %v13870_v3  ;;  %v13918_v51 = vsub.f32 %v13573_v26, %v13821_v0  ;;  %v13922_v7 = vsub.f32 %v13579_v16, %v13821_v0  ;;  %v13926_v38 = vsub.f32 %v13585_v18, %v13821_v0 }
 0xa4c   :  { %17056 = vst [vmem:[#allocation109_spill] sm:$0xff] %v13898_v31  ;;  %17057 = vst [vmem:[#allocation110_spill] sm:$0xff] %v13902_v25  ;;  %v13930_v22 = vsub.f32 %v13591_v53, %v13821_v0  ;;  %v13934_v43 = vsub.f32 %v13597_v4, %v13821_v0  ;;  %v13938_v63 = vsub.f32 %v13603_v50, %v13821_v0  ;;  %v17080_v4 = vld [vmem:[#allocation17_spill] sm:$0xff]  ;;  %v17082_v50 = vld [vmem:[#allocation52_spill] sm:$0xff] }
 0xa4d   :  { %17058 = vst [vmem:[#allocation111_spill] sm:$0xff] %v13926_v38  ;;  %v13942_v26 = vsub.f32 %v13609_v54, %v13821_v0  ;;  %v13946_v16 = vsub.f32 %v13615_v58, %v13821_v0  ;;  %v13950_v18 = vsub.f32 %v13621_v41, %v13821_v0  ;;  %v13954_v9 = vsub.f32 %v13627_v8, %v13821_v0 }
 0xa4e   :  { %17059 = vst [vmem:[#allocation112_spill] sm:$0xff] %v13930_v22  ;;  %17060 = vst [vmem:[#allocation113_spill] sm:$0xff] %v13934_v43  ;;  %v13958_v53 = vsub.f32 %v13633_v40, %v13821_v0  ;;  %v13962_v54 = vsub.f32 %v13639_v56, %v13821_v0  ;;  %v13966_v58 = vsub.f32 %v13645_v10, %v13821_v0 }
 0xa4f   :  { %17061 = vst [vmem:[#allocation114_spill] sm:$0xff] %v13938_v63  ;;  %17062 = vst [vmem:[#allocation115_spill] sm:$0xff] %v13942_v26  ;;  %v13970_v41 = vsub.f32 %v13651_v36, %v13821_v0  ;;  %v13974_v8 = vsub.f32 %v13657_v33, %v13821_v0  ;;  %v13978_v40 = vsub.f32 %v13663_v34, %v13821_v0 }
 0xa50   :  { %17063 = vst [vmem:[#allocation116_spill] sm:$0xff] %v13946_v16  ;;  %17064 = vst [vmem:[#allocation117_spill] sm:$0xff] %v13950_v18  ;;  %v13982_v56 = vsub.f32 %v13669_v49, %v13821_v0  ;;  %v13986_v10 = vsub.f32 %v13675_v13, %v13821_v0  ;;  %v13990_v36 = vsub.f32 %v13681_v29, %v13821_v0 }
 0xa51   :  { %17065 = vst [vmem:[#allocation118_spill] sm:$0xff] %v13954_v9  ;;  %17066 = vst [vmem:[#allocation119_spill] sm:$0xff] %v13958_v53  ;;  %v13994_v33 = vsub.f32 %v13687_v57, %v13821_v0  ;;  %v13998_v34 = vsub.f32 %v13693_v30, %v13821_v0  ;;  %v14002_v49 = vsub.f32 %v13699_v44, %v13821_v0 }
 0xa52   :  { %17067 = vst [vmem:[#allocation120_spill] sm:$0xff] %v13962_v54  ;;  %17068 = vst [vmem:[#allocation121_spill] sm:$0xff] %v13966_v58  ;;  %v14006_v13 = vsub.f32 %v13705_v19, %v13821_v0  ;;  %v14010_v29 = vsub.f32 %v13711_v15, %v13821_v0  ;;  %v14014_v57 = vsub.f32 %v17080_v4, %v13821_v0 }
 0xa53   :  { %17069 = vst [vmem:[#allocation122_spill] sm:$0xff] %v13970_v41  ;;  %17070 = vst [vmem:[#allocation123_spill] sm:$0xff] %v13974_v8  ;;  %v14018_v30 = vsub.f32 %v17082_v50, %v13821_v0  ;;  %v14022_v44 = vsub.f32 %v17084_v28, %v13821_v0  ;;  %v14026_v19 = vsub.f32 %v17086_v55, %v13821_v0 }
 0xa54   :  { %17071 = vst [vmem:[#allocation124_spill] sm:$0xff] %v13978_v40  ;;  %17072 = vst [vmem:[#allocation125_spill] sm:$0xff] %v13982_v56  ;;  %v14030_v15 = vsub.f32 %v17088_v48, %v13821_v0  ;;  %v14034_v4 = vsub.f32 %v17090_v62, %v13821_v0  ;;  %v14038_v50 = vsub.f32 %v17092_v32, %v13821_v0 }
 0xa55   :  { %17073 = vst [vmem:[#allocation126_spill] sm:$0xff] %v13986_v10  ;;  %17074 = vst [vmem:[#allocation127_spill] sm:$0xff] %v13990_v36 }
 0xa56   :  { %17075 = vst [vmem:[#allocation128_spill] sm:$0xff] %v13994_v33  ;;  %17076 = vst [vmem:[#allocation129_spill] sm:$0xff] %v13998_v34 }
 0xa57   :  { %17077 = vst [vmem:[#allocation130_spill] sm:$0xff] %v14002_v49  ;;  %17078 = vst [vmem:[#allocation131_spill] sm:$0xff] %v14006_v13 }
 0xa58   :  { %17079 = vst [vmem:[#allocation132_spill] sm:$0xff] %v14010_v29  ;;  %17081 = vst [vmem:[#allocation17_spill] sm:$0xff] %v14014_v57 }
 0xa59   :  { %17083 = vst [vmem:[#allocation52_spill] sm:$0xff] %v14018_v30  ;;  %17085 = vst [vmem:[#allocation48_spill] sm:$0xff] %v14022_v44  ;;  %v17094_v30 = vld [vmem:[#allocation37_spill] sm:$0xff]  ;;  %v17096_v44 = vld [vmem:[#allocation24_spill] sm:$0xff] }
 0xa5a   :  { %17087 = vst [vmem:[#allocation61_spill] sm:$0xff] %v14026_v19  ;;  %17089 = vst [vmem:[#allocation58_spill] sm:$0xff] %v14030_v15  ;;  %v14042_v28 = vsub.f32 %v17094_v30, %v13821_v0  ;;  %v14046_v55 = vsub.f32 %v17096_v44, %v13821_v0  ;;  %v17098_v19 = vld [vmem:[#allocation35_spill] sm:$0xff]  ;;  %v17100_v15 = vld [vmem:[#allocation50_spill] sm:$0xff] }
 0xa5b   :  { %17091 = vst [vmem:[#allocation70_spill] sm:$0xff] %v14034_v4  ;;  %17093 = vst [vmem:[#allocation69_spill] sm:$0xff] %v14038_v50  ;;  %v14050_v48 = vsub.f32 %v17098_v19, %v13821_v0  ;;  %v14054_v62 = vsub.f32 %v17100_v15, %v13821_v0  ;;  %v17102_v4 = vld [vmem:[#allocation56_spill] sm:$0xff]  ;;  %v17104_v50 = vld [vmem:[#allocation67_spill] sm:$0xff] }
 0xa5c   :  { %17095 = vst [vmem:[#allocation37_spill] sm:$0xff] %v14042_v28  ;;  %17097 = vst [vmem:[#allocation24_spill] sm:$0xff] %v14046_v55  ;;  %v14058_v32 = vsub.f32 %v17102_v4, %v13821_v0  ;;  %v14062_v30 = vsub.f32 %v17104_v50, %v13821_v0  ;;  %v17106_v28 = vld [vmem:[#allocation96_spill] sm:$0xff]  ;;  %v14078_v4 = vsub.f32 %v13813_v11, %v13821_v0  ;;  %v17113_v50 = vrot.slane %v13819_v12, 2 }
 0xa5d   :  { %17099 = vst [vmem:[#allocation35_spill] sm:$0xff] %v14050_v48  ;;  %17101 = vst [vmem:[#allocation50_spill] sm:$0xff] %v14054_v62  ;;  %v14066_v44 = vsub.f32 %v17106_v28, %v13821_v0  ;;  %v17108_v55 = vld [vmem:[#allocation72_spill] sm:$0xff]  ;;  %v17110_v48 = vld [vmem:[#allocation54_spill] sm:$0xff]  ;;  %v7070_v28 = vmul.f32 %v13826_v42, %v13826_v42  ;;  %v7078_v11 = vmul.f32 %v13842_v20, %v13842_v20 }
 0xa5e   :  { %17103 = vst [vmem:[#allocation56_spill] sm:$0xff] %v14058_v32  ;;  %17105 = vst [vmem:[#allocation67_spill] sm:$0xff] %v14062_v30  ;;  %v14070_v19 = vsub.f32 %v17108_v55, %v13821_v0  ;;  %v14074_v15 = vsub.f32 %v17110_v48, %v13821_v0  ;;  %v6937_v30 = vadd.f32 %v17113_v50, %v13819_v12 }
 0xa5f   :  { %17107 = vst [vmem:[#allocation96_spill] sm:$0xff] %v14066_v44  ;;  %17112 = vst [vmem:[#allocation133_spill] sm:$0xff] %v14078_v4  ;;  %v7072_v55 = vmul.f32 %v13830_v2, %v13830_v2  ;;  %v7074_v48 = vmul.f32 %v13834_v1, %v13834_v1  ;;  %v7076_v0 = vmul.f32 %v13838_v17, %v13838_v17 }
 0xa60   :  { %17109 = vst [vmem:[#allocation72_spill] sm:$0xff] %v14070_v19  ;;  %17111 = vst [vmem:[#allocation54_spill] sm:$0xff] %v14074_v15  ;;  %v6938_v32 = vrot.slane %v6937_v30, 1  ;;  %v7080_v12 = vmul.f32 %v13846_v21, %v13846_v21  ;;  %v14105_v50 = vmul.f32 %v13862_v59, %v13862_v59  ;;  %v14109_v17 = vmul.f32 %v13866_v23, %v13866_v23  ;;  %v17114_v21 = vld [vmem:[#allocation99_spill] sm:$0xff]  ;;  %v17117_v59 = vld [vmem:[#allocation32_spill] sm:$0xff] }
 0xa61   :  { %v7198_v20 = vadd.f32 %v7072_v55, %v7070_v28  ;;  %v17118_v23 = vld [vmem:[#allocation27_spill] sm:$0xff]  ;;  %v17119_v28 = vld [vmem:[#allocation28_spill] sm:$0xff] }
 0xa62   :  { %v6939_v62 = vadd.f32 %v6938_v32, %v6937_v30  ;;  %v7082_v32 = vmul.f32 %v13850_v39, %v13850_v39  ;;  %v7084_v30 = vmul.f32 %v13854_v24, %v13854_v24  ;;  %v17115_v39 = vld [vmem:[#allocation100_spill] sm:$0xff]  ;;  %v17120_v55 = vld [vmem:[#allocation31_spill] sm:$0xff] }
 0xa63   :  { %v17116_v24 = vld [vmem:[#allocation36_spill] sm:$0xff]  ;;  %v7199_v15 = vadd.f32 %v7198_v20, %v7074_v48  ;;  %v17126_v20 = vld [vmem:[#allocation45_spill] sm:$0xff] }
 0xa64   :  { %v14087_v19 = vmul.f32 0.001953125, %v6939_v62  ;;  %v7086_v62 = vmul.f32 %v13858_v47, %v13858_v47 }
 0xa65   :  { %v7200_v34 = vadd.f32 %v7199_v15, %v7076_v0  ;;  %v17135_v15 = vld [vmem:[#allocation76_spill] sm:$0xff] }
 0xa66   :  { %v14113_v1 = vsub.f32 %v17114_v21, %v14087_v19  ;;  %v14117_v2 = vsub.f32 %v17115_v39, %v14087_v19  ;;  %v14121_v47 = vsub.f32 %v17116_v24, %v14087_v19  ;;  %v14125_v42 = vsub.f32 %v17117_v59, %v14087_v19  ;;  %v17121_v24 = vld [vmem:[#allocation33_spill] sm:$0xff]  ;;  %v17122_v59 = vld [vmem:[#allocation38_spill] sm:$0xff] }
 0xa67   :  { %v14129_v4 = vsub.f32 %v17118_v23, %v14087_v19  ;;  %v14133_v21 = vsub.f32 %v17119_v28, %v14087_v19  ;;  %v14137_v39 = vsub.f32 %v17120_v55, %v14087_v19  ;;  %v14141_v44 = vsub.f32 %v17121_v24, %v14087_v19  ;;  %v17123_v23 = vld [vmem:[#allocation22_spill] sm:$0xff]  ;;  %v17124_v28 = vld [vmem:[#allocation25_spill] sm:$0xff] }
 0xa68   :  { %v14145_v57 = vsub.f32 %v17122_v59, %v14087_v19  ;;  %v14149_v29 = vsub.f32 %v17123_v23, %v14087_v19  ;;  %v14153_v13 = vsub.f32 %v17124_v28, %v14087_v19  ;;  %v17125_v55 = vld [vmem:[#allocation26_spill] sm:$0xff]  ;;  %v14161_v48 = vsub.f32 %v17126_v20, %v14087_v19  ;;  %v17128_v23 = vld [vmem:[#allocation51_spill] sm:$0xff] }
 0xa69   :  { %v14157_v49 = vsub.f32 %v17125_v55, %v14087_v19  ;;  %v17127_v24 = vld [vmem:[#allocation46_spill] sm:$0xff]  ;;  %v14169_v33 = vsub.f32 %v17128_v23, %v14087_v19  ;;  %v17129_v28 = vld [vmem:[#allocation23_spill] sm:$0xff]  ;;  %v17130_v55 = vld [vmem:[#allocation73_spill] sm:$0xff]  ;;  %v14189_v0 = vsub.f32 %v17135_v15, %v14087_v19  ;;  %v7201_v8 = vadd.f32 %v7200_v34, %v7078_v11 }
 0xa6a   :  { %v14165_v59 = vsub.f32 %v17127_v24, %v14087_v19  ;;  %v14173_v36 = vsub.f32 %v17129_v28, %v14087_v19  ;;  %v14177_v10 = vsub.f32 %v17130_v55, %v14087_v19  ;;  %v17131_v20 = vld [vmem:[#allocation74_spill] sm:$0xff]  ;;  %v17133_v24 = vld [vmem:[#allocation75_spill] sm:$0xff]  ;;  %v17137_v23 = vld [vmem:[#allocation77_spill] sm:$0xff] }
 0xa6b   :  { %v14181_v56 = vsub.f32 %v17131_v20, %v14087_v19  ;;  %v14185_v40 = vsub.f32 %v17133_v24, %v14087_v19  ;;  %17136 = vst [vmem:[#allocation36_spill] sm:$0xff] %v14189_v0  ;;  %v14193_v28 = vsub.f32 %v17137_v23, %v14087_v19  ;;  %v17139_v55 = vld [vmem:[#allocation78_spill] sm:$0xff]  ;;  %v17140_v20 = vld [vmem:[#allocation79_spill] sm:$0xff]  ;;  %v17142_v24 = vld [vmem:[#allocation80_spill] sm:$0xff] }
 0xa6c   :  { %v14197_v41 = vsub.f32 %v17139_v55, %v14087_v19  ;;  %v17144_v15 = vld [vmem:[#allocation81_spill] sm:$0xff]  ;;  %v17146_v23 = vld [vmem:[#allocation60_spill] sm:$0xff]  ;;  %v17148_v34 = vld [vmem:[#allocation63_spill] sm:$0xff] }
 0xa6d   :  { %17132 = vst [vmem:[#allocation99_spill] sm:$0xff] %v14181_v56  ;;  %17134 = vst [vmem:[#allocation100_spill] sm:$0xff] %v14185_v40  ;;  %v14201_v56 = vsub.f32 %v17140_v20, %v14087_v19  ;;  %v14205_v40 = vsub.f32 %v17142_v24, %v14087_v19  ;;  %v14209_v0 = vsub.f32 %v17144_v15, %v14087_v19  ;;  %v17150_v55 = vld [vmem:[#allocation82_spill] sm:$0xff]  ;;  %v17152_v24 = vld [vmem:[#allocation83_spill] sm:$0xff] }
 0xa6e   :  { %17138 = vst [vmem:[#allocation32_spill] sm:$0xff] %v14193_v28  ;;  %v14213_v28 = vsub.f32 %v17146_v23, %v14087_v19  ;;  %v14217_v11 = vsub.f32 %v17148_v34, %v14087_v19  ;;  %v14221_v20 = vsub.f32 %v17150_v55, %v14087_v19  ;;  %v17154_v15 = vld [vmem:[#allocation64_spill] sm:$0xff]  ;;  %v17158_v34 = vld [vmem:[#allocation85_spill] sm:$0xff]  ;;  %v17160_v55 = vld [vmem:[#allocation86_spill] sm:$0xff] }
 0xa6f   :  { %17141 = vst [vmem:[#allocation27_spill] sm:$0xff] %v14201_v56  ;;  %17143 = vst [vmem:[#allocation28_spill] sm:$0xff] %v14205_v40  ;;  %v7202_v56 = vadd.f32 %v7201_v8, %v7080_v12  ;;  %v14225_v40 = vsub.f32 %v17152_v24, %v14087_v19  ;;  %v17156_v23 = vld [vmem:[#allocation84_spill] sm:$0xff]  ;;  %v17162_v8 = vld [vmem:[#allocation87_spill] sm:$0xff] }
 0xa70   :  { %17145 = vst [vmem:[#allocation31_spill] sm:$0xff] %v14209_v0  ;;  %17147 = vst [vmem:[#allocation33_spill] sm:$0xff] %v14213_v28  ;;  %v14229_v0 = vsub.f32 %v17154_v15, %v14087_v19  ;;  %v14233_v28 = vsub.f32 %v17156_v23, %v14087_v19  ;;  %v14245_v12 = vsub.f32 %v17162_v8, %v14087_v19  ;;  %v17164_v24 = vld [vmem:[#allocation88_spill] sm:$0xff]  ;;  %v17166_v23 = vld [vmem:[#allocation89_spill] sm:$0xff] }
 0xa71   :  { %17149 = vst [vmem:[#allocation38_spill] sm:$0xff] %v14217_v11  ;;  %17151 = vst [vmem:[#allocation22_spill] sm:$0xff] %v14221_v20  ;;  %v14237_v11 = vsub.f32 %v17158_v34, %v14087_v19  ;;  %v14241_v20 = vsub.f32 %v17160_v55, %v14087_v19  ;;  %v14249_v15 = vsub.f32 %v17164_v24, %v14087_v19  ;;  %v17168_v34 = vld [vmem:[#allocation90_spill] sm:$0xff]  ;;  %v17170_v55 = vld [vmem:[#allocation91_spill] sm:$0xff] }
 0xa72   :  { %17153 = vst [vmem:[#allocation25_spill] sm:$0xff] %v14225_v40  ;;  %17155 = vst [vmem:[#allocation26_spill] sm:$0xff] %v14229_v0  ;;  %v7203_v0 = vadd.f32 %v7202_v56, %v7082_v32  ;;  %v17172_v8 = vld [vmem:[#allocation92_spill] sm:$0xff]  ;;  %v17174_v24 = vld [vmem:[#allocation93_spill] sm:$0xff] }
 0xa73   :  { %17157 = vst [vmem:[#allocation45_spill] sm:$0xff] %v14233_v28  ;;  %17159 = vst [vmem:[#allocation46_spill] sm:$0xff] %v14237_v11  ;;  %v14253_v28 = vsub.f32 %v17166_v23, %v14087_v19  ;;  %v14257_v11 = vsub.f32 %v17168_v34, %v14087_v19  ;;  %v17176_v56 = vld [vmem:[#allocation94_spill] sm:$0xff]  ;;  %v17178_v23 = vld [vmem:[#allocation95_spill] sm:$0xff] }
 0xa74   :  { %17161 = vst [vmem:[#allocation51_spill] sm:$0xff] %v14241_v20  ;;  %17163 = vst [vmem:[#allocation23_spill] sm:$0xff] %v14245_v12  ;;  %v14261_v20 = vsub.f32 %v17170_v55, %v14087_v19  ;;  %v14265_v12 = vsub.f32 %v17172_v8, %v14087_v19  ;;  %v14273_v32 = vsub.f32 %v17176_v56, %v14087_v19  ;;  %v17180_v55 = vld [vmem:[#allocation65_spill] sm:$0xff]  ;;  %v17182_v8 = vld [vmem:[#allocation66_spill] sm:$0xff] }
 0xa75   :  { %17165 = vst [vmem:[#allocation73_spill] sm:$0xff] %v14249_v15  ;;  %17167 = vst [vmem:[#allocation74_spill] sm:$0xff] %v14253_v28  ;;  %v14269_v15 = vsub.f32 %v17174_v24, %v14087_v19  ;;  %v14277_v34 = vsub.f32 %v17178_v23, %v14087_v19  ;;  %v17184_v24 = vld [vmem:[#allocation39_spill] sm:$0xff]  ;;  %v17186_v56 = vld [vmem:[#allocation42_spill] sm:$0xff] }
 0xa76   :  { %17169 = vst [vmem:[#allocation75_spill] sm:$0xff] %v14257_v11  ;;  %17171 = vst [vmem:[#allocation76_spill] sm:$0xff] %v14261_v20  ;;  %v7204_v11 = vadd.f32 %v7203_v0, %v7084_v30  ;;  %v14281_v20 = vsub.f32 %v17180_v55, %v14087_v19  ;;  %v17188_v23 = vld [vmem:[#allocation34_spill] sm:$0xff]  ;;  %v17190_v30 = vld [vmem:[#allocation47_spill] sm:$0xff] }
 0xa77   :  { %17173 = vst [vmem:[#allocation77_spill] sm:$0xff] %v14265_v12  ;;  %17175 = vst [vmem:[#allocation78_spill] sm:$0xff] %v14269_v15  ;;  %v14285_v12 = vsub.f32 %v17182_v8, %v14087_v19  ;;  %v14289_v15 = vsub.f32 %v17184_v24, %v14087_v19  ;;  %v14301_v0 = vsub.f32 %v17190_v30, %v14087_v19  ;;  %v17192_v55 = vld [vmem:[#allocation20_spill] sm:$0xff]  ;;  %v17194_v24 = vld [vmem:[#allocation57_spill] sm:$0xff] }
 0xa78   :  { %17177 = vst [vmem:[#allocation79_spill] sm:$0xff] %v14273_v32  ;;  %17179 = vst [vmem:[#allocation80_spill] sm:$0xff] %v14277_v34  ;;  %v14293_v32 = vsub.f32 %v17186_v56, %v14087_v19  ;;  %v14297_v34 = vsub.f32 %v17188_v23, %v14087_v19  ;;  %v14305_v8 = vsub.f32 %v17192_v55, %v14087_v19  ;;  %v17196_v56 = vld [vmem:[#allocation53_spill] sm:$0xff]  ;;  %v17198_v23 = vld [vmem:[#allocation44_spill] sm:$0xff] }
 0xa79   :  { %17181 = vst [vmem:[#allocation81_spill] sm:$0xff] %v14281_v20  ;;  %17183 = vst [vmem:[#allocation60_spill] sm:$0xff] %v14285_v12  ;;  %v7205_v12 = vadd.f32 %v7204_v11, %v7086_v62  ;;  %v17200_v30 = vld [vmem:[#allocation62_spill] sm:$0xff]  ;;  %v17202_v55 = vld [vmem:[#allocation71_spill] sm:$0xff] }
 0xa7a   :  { %17185 = vst [vmem:[#allocation63_spill] sm:$0xff] %v14289_v15  ;;  %17187 = vst [vmem:[#allocation82_spill] sm:$0xff] %v14293_v32  ;;  %v14309_v15 = vsub.f32 %v17194_v24, %v14087_v19  ;;  %v14313_v32 = vsub.f32 %v17196_v56, %v14087_v19  ;;  %v17204_v62 = vld [vmem:[#allocation43_spill] sm:$0xff]  ;;  %v17206_v24 = vld [vmem:[#allocation41_spill] sm:$0xff] }
 0xa7b   :  { %17189 = vst [vmem:[#allocation83_spill] sm:$0xff] %v14297_v34  ;;  %17191 = vst [vmem:[#allocation64_spill] sm:$0xff] %v14301_v0  ;;  %v14317_v34 = vsub.f32 %v17198_v23, %v14087_v19  ;;  %v14321_v0 = vsub.f32 %v17200_v30, %v14087_v19  ;;  %v14329_v11 = vsub.f32 %v17204_v62, %v14087_v19  ;;  %v17208_v23 = vld [vmem:[#allocation49_spill] sm:$0xff]  ;;  %v17210_v30 = vld [vmem:[#allocation55_spill] sm:$0xff] }
 0xa7c   :  { %17193 = vst [vmem:[#allocation84_spill] sm:$0xff] %v14305_v8  ;;  %17195 = vst [vmem:[#allocation85_spill] sm:$0xff] %v14309_v15  ;;  %v14325_v8 = vsub.f32 %v17202_v55, %v14087_v19  ;;  %v14333_v56 = vsub.f32 %v17206_v24, %v14087_v19  ;;  %v17212_v55 = vld [vmem:[#allocation59_spill] sm:$0xff]  ;;  %v17214_v62 = vld [vmem:[#allocation68_spill] sm:$0xff] }
 0xa7d   :  { %17197 = vst [vmem:[#allocation86_spill] sm:$0xff] %v14313_v32  ;;  %17199 = vst [vmem:[#allocation87_spill] sm:$0xff] %v14317_v34  ;;  %v7206_v32 = vadd.f32 %v7205_v12, %v14105_v50  ;;  %v14338_v34 = vsub.f32 %v17208_v23, %v14087_v19  ;;  %v17216_v24 = vld [vmem:[#allocation97_spill] sm:$0xff]  ;;  %v14362_v23 = vsub.f32 %v13810_v45, %v14087_v19 }
 0xa7e   :  { %17201 = vst [vmem:[#allocation88_spill] sm:$0xff] %v14321_v0  ;;  %17203 = vst [vmem:[#allocation89_spill] sm:$0xff] %v14325_v8  ;;  %v14342_v0 = vsub.f32 %v17210_v30, %v14087_v19  ;;  %v14346_v8 = vsub.f32 %v17212_v55, %v14087_v19  ;;  %v17218_v50 = vld [vmem:[#allocation29_spill] sm:$0xff]  ;;  %v7092_v30 = vmul.f32 %v13870_v3, %v13870_v3 }
 0xa7f   :  { %17205 = vst [vmem:[#allocation90_spill] sm:$0xff] %v14329_v11  ;;  %17207 = vst [vmem:[#allocation91_spill] sm:$0xff] %v14333_v56  ;;  %v14350_v11 = vsub.f32 %v17214_v62, %v14087_v19  ;;  %v14354_v56 = vsub.f32 %v17216_v24, %v14087_v19  ;;  %v14358_v12 = vsub.f32 %v17218_v50, %v14087_v19 }
 0xa80   :  { %17209 = vst [vmem:[#allocation92_spill] sm:$0xff] %v14338_v34  ;;  %17211 = vst [vmem:[#allocation93_spill] sm:$0xff] %v14342_v0  ;;  %v7207_v55 = vadd.f32 %v7206_v32, %v14109_v17  ;;  %v14369_v62 = vsub.f32 %v13816_v46, %v14087_v19  ;;  %v7094_v24 = vmul.f32 %v13874_v61, %v13874_v61 }
 0xa81   :  { %17213 = vst [vmem:[#allocation94_spill] sm:$0xff] %v14346_v8  ;;  %17215 = vst [vmem:[#allocation95_spill] sm:$0xff] %v14350_v11  ;;  %v7096_v50 = vmul.f32 %v13878_v37, %v13878_v37  ;;  %v7098_v45 = vmul.f32 %v13882_v5, %v13882_v5  ;;  %v7100_v3 = vmul.f32 %v13886_v6, %v13886_v6 }
 0xa82   :  { %17217 = vst [vmem:[#allocation65_spill] sm:$0xff] %v14354_v56  ;;  %17219 = vst [vmem:[#allocation66_spill] sm:$0xff] %v14358_v12  ;;  %v7208_v56 = vadd.f32 %v7207_v55, %v7092_v30  ;;  %v7102_v46 = vmul.f32 %v13890_v35, %v13890_v35  ;;  %v7104_v32 = vmul.f32 %v13894_v14, %v13894_v14 }
 0xa83   :  { %17220 = vst [vmem:[#allocation39_spill] sm:$0xff] %v14362_v23  ;;  %v7106_v55 = vmul.f32 %v13898_v31, %v13898_v31 }
 0xa84   :  { %v7209_v12 = vadd.f32 %v7208_v56, %v7094_v24  ;;  %v7071_v24 = vmul.f32 %v14113_v1, %v14113_v1 }
 0xa86   :  { %v7210_v23 = vadd.f32 %v7209_v12, %v7096_v50  ;;  %v7073_v12 = vmul.f32 %v14117_v2, %v14117_v2 }
 0xa88   :  { %v7211_v17 = vadd.f32 %v7210_v23, %v7098_v45  ;;  %v7108_v23 = vmul.f32 %v13902_v25, %v13902_v25  ;;  %v7114_v25 = vmul.f32 %v13914_v27, %v13914_v27 }
 0xa8a   :  { %v7212_v19 = vadd.f32 %v7211_v17, %v7100_v3  ;;  %v7110_v3 = vmul.f32 %v13906_v52, %v13906_v52  ;;  %v7075_v17 = vmul.f32 %v14121_v47, %v14121_v47 }
 0xa8c   :  { %v7213_v30 = vadd.f32 %v7212_v19, %v7102_v46  ;;  %v7267_v46 = vadd.f32 %v7073_v12, %v7071_v24  ;;  %v7112_v19 = vmul.f32 %v13910_v60, %v13910_v60  ;;  %v7081_v12 = vmul.f32 %v14133_v21, %v14133_v21 }
 0xa8e   :  { %v7214_v56 = vadd.f32 %v7213_v30, %v7104_v32  ;;  %v7077_v30 = vmul.f32 %v14125_v42, %v14125_v42  ;;  %v7268_v31 = vadd.f32 %v7267_v46, %v7075_v17  ;;  %v7083_v46 = vmul.f32 %v14137_v39, %v14137_v39 }
 0xa90   :  { %v7215_v50 = vadd.f32 %v7214_v56, %v7106_v55  ;;  %v7079_v56 = vmul.f32 %v14129_v4, %v14129_v4 }
 0xa92   :  { %v7216_v45 = vadd.f32 %v7215_v50, %v7108_v23  ;;  %v7269_v23 = vadd.f32 %v7268_v31, %v7077_v30  ;;  %v7116_v50 = vmul.f32 %v13918_v51, %v13918_v51  ;;  %v7085_v30 = vmul.f32 %v14141_v44, %v14141_v44 }
 0xa94   :  { %v7217_v32 = vadd.f32 %v7216_v45, %v7110_v3  ;;  %v7270_v3 = vadd.f32 %v7269_v23, %v7079_v56  ;;  %v7118_v45 = vmul.f32 %v13922_v7, %v13922_v7  ;;  %v7087_v23 = vmul.f32 %v14145_v57, %v14145_v57 }
 0xa96   :  { %v7218_v55 = vadd.f32 %v7217_v32, %v7112_v19  ;;  %v7271_v19 = vadd.f32 %v7270_v3, %v7081_v12  ;;  %v7120_v32 = vmul.f32 %v13926_v38, %v13926_v38  ;;  %v7089_v3 = vmul.f32 %v14149_v29, %v14149_v29 }
 0xa98   :  { %v7219_v24 = vadd.f32 %v7218_v55, %v7114_v25  ;;  %v7272_v25 = vadd.f32 %v7271_v19, %v7083_v46  ;;  %v7122_v55 = vmul.f32 %v13930_v22, %v13930_v22  ;;  %v7091_v19 = vmul.f32 %v14153_v13, %v14153_v13 }
 0xa9a   :  { %v7220_v17 = vadd.f32 %v7219_v24, %v7116_v50  ;;  %v7273_v50 = vadd.f32 %v7272_v25, %v7085_v30  ;;  %v7124_v24 = vmul.f32 %v13934_v43, %v13934_v43  ;;  %v7093_v25 = vmul.f32 %v14157_v49, %v14157_v49 }
 0xa9c   :  { %v7221_v31 = vadd.f32 %v7220_v17, %v7118_v45  ;;  %v7274_v45 = vadd.f32 %v7273_v50, %v7087_v23  ;;  %v7126_v17 = vmul.f32 %v13938_v63, %v13938_v63  ;;  %v7095_v50 = vmul.f32 %v14161_v48, %v14161_v48 }
 0xa9e   :  { %v7222_v56 = vadd.f32 %v7221_v31, %v7120_v32  ;;  %v7275_v32 = vadd.f32 %v7274_v45, %v7089_v3  ;;  %v7128_v31 = vmul.f32 %v13942_v26, %v13942_v26  ;;  %v7097_v45 = vmul.f32 %v14165_v59, %v14165_v59 }
 0xaa0   :  { %v7223_v12 = vadd.f32 %v7222_v56, %v7122_v55  ;;  %v7276_v55 = vadd.f32 %v7275_v32, %v7091_v19  ;;  %v7130_v56 = vmul.f32 %v13946_v16, %v13946_v16  ;;  %v7099_v32 = vmul.f32 %v14169_v33, %v14169_v33 }
 0xaa2   :  { %v7224_v46 = vadd.f32 %v7223_v12, %v7124_v24  ;;  %v7277_v24 = vadd.f32 %v7276_v55, %v7093_v25  ;;  %v7132_v12 = vmul.f32 %v13950_v18, %v13950_v18  ;;  %v7101_v55 = vmul.f32 %v14173_v36, %v14173_v36 }
 0xaa4   :  { %v7225_v30 = vadd.f32 %v7224_v46, %v7126_v17  ;;  %v7278_v17 = vadd.f32 %v7277_v24, %v7095_v50  ;;  %v7134_v46 = vmul.f32 %v13954_v9, %v13954_v9  ;;  %v7103_v24 = vmul.f32 %v14177_v10, %v14177_v10 }
 0xaa6   :  { %v7226_v23 = vadd.f32 %v7225_v30, %v7128_v31  ;;  %v7279_v31 = vadd.f32 %v7278_v17, %v7097_v45  ;;  %v7136_v30 = vmul.f32 %v13958_v53, %v13958_v53  ;;  %v17221_v17 = vld [vmem:[#allocation99_spill] sm:$0xff] }
 0xaa7   :  { %v7105_v53 = vmul.f32 %v17221_v17, %v17221_v17 }
 0xaa8   :  { %v7227_v3 = vadd.f32 %v7226_v23, %v7130_v56  ;;  %v7280_v56 = vadd.f32 %v7279_v31, %v7099_v32  ;;  %v7138_v23 = vmul.f32 %v13962_v54, %v13962_v54  ;;  %v17223_v31 = vld [vmem:[#allocation100_spill] sm:$0xff] }
 0xaa9   :  { %v7107_v54 = vmul.f32 %v17223_v31, %v17223_v31 }
 0xaaa   :  { %v7228_v19 = vadd.f32 %v7227_v3, %v7132_v12  ;;  %v7281_v12 = vadd.f32 %v7280_v56, %v7101_v55  ;;  %v7140_v3 = vmul.f32 %v13966_v58, %v13966_v58  ;;  %v17225_v56 = vld [vmem:[#allocation36_spill] sm:$0xff] }
 0xaab   :  { %v7109_v58 = vmul.f32 %v17225_v56, %v17225_v56 }
 0xaac   :  { %v7229_v25 = vadd.f32 %v7228_v19, %v7134_v46  ;;  %v7282_v46 = vadd.f32 %v7281_v12, %v7103_v24  ;;  %v17222_v19 = vld [vmem:[#allocation122_spill] sm:$0xff]  ;;  %v17227_v12 = vld [vmem:[#allocation32_spill] sm:$0xff] }
 0xaad   :  { %v7142_v9 = vmul.f32 %v17222_v19, %v17222_v19  ;;  %v7111_v19 = vmul.f32 %v17227_v12, %v17227_v12 }
 0xaae   :  { %v7230_v50 = vadd.f32 %v7229_v25, %v7136_v30  ;;  %v7283_v30 = vadd.f32 %v7282_v46, %v7105_v53  ;;  %v17224_v25 = vld [vmem:[#allocation123_spill] sm:$0xff]  ;;  %v7113_v46 = vmul.f32 %v14197_v41, %v14197_v41 }
 0xaaf   :  { %v7144_v18 = vmul.f32 %v17224_v25, %v17224_v25 }
 0xab0   :  { %v7231_v45 = vadd.f32 %v7230_v50, %v7138_v23  ;;  %v7284_v23 = vadd.f32 %v7283_v30, %v7107_v54  ;;  %v17226_v50 = vld [vmem:[#allocation124_spill] sm:$0xff]  ;;  %v17230_v30 = vld [vmem:[#allocation27_spill] sm:$0xff] }
 0xab1   :  { %v7146_v16 = vmul.f32 %v17226_v50, %v17226_v50  ;;  %v7115_v50 = vmul.f32 %v17230_v30, %v17230_v30 }
 0xab2   :  { %v7232_v32 = vadd.f32 %v7231_v45, %v7140_v3  ;;  %v7285_v3 = vadd.f32 %v7284_v23, %v7109_v58  ;;  %v17228_v45 = vld [vmem:[#allocation125_spill] sm:$0xff]  ;;  %v17232_v23 = vld [vmem:[#allocation28_spill] sm:$0xff] }
 0xab3   :  { %v7148_v26 = vmul.f32 %v17228_v45, %v17228_v45  ;;  %v7117_v45 = vmul.f32 %v17232_v23, %v17232_v23 }
 0xab4   :  { %v7233_v55 = vadd.f32 %v7232_v32, %v7142_v9  ;;  %v7286_v9 = vadd.f32 %v7285_v3, %v7111_v19  ;;  %v17229_v32 = vld [vmem:[#allocation126_spill] sm:$0xff]  ;;  %v17234_v3 = vld [vmem:[#allocation31_spill] sm:$0xff] }
 0xab5   :  { %v7150_v25 = vmul.f32 %v17229_v32, %v17229_v32  ;;  %v7119_v32 = vmul.f32 %v17234_v3, %v17234_v3 }
 0xab6   :  { %v7234_v24 = vadd.f32 %v7233_v55, %v7144_v18  ;;  %v7287_v18 = vadd.f32 %v7286_v9, %v7113_v46  ;;  %v17231_v55 = vld [vmem:[#allocation127_spill] sm:$0xff]  ;;  %v17236_v9 = vld [vmem:[#allocation33_spill] sm:$0xff] }
 0xab7   :  { %v7152_v63 = vmul.f32 %v17231_v55, %v17231_v55  ;;  %v7121_v55 = vmul.f32 %v17236_v9, %v17236_v9 }
 0xab8   :  { %v7235_v53 = vadd.f32 %v7234_v24, %v7146_v16  ;;  %v7288_v16 = vadd.f32 %v7287_v18, %v7115_v50  ;;  %v17233_v24 = vld [vmem:[#allocation128_spill] sm:$0xff]  ;;  %v17238_v18 = vld [vmem:[#allocation38_spill] sm:$0xff] }
 0xab9   :  { %v7154_v43 = vmul.f32 %v17233_v24, %v17233_v24  ;;  %v7123_v24 = vmul.f32 %v17238_v18, %v17238_v18 }
 0xaba   :  { %v7236_v54 = vadd.f32 %v7235_v53, %v7148_v26  ;;  %v7289_v26 = vadd.f32 %v7288_v16, %v7117_v45  ;;  %v17235_v53 = vld [vmem:[#allocation129_spill] sm:$0xff]  ;;  %v17240_v16 = vld [vmem:[#allocation22_spill] sm:$0xff] }
 0xabb   :  { %v7156_v22 = vmul.f32 %v17235_v53, %v17235_v53  ;;  %v7125_v53 = vmul.f32 %v17240_v16, %v17240_v16 }
 0xabc   :  { %v7237_v58 = vadd.f32 %v7236_v54, %v7150_v25  ;;  %v7290_v25 = vadd.f32 %v7289_v26, %v7119_v32  ;;  %v17237_v54 = vld [vmem:[#allocation130_spill] sm:$0xff]  ;;  %v7127_v26 = vmul.f32 %v14225_v40, %v14225_v40 }
 0xabd   :  { %v7158_v38 = vmul.f32 %v17237_v54, %v17237_v54 }
 0xabe   :  { %v7238_v19 = vadd.f32 %v7237_v58, %v7152_v63  ;;  %v7291_v63 = vadd.f32 %v7290_v25, %v7121_v55  ;;  %v17239_v58 = vld [vmem:[#allocation131_spill] sm:$0xff]  ;;  %v17243_v25 = vld [vmem:[#allocation26_spill] sm:$0xff] }
 0xabf   :  { %v7160_v3 = vmul.f32 %v17239_v58, %v17239_v58  ;;  %v7129_v58 = vmul.f32 %v17243_v25, %v17243_v25 }
 0xac0   :  { %v7239_v46 = vadd.f32 %v7238_v19, %v7154_v43  ;;  %v7292_v43 = vadd.f32 %v7291_v63, %v7123_v24  ;;  %v17241_v19 = vld [vmem:[#allocation132_spill] sm:$0xff]  ;;  %v17245_v63 = vld [vmem:[#allocation45_spill] sm:$0xff] }
 0xac1   :  { %v7162_v9 = vmul.f32 %v17241_v19, %v17241_v19  ;;  %v7131_v19 = vmul.f32 %v17245_v63, %v17245_v63 }
 0xac2   :  { %v7240_v50 = vadd.f32 %v7239_v46, %v7156_v22  ;;  %v7293_v22 = vadd.f32 %v7292_v43, %v7125_v53  ;;  %v17242_v46 = vld [vmem:[#allocation17_spill] sm:$0xff]  ;;  %v17247_v43 = vld [vmem:[#allocation46_spill] sm:$0xff] }
 0xac3   :  { %v7164_v54 = vmul.f32 %v17242_v46, %v17242_v46  ;;  %v7133_v46 = vmul.f32 %v17247_v43, %v17247_v43 }
 0xac4   :  { %v7241_v45 = vadd.f32 %v7240_v50, %v7158_v38  ;;  %v7294_v38 = vadd.f32 %v7293_v22, %v7127_v26  ;;  %v17244_v50 = vld [vmem:[#allocation52_spill] sm:$0xff]  ;;  %v17249_v22 = vld [vmem:[#allocation51_spill] sm:$0xff] }
 0xac5   :  { %v7166_v16 = vmul.f32 %v17244_v50, %v17244_v50  ;;  %v7135_v50 = vmul.f32 %v17249_v22, %v17249_v22 }
 0xac6   :  { %v7242_v32 = vadd.f32 %v7241_v45, %v7160_v3  ;;  %v7295_v3 = vadd.f32 %v7294_v38, %v7129_v58  ;;  %v17246_v45 = vld [vmem:[#allocation48_spill] sm:$0xff]  ;;  %v17251_v38 = vld [vmem:[#allocation23_spill] sm:$0xff] }
 0xac7   :  { %v7168_v40 = vmul.f32 %v17246_v45, %v17246_v45  ;;  %v7137_v45 = vmul.f32 %v17251_v38, %v17251_v38  ;;  %v17259_v38 = vld [vmem:[#allocation77_spill] sm:$0xff] }
 0xac8   :  { %v7243_v55 = vadd.f32 %v7242_v32, %v7162_v9  ;;  %v7296_v9 = vadd.f32 %v7295_v3, %v7131_v19  ;;  %v17248_v32 = vld [vmem:[#allocation61_spill] sm:$0xff] }
 0xac9   :  { %v7170_v25 = vmul.f32 %v17248_v32, %v17248_v32  ;;  %v17253_v3 = vld [vmem:[#allocation73_spill] sm:$0xff] }
 0xaca   :  { %v7244_v24 = vadd.f32 %v7243_v55, %v7164_v54  ;;  %v7297_v54 = vadd.f32 %v7296_v9, %v7133_v46  ;;  %v17250_v55 = vld [vmem:[#allocation58_spill] sm:$0xff]  ;;  %v7139_v32 = vmul.f32 %v17253_v3, %v17253_v3  ;;  %v7141_v9 = vmul.f32 %v14253_v28, %v14253_v28  ;;  %v17260_v28 = vld [vmem:[#allocation35_spill] sm:$0xff] }
 0xacb   :  { %v7172_v63 = vmul.f32 %v17250_v55, %v17250_v55 }
 0xacc   :  { %v7245_v53 = vadd.f32 %v7244_v24, %v7166_v16  ;;  %v7298_v16 = vadd.f32 %v7297_v54, %v7135_v50  ;;  %v17252_v24 = vld [vmem:[#allocation70_spill] sm:$0xff]  ;;  %v17256_v54 = vld [vmem:[#allocation75_spill] sm:$0xff] }
 0xacd   :  { %v7174_v43 = vmul.f32 %v17252_v24, %v17252_v24  ;;  %v7143_v24 = vmul.f32 %v17256_v54, %v17256_v54  ;;  %v17262_v54 = vld [vmem:[#allocation79_spill] sm:$0xff] }
 0xace   :  { %v7246_v26 = vadd.f32 %v7245_v53, %v7168_v40  ;;  %v7299_v40 = vadd.f32 %v7298_v16, %v7137_v45  ;;  %v17254_v53 = vld [vmem:[#allocation69_spill] sm:$0xff]  ;;  %v17258_v16 = vld [vmem:[#allocation76_spill] sm:$0xff] }
 0xacf   :  { %v7176_v22 = vmul.f32 %v17254_v53, %v17254_v53  ;;  %v7145_v53 = vmul.f32 %v17258_v16, %v17258_v16 }
 0xad0   :  { %v7247_v58 = vadd.f32 %v7246_v26, %v7170_v25  ;;  %v7300_v25 = vadd.f32 %v7299_v40, %v7139_v32  ;;  %v17255_v26 = vld [vmem:[#allocation37_spill] sm:$0xff]  ;;  %v7147_v32 = vmul.f32 %v17259_v38, %v17259_v38  ;;  %v17265_v38 = vld [vmem:[#allocation56_spill] sm:$0xff] }
 0xad1   :  { %v7178_v55 = vmul.f32 %v17255_v26, %v17255_v26 }
 0xad2   :  { %v7248_v19 = vadd.f32 %v7247_v58, %v7172_v63  ;;  %v7301_v63 = vadd.f32 %v7300_v25, %v7141_v9  ;;  %v17257_v58 = vld [vmem:[#allocation24_spill] sm:$0xff] }
 0xad3   :  { %v7180_v3 = vmul.f32 %v17257_v58, %v17257_v58  ;;  %v17263_v58 = vld [vmem:[#allocation50_spill] sm:$0xff] }
 0xad4   :  { %v7249_v46 = vadd.f32 %v7248_v19, %v7174_v43  ;;  %v7302_v43 = vadd.f32 %v7301_v63, %v7143_v24  ;;  %v7184_v24 = vmul.f32 %v17263_v58, %v17263_v58 }
 0xad6   :  { %v7250_v50 = vadd.f32 %v7249_v46, %v7176_v22  ;;  %v7303_v40 = vadd.f32 %v7302_v43, %v7145_v53  ;;  %v7182_v22 = vmul.f32 %v17260_v28, %v17260_v28  ;;  %v17261_v46 = vld [vmem:[#allocation78_spill] sm:$0xff]  ;;  %v7155_v43 = vmul.f32 %v14281_v20, %v14281_v20 }
 0xad7   :  { %v7149_v26 = vmul.f32 %v17261_v46, %v17261_v46  ;;  %v17268_v46 = vld [vmem:[#allocation67_spill] sm:$0xff] }
 0xad8   :  { %v7251_v45 = vadd.f32 %v7250_v50, %v7178_v55  ;;  %v7304_v9 = vadd.f32 %v7303_v40, %v7147_v32  ;;  %v7151_v55 = vmul.f32 %v17262_v54, %v17262_v54  ;;  %v7186_v32 = vmul.f32 %v17265_v38, %v17265_v38 }
 0xada   :  { %v7252_v19 = vadd.f32 %v7251_v45, %v7180_v3  ;;  %v7305_v50 = vadd.f32 %v7304_v9, %v7149_v26  ;;  %v17264_v3 = vld [vmem:[#allocation80_spill] sm:$0xff]  ;;  %v17267_v9 = vld [vmem:[#allocation63_spill] sm:$0xff] }
 0xadb   :  { %v7153_v63 = vmul.f32 %v17264_v3, %v17264_v3  ;;  %v7159_v58 = vmul.f32 %v17267_v9, %v17267_v9  ;;  %v17271_v3 = vld [vmem:[#allocation96_spill] sm:$0xff] }
 0xadc   :  { %v7253_v25 = vadd.f32 %v7252_v19, %v7182_v22  ;;  %v7306_v45 = vadd.f32 %v7305_v50, %v7151_v55  ;;  %v17266_v19 = vld [vmem:[#allocation60_spill] sm:$0xff]  ;;  %v7188_v55 = vmul.f32 %v17268_v46, %v17268_v46 }
 0xadd   :  { %v7157_v40 = vmul.f32 %v17266_v19, %v17266_v19  ;;  %v17274_v19 = vld [vmem:[#allocation72_spill] sm:$0xff] }
 0xade   :  { %v7254_v53 = vadd.f32 %v7253_v25, %v7184_v24  ;;  %v7307_v28 = vadd.f32 %v7306_v45, %v7153_v63  ;;  %v17269_v25 = vld [vmem:[#allocation82_spill] sm:$0xff]  ;;  %v17270_v45 = vld [vmem:[#allocation83_spill] sm:$0xff] }
 0xadf   :  { %v7161_v50 = vmul.f32 %v17269_v25, %v17269_v25  ;;  %v7163_v38 = vmul.f32 %v17270_v45, %v17270_v45  ;;  %v17276_v45 = vld [vmem:[#allocation54_spill] sm:$0xff] }
 0xae0   :  { %v7308_v22 = vadd.f32 %v7307_v28, %v7155_v43  ;;  %v7255_v26 = vadd.f32 %v7254_v53, %v7186_v32  ;;  %v7190_v28 = vmul.f32 %v17271_v3, %v17271_v3  ;;  %v17272_v53 = vld [vmem:[#allocation64_spill] sm:$0xff] }
 0xae1   :  { %v7165_v43 = vmul.f32 %v17272_v53, %v17272_v53  ;;  %v17279_v53 = vld [vmem:[#allocation133_spill] sm:$0xff] }
 0xae2   :  { %v7309_v54 = vadd.f32 %v7308_v22, %v7157_v40  ;;  %v7256_v63 = vadd.f32 %v7255_v26, %v7188_v55  ;;  %v17273_v22 = vld [vmem:[#allocation84_spill] sm:$0xff] }
 0xae3   :  { %v7167_v46 = vmul.f32 %v17273_v22, %v17273_v22 }
 0xae4   :  { %v7310_v24 = vadd.f32 %v7309_v54, %v7159_v58  ;;  %v7257_v40 = vadd.f32 %v7256_v63, %v7190_v28  ;;  %v7192_v54 = vmul.f32 %v17274_v19, %v17274_v19  ;;  %v7169_v58 = vmul.f32 %v14309_v15, %v14309_v15  ;;  %v17282_v15 = vld [vmem:[#allocation91_spill] sm:$0xff] }
 0xae6   :  { %v7311_v20 = vadd.f32 %v7310_v24, %v7161_v50  ;;  %v7258_v55 = vadd.f32 %v7257_v40, %v7192_v54  ;;  %v17275_v50 = vld [vmem:[#allocation86_spill] sm:$0xff] }
 0xae7   :  { %v7171_v24 = vmul.f32 %v17275_v50, %v17275_v50 }
 0xae8   :  { %v7312_v32 = vadd.f32 %v7311_v20, %v7163_v38  ;;  %v7194_v20 = vmul.f32 %v17276_v45, %v17276_v45  ;;  %v17277_v38 = vld [vmem:[#allocation87_spill] sm:$0xff] }
 0xae9   :  { %v7173_v63 = vmul.f32 %v17277_v38, %v17277_v38 }
 0xaea   :  { %v7313_v9 = vadd.f32 %v7312_v32, %v7165_v43  ;;  %v7259_v43 = vadd.f32 %v7258_v55, %v7194_v20  ;;  %v17278_v32 = vld [vmem:[#allocation88_spill] sm:$0xff]  ;;  %v7183_v20 = vmul.f32 %v14338_v34, %v14338_v34  ;;  %v17284_v34 = vld [vmem:[#allocation66_spill] sm:$0xff] }
 0xaeb   :  { %v7175_v19 = vmul.f32 %v17278_v32, %v17278_v32 }
 0xaec   :  { %v7314_v26 = vadd.f32 %v7313_v9, %v7167_v46  ;;  %v7196_v46 = vmul.f32 %v17279_v53, %v17279_v53  ;;  %v17280_v9 = vld [vmem:[#allocation89_spill] sm:$0xff] }
 0xaed   :  { %v7177_v40 = vmul.f32 %v17280_v9, %v17280_v9 }
 0xaee   :  { %v7315_v3 = vadd.f32 %v7314_v26, %v7169_v58  ;;  %v7260_v58 = vadd.f32 %v7259_v43, %v7196_v46  ;;  %v17281_v26 = vld [vmem:[#allocation90_spill] sm:$0xff]  ;;  %v7189_v43 = vmul.f32 %v14350_v11, %v14350_v11 }
 0xaef   :  { %v7179_v45 = vmul.f32 %v17281_v26, %v17281_v26 }
 0xaf0   :  { %v7316_v28 = vadd.f32 %v7315_v3, %v7171_v24  ;;  %v7181_v3 = vmul.f32 %v17282_v15, %v17282_v15  ;;  %v7261_v24 = vrot.slane %v7260_v58, 4 }
 0xaf2   :  { %v7317_v22 = vadd.f32 %v7316_v28, %v7173_v63  ;;  %v7185_v28 = vmul.f32 %v14342_v0, %v14342_v0  ;;  %v7262_v9 = vadd.f32 %v7261_v24, %v7260_v58 }
 0xaf4   :  { %v7318_v54 = vadd.f32 %v7317_v22, %v7175_v19  ;;  %v7187_v19 = vmul.f32 %v14346_v8, %v14346_v8 }
 0xaf6   :  { %v7319_v50 = vadd.f32 %v7318_v54, %v7177_v40  ;;  %v7263_v40 = vrot.slane %v7262_v9, 2 }
 0xaf8   :  { %v7320_v55 = vadd.f32 %v7319_v50, %v7179_v45  ;;  %v17283_v45 = vld [vmem:[#allocation65_spill] sm:$0xff]  ;;  %v7264_v0 = vadd.f32 %v7263_v40, %v7262_v9 }
 0xaf9   :  { %v7191_v50 = vmul.f32 %v17283_v45, %v17283_v45 }
 0xafa   :  { %v7321_v63 = vadd.f32 %v7320_v55, %v7181_v3  ;;  %v7193_v3 = vmul.f32 %v17284_v34, %v17284_v34 }
 0xafc   :  { %v7322_v53 = vadd.f32 %v7321_v63, %v7183_v20  ;;  %v17285_v20 = vld [vmem:[#allocation39_spill] sm:$0xff] }
 0xafd   :  { %v7195_v58 = vmul.f32 %v17285_v20, %v17285_v20 }
 0xafe   :  { %v7323_v22 = vadd.f32 %v7322_v53, %v7185_v28  ;;  %v7197_v53 = vmul.f32 %v14369_v62, %v14369_v62  ;;  %v7265_v28 = vrot.slane %v7264_v0, 1 }
 0xb00   :  { %v7324_v46 = vadd.f32 %v7323_v22, %v7187_v19  ;;  %v7266_v11 = vadd.f32 %v7265_v28, %v7264_v0 }
 0xb02   :  { %v7325_v54 = vadd.f32 %v7324_v46, %v7189_v43  ;;  %v7336_v43 = vmul.f32 0.001953125, %v7266_v11 }
 0xb04   :  { %v7326_v55 = vadd.f32 %v7325_v54, %v7191_v50  ;;  %v7339_v34 = vadd.f32 1e-05, %v7336_v43  ;;  %v10186_v54 = vmov 1966171168  }
 0xb06   :  { %v7327_v24 = vadd.f32 %v7326_v55, %v7193_v3  ;;  %9891 = vrsqrt.f32 %v7339_v34  ;;  %v7347_v3 = vunpack.c.l.s4 %v10186_v54  ;;  %v8151_v34 = vld [vmem:[%s16169_s6 + $0x1] ss:$2 sm:$0x3] }
 0xb07   :  { %v17289_v54 = vld [vmem:[#allocation21_spill] sm:$0xff] }
 0xb08   :  { %v7328_v63 = vadd.f32 %v7327_v24, %v7195_v58  ;;  %v7348_v55 = vunpack.c.0.s8 %v7347_v3  ;;  %v17286_v58 = vld [vmem:[#allocation18_spill] sm:$0xff] }
 0xb09   :  { %v7369_v11 = vsub.s32 1, %v17286_v58 }
 0xb0a   :  { %v7329_v19 = vadd.f32 %v7328_v63, %v7197_v53  ;;  %v7351_v24 = vsub.s32 %v7348_v55, %v17286_v58  ;;  %v17290_v58 = vld [vmem:[#allocation40_spill] sm:$0xff] }
 0xb0b   :  { %v14611_v28 = vrot.slane %v8151_v34, %v7369_v11 }
 0xb0c   :  { %v7330_v22 = vrot.slane %v7329_v19, 4 }
 0xb0e   :  { %v7331_v8 = vadd.f32 %v7330_v22, %v7329_v19  ;;  %v17287_v19 = vld [vmem:[#allocation19_spill] sm:$0xff] }
 0xb10   :  { %v7332_v45 = vrot.slane %v7331_v8, 2  ;;  %v9892_v20 = vpop.eup %9891 }
 0xb12   :  { %v7333_v46 = vadd.f32 %v7332_v45, %v7331_v8  ;;  %v7338_v8 = vld [vmem:[%s16169_s6] ss:$2 sm:$0x3]  ;;  %s10187_s6 = smov [#allocation12]  }
 0xb13   :  { %s8031_s1 = sshll.u32 %s10187_s6, 4  ;;  %s8032_s1 = int_to_ptr.vmem [resolvable:$true] %s8031_s1 }
 0xb14   :  { %v7334_v15 = vrot.slane %v7333_v46, 1  ;;  %s10143_s25 = scalar_lea.vmem %s8032_s1, 16384  ;;  %p10148_p13 = scmp.lt.s32.totalorder %s8032_s1, %s8032_s1 }
 0xb15   :  { %p10144_p12 = scmp.ne.s32.totalorder %s8032_s1, %s10143_s25  ;;  %p10149_p0 = scmp.lt.s32.totalorder %s10143_s25, %s10143_s25 }
 0xb16   :  { %v7335_v50 = vadd.f32 %v7334_v15, %v7333_v46 }
 0xb17   :  { %p10150_p1 = por %p10149_p0, %p10148_p13 }
 0xb18   :  { %v7337_v9 = vmul.f32 0.001953125, %v7335_v50  ;;  %v17288_v50 = vld [vmem:[#allocation30_spill] sm:$0xff] }
 0xb19   :  { %p10151_p2 = pnand %p10150_p1, %p10144_p12 }
 0xb1a   :  { %v7340_v40 = vadd.f32 1e-05, %v7337_v9 }
 0xb1c   :  { %9893 = vrsqrt.f32 %v7340_v40 }
 0xb26   :  { %v9894_v53 = vpop.eup %9893 }
 0xb27   :  { %v7345_v63 = vcombine.low %v9892_v20, %v9894_v53  ;;  %v14619_v20 = vrot.slane %v8151_v34, %v17287_v19  ;;  %v17291_v53 = vld [vmem:[#allocation98_spill] sm:$0xff] }
 0xb29   :  { %v7352_v0 = vrot.slane %v7345_v63, %v7351_v24 }
 0xb2b   :  { %v7359_v15 = vrot.slane %v7352_v0, %v7351_v24 }
 0xb2d   :  { %v7361_v45 = vmul.f32 %v7359_v15, %v7338_v8 }
 0xb2f   :  { %v14614_v22 = vrot.slane %v7361_v45, %v17287_v19  ;;  %v14616_v43 = vrot.slane %v7361_v45, %v7369_v11  ;;  %v17294_v45 = vld [vmem:[#allocation103_spill] sm:$0xff] }
 0xb31   :  { %v7500_v46 = vmul.f32 %v14616_v43, %v14369_v62  ;;  %v14625_v9 = vmul.f32 %v14614_v22, %v17288_v50  ;;  %v14629_v40 = vmul.f32 %v14616_v43, %v14113_v1  ;;  %v14633_v3 = vmul.f32 %v14614_v22, %v17289_v54 }
 0xb32   :  { %v14637_v55 = vmul.f32 %v14616_v43, %v14117_v2  ;;  %v14641_v24 = vmul.f32 %v14614_v22, %v17290_v58  ;;  %v14645_v62 = vmul.f32 %v14616_v43, %v14121_v47  ;;  %v14649_v1 = vmul.f32 %v14614_v22, %v17291_v53  ;;  %v17292_v2 = vld [vmem:[#allocation101_spill] sm:$0xff]  ;;  %v17293_v47 = vld [vmem:[#allocation102_spill] sm:$0xff] }
 0xb33   :  { %v7641_v63 = vadd.f32 %v14611_v28, %v7500_v46  ;;  %v14654_v0 = vmul.f32 %v14616_v43, %v14125_v42  ;;  %v14658_v8 = vmul.f32 %v14614_v22, %v17292_v2  ;;  %v14662_v11 = vmul.f32 %v14616_v43, %v14129_v4  ;;  %v9905_v46 = vld [vmem:[#allocation3 + $0x3f8] sm:$0xff] }
 0xb34   :  { %v14666_v15 = vmul.f32 %v14614_v22, %v17293_v47  ;;  %v14670_v34 = vmul.f32 %v14616_v43, %v14133_v21  ;;  %v14674_v42 = vmul.f32 %v14614_v22, %v17294_v45  ;;  %v14678_v19 = vmul.f32 %v14616_v43, %v14137_v39  ;;  %v17295_v4 = vld [vmem:[#allocation104_spill] sm:$0xff]  ;;  %v17296_v21 = vld [vmem:[#allocation105_spill] sm:$0xff]  ;;  %v17297_v39 = vld [vmem:[#allocation106_spill] sm:$0xff] }
 0xb35   :  { %v7769_v50 = vadd.f32 %v9905_v46, %v7641_v63  ;;  %v14682_v54 = vmul.f32 %v14614_v22, %v17295_v4  ;;  %v14686_v58 = vmul.f32 %v14616_v43, %v14141_v44  ;;  %v14690_v53 = vmul.f32 %v14614_v22, %v17296_v21  ;;  %v17298_v45 = vld [vmem:[#allocation107_spill] sm:$0xff]  ;;  %v17299_v21 = vld [vmem:[#allocation108_spill] sm:$0xff] }
 0xb36   :  { %v14694_v2 = vmul.f32 %v14616_v43, %v14145_v57  ;;  %v14698_v47 = vmul.f32 %v14614_v22, %v17297_v39  ;;  %v14702_v63 = vmul.f32 %v14616_v43, %v14149_v29  ;;  %v14706_v44 = vmul.f32 %v14614_v22, %v17298_v45 }
 0xb37   :  { %v7897_v46 = vmax.f32 %v7769_v50, 0.0  ;;  %v14710_v4 = vmul.f32 %v14616_v43, %v14153_v13  ;;  %v14714_v57 = vmul.f32 %v14614_v22, %v17299_v21  ;;  %v14718_v39 = vmul.f32 %v14616_v43, %v14157_v49  ;;  %v17301_v21 = vld [vmem:[#allocation110_spill] sm:$0xff] }
 0xb38   :  { %v14722_v29 = vmul.f32 %v14614_v22, %v13874_v61  ;;  %v14726_v45 = vmul.f32 %v14616_v43, %v14161_v48  ;;  %v14730_v13 = vmul.f32 %v14614_v22, %v13878_v37  ;;  %v14734_v50 = vmul.f32 %v14616_v43, %v14165_v59 }
 0xb39   :  { %8025 = vst [vmem:[#allocation12 + $0x3f8] sm:$0xff] %v7897_v46  ;;  %v14738_v49 = vmul.f32 %v14614_v22, %v13882_v5  ;;  %v14742_v61 = vmul.f32 %v14616_v43, %v14169_v33  ;;  %v14746_v48 = vmul.f32 %v14614_v22, %v13886_v6  ;;  %v14750_v37 = vmul.f32 %v14616_v43, %v14173_v36  ;;  %v17300_v46 = vld [vmem:[#allocation109_spill] sm:$0xff] }
 0xb3a   :  { %v14754_v59 = vmul.f32 %v14614_v22, %v13890_v35  ;;  %v14758_v5 = vmul.f32 %v14616_v43, %v14177_v10  ;;  %v14762_v33 = vmul.f32 %v14614_v22, %v13894_v14  ;;  %v14766_v6 = vmul.f32 %v14616_v43, %v17221_v17 }
 0xb3b   :  { %v14770_v36 = vmul.f32 %v14614_v22, %v17300_v46  ;;  %v14774_v35 = vmul.f32 %v14616_v43, %v17223_v31  ;;  %v14778_v10 = vmul.f32 %v14614_v22, %v17301_v21  ;;  %v14782_v14 = vmul.f32 %v14616_v43, %v17225_v56 }
 0xb3c   :  { %v14786_v17 = vmul.f32 %v14614_v22, %v13906_v52  ;;  %v14790_v46 = vmul.f32 %v14616_v43, %v17227_v12  ;;  %v14794_v31 = vmul.f32 %v14614_v22, %v13910_v60  ;;  %v14798_v21 = vmul.f32 %v14616_v43, %v14197_v41 }
 0xb3d   :  { %v14802_v56 = vmul.f32 %v14614_v22, %v13914_v27  ;;  %v14806_v52 = vmul.f32 %v14616_v43, %v17230_v30  ;;  %v14810_v12 = vmul.f32 %v14614_v22, %v13918_v51  ;;  %v14814_v60 = vmul.f32 %v14616_v43, %v17232_v23 }
 0xb3e   :  { %17302 = vst [vmem:[#allocation42_spill] sm:$0xff] %v14798_v21  ;;  %v14818_v41 = vmul.f32 %v14614_v22, %v13922_v7  ;;  %v17307_v21 = vld [vmem:[#allocation31_spill] sm:$0xff]  ;;  %v14838_v7 = vmul.f32 %v14616_v43, %v17238_v18 }
 0xb3f   :  { %17303 = vst [vmem:[#allocation34_spill] sm:$0xff] %v14802_v56  ;;  %17304 = vst [vmem:[#allocation47_spill] sm:$0xff] %v14806_v52  ;;  %v14822_v27 = vmul.f32 %v14616_v43, %v17307_v21  ;;  %v17309_v56 = vld [vmem:[#allocation111_spill] sm:$0xff]  ;;  %v17311_v52 = vld [vmem:[#allocation33_spill] sm:$0xff] }
 0xb40   :  { %17305 = vst [vmem:[#allocation20_spill] sm:$0xff] %v14810_v12  ;;  %17306 = vst [vmem:[#allocation57_spill] sm:$0xff] %v14818_v41  ;;  %v14826_v30 = vmul.f32 %v14614_v22, %v17309_v56  ;;  %v14830_v51 = vmul.f32 %v14616_v43, %v17311_v52  ;;  %v17313_v12 = vld [vmem:[#allocation112_spill] sm:$0xff]  ;;  %v17316_v41 = vld [vmem:[#allocation113_spill] sm:$0xff] }
 0xb41   :  { %17308 = vst [vmem:[#allocation53_spill] sm:$0xff] %v14822_v27  ;;  %v14834_v23 = vmul.f32 %v14614_v22, %v17313_v12  ;;  %17315 = vst [vmem:[#allocation43_spill] sm:$0xff] %v14838_v7  ;;  %v14842_v21 = vmul.f32 %v14614_v22, %v17316_v41  ;;  %v17318_v27 = vld [vmem:[#allocation22_spill] sm:$0xff] }
 0xb42   :  { %17310 = vst [vmem:[#allocation44_spill] sm:$0xff] %v14826_v30  ;;  %17312 = vst [vmem:[#allocation62_spill] sm:$0xff] %v14830_v51  ;;  %v14846_v56 = vmul.f32 %v14616_v43, %v17318_v27  ;;  %v17320_v30 = vld [vmem:[#allocation114_spill] sm:$0xff]  ;;  %v17322_v51 = vld [vmem:[#allocation25_spill] sm:$0xff] }
 0xb43   :  { %17314 = vst [vmem:[#allocation71_spill] sm:$0xff] %v14834_v23  ;;  %17317 = vst [vmem:[#allocation41_spill] sm:$0xff] %v14842_v21  ;;  %v14850_v52 = vmul.f32 %v14614_v22, %v17320_v30  ;;  %v14854_v12 = vmul.f32 %v14616_v43, %v17322_v51  ;;  %v17324_v23 = vld [vmem:[#allocation115_spill] sm:$0xff]  ;;  %v17326_v7 = vld [vmem:[#allocation26_spill] sm:$0xff] }
 0xb44   :  { %17319 = vst [vmem:[#allocation49_spill] sm:$0xff] %v14846_v56  ;;  %v14858_v18 = vmul.f32 %v14614_v22, %v17324_v23  ;;  %v14862_v41 = vmul.f32 %v14616_v43, %v17326_v7  ;;  %v17328_v21 = vld [vmem:[#allocation116_spill] sm:$0xff]  ;;  %v17330_v56 = vld [vmem:[#allocation45_spill] sm:$0xff] }
 0xb45   :  { %17321 = vst [vmem:[#allocation55_spill] sm:$0xff] %v14850_v52  ;;  %17323 = vst [vmem:[#allocation59_spill] sm:$0xff] %v14854_v12  ;;  %v14866_v27 = vmul.f32 %v14614_v22, %v17328_v21  ;;  %v14870_v30 = vmul.f32 %v14616_v43, %v17330_v56  ;;  %v17332_v52 = vld [vmem:[#allocation117_spill] sm:$0xff]  ;;  %v17334_v12 = vld [vmem:[#allocation46_spill] sm:$0xff] }
 0xb46   :  { %17325 = vst [vmem:[#allocation68_spill] sm:$0xff] %v14858_v18  ;;  %17327 = vst [vmem:[#allocation97_spill] sm:$0xff] %v14862_v41  ;;  %v14874_v51 = vmul.f32 %v14614_v22, %v17332_v52  ;;  %v14878_v23 = vmul.f32 %v14616_v43, %v17334_v12  ;;  %v17336_v18 = vld [vmem:[#allocation118_spill] sm:$0xff]  ;;  %v17338_v41 = vld [vmem:[#allocation51_spill] sm:$0xff] }
 0xb47   :  { %17329 = vst [vmem:[#allocation29_spill] sm:$0xff] %v14866_v27  ;;  %17331 = vst [vmem:[#allocation99_spill] sm:$0xff] %v14870_v30  ;;  %v14882_v7 = vmul.f32 %v14614_v22, %v17336_v18  ;;  %v14886_v21 = vmul.f32 %v14616_v43, %v17338_v41  ;;  %v17340_v27 = vld [vmem:[#allocation119_spill] sm:$0xff] }
 0xb48   :  { %17333 = vst [vmem:[#allocation100_spill] sm:$0xff] %v14874_v51  ;;  %17335 = vst [vmem:[#allocation36_spill] sm:$0xff] %v14878_v23  ;;  %v14890_v56 = vmul.f32 %v14614_v22, %v17340_v27  ;;  %v17342_v30 = vld [vmem:[#allocation23_spill] sm:$0xff]  ;;  %v17344_v51 = vld [vmem:[#allocation120_spill] sm:$0xff] }
 0xb49   :  { %17337 = vst [vmem:[#allocation32_spill] sm:$0xff] %v14882_v7  ;;  %17339 = vst [vmem:[#allocation27_spill] sm:$0xff] %v14886_v21  ;;  %v14894_v52 = vmul.f32 %v14616_v43, %v17342_v30  ;;  %v14898_v12 = vmul.f32 %v14614_v22, %v17344_v51  ;;  %v17346_v23 = vld [vmem:[#allocation73_spill] sm:$0xff]  ;;  %v17349_v21 = vld [vmem:[#allocation74_spill] sm:$0xff] }
 0xb4a   :  { %17341 = vst [vmem:[#allocation28_spill] sm:$0xff] %v14890_v56  ;;  %v14902_v18 = vmul.f32 %v14616_v43, %v17346_v23  ;;  %v17347_v7 = vld [vmem:[#allocation121_spill] sm:$0xff]  ;;  %v14910_v27 = vmul.f32 %v14616_v43, %v17349_v21  ;;  %v17351_v56 = vld [vmem:[#allocation122_spill] sm:$0xff] }
 0xb4b   :  { %17343 = vst [vmem:[#allocation38_spill] sm:$0xff] %v14894_v52  ;;  %17345 = vst [vmem:[#allocation76_spill] sm:$0xff] %v14898_v12  ;;  %v14906_v41 = vmul.f32 %v14614_v22, %v17347_v7  ;;  %v14914_v30 = vmul.f32 %v14614_v22, %v17351_v56  ;;  %v17353_v52 = vld [vmem:[#allocation75_spill] sm:$0xff]  ;;  %v14926_v7 = vmul.f32 %v14616_v43, %v17258_v16 }
 0xb4c   :  { %17350 = vst [vmem:[#allocation87_spill] sm:$0xff] %v14910_v27  ;;  %v14918_v51 = vmul.f32 %v14616_v43, %v17353_v52  ;;  %v17355_v12 = vld [vmem:[#allocation123_spill] sm:$0xff]  ;;  %v17360_v27 = vld [vmem:[#allocation77_spill] sm:$0xff] }
 0xb4d   :  { %17348 = vst [vmem:[#allocation82_spill] sm:$0xff] %v14906_v41  ;;  %17352 = vst [vmem:[#allocation88_spill] sm:$0xff] %v14914_v30  ;;  %v14922_v23 = vmul.f32 %v14614_v22, %v17355_v12  ;;  %v17358_v41 = vld [vmem:[#allocation124_spill] sm:$0xff]  ;;  %v14934_v56 = vmul.f32 %v14616_v43, %v17360_v27  ;;  %v17362_v30 = vld [vmem:[#allocation125_spill] sm:$0xff] }
 0xb4e   :  { %17354 = vst [vmem:[#allocation90_spill] sm:$0xff] %v14918_v51  ;;  %17357 = vst [vmem:[#allocation19_spill] sm:$0xff] %v14926_v7  ;;  %v14930_v21 = vmul.f32 %v14614_v22, %v17358_v41  ;;  %v14938_v52 = vmul.f32 %v14614_v22, %v17362_v30  ;;  %v17364_v51 = vld [vmem:[#allocation78_spill] sm:$0xff]  ;;  %v17368_v7 = vld [vmem:[#allocation79_spill] sm:$0xff] }
 0xb4f   :  { %17356 = vst [vmem:[#allocation18_spill] sm:$0xff] %v14922_v23  ;;  %17361 = vst [vmem:[#allocation21_spill] sm:$0xff] %v14934_v56  ;;  %v14942_v12 = vmul.f32 %v14616_v43, %v17364_v51  ;;  %v17366_v23 = vld [vmem:[#allocation126_spill] sm:$0xff]  ;;  %v14950_v41 = vmul.f32 %v14616_v43, %v17368_v7  ;;  %v17372_v56 = vld [vmem:[#allocation80_spill] sm:$0xff] }
 0xb50   :  { %17359 = vst [vmem:[#allocation30_spill] sm:$0xff] %v14930_v21  ;;  %17363 = vst [vmem:[#allocation40_spill] sm:$0xff] %v14938_v52  ;;  %v14946_v16 = vmul.f32 %v14614_v22, %v17366_v23  ;;  %v17370_v21 = vld [vmem:[#allocation127_spill] sm:$0xff]  ;;  %v14958_v30 = vmul.f32 %v14616_v43, %v17372_v56  ;;  %v17374_v52 = vld [vmem:[#allocation128_spill] sm:$0xff] }
 0xb51   :  { %17365 = vst [vmem:[#allocation98_spill] sm:$0xff] %v14942_v12  ;;  %17369 = vst [vmem:[#allocation102_spill] sm:$0xff] %v14950_v41  ;;  %v14954_v27 = vmul.f32 %v14614_v22, %v17370_v21  ;;  %v14962_v51 = vmul.f32 %v14614_v22, %v17374_v52  ;;  %v17376_v12 = vld [vmem:[#allocation81_spill] sm:$0xff]  ;;  %v17379_v41 = vld [vmem:[#allocation60_spill] sm:$0xff] }
 0xb52   :  { %17367 = vst [vmem:[#allocation101_spill] sm:$0xff] %v14946_v16  ;;  %17373 = vst [vmem:[#allocation104_spill] sm:$0xff] %v14958_v30  ;;  %v14966_v23 = vmul.f32 %v14616_v43, %v17376_v12  ;;  %v17377_v16 = vld [vmem:[#allocation129_spill] sm:$0xff]  ;;  %v14974_v21 = vmul.f32 %v14616_v43, %v17379_v41  ;;  %v17383_v30 = vld [vmem:[#allocation63_spill] sm:$0xff] }
 0xb53   :  { %17371 = vst [vmem:[#allocation103_spill] sm:$0xff] %v14954_v27  ;;  %17375 = vst [vmem:[#allocation105_spill] sm:$0xff] %v14962_v51  ;;  %v14970_v7 = vmul.f32 %v14614_v22, %v17377_v16  ;;  %v17381_v27 = vld [vmem:[#allocation130_spill] sm:$0xff]  ;;  %v14982_v52 = vmul.f32 %v14616_v43, %v17383_v30  ;;  %v17385_v51 = vld [vmem:[#allocation131_spill] sm:$0xff]  ;;  %v14990_v16 = vmul.f32 %v14616_v43, %v17269_v25 }
 0xb54   :  { %17380 = vst [vmem:[#allocation107_spill] sm:$0xff] %v14974_v21  ;;  %v14978_v56 = vmul.f32 %v14614_v22, %v17381_v27  ;;  %v14986_v12 = vmul.f32 %v14614_v22, %v17385_v51  ;;  %v17390_v21 = vld [vmem:[#allocation83_spill] sm:$0xff] }
 0xb55   :  { %17378 = vst [vmem:[#allocation106_spill] sm:$0xff] %v14970_v7  ;;  %17384 = vst [vmem:[#allocation109_spill] sm:$0xff] %v14982_v52  ;;  %v17388_v7 = vld [vmem:[#allocation132_spill] sm:$0xff]  ;;  %v14998_v27 = vmul.f32 %v14616_v43, %v17390_v21 }
 0xb56   :  { %17382 = vst [vmem:[#allocation108_spill] sm:$0xff] %v14978_v56  ;;  %17386 = vst [vmem:[#allocation110_spill] sm:$0xff] %v14986_v12  ;;  %v14994_v41 = vmul.f32 %v14614_v22, %v17388_v7  ;;  %v17392_v56 = vld [vmem:[#allocation17_spill] sm:$0xff]  ;;  %v17394_v52 = vld [vmem:[#allocation64_spill] sm:$0xff] }
 0xb57   :  { %17387 = vst [vmem:[#allocation31_spill] sm:$0xff] %v14990_v16  ;;  %17391 = vst [vmem:[#allocation33_spill] sm:$0xff] %v14998_v27  ;;  %v15002_v30 = vmul.f32 %v14614_v22, %v17392_v56  ;;  %v15006_v51 = vmul.f32 %v14616_v43, %v17394_v52  ;;  %v17396_v12 = vld [vmem:[#allocation52_spill] sm:$0xff]  ;;  %v17401_v27 = vld [vmem:[#allocation85_spill] sm:$0xff] }
 0xb58   :  { %17389 = vst [vmem:[#allocation111_spill] sm:$0xff] %v14994_v41  ;;  %v15010_v25 = vmul.f32 %v14614_v22, %v17396_v12  ;;  %v17398_v16 = vld [vmem:[#allocation84_spill] sm:$0xff]  ;;  %v15022_v56 = vmul.f32 %v14616_v43, %v17401_v27 }
 0xb59   :  { %17393 = vst [vmem:[#allocation112_spill] sm:$0xff] %v15002_v30  ;;  %17395 = vst [vmem:[#allocation113_spill] sm:$0xff] %v15006_v51  ;;  %v15014_v7 = vmul.f32 %v14616_v43, %v17398_v16  ;;  %v17399_v41 = vld [vmem:[#allocation48_spill] sm:$0xff]  ;;  %v17402_v30 = vld [vmem:[#allocation61_spill] sm:$0xff] }
 0xb5a   :  { %17397 = vst [vmem:[#allocation22_spill] sm:$0xff] %v15010_v25  ;;  %v15018_v21 = vmul.f32 %v14614_v22, %v17399_v41  ;;  %v15026_v52 = vmul.f32 %v14614_v22, %v17402_v30  ;;  %v17404_v51 = vld [vmem:[#allocation86_spill] sm:$0xff]  ;;  %v15038_v41 = vmul.f32 %v14616_v43, %v17277_v38  ;;  %v15046_v30 = vmul.f32 %v14616_v43, %v17278_v32 }
 0xb5b   :  { %v15030_v12 = vmul.f32 %v14616_v43, %v17404_v51  ;;  %v17406_v25 = vld [vmem:[#allocation58_spill] sm:$0xff] }
 0xb5c   :  { %17400 = vst [vmem:[#allocation114_spill] sm:$0xff] %v15018_v21  ;;  %17403 = vst [vmem:[#allocation25_spill] sm:$0xff] %v15026_v52  ;;  %v15034_v16 = vmul.f32 %v14614_v22, %v17406_v25  ;;  %v17408_v21 = vld [vmem:[#allocation70_spill] sm:$0xff]  ;;  %v17411_v52 = vld [vmem:[#allocation69_spill] sm:$0xff] }
 0xb5d   :  { %17405 = vst [vmem:[#allocation115_spill] sm:$0xff] %v15030_v12  ;;  %v15042_v27 = vmul.f32 %v14614_v22, %v17408_v21  ;;  %17410 = vst [vmem:[#allocation45_spill] sm:$0xff] %v15046_v30  ;;  %v15050_v51 = vmul.f32 %v14614_v22, %v17411_v52  ;;  %v17413_v12 = vld [vmem:[#allocation89_spill] sm:$0xff]  ;;  %v15062_v21 = vmul.f32 %v14616_v43, %v17281_v26  ;;  %v17420_v30 = vld [vmem:[#allocation91_spill] sm:$0xff] }
 0xb5e   :  { %17407 = vst [vmem:[#allocation26_spill] sm:$0xff] %v15034_v16  ;;  %v15054_v25 = vmul.f32 %v14616_v43, %v17413_v12  ;;  %v17415_v16 = vld [vmem:[#allocation37_spill] sm:$0xff]  ;;  %v15070_v52 = vmul.f32 %v14616_v43, %v17420_v30 }
 0xb5f   :  { %17409 = vst [vmem:[#allocation116_spill] sm:$0xff] %v15042_v27  ;;  %17412 = vst [vmem:[#allocation117_spill] sm:$0xff] %v15050_v51  ;;  %v15058_v38 = vmul.f32 %v14614_v22, %v17415_v16  ;;  %v17418_v27 = vld [vmem:[#allocation24_spill] sm:$0xff]  ;;  %v17422_v51 = vld [vmem:[#allocation35_spill] sm:$0xff] }
 0xb60   :  { %17414 = vst [vmem:[#allocation46_spill] sm:$0xff] %v15054_v25  ;;  %17417 = vst [vmem:[#allocation51_spill] sm:$0xff] %v15062_v21  ;;  %v15066_v32 = vmul.f32 %v14614_v22, %v17418_v27  ;;  %v15074_v12 = vmul.f32 %v14614_v22, %v17422_v51  ;;  %v17424_v25 = vld [vmem:[#allocation92_spill] sm:$0xff]  ;;  %v17428_v21 = vld [vmem:[#allocation93_spill] sm:$0xff] }
 0xb61   :  { %17416 = vst [vmem:[#allocation118_spill] sm:$0xff] %v15058_v38  ;;  %17421 = vst [vmem:[#allocation23_spill] sm:$0xff] %v15070_v52  ;;  %v15078_v16 = vmul.f32 %v14616_v43, %v17424_v25  ;;  %v17426_v38 = vld [vmem:[#allocation50_spill] sm:$0xff]  ;;  %v15086_v27 = vmul.f32 %v14616_v43, %v17428_v21 }
 0xb62   :  { %17419 = vst [vmem:[#allocation119_spill] sm:$0xff] %v15066_v32  ;;  %17423 = vst [vmem:[#allocation120_spill] sm:$0xff] %v15074_v12  ;;  %v15082_v26 = vmul.f32 %v14614_v22, %v17426_v38  ;;  %v17430_v32 = vld [vmem:[#allocation56_spill] sm:$0xff]  ;;  %v17432_v52 = vld [vmem:[#allocation94_spill] sm:$0xff] }
 0xb63   :  { %17425 = vst [vmem:[#allocation73_spill] sm:$0xff] %v15078_v16  ;;  %17429 = vst [vmem:[#allocation74_spill] sm:$0xff] %v15086_v27  ;;  %v15090_v30 = vmul.f32 %v14614_v22, %v17430_v32  ;;  %v15094_v51 = vmul.f32 %v14616_v43, %v17432_v52  ;;  %v17434_v12 = vld [vmem:[#allocation67_spill] sm:$0xff]  ;;  %v17440_v27 = vld [vmem:[#allocation65_spill] sm:$0xff] }
 0xb64   :  { %17427 = vst [vmem:[#allocation121_spill] sm:$0xff] %v15082_v26  ;;  %v15098_v25 = vmul.f32 %v14614_v22, %v17434_v12  ;;  %v17436_v16 = vld [vmem:[#allocation95_spill] sm:$0xff]  ;;  %v17438_v26 = vld [vmem:[#allocation96_spill] sm:$0xff]  ;;  %v15110_v32 = vmul.f32 %v14616_v43, %v17440_v27 }
 0xb65   :  { %17431 = vst [vmem:[#allocation122_spill] sm:$0xff] %v15090_v30  ;;  %17433 = vst [vmem:[#allocation75_spill] sm:$0xff] %v15094_v51  ;;  %v15102_v38 = vmul.f32 %v14616_v43, %v17436_v16  ;;  %v15106_v21 = vmul.f32 %v14614_v22, %v17438_v26  ;;  %v17441_v30 = vld [vmem:[#allocation72_spill] sm:$0xff]  ;;  %v17442_v51 = vld [vmem:[#allocation66_spill] sm:$0xff] }
 0xb66   :  { %17435 = vst [vmem:[#allocation123_spill] sm:$0xff] %v15098_v25  ;;  %v15114_v52 = vmul.f32 %v14614_v22, %v17441_v30  ;;  %v15118_v12 = vmul.f32 %v14616_v43, %v17442_v51  ;;  %v17443_v25 = vld [vmem:[#allocation54_spill] sm:$0xff]  ;;  %v15134_v30 = vadd.f32 %v14619_v20, %v14625_v9  ;;  %v15138_v51 = vadd.f32 %v14611_v28, %v14629_v40 }
 0xb67   :  { %17437 = vst [vmem:[#allocation124_spill] sm:$0xff] %v15102_v38  ;;  %17439 = vst [vmem:[#allocation77_spill] sm:$0xff] %v15106_v21  ;;  %v15122_v16 = vmul.f32 %v14614_v22, %v17443_v25  ;;  %v17444_v38 = vld [vmem:[#allocation39_spill] sm:$0xff]  ;;  %v17445_v21 = vld [vmem:[#allocation133_spill] sm:$0xff]  ;;  %v15142_v25 = vadd.f32 %v14619_v20, %v14633_v3  ;;  %v15154_v9 = vadd.f32 %v14611_v28, %v14645_v62 }
 0xb68   :  { %v15126_v26 = vmul.f32 %v14616_v43, %v17444_v38  ;;  %v15130_v27 = vmul.f32 %v14614_v22, %v17445_v21  ;;  %v15146_v43 = vadd.f32 %v14611_v28, %v14637_v55  ;;  %v15150_v22 = vadd.f32 %v14619_v20, %v14641_v24  ;;  %v17449_v38 = vld [vmem:[#allocation42_spill] sm:$0xff] }
 0xb69   :  { %v15158_v40 = vadd.f32 %v14619_v20, %v14649_v1  ;;  %v15162_v3 = vadd.f32 %v14611_v28, %v14654_v0  ;;  %v15166_v55 = vadd.f32 %v14619_v20, %v14658_v8  ;;  %v15170_v24 = vadd.f32 %v14611_v28, %v14662_v11  ;;  %v17451_v21 = vld [vmem:[#allocation34_spill] sm:$0xff] }
 0xb6a   :  { %v15174_v62 = vadd.f32 %v14619_v20, %v14666_v15  ;;  %v15178_v1 = vadd.f32 %v14611_v28, %v14670_v34  ;;  %v15182_v0 = vadd.f32 %v14619_v20, %v14674_v42  ;;  %v15186_v8 = vadd.f32 %v14611_v28, %v14678_v19 }
 0xb6b   :  { %v15190_v11 = vadd.f32 %v14619_v20, %v14682_v54  ;;  %v15194_v15 = vadd.f32 %v14611_v28, %v14686_v58  ;;  %v15198_v34 = vadd.f32 %v14619_v20, %v14690_v53  ;;  %v15202_v42 = vadd.f32 %v14611_v28, %v14694_v2 }
 0xb6c   :  { %v15206_v19 = vadd.f32 %v14619_v20, %v14698_v47  ;;  %v15210_v54 = vadd.f32 %v14611_v28, %v14702_v63  ;;  %v15214_v58 = vadd.f32 %v14619_v20, %v14706_v44  ;;  %v15218_v53 = vadd.f32 %v14611_v28, %v14710_v4 }
 0xb6d   :  { %v15222_v2 = vadd.f32 %v14619_v20, %v14714_v57  ;;  %v15226_v47 = vadd.f32 %v14611_v28, %v14718_v39  ;;  %v15230_v63 = vadd.f32 %v14619_v20, %v14722_v29  ;;  %v15234_v44 = vadd.f32 %v14611_v28, %v14726_v45 }
 0xb6e   :  { %v15238_v4 = vadd.f32 %v14619_v20, %v14730_v13  ;;  %v15242_v57 = vadd.f32 %v14611_v28, %v14734_v50  ;;  %v15246_v39 = vadd.f32 %v14619_v20, %v14738_v49  ;;  %v15250_v29 = vadd.f32 %v14611_v28, %v14742_v61 }
 0xb6f   :  { %v15254_v45 = vadd.f32 %v14619_v20, %v14746_v48  ;;  %v15258_v13 = vadd.f32 %v14611_v28, %v14750_v37  ;;  %v15262_v50 = vadd.f32 %v14619_v20, %v14754_v59  ;;  %v15266_v49 = vadd.f32 %v14611_v28, %v14758_v5 }
 0xb70   :  { %v15270_v61 = vadd.f32 %v14619_v20, %v14762_v33  ;;  %v15274_v48 = vadd.f32 %v14611_v28, %v14766_v6  ;;  %v15278_v37 = vadd.f32 %v14619_v20, %v14770_v36  ;;  %v15282_v59 = vadd.f32 %v14611_v28, %v14774_v35 }
 0xb71   :  { %v15286_v5 = vadd.f32 %v14619_v20, %v14778_v10  ;;  %v15290_v33 = vadd.f32 %v14611_v28, %v14782_v14  ;;  %v15294_v6 = vadd.f32 %v14619_v20, %v14786_v17  ;;  %v15298_v36 = vadd.f32 %v14611_v28, %v14790_v46 }
 0xb72   :  { %v15302_v35 = vadd.f32 %v14619_v20, %v14794_v31  ;;  %v15306_v10 = vadd.f32 %v14611_v28, %v17449_v38  ;;  %v15310_v14 = vadd.f32 %v14619_v20, %v17451_v21  ;;  %v15322_v31 = vadd.f32 %v14611_v28, %v14814_v60 }
 0xb73   :  { %17446 = vst [vmem:[#allocation125_spill] sm:$0xff] %v15290_v33  ;;  %17447 = vst [vmem:[#allocation78_spill] sm:$0xff] %v15294_v6  ;;  %v17453_v33 = vld [vmem:[#allocation47_spill] sm:$0xff]  ;;  %v17455_v6 = vld [vmem:[#allocation20_spill] sm:$0xff] }
 0xb74   :  { %17448 = vst [vmem:[#allocation126_spill] sm:$0xff] %v15302_v35  ;;  %17450 = vst [vmem:[#allocation79_spill] sm:$0xff] %v15306_v10  ;;  %v15314_v17 = vadd.f32 %v14611_v28, %v17453_v33  ;;  %v15318_v46 = vadd.f32 %v14619_v20, %v17455_v6  ;;  %v17458_v35 = vld [vmem:[#allocation57_spill] sm:$0xff] }
 0xb75   :  { %17452 = vst [vmem:[#allocation127_spill] sm:$0xff] %v15310_v14  ;;  %17457 = vst [vmem:[#allocation81_spill] sm:$0xff] %v15322_v31  ;;  %v15326_v38 = vadd.f32 %v14619_v20, %v17458_v35  ;;  %v17460_v10 = vld [vmem:[#allocation53_spill] sm:$0xff]  ;;  %v17462_v14 = vld [vmem:[#allocation44_spill] sm:$0xff] }
 0xb76   :  { %17454 = vst [vmem:[#allocation80_spill] sm:$0xff] %v15314_v17  ;;  %17456 = vst [vmem:[#allocation128_spill] sm:$0xff] %v15318_v46  ;;  %v15330_v21 = vadd.f32 %v14611_v28, %v17460_v10  ;;  %v15334_v33 = vadd.f32 %v14619_v20, %v17462_v14  ;;  %v17464_v17 = vld [vmem:[#allocation62_spill] sm:$0xff]  ;;  %v17466_v46 = vld [vmem:[#allocation71_spill] sm:$0xff] }
 0xb77   :  { %17459 = vst [vmem:[#allocation129_spill] sm:$0xff] %v15326_v38  ;;  %v15338_v6 = vadd.f32 %v14611_v28, %v17464_v17  ;;  %v15342_v60 = vadd.f32 %v14619_v20, %v17466_v46  ;;  %v17468_v31 = vld [vmem:[#allocation43_spill] sm:$0xff]  ;;  %v17470_v38 = vld [vmem:[#allocation41_spill] sm:$0xff] }
 0xb78   :  { %17461 = vst [vmem:[#allocation60_spill] sm:$0xff] %v15330_v21  ;;  %17463 = vst [vmem:[#allocation130_spill] sm:$0xff] %v15334_v33  ;;  %v15346_v35 = vadd.f32 %v14611_v28, %v17468_v31  ;;  %v15350_v10 = vadd.f32 %v14619_v20, %v17470_v38  ;;  %v17472_v21 = vld [vmem:[#allocation49_spill] sm:$0xff]  ;;  %v17474_v33 = vld [vmem:[#allocation55_spill] sm:$0xff] }
 0xb79   :  { %17465 = vst [vmem:[#allocation63_spill] sm:$0xff] %v15338_v6  ;;  %17467 = vst [vmem:[#allocation131_spill] sm:$0xff] %v15342_v60  ;;  %v15354_v14 = vadd.f32 %v14611_v28, %v17472_v21  ;;  %v15358_v17 = vadd.f32 %v14619_v20, %v17474_v33  ;;  %v17476_v6 = vld [vmem:[#allocation59_spill] sm:$0xff]  ;;  %v17478_v60 = vld [vmem:[#allocation68_spill] sm:$0xff] }
 0xb7a   :  { %17469 = vst [vmem:[#allocation132_spill] sm:$0xff] %v15346_v35  ;;  %17471 = vst [vmem:[#allocation83_spill] sm:$0xff] %v15350_v10  ;;  %v15362_v46 = vadd.f32 %v14611_v28, %v17476_v6  ;;  %v15366_v31 = vadd.f32 %v14619_v20, %v17478_v60  ;;  %v17480_v35 = vld [vmem:[#allocation97_spill] sm:$0xff] }
 0xb7b   :  { %17473 = vst [vmem:[#allocation17_spill] sm:$0xff] %v15354_v14  ;;  %17475 = vst [vmem:[#allocation64_spill] sm:$0xff] %v15358_v17  ;;  %v15370_v38 = vadd.f32 %v14611_v28, %v17480_v35  ;;  %v17482_v10 = vld [vmem:[#allocation29_spill] sm:$0xff]  ;;  %v17484_v14 = vld [vmem:[#allocation99_spill] sm:$0xff] }
 0xb7c   :  { %17477 = vst [vmem:[#allocation52_spill] sm:$0xff] %v15362_v46  ;;  %17479 = vst [vmem:[#allocation84_spill] sm:$0xff] %v15366_v31  ;;  %v15374_v21 = vadd.f32 %v14619_v20, %v17482_v10  ;;  %v15378_v33 = vadd.f32 %v14611_v28, %v17484_v14  ;;  %v17486_v17 = vld [vmem:[#allocation100_spill] sm:$0xff] }
 0xb7d   :  { %17481 = vst [vmem:[#allocation48_spill] sm:$0xff] %v15370_v38  ;;  %v15382_v6 = vadd.f32 %v14619_v20, %v17486_v17  ;;  %v17488_v46 = vld [vmem:[#allocation36_spill] sm:$0xff]  ;;  %v17491_v38 = vld [vmem:[#allocation27_spill] sm:$0xff] }
 0xb7e   :  { %17483 = vst [vmem:[#allocation85_spill] sm:$0xff] %v15374_v21  ;;  %17485 = vst [vmem:[#allocation61_spill] sm:$0xff] %v15378_v33  ;;  %v15386_v60 = vadd.f32 %v14611_v28, %v17488_v46  ;;  %v17489_v31 = vld [vmem:[#allocation32_spill] sm:$0xff]  ;;  %v15394_v10 = vadd.f32 %v14611_v28, %v17491_v38  ;;  %v17495_v33 = vld [vmem:[#allocation38_spill] sm:$0xff] }
 0xb7f   :  { %17487 = vst [vmem:[#allocation86_spill] sm:$0xff] %v15382_v6  ;;  %v15390_v35 = vadd.f32 %v14619_v20, %v17489_v31  ;;  %v17493_v21 = vld [vmem:[#allocation28_spill] sm:$0xff]  ;;  %v15402_v17 = vadd.f32 %v14611_v28, %v17495_v33  ;;  %v15410_v31 = vadd.f32 %v14611_v28, %v14902_v18 }
 0xb80   :  { %17492 = vst [vmem:[#allocation70_spill] sm:$0xff] %v15394_v10  ;;  %v15398_v14 = vadd.f32 %v14619_v20, %v17493_v21  ;;  %v17497_v6 = vld [vmem:[#allocation76_spill] sm:$0xff]  ;;  %v17502_v10 = vld [vmem:[#allocation87_spill] sm:$0xff] }
 0xb81   :  { %17490 = vst [vmem:[#allocation58_spill] sm:$0xff] %v15390_v35  ;;  %17496 = vst [vmem:[#allocation89_spill] sm:$0xff] %v15402_v17  ;;  %v15406_v46 = vadd.f32 %v14619_v20, %v17497_v6  ;;  %v17500_v35 = vld [vmem:[#allocation82_spill] sm:$0xff]  ;;  %v15418_v21 = vadd.f32 %v14611_v28, %v17502_v10 }
 0xb82   :  { %17494 = vst [vmem:[#allocation69_spill] sm:$0xff] %v15398_v14  ;;  %17499 = vst [vmem:[#allocation24_spill] sm:$0xff] %v15410_v31  ;;  %v15414_v38 = vadd.f32 %v14619_v20, %v17500_v35  ;;  %v17504_v14 = vld [vmem:[#allocation88_spill] sm:$0xff]  ;;  %v17506_v17 = vld [vmem:[#allocation90_spill] sm:$0xff] }
 0xb83   :  { %17498 = vst [vmem:[#allocation37_spill] sm:$0xff] %v15406_v46  ;;  %17503 = vst [vmem:[#allocation35_spill] sm:$0xff] %v15418_v21  ;;  %v15422_v33 = vadd.f32 %v14619_v20, %v17504_v14  ;;  %v15426_v6 = vadd.f32 %v14611_v28, %v17506_v17  ;;  %v17508_v46 = vld [vmem:[#allocation18_spill] sm:$0xff]  ;;  %v17510_v31 = vld [vmem:[#allocation19_spill] sm:$0xff] }
 0xb84   :  { %17501 = vst [vmem:[#allocation91_spill] sm:$0xff] %v15414_v38  ;;  %v15430_v18 = vadd.f32 %v14619_v20, %v17508_v46  ;;  %v15434_v35 = vadd.f32 %v14611_v28, %v17510_v31  ;;  %v17512_v38 = vld [vmem:[#allocation30_spill] sm:$0xff]  ;;  %v17514_v21 = vld [vmem:[#allocation21_spill] sm:$0xff] }
 0xb85   :  { %17505 = vst [vmem:[#allocation92_spill] sm:$0xff] %v15422_v33  ;;  %17507 = vst [vmem:[#allocation50_spill] sm:$0xff] %v15426_v6  ;;  %v15438_v10 = vadd.f32 %v14619_v20, %v17512_v38  ;;  %v15442_v14 = vadd.f32 %v14611_v28, %v17514_v21  ;;  %v17516_v33 = vld [vmem:[#allocation40_spill] sm:$0xff]  ;;  %v17518_v6 = vld [vmem:[#allocation98_spill] sm:$0xff] }
 0xb86   :  { %17509 = vst [vmem:[#allocation93_spill] sm:$0xff] %v15430_v18  ;;  %17511 = vst [vmem:[#allocation56_spill] sm:$0xff] %v15434_v35  ;;  %v15446_v17 = vadd.f32 %v14619_v20, %v17516_v33  ;;  %v15450_v46 = vadd.f32 %v14611_v28, %v17518_v6  ;;  %v17519_v18 = vld [vmem:[#allocation101_spill] sm:$0xff]  ;;  %v17521_v35 = vld [vmem:[#allocation102_spill] sm:$0xff] }
 0xb87   :  { %17513 = vst [vmem:[#allocation94_spill] sm:$0xff] %v15438_v10  ;;  %17515 = vst [vmem:[#allocation67_spill] sm:$0xff] %v15442_v14  ;;  %v15454_v31 = vadd.f32 %v14619_v20, %v17519_v18  ;;  %v15458_v38 = vadd.f32 %v14611_v28, %v17521_v35  ;;  %v17523_v10 = vld [vmem:[#allocation103_spill] sm:$0xff]  ;;  %v17525_v14 = vld [vmem:[#allocation104_spill] sm:$0xff]  ;;  %v15474_v18 = vadd.f32 %v14611_v28, %v14966_v23 }
 0xb88   :  { %17517 = vst [vmem:[#allocation95_spill] sm:$0xff] %v15446_v17  ;;  %v15462_v21 = vadd.f32 %v14619_v20, %v17523_v10  ;;  %v15466_v33 = vadd.f32 %v14611_v28, %v17525_v14  ;;  %v17527_v17 = vld [vmem:[#allocation105_spill] sm:$0xff] }
 0xb89   :  { %17520 = vst [vmem:[#allocation96_spill] sm:$0xff] %v15454_v31  ;;  %17522 = vst [vmem:[#allocation65_spill] sm:$0xff] %v15458_v38  ;;  %v15470_v6 = vadd.f32 %v14619_v20, %v17527_v17  ;;  %v17530_v31 = vld [vmem:[#allocation106_spill] sm:$0xff]  ;;  %v17532_v38 = vld [vmem:[#allocation107_spill] sm:$0xff] }
 0xb8a   :  { %17524 = vst [vmem:[#allocation72_spill] sm:$0xff] %v15462_v21  ;;  %17526 = vst [vmem:[#allocation66_spill] sm:$0xff] %v15466_v33  ;;  %v15478_v35 = vadd.f32 %v14619_v20, %v17530_v31  ;;  %v15482_v10 = vadd.f32 %v14611_v28, %v17532_v38  ;;  %v17534_v21 = vld [vmem:[#allocation108_spill] sm:$0xff]  ;;  %v17536_v33 = vld [vmem:[#allocation109_spill] sm:$0xff] }
 0xb8b   :  { %17528 = vst [vmem:[#allocation54_spill] sm:$0xff] %v15470_v6  ;;  %17529 = vst [vmem:[#allocation39_spill] sm:$0xff] %v15474_v18  ;;  %v15486_v14 = vadd.f32 %v14619_v20, %v17534_v21  ;;  %v15490_v17 = vadd.f32 %v14611_v28, %v17536_v33  ;;  %v17538_v6 = vld [vmem:[#allocation110_spill] sm:$0xff]  ;;  %v17540_v18 = vld [vmem:[#allocation31_spill] sm:$0xff] }
 0xb8c   :  { %17531 = vst [vmem:[#allocation133_spill] sm:$0xff] %v15478_v35  ;;  %17533 = vst [vmem:[#allocation42_spill] sm:$0xff] %v15482_v10  ;;  %v15494_v23 = vadd.f32 %v14619_v20, %v17538_v6  ;;  %v15498_v31 = vadd.f32 %v14611_v28, %v17540_v18  ;;  %v17541_v35 = vld [vmem:[#allocation111_spill] sm:$0xff]  ;;  %v17543_v10 = vld [vmem:[#allocation33_spill] sm:$0xff] }
 0xb8d   :  { %17535 = vst [vmem:[#allocation34_spill] sm:$0xff] %v15486_v14  ;;  %17537 = vst [vmem:[#allocation47_spill] sm:$0xff] %v15490_v17  ;;  %v15502_v38 = vadd.f32 %v14619_v20, %v17541_v35  ;;  %v15506_v21 = vadd.f32 %v14611_v28, %v17543_v10  ;;  %v17544_v14 = vld [vmem:[#allocation112_spill] sm:$0xff]  ;;  %v17546_v17 = vld [vmem:[#allocation113_spill] sm:$0xff]  ;;  %v15522_v35 = vadd.f32 %v14611_v28, %v15014_v7 }
 0xb8e   :  { %17539 = vst [vmem:[#allocation20_spill] sm:$0xff] %v15494_v23  ;;  %v15510_v33 = vadd.f32 %v14619_v20, %v17544_v14  ;;  %v15514_v6 = vadd.f32 %v14611_v28, %v17546_v17  ;;  %v17548_v23 = vld [vmem:[#allocation22_spill] sm:$0xff]  ;;  %v15530_v14 = vadd.f32 %v14611_v28, %v15022_v56 }
 0xb8f   :  { %17542 = vst [vmem:[#allocation57_spill] sm:$0xff] %v15502_v38  ;;  %v15518_v18 = vadd.f32 %v14619_v20, %v17548_v23  ;;  %v17550_v38 = vld [vmem:[#allocation114_spill] sm:$0xff] }
 0xb90   :  { %17545 = vst [vmem:[#allocation53_spill] sm:$0xff] %v15510_v33  ;;  %17547 = vst [vmem:[#allocation44_spill] sm:$0xff] %v15514_v6  ;;  %v15526_v10 = vadd.f32 %v14619_v20, %v17550_v38  ;;  %v17553_v33 = vld [vmem:[#allocation25_spill] sm:$0xff]  ;;  %v17555_v6 = vld [vmem:[#allocation115_spill] sm:$0xff]  ;;  %v15546_v38 = vadd.f32 %v14611_v28, %v15038_v41 }
 0xb91   :  { %17549 = vst [vmem:[#allocation62_spill] sm:$0xff] %v15518_v18  ;;  %17552 = vst [vmem:[#allocation43_spill] sm:$0xff] %v15530_v14  ;;  %v15534_v17 = vadd.f32 %v14619_v20, %v17553_v33  ;;  %v15538_v23 = vadd.f32 %v14611_v28, %v17555_v6  ;;  %v17557_v18 = vld [vmem:[#allocation26_spill] sm:$0xff]  ;;  %v17562_v14 = vld [vmem:[#allocation45_spill] sm:$0xff] }
 0xb92   :  { %17551 = vst [vmem:[#allocation71_spill] sm:$0xff] %v15526_v10  ;;  %v15542_v7 = vadd.f32 %v14619_v20, %v17557_v18  ;;  %17559 = vst [vmem:[#allocation59_spill] sm:$0xff] %v15546_v38  ;;  %v17560_v10 = vld [vmem:[#allocation116_spill] sm:$0xff]  ;;  %v15554_v33 = vadd.f32 %v14611_v28, %v17562_v14  ;;  %v17570_v38 = vld [vmem:[#allocation51_spill] sm:$0xff] }
 0xb93   :  { %17554 = vst [vmem:[#allocation41_spill] sm:$0xff] %v15534_v17  ;;  %17556 = vst [vmem:[#allocation49_spill] sm:$0xff] %v15538_v23  ;;  %v15550_v56 = vadd.f32 %v14619_v20, %v17560_v10  ;;  %v17564_v17 = vld [vmem:[#allocation117_spill] sm:$0xff]  ;;  %v17566_v23 = vld [vmem:[#allocation46_spill] sm:$0xff]  ;;  %v15570_v10 = vadd.f32 %v14611_v28, %v17570_v38 }
 0xb94   :  { %17558 = vst [vmem:[#allocation55_spill] sm:$0xff] %v15542_v7  ;;  %17563 = vst [vmem:[#allocation97_spill] sm:$0xff] %v15554_v33  ;;  %v15558_v6 = vadd.f32 %v14619_v20, %v17564_v17  ;;  %v15562_v18 = vadd.f32 %v14611_v28, %v17566_v23  ;;  %v17568_v7 = vld [vmem:[#allocation118_spill] sm:$0xff]  ;;  %v17574_v33 = vld [vmem:[#allocation23_spill] sm:$0xff] }
 0xb95   :  { %17561 = vst [vmem:[#allocation68_spill] sm:$0xff] %v15550_v56  ;;  %v15566_v41 = vadd.f32 %v14619_v20, %v17568_v7  ;;  %17571 = vst [vmem:[#allocation36_spill] sm:$0xff] %v15570_v10  ;;  %v17572_v56 = vld [vmem:[#allocation119_spill] sm:$0xff]  ;;  %v15578_v17 = vadd.f32 %v14611_v28, %v17574_v33  ;;  %v17582_v10 = vld [vmem:[#allocation74_spill] sm:$0xff] }
 0xb96   :  { %17565 = vst [vmem:[#allocation29_spill] sm:$0xff] %v15558_v6  ;;  %17567 = vst [vmem:[#allocation99_spill] sm:$0xff] %v15562_v18  ;;  %v15574_v14 = vadd.f32 %v14619_v20, %v17572_v56  ;;  %v17576_v6 = vld [vmem:[#allocation120_spill] sm:$0xff]  ;;  %v17578_v18 = vld [vmem:[#allocation73_spill] sm:$0xff]  ;;  %v15594_v56 = vadd.f32 %v14611_v28, %v17582_v10 }
 0xb97   :  { %17569 = vst [vmem:[#allocation100_spill] sm:$0xff] %v15566_v41  ;;  %17575 = vst [vmem:[#allocation27_spill] sm:$0xff] %v15578_v17  ;;  %v15582_v23 = vadd.f32 %v14619_v20, %v17576_v6  ;;  %v15586_v7 = vadd.f32 %v14611_v28, %v17578_v18  ;;  %v17580_v41 = vld [vmem:[#allocation121_spill] sm:$0xff]  ;;  %v17584_v17 = vld [vmem:[#allocation75_spill] sm:$0xff] }
 0xb98   :  { %17573 = vst [vmem:[#allocation32_spill] sm:$0xff] %v15574_v14  ;;  %v15590_v38 = vadd.f32 %v14619_v20, %v17580_v41  ;;  %v17583_v14 = vld [vmem:[#allocation122_spill] sm:$0xff]  ;;  %v15602_v6 = vadd.f32 %v14611_v28, %v17584_v17  ;;  %v15622_v17 = vadd.f32 %v14619_v20, %v15114_v52 }
 0xb99   :  { %17577 = vst [vmem:[#allocation28_spill] sm:$0xff] %v15582_v23  ;;  %17579 = vst [vmem:[#allocation38_spill] sm:$0xff] %v15586_v7  ;;  %v15598_v33 = vadd.f32 %v14619_v20, %v17583_v14  ;;  %v17585_v23 = vld [vmem:[#allocation123_spill] sm:$0xff]  ;;  %v17586_v7 = vld [vmem:[#allocation124_spill] sm:$0xff]  ;;  %v15618_v14 = vadd.f32 %v14611_v28, %v15110_v32  ;;  %v15638_v32 = vadd.f32 %v14619_v20, %v15130_v27 }
 0xb9a   :  { %17581 = vst [vmem:[#allocation76_spill] sm:$0xff] %v15590_v38  ;;  %v15606_v18 = vadd.f32 %v14619_v20, %v17585_v23  ;;  %v15610_v41 = vadd.f32 %v14611_v28, %v17586_v7  ;;  %v17587_v38 = vld [vmem:[#allocation77_spill] sm:$0xff]  ;;  %17589 = vst [vmem:[#allocation87_spill] sm:$0xff] %v15622_v17  ;;  %v15626_v23 = vadd.f32 %v14611_v28, %v15118_v12 }
 0xb9b   :  { %v15614_v10 = vadd.f32 %v14619_v20, %v17587_v38  ;;  %17588 = vst [vmem:[#allocation82_spill] sm:$0xff] %v15618_v14  ;;  %v15630_v7 = vadd.f32 %v14619_v20, %v15122_v16  ;;  %v15634_v38 = vadd.f32 %v14611_v28, %v15126_v26  ;;  %v9906_v14 = vld [vmem:[#allocation3] sm:$0xff]  ;;  %v9907_v17 = vld [vmem:[#allocation3 + $0x8] sm:$0xff] }
 0xb9c   :  { %17590 = vst [vmem:[#allocation88_spill] sm:$0xff] %v15626_v23  ;;  %v15641_v52 = vadd.f32 %v9906_v14, %v15134_v30  ;;  %v15644_v12 = vadd.f32 %v9907_v17, %v15138_v51  ;;  %v9908_v23 = vld [vmem:[#allocation3 + $0x10] sm:$0xff]  ;;  %v9910_v26 = vld [vmem:[#allocation3 + $0x20] sm:$0xff]  ;;  %v9911_v27 = vld [vmem:[#allocation3 + $0x28] sm:$0xff] }
 0xb9d   :  { %17591 = vst [vmem:[#allocation90_spill] sm:$0xff] %v15630_v7  ;;  %v15647_v16 = vadd.f32 %v9908_v23, %v15142_v25  ;;  %v9909_v7 = vld [vmem:[#allocation3 + $0x18] sm:$0xff]  ;;  %v15653_v20 = vadd.f32 %v9910_v26, %v15150_v22  ;;  %v15656_v30 = vadd.f32 %v9911_v27, %v15154_v9  ;;  %v9912_v14 = vld [vmem:[#allocation3 + $0x30] sm:$0xff]  ;;  %v9914_v23 = vld [vmem:[#allocation3 + $0x40] sm:$0xff] }
 0xb9e   :  { %v15650_v28 = vadd.f32 %v9909_v7, %v15146_v43  ;;  %v15659_v51 = vadd.f32 %v9912_v14, %v15158_v40  ;;  %v9913_v17 = vld [vmem:[#allocation3 + $0x38] sm:$0xff]  ;;  %v15665_v43 = vadd.f32 %v9914_v23, %v15166_v55  ;;  %v9915_v7 = vld [vmem:[#allocation3 + $0x48] sm:$0xff]  ;;  %v9916_v26 = vld [vmem:[#allocation3 + $0x50] sm:$0xff] }
 0xb9f   :  { %v15662_v25 = vadd.f32 %v9913_v17, %v15162_v3  ;;  %v15668_v22 = vadd.f32 %v9915_v7, %v15170_v24  ;;  %v15671_v9 = vadd.f32 %v9916_v26, %v15174_v62  ;;  %v9917_v27 = vld [vmem:[#allocation3 + $0x58] sm:$0xff]  ;;  %v9918_v14 = vld [vmem:[#allocation3 + $0x60] sm:$0xff]  ;;  %v9919_v17 = vld [vmem:[#allocation3 + $0x68] sm:$0xff] }
 0xba0   :  { %v15674_v40 = vadd.f32 %v9917_v27, %v15178_v1  ;;  %v15677_v3 = vadd.f32 %v9918_v14, %v15182_v0  ;;  %v15680_v55 = vadd.f32 %v9919_v17, %v15186_v8  ;;  %v9920_v23 = vld [vmem:[#allocation3 + $0x70] sm:$0xff]  ;;  %v9921_v7 = vld [vmem:[#allocation3 + $0x78] sm:$0xff]  ;;  %v9922_v26 = vld [vmem:[#allocation3 + $0x80] sm:$0xff] }
 0xba1   :  { %v15683_v24 = vadd.f32 %v9920_v23, %v15190_v11  ;;  %v15686_v62 = vadd.f32 %v9921_v7, %v15194_v15  ;;  %v15689_v1 = vadd.f32 %v9922_v26, %v15198_v34  ;;  %v9923_v27 = vld [vmem:[#allocation3 + $0x88] sm:$0xff]  ;;  %v9924_v14 = vld [vmem:[#allocation3 + $0x90] sm:$0xff]  ;;  %v9925_v17 = vld [vmem:[#allocation3 + $0x98] sm:$0xff] }
 0xba2   :  { %v15692_v0 = vadd.f32 %v9923_v27, %v15202_v42  ;;  %v15695_v8 = vadd.f32 %v9924_v14, %v15206_v19  ;;  %v15698_v11 = vadd.f32 %v9925_v17, %v15210_v54  ;;  %v9926_v23 = vld [vmem:[#allocation3 + $0xa0] sm:$0xff]  ;;  %v9927_v7 = vld [vmem:[#allocation3 + $0xa8] sm:$0xff]  ;;  %v9928_v26 = vld [vmem:[#allocation3 + $0xb0] sm:$0xff] }
 0xba3   :  { %v15701_v15 = vadd.f32 %v9926_v23, %v15214_v58  ;;  %v15704_v34 = vadd.f32 %v9927_v7, %v15218_v53  ;;  %v15707_v42 = vadd.f32 %v9928_v26, %v15222_v2  ;;  %v9929_v27 = vld [vmem:[#allocation3 + $0xb8] sm:$0xff]  ;;  %v9930_v14 = vld [vmem:[#allocation3 + $0xc0] sm:$0xff]  ;;  %v9931_v17 = vld [vmem:[#allocation3 + $0xc8] sm:$0xff] }
 0xba4   :  { %v15710_v19 = vadd.f32 %v9929_v27, %v15226_v47  ;;  %v15713_v54 = vadd.f32 %v9930_v14, %v15230_v63  ;;  %v15716_v58 = vadd.f32 %v9931_v17, %v15234_v44  ;;  %v9932_v23 = vld [vmem:[#allocation3 + $0xd0] sm:$0xff]  ;;  %v9933_v7 = vld [vmem:[#allocation3 + $0xd8] sm:$0xff]  ;;  %v9934_v26 = vld [vmem:[#allocation3 + $0xe0] sm:$0xff] }
 0xba5   :  { %v15719_v53 = vadd.f32 %v9932_v23, %v15238_v4  ;;  %v15722_v2 = vadd.f32 %v9933_v7, %v15242_v57  ;;  %v15725_v47 = vadd.f32 %v9934_v26, %v15246_v39  ;;  %v9935_v27 = vld [vmem:[#allocation3 + $0xe8] sm:$0xff]  ;;  %v9936_v14 = vld [vmem:[#allocation3 + $0xf0] sm:$0xff]  ;;  %v9937_v17 = vld [vmem:[#allocation3 + $0xf8] sm:$0xff] }
 0xba6   :  { %v15728_v63 = vadd.f32 %v9935_v27, %v15250_v29  ;;  %v15731_v44 = vadd.f32 %v9936_v14, %v15254_v45  ;;  %v15734_v4 = vadd.f32 %v9937_v17, %v15258_v13  ;;  %v9938_v23 = vld [vmem:[#allocation3 + $0x100] sm:$0xff]  ;;  %v9939_v7 = vld [vmem:[#allocation3 + $0x108] sm:$0xff]  ;;  %v9940_v26 = vld [vmem:[#allocation3 + $0x110] sm:$0xff] }
 0xba7   :  { %v15737_v57 = vadd.f32 %v9938_v23, %v15262_v50  ;;  %v15740_v39 = vadd.f32 %v9939_v7, %v15266_v49  ;;  %v15743_v29 = vadd.f32 %v9940_v26, %v15270_v61  ;;  %v9941_v27 = vld [vmem:[#allocation3 + $0x118] sm:$0xff]  ;;  %v9942_v14 = vld [vmem:[#allocation3 + $0x120] sm:$0xff]  ;;  %v9943_v17 = vld [vmem:[#allocation3 + $0x128] sm:$0xff] }
 0xba8   :  { %v15746_v45 = vadd.f32 %v9941_v27, %v15274_v48  ;;  %v15749_v13 = vadd.f32 %v9942_v14, %v15278_v37  ;;  %v15752_v50 = vadd.f32 %v9943_v17, %v15282_v59  ;;  %v9944_v23 = vld [vmem:[#allocation3 + $0x130] sm:$0xff]  ;;  %v9945_v7 = vld [vmem:[#allocation3 + $0x138] sm:$0xff]  ;;  %v9946_v26 = vld [vmem:[#allocation3 + $0x140] sm:$0xff] }
 0xba9   :  { %17592 = vst [vmem:[#allocation18_spill] sm:$0xff] %v15740_v39  ;;  %17593 = vst [vmem:[#allocation19_spill] sm:$0xff] %v15743_v29  ;;  %v15755_v49 = vadd.f32 %v9944_v23, %v15286_v5  ;;  %v17597_v39 = vld [vmem:[#allocation125_spill] sm:$0xff]  ;;  %v17599_v29 = vld [vmem:[#allocation78_spill] sm:$0xff] }
 0xbaa   :  { %17594 = vst [vmem:[#allocation30_spill] sm:$0xff] %v15749_v13  ;;  %17595 = vst [vmem:[#allocation21_spill] sm:$0xff] %v15752_v50  ;;  %v15758_v61 = vadd.f32 %v9945_v7, %v17597_v39  ;;  %v15761_v48 = vadd.f32 %v9946_v26, %v17599_v29  ;;  %v9947_v27 = vld [vmem:[#allocation3 + $0x148] sm:$0xff]  ;;  %v9948_v14 = vld [vmem:[#allocation3 + $0x150] sm:$0xff] }
 0xbab   :  { %17596 = vst [vmem:[#allocation40_spill] sm:$0xff] %v15755_v49  ;;  %v15764_v37 = vadd.f32 %v9947_v27, %v15298_v36  ;;  %v17602_v13 = vld [vmem:[#allocation126_spill] sm:$0xff]  ;;  %v9949_v17 = vld [vmem:[#allocation3 + $0x158] sm:$0xff]  ;;  %v9950_v23 = vld [vmem:[#allocation3 + $0x160] sm:$0xff] }
 0xbac   :  { %17598 = vst [vmem:[#allocation98_spill] sm:$0xff] %v15758_v61  ;;  %17600 = vst [vmem:[#allocation101_spill] sm:$0xff] %v15761_v48  ;;  %v15767_v59 = vadd.f32 %v9948_v14, %v17602_v13  ;;  %v17604_v50 = vld [vmem:[#allocation79_spill] sm:$0xff]  ;;  %v9951_v7 = vld [vmem:[#allocation3 + $0x168] sm:$0xff] }
 0xbad   :  { %17601 = vst [vmem:[#allocation102_spill] sm:$0xff] %v15764_v37  ;;  %v15770_v5 = vadd.f32 %v9949_v17, %v17604_v50  ;;  %v17606_v49 = vld [vmem:[#allocation127_spill] sm:$0xff]  ;;  %v17608_v61 = vld [vmem:[#allocation80_spill] sm:$0xff]  ;;  %v17612_v37 = vld [vmem:[#allocation81_spill] sm:$0xff] }
 0xbae   :  { %17603 = vst [vmem:[#allocation103_spill] sm:$0xff] %v15767_v59  ;;  %v15773_v39 = vadd.f32 %v9950_v23, %v17606_v49  ;;  %v15776_v29 = vadd.f32 %v9951_v7, %v17608_v61  ;;  %v9952_v26 = vld [vmem:[#allocation3 + $0x170] sm:$0xff]  ;;  %v17610_v48 = vld [vmem:[#allocation128_spill] sm:$0xff]  ;;  %v17614_v59 = vld [vmem:[#allocation129_spill] sm:$0xff] }
 0xbaf   :  { %17605 = vst [vmem:[#allocation104_spill] sm:$0xff] %v15770_v5  ;;  %v15779_v36 = vadd.f32 %v9952_v26, %v17610_v48  ;;  %v9953_v27 = vld [vmem:[#allocation3 + $0x178] sm:$0xff]  ;;  %v9954_v14 = vld [vmem:[#allocation3 + $0x180] sm:$0xff]  ;;  %v9955_v17 = vld [vmem:[#allocation3 + $0x188] sm:$0xff] }
 0xbb0   :  { %17607 = vst [vmem:[#allocation105_spill] sm:$0xff] %v15773_v39  ;;  %17609 = vst [vmem:[#allocation106_spill] sm:$0xff] %v15776_v29  ;;  %v15782_v13 = vadd.f32 %v9953_v27, %v17612_v37  ;;  %v15785_v50 = vadd.f32 %v9954_v14, %v17614_v59  ;;  %v17616_v5 = vld [vmem:[#allocation60_spill] sm:$0xff]  ;;  %v9956_v23 = vld [vmem:[#allocation3 + $0x190] sm:$0xff] }
 0xbb1   :  { %17611 = vst [vmem:[#allocation107_spill] sm:$0xff] %v15779_v36  ;;  %v15788_v49 = vadd.f32 %v9955_v17, %v17616_v5  ;;  %v17618_v39 = vld [vmem:[#allocation130_spill] sm:$0xff]  ;;  %v9957_v7 = vld [vmem:[#allocation3 + $0x198] sm:$0xff]  ;;  %v9958_v26 = vld [vmem:[#allocation3 + $0x1a0] sm:$0xff] }
 0xbb2   :  { %17613 = vst [vmem:[#allocation108_spill] sm:$0xff] %v15782_v13  ;;  %17615 = vst [vmem:[#allocation109_spill] sm:$0xff] %v15785_v50  ;;  %v15791_v61 = vadd.f32 %v9956_v23, %v17618_v39  ;;  %v17620_v29 = vld [vmem:[#allocation63_spill] sm:$0xff]  ;;  %v9959_v27 = vld [vmem:[#allocation3 + $0x1a8] sm:$0xff] }
 0xbb3   :  { %17617 = vst [vmem:[#allocation110_spill] sm:$0xff] %v15788_v49  ;;  %v15794_v48 = vadd.f32 %v9957_v7, %v17620_v29  ;;  %v17622_v36 = vld [vmem:[#allocation131_spill] sm:$0xff]  ;;  %v17624_v13 = vld [vmem:[#allocation132_spill] sm:$0xff]  ;;  %v17628_v49 = vld [vmem:[#allocation17_spill] sm:$0xff] }
 0xbb4   :  { %17619 = vst [vmem:[#allocation31_spill] sm:$0xff] %v15791_v61  ;;  %v15797_v37 = vadd.f32 %v9958_v26, %v17622_v36  ;;  %v15800_v59 = vadd.f32 %v9959_v27, %v17624_v13  ;;  %v9960_v14 = vld [vmem:[#allocation3 + $0x1b0] sm:$0xff]  ;;  %v9961_v17 = vld [vmem:[#allocation3 + $0x1b8] sm:$0xff]  ;;  %v9962_v23 = vld [vmem:[#allocation3 + $0x1c0] sm:$0xff] }
 0xbb5   :  { %17621 = vst [vmem:[#allocation111_spill] sm:$0xff] %v15794_v48  ;;  %v17626_v50 = vld [vmem:[#allocation83_spill] sm:$0xff]  ;;  %v15806_v39 = vadd.f32 %v9961_v17, %v17628_v49  ;;  %v17630_v61 = vld [vmem:[#allocation64_spill] sm:$0xff]  ;;  %v9963_v7 = vld [vmem:[#allocation3 + $0x1c8] sm:$0xff] }
 0xbb6   :  { %17623 = vst [vmem:[#allocation33_spill] sm:$0xff] %v15797_v37  ;;  %17625 = vst [vmem:[#allocation112_spill] sm:$0xff] %v15800_v59  ;;  %v15803_v5 = vadd.f32 %v9960_v14, %v17626_v50  ;;  %v15809_v29 = vadd.f32 %v9962_v23, %v17630_v61  ;;  %v17632_v48 = vld [vmem:[#allocation52_spill] sm:$0xff]  ;;  %v9964_v26 = vld [vmem:[#allocation3 + $0x1d0] sm:$0xff] }
 0xbb7   :  { %17629 = vst [vmem:[#allocation22_spill] sm:$0xff] %v15806_v39  ;;  %v15812_v36 = vadd.f32 %v9963_v7, %v17632_v48  ;;  %v17633_v37 = vld [vmem:[#allocation84_spill] sm:$0xff]  ;;  %v9967_v17 = vld [vmem:[#allocation3 + $0x1e8] sm:$0xff]  ;;  %v9968_v23 = vld [vmem:[#allocation3 + $0x1f0] sm:$0xff] }
 0xbb8   :  { %17627 = vst [vmem:[#allocation113_spill] sm:$0xff] %v15803_v5  ;;  %17631 = vst [vmem:[#allocation114_spill] sm:$0xff] %v15809_v29  ;;  %v15815_v13 = vadd.f32 %v9964_v26, %v17633_v37  ;;  %v9965_v27 = vld [vmem:[#allocation3 + $0x1d8] sm:$0xff]  ;;  %v9966_v14 = vld [vmem:[#allocation3 + $0x1e0] sm:$0xff] }
 0xbb9   :  { %v17635_v59 = vld [vmem:[#allocation48_spill] sm:$0xff]  ;;  %v17637_v5 = vld [vmem:[#allocation85_spill] sm:$0xff]  ;;  %v17641_v29 = vld [vmem:[#allocation86_spill] sm:$0xff] }
 0xbba   :  { %17634 = vst [vmem:[#allocation25_spill] sm:$0xff] %v15815_v13  ;;  %v15818_v50 = vadd.f32 %v9965_v27, %v17635_v59  ;;  %v15821_v49 = vadd.f32 %v9966_v14, %v17637_v5  ;;  %v17639_v39 = vld [vmem:[#allocation61_spill] sm:$0xff]  ;;  %v15827_v48 = vadd.f32 %v9968_v23, %v17641_v29  ;;  %v9969_v7 = vld [vmem:[#allocation3 + $0x1f8] sm:$0xff]  ;;  %v17644_v13 = vld [vmem:[#allocation58_spill] sm:$0xff] }
 0xbbb   :  { %v15824_v61 = vadd.f32 %v9967_v17, %v17639_v39  ;;  %v15830_v37 = vadd.f32 %v9969_v7, %v15386_v60  ;;  %v9970_v26 = vld [vmem:[#allocation3 + $0x200] sm:$0xff]  ;;  %v9971_v27 = vld [vmem:[#allocation3 + $0x208] sm:$0xff]  ;;  %v9972_v14 = vld [vmem:[#allocation3 + $0x210] sm:$0xff] }
 0xbbc   :  { %17636 = vst [vmem:[#allocation115_spill] sm:$0xff] %v15818_v50  ;;  %17638 = vst [vmem:[#allocation26_spill] sm:$0xff] %v15821_v49  ;;  %v15833_v59 = vadd.f32 %v9970_v26, %v17644_v13  ;;  %v17646_v50 = vld [vmem:[#allocation70_spill] sm:$0xff]  ;;  %v17648_v49 = vld [vmem:[#allocation69_spill] sm:$0xff] }
 0xbbd   :  { %17640 = vst [vmem:[#allocation116_spill] sm:$0xff] %v15824_v61  ;;  %17642 = vst [vmem:[#allocation45_spill] sm:$0xff] %v15827_v48  ;;  %v15836_v5 = vadd.f32 %v9971_v27, %v17646_v50  ;;  %v15839_v39 = vadd.f32 %v9972_v14, %v17648_v49  ;;  %v9973_v17 = vld [vmem:[#allocation3 + $0x218] sm:$0xff]  ;;  %v17650_v61 = vld [vmem:[#allocation89_spill] sm:$0xff] }
 0xbbe   :  { %17643 = vst [vmem:[#allocation117_spill] sm:$0xff] %v15830_v37  ;;  %17645 = vst [vmem:[#allocation46_spill] sm:$0xff] %v15833_v59  ;;  %v15842_v29 = vadd.f32 %v9973_v17, %v17650_v61  ;;  %v9974_v23 = vld [vmem:[#allocation3 + $0x220] sm:$0xff]  ;;  %v9975_v7 = vld [vmem:[#allocation3 + $0x228] sm:$0xff] }
 0xbbf   :  { %17647 = vst [vmem:[#allocation118_spill] sm:$0xff] %v15836_v5  ;;  %17649 = vst [vmem:[#allocation51_spill] sm:$0xff] %v15839_v39  ;;  %v17652_v48 = vld [vmem:[#allocation37_spill] sm:$0xff]  ;;  %v17654_v37 = vld [vmem:[#allocation24_spill] sm:$0xff] }
 0xbc0   :  { %17651 = vst [vmem:[#allocation119_spill] sm:$0xff] %v15842_v29  ;;  %v15845_v60 = vadd.f32 %v9974_v23, %v17652_v48  ;;  %v15848_v13 = vadd.f32 %v9975_v7, %v17654_v37  ;;  %v9976_v26 = vld [vmem:[#allocation3 + $0x230] sm:$0xff]  ;;  %v9977_v27 = vld [vmem:[#allocation3 + $0x238] sm:$0xff]  ;;  %v9978_v14 = vld [vmem:[#allocation3 + $0x240] sm:$0xff] }
 0xbc1   :  { %v17656_v59 = vld [vmem:[#allocation91_spill] sm:$0xff]  ;;  %v17660_v39 = vld [vmem:[#allocation92_spill] sm:$0xff]  ;;  %v9979_v17 = vld [vmem:[#allocation3 + $0x248] sm:$0xff] }
 0xbc2   :  { %17653 = vst [vmem:[#allocation23_spill] sm:$0xff] %v15845_v60  ;;  %17655 = vst [vmem:[#allocation120_spill] sm:$0xff] %v15848_v13  ;;  %v15851_v50 = vadd.f32 %v9976_v26, %v17656_v59  ;;  %v17658_v5 = vld [vmem:[#allocation35_spill] sm:$0xff]  ;;  %v15857_v61 = vadd.f32 %v9978_v14, %v17660_v39  ;;  %v17662_v29 = vld [vmem:[#allocation50_spill] sm:$0xff] }
 0xbc3   :  { %v15854_v49 = vadd.f32 %v9977_v27, %v17658_v5  ;;  %v15860_v48 = vadd.f32 %v9979_v17, %v17662_v29  ;;  %v9980_v23 = vld [vmem:[#allocation3 + $0x250] sm:$0xff]  ;;  %v17663_v60 = vld [vmem:[#allocation93_spill] sm:$0xff]  ;;  %v9981_v7 = vld [vmem:[#allocation3 + $0x258] sm:$0xff] }
 0xbc4   :  { %17657 = vst [vmem:[#allocation73_spill] sm:$0xff] %v15851_v50  ;;  %17661 = vst [vmem:[#allocation74_spill] sm:$0xff] %v15857_v61  ;;  %v15863_v37 = vadd.f32 %v9980_v23, %v17663_v60  ;;  %v17665_v13 = vld [vmem:[#allocation56_spill] sm:$0xff]  ;;  %v17667_v50 = vld [vmem:[#allocation94_spill] sm:$0xff] }
 0xbc5   :  { %17659 = vst [vmem:[#allocation121_spill] sm:$0xff] %v15854_v49  ;;  %v15866_v59 = vadd.f32 %v9981_v7, %v17665_v13  ;;  %v9982_v26 = vld [vmem:[#allocation3 + $0x260] sm:$0xff]  ;;  %v9983_v27 = vld [vmem:[#allocation3 + $0x268] sm:$0xff]  ;;  %v17669_v49 = vld [vmem:[#allocation67_spill] sm:$0xff] }
 0xbc6   :  { %17664 = vst [vmem:[#allocation122_spill] sm:$0xff] %v15863_v37  ;;  %v15869_v5 = vadd.f32 %v9982_v26, %v17667_v50  ;;  %v15872_v39 = vadd.f32 %v9983_v27, %v17669_v49  ;;  %v9984_v14 = vld [vmem:[#allocation3 + $0x270] sm:$0xff]  ;;  %v9985_v17 = vld [vmem:[#allocation3 + $0x278] sm:$0xff]  ;;  %v9986_v23 = vld [vmem:[#allocation3 + $0x280] sm:$0xff] }
 0xbc7   :  { %17666 = vst [vmem:[#allocation75_spill] sm:$0xff] %v15866_v59  ;;  %v17671_v61 = vld [vmem:[#allocation95_spill] sm:$0xff]  ;;  %v15878_v60 = vadd.f32 %v9985_v17, %v15450_v46  ;;  %v17674_v37 = vld [vmem:[#allocation96_spill] sm:$0xff]  ;;  %v9987_v7 = vld [vmem:[#allocation3 + $0x288] sm:$0xff] }
 0xbc8   :  { %17668 = vst [vmem:[#allocation123_spill] sm:$0xff] %v15869_v5  ;;  %17670 = vst [vmem:[#allocation124_spill] sm:$0xff] %v15872_v39  ;;  %v15875_v29 = vadd.f32 %v9984_v14, %v17671_v61  ;;  %v15881_v13 = vadd.f32 %v9986_v23, %v17674_v37  ;;  %v17676_v59 = vld [vmem:[#allocation65_spill] sm:$0xff]  ;;  %v9988_v26 = vld [vmem:[#allocation3 + $0x290] sm:$0xff] }
 0xbc9   :  { %17673 = vst [vmem:[#allocation125_spill] sm:$0xff] %v15878_v60  ;;  %v15884_v50 = vadd.f32 %v9987_v7, %v17676_v59  ;;  %v17678_v5 = vld [vmem:[#allocation72_spill] sm:$0xff]  ;;  %v17680_v39 = vld [vmem:[#allocation66_spill] sm:$0xff]  ;;  %v17684_v60 = vld [vmem:[#allocation39_spill] sm:$0xff] }
 0xbca   :  { %17672 = vst [vmem:[#allocation77_spill] sm:$0xff] %v15875_v29  ;;  %17675 = vst [vmem:[#allocation78_spill] sm:$0xff] %v15881_v13  ;;  %v15887_v49 = vadd.f32 %v9988_v26, %v17678_v5  ;;  %v9989_v27 = vld [vmem:[#allocation3 + $0x298] sm:$0xff]  ;;  %v9990_v14 = vld [vmem:[#allocation3 + $0x2a0] sm:$0xff] }
 0xbcb   :  { %17677 = vst [vmem:[#allocation126_spill] sm:$0xff] %v15884_v50  ;;  %v15890_v61 = vadd.f32 %v9989_v27, %v17680_v39  ;;  %v17682_v29 = vld [vmem:[#allocation54_spill] sm:$0xff]  ;;  %v17685_v13 = vld [vmem:[#allocation133_spill] sm:$0xff]  ;;  %v9993_v7 = vld [vmem:[#allocation3 + $0x2b8] sm:$0xff] }
 0xbcc   :  { %17679 = vst [vmem:[#allocation79_spill] sm:$0xff] %v15887_v49  ;;  %v15893_v46 = vadd.f32 %v9990_v14, %v17682_v29  ;;  %v9991_v17 = vld [vmem:[#allocation3 + $0x2a8] sm:$0xff]  ;;  %v9992_v23 = vld [vmem:[#allocation3 + $0x2b0] sm:$0xff]  ;;  %v9994_v26 = vld [vmem:[#allocation3 + $0x2c0] sm:$0xff] }
 0xbcd   :  { %17681 = vst [vmem:[#allocation127_spill] sm:$0xff] %v15890_v61  ;;  %v15896_v37 = vadd.f32 %v9991_v17, %v17684_v60  ;;  %v15899_v59 = vadd.f32 %v9992_v23, %v17685_v13  ;;  %v17687_v50 = vld [vmem:[#allocation42_spill] sm:$0xff]  ;;  %v17690_v61 = vld [vmem:[#allocation47_spill] sm:$0xff]  ;;  %v9998_v23 = vld [vmem:[#allocation3 + $0x2e0] sm:$0xff] }
 0xbce   :  { %17683 = vst [vmem:[#allocation80_spill] sm:$0xff] %v15893_v46  ;;  %v15902_v5 = vadd.f32 %v9993_v7, %v17687_v50  ;;  %v17688_v49 = vld [vmem:[#allocation34_spill] sm:$0xff]  ;;  %v17692_v46 = vld [vmem:[#allocation20_spill] sm:$0xff] }
 0xbcf   :  { %17686 = vst [vmem:[#allocation128_spill] sm:$0xff] %v15899_v59  ;;  %v15905_v39 = vadd.f32 %v9994_v26, %v17688_v49  ;;  %v9995_v27 = vld [vmem:[#allocation3 + $0x2c8] sm:$0xff]  ;;  %v9996_v14 = vld [vmem:[#allocation3 + $0x2d0] sm:$0xff]  ;;  %v9997_v17 = vld [vmem:[#allocation3 + $0x2d8] sm:$0xff] }
 0xbd0   :  { %v15908_v29 = vadd.f32 %v9995_v27, %v17690_v61  ;;  %v15911_v60 = vadd.f32 %v9996_v14, %v17692_v46  ;;  %v15914_v13 = vadd.f32 %v9997_v17, %v15498_v31  ;;  %v17694_v59 = vld [vmem:[#allocation57_spill] sm:$0xff]  ;;  %v10000_v26 = vld [vmem:[#allocation3 + $0x2f0] sm:$0xff]  ;;  %v10001_v27 = vld [vmem:[#allocation3 + $0x2f8] sm:$0xff] }
 0xbd1   :  { %17689 = vst [vmem:[#allocation81_spill] sm:$0xff] %v15905_v39  ;;  %v15917_v50 = vadd.f32 %v9998_v23, %v17694_v59  ;;  %v9999_v7 = vld [vmem:[#allocation3 + $0x2e8] sm:$0xff]  ;;  %v10002_v14 = vld [vmem:[#allocation3 + $0x300] sm:$0xff]  ;;  %v10004_v23 = vld [vmem:[#allocation3 + $0x310] sm:$0xff] }
 0xbd2   :  { %17691 = vst [vmem:[#allocation129_spill] sm:$0xff] %v15908_v29  ;;  %17693 = vst [vmem:[#allocation60_spill] sm:$0xff] %v15911_v60  ;;  %v15920_v49 = vadd.f32 %v9999_v7, %v15506_v21  ;;  %v17697_v39 = vld [vmem:[#allocation53_spill] sm:$0xff]  ;;  %v17699_v29 = vld [vmem:[#allocation44_spill] sm:$0xff] }
 0xbd3   :  { %17695 = vst [vmem:[#allocation130_spill] sm:$0xff] %v15917_v50  ;;  %v15923_v61 = vadd.f32 %v10000_v26, %v17697_v39  ;;  %v15926_v46 = vadd.f32 %v10001_v27, %v17699_v29  ;;  %v17701_v60 = vld [vmem:[#allocation62_spill] sm:$0xff]  ;;  %v17704_v50 = vld [vmem:[#allocation71_spill] sm:$0xff]  ;;  %v10006_v26 = vld [vmem:[#allocation3 + $0x320] sm:$0xff] }
 0xbd4   :  { %17696 = vst [vmem:[#allocation63_spill] sm:$0xff] %v15920_v49  ;;  %v15929_v31 = vadd.f32 %v10002_v14, %v17701_v60  ;;  %v10003_v17 = vld [vmem:[#allocation3 + $0x308] sm:$0xff]  ;;  %v15935_v21 = vadd.f32 %v10004_v23, %v17704_v50  ;;  %v10005_v7 = vld [vmem:[#allocation3 + $0x318] sm:$0xff]  ;;  %v10008_v14 = vld [vmem:[#allocation3 + $0x330] sm:$0xff] }
 0xbd5   :  { %17698 = vst [vmem:[#allocation131_spill] sm:$0xff] %v15923_v61  ;;  %17700 = vst [vmem:[#allocation132_spill] sm:$0xff] %v15926_v46  ;;  %v15932_v59 = vadd.f32 %v10003_v17, %v15522_v35  ;;  %v17706_v49 = vld [vmem:[#allocation43_spill] sm:$0xff]  ;;  %v17708_v61 = vld [vmem:[#allocation41_spill] sm:$0xff] }
 0xbd6   :  { %17702 = vst [vmem:[#allocation83_spill] sm:$0xff] %v15929_v31  ;;  %17705 = vst [vmem:[#allocation64_spill] sm:$0xff] %v15935_v21  ;;  %v15938_v39 = vadd.f32 %v10005_v7, %v17706_v49  ;;  %v15941_v29 = vadd.f32 %v10006_v26, %v17708_v61  ;;  %v10007_v27 = vld [vmem:[#allocation3 + $0x328] sm:$0xff]  ;;  %v17712_v31 = vld [vmem:[#allocation55_spill] sm:$0xff] }
 0xbd7   :  { %17703 = vst [vmem:[#allocation17_spill] sm:$0xff] %v15932_v59  ;;  %v17710_v46 = vld [vmem:[#allocation49_spill] sm:$0xff]  ;;  %v15947_v35 = vadd.f32 %v10008_v14, %v17712_v31  ;;  %v10009_v17 = vld [vmem:[#allocation3 + $0x338] sm:$0xff]  ;;  %v10012_v26 = vld [vmem:[#allocation3 + $0x350] sm:$0xff] }
 0xbd8   :  { %17707 = vst [vmem:[#allocation52_spill] sm:$0xff] %v15938_v39  ;;  %17709 = vst [vmem:[#allocation84_spill] sm:$0xff] %v15941_v29  ;;  %v15944_v60 = vadd.f32 %v10007_v27, %v17710_v46  ;;  %v17714_v59 = vld [vmem:[#allocation59_spill] sm:$0xff]  ;;  %v10010_v23 = vld [vmem:[#allocation3 + $0x340] sm:$0xff] }
 0xbd9   :  { %17713 = vst [vmem:[#allocation85_spill] sm:$0xff] %v15947_v35  ;;  %v15950_v50 = vadd.f32 %v10009_v17, %v17714_v59  ;;  %v17716_v21 = vld [vmem:[#allocation68_spill] sm:$0xff]  ;;  %v10011_v7 = vld [vmem:[#allocation3 + $0x348] sm:$0xff] }
 0xbda   :  { %17711 = vst [vmem:[#allocation48_spill] sm:$0xff] %v15944_v60  ;;  %v15953_v49 = vadd.f32 %v10010_v23, %v17716_v21  ;;  %v17718_v39 = vld [vmem:[#allocation97_spill] sm:$0xff]  ;;  %v10013_v27 = vld [vmem:[#allocation3 + $0x358] sm:$0xff]  ;;  %v10016_v23 = vld [vmem:[#allocation3 + $0x370] sm:$0xff] }
 0xbdb   :  { %17715 = vst [vmem:[#allocation61_spill] sm:$0xff] %v15950_v50  ;;  %v15956_v61 = vadd.f32 %v10011_v7, %v17718_v39  ;;  %v17720_v29 = vld [vmem:[#allocation29_spill] sm:$0xff]  ;;  %v17722_v60 = vld [vmem:[#allocation99_spill] sm:$0xff]  ;;  %v17724_v35 = vld [vmem:[#allocation100_spill] sm:$0xff] }
 0xbdc   :  { %17717 = vst [vmem:[#allocation86_spill] sm:$0xff] %v15953_v49  ;;  %v15959_v46 = vadd.f32 %v10012_v26, %v17720_v29  ;;  %v15962_v31 = vadd.f32 %v10013_v27, %v17722_v60  ;;  %v10014_v14 = vld [vmem:[#allocation3 + $0x360] sm:$0xff]  ;;  %v10015_v17 = vld [vmem:[#allocation3 + $0x368] sm:$0xff]  ;;  %v10017_v7 = vld [vmem:[#allocation3 + $0x378] sm:$0xff] }
 0xbdd   :  { %17719 = vst [vmem:[#allocation58_spill] sm:$0xff] %v15956_v61  ;;  %v15965_v59 = vadd.f32 %v10014_v14, %v17724_v35  ;;  %v17726_v50 = vld [vmem:[#allocation36_spill] sm:$0xff]  ;;  %v17728_v61 = vld [vmem:[#allocation27_spill] sm:$0xff]  ;;  %v10019_v27 = vld [vmem:[#allocation3 + $0x388] sm:$0xff] }
 0xbde   :  { %17721 = vst [vmem:[#allocation70_spill] sm:$0xff] %v15959_v46  ;;  %17723 = vst [vmem:[#allocation69_spill] sm:$0xff] %v15962_v31  ;;  %v15968_v21 = vadd.f32 %v10015_v17, %v17726_v50  ;;  %v17727_v49 = vld [vmem:[#allocation32_spill] sm:$0xff]  ;;  %v15974_v29 = vadd.f32 %v10017_v7, %v17728_v61  ;;  %v17730_v31 = vld [vmem:[#allocation38_spill] sm:$0xff] }
 0xbdf   :  { %17725 = vst [vmem:[#allocation89_spill] sm:$0xff] %v15965_v59  ;;  %v15971_v39 = vadd.f32 %v10016_v23, %v17727_v49  ;;  %v10018_v26 = vld [vmem:[#allocation3 + $0x380] sm:$0xff]  ;;  %v15980_v35 = vadd.f32 %v10019_v27, %v17730_v31  ;;  %v10020_v14 = vld [vmem:[#allocation3 + $0x390] sm:$0xff]  ;;  %v10021_v17 = vld [vmem:[#allocation3 + $0x398] sm:$0xff] }
 0xbe0   :  { %v17729_v46 = vld [vmem:[#allocation28_spill] sm:$0xff]  ;;  %v15986_v49 = vadd.f32 %v10021_v17, %v15594_v56  ;;  %v10023_v7 = vld [vmem:[#allocation3 + $0x3a8] sm:$0xff] }
 0xbe1   :  { %v15977_v60 = vadd.f32 %v10018_v26, %v17729_v46  ;;  %v17731_v59 = vld [vmem:[#allocation76_spill] sm:$0xff]  ;;  %v15992_v46 = vadd.f32 %v10023_v7, %v15602_v6  ;;  %v10024_v26 = vld [vmem:[#allocation3 + $0x3b0] sm:$0xff]  ;;  %v10027_v17 = vld [vmem:[#allocation3 + $0x3c8] sm:$0xff] }
 0xbe2   :  { %v15983_v50 = vadd.f32 %v10020_v14, %v17731_v59  ;;  %17732 = vst [vmem:[#allocation37_spill] sm:$0xff] %v15986_v49  ;;  %v10022_v23 = vld [vmem:[#allocation3 + $0x3a0] sm:$0xff]  ;;  %v15995_v31 = vadd.f32 %v10024_v26, %v15606_v18  ;;  %v10025_v27 = vld [vmem:[#allocation3 + $0x3b8] sm:$0xff]  ;;  %v17736_v49 = vld [vmem:[#allocation82_spill] sm:$0xff] }
 0xbe3   :  { %v15989_v61 = vadd.f32 %v10022_v23, %v15598_v33  ;;  %17734 = vst [vmem:[#allocation91_spill] sm:$0xff] %v15992_v46  ;;  %v15998_v59 = vadd.f32 %v10025_v27, %v15610_v41  ;;  %v10026_v14 = vld [vmem:[#allocation3 + $0x3c0] sm:$0xff]  ;;  %v16004_v33 = vadd.f32 %v10027_v17, %v17736_v49  ;;  %v10028_v23 = vld [vmem:[#allocation3 + $0x3d0] sm:$0xff]  ;;  %v10029_v7 = vld [vmem:[#allocation3 + $0x3d8] sm:$0xff]  ;;  %v7770_v17 = vmax.f32 %v15641_v52, 0.0 }
 0xbe4   :  { %17735 = vst [vmem:[#allocation35_spill] sm:$0xff] %v15995_v31  ;;  %v16001_v56 = vadd.f32 %v10026_v14, %v15614_v10  ;;  %v17738_v46 = vld [vmem:[#allocation88_spill] sm:$0xff]  ;;  %v17739_v31 = vld [vmem:[#allocation90_spill] sm:$0xff]  ;;  %v7780_v52 = vmax.f32 %v15671_v9, 0.0  ;;  %v7790_v9 = vmax.f32 %v15701_v15, 0.0  ;;  %v7800_v15 = vmax.f32 %v15731_v44, 0.0 }
 0xbe5   :  { %17733 = vst [vmem:[#allocation24_spill] sm:$0xff] %v15989_v61  ;;  %v17737_v61 = vld [vmem:[#allocation87_spill] sm:$0xff]  ;;  %v16010_v18 = vadd.f32 %v10029_v7, %v17738_v46  ;;  %v10030_v26 = vld [vmem:[#allocation3 + $0x3e0] sm:$0xff]  ;;  %v10031_v27 = vld [vmem:[#allocation3 + $0x3e8] sm:$0xff]  ;;  %v7773_v46 = vmax.f32 %v15650_v28, 0.0  ;;  %v7774_v7 = vmax.f32 %v15653_v20, 0.0 }
 0xbe6   :  { %v16007_v6 = vadd.f32 %v10028_v23, %v17737_v61  ;;  %v16013_v41 = vadd.f32 %v10030_v26, %v17739_v31  ;;  %v16016_v10 = vadd.f32 %v10031_v27, %v15634_v38  ;;  %v10032_v14 = vld [vmem:[#allocation3 + $0x3f0] sm:$0xff]  ;;  %v7771_v61 = vmax.f32 %v15644_v12, 0.0  ;;  %7898 = vst [vmem:[#allocation12] sm:$0xff] %v7770_v17  ;;  %7908 = vst [vmem:[#allocation12 + $0x50] sm:$0xff] %v7780_v52  ;;  %v17743_v44 = vld [vmem:[#allocation21_spill] sm:$0xff] }
 0xbe7   :  { %v16019_v49 = vadd.f32 %v10032_v14, %v15638_v32  ;;  %v7772_v23 = vmax.f32 %v15647_v16, 0.0  ;;  %v7775_v31 = vmax.f32 %v15656_v30, 0.0  ;;  %v7776_v26 = vmax.f32 %v15659_v51, 0.0  ;;  %7901 = vst [vmem:[#allocation12 + $0x18] sm:$0xff] %v7773_v46  ;;  %7902 = vst [vmem:[#allocation12 + $0x20] sm:$0xff] %v7774_v7  ;;  %v17744_v17 = vld [vmem:[#allocation40_spill] sm:$0xff] }
 0xbe8   :  { %v7777_v38 = vmax.f32 %v15662_v25, 0.0  ;;  %v7778_v27 = vmax.f32 %v15665_v43, 0.0  ;;  %v7779_v32 = vmax.f32 %v15668_v22, 0.0  ;;  %7899 = vst [vmem:[#allocation12 + $0x8] sm:$0xff] %v7771_v61  ;;  %v7781_v12 = vmax.f32 %v15674_v40, 0.0  ;;  %7918 = vst [vmem:[#allocation12 + $0xa0] sm:$0xff] %v7790_v9 }
 0xbe9   :  { %7900 = vst [vmem:[#allocation12 + $0x10] sm:$0xff] %v7772_v23  ;;  %v7782_v16 = vmax.f32 %v15677_v3, 0.0  ;;  %v7783_v28 = vmax.f32 %v15680_v55, 0.0  ;;  %v7784_v20 = vmax.f32 %v15683_v24, 0.0  ;;  %7903 = vst [vmem:[#allocation12 + $0x28] sm:$0xff] %v7775_v31  ;;  %v7785_v30 = vmax.f32 %v15686_v62, 0.0 }
 0xbea   :  { %7904 = vst [vmem:[#allocation12 + $0x30] sm:$0xff] %v7776_v26  ;;  %v7786_v51 = vmax.f32 %v15689_v1, 0.0  ;;  %v7787_v25 = vmax.f32 %v15692_v0, 0.0  ;;  %v7788_v43 = vmax.f32 %v15695_v8, 0.0  ;;  %7905 = vst [vmem:[#allocation12 + $0x38] sm:$0xff] %v7777_v38  ;;  %v7789_v22 = vmax.f32 %v15698_v11, 0.0 }
 0xbeb   :  { %7906 = vst [vmem:[#allocation12 + $0x40] sm:$0xff] %v7778_v27  ;;  %7907 = vst [vmem:[#allocation12 + $0x48] sm:$0xff] %v7779_v32  ;;  %v7791_v40 = vmax.f32 %v15704_v34, 0.0  ;;  %v7792_v3 = vmax.f32 %v15707_v42, 0.0  ;;  %v7793_v55 = vmax.f32 %v15710_v19, 0.0  ;;  %v7794_v24 = vmax.f32 %v15713_v54, 0.0 }
 0xbec   :  { %7909 = vst [vmem:[#allocation12 + $0x58] sm:$0xff] %v7781_v12  ;;  %7910 = vst [vmem:[#allocation12 + $0x60] sm:$0xff] %v7782_v16  ;;  %v7795_v62 = vmax.f32 %v15716_v58, 0.0  ;;  %v7796_v1 = vmax.f32 %v15719_v53, 0.0  ;;  %v7797_v0 = vmax.f32 %v15722_v2, 0.0  ;;  %v7798_v8 = vmax.f32 %v15725_v47, 0.0 }
 0xbed   :  { %7911 = vst [vmem:[#allocation12 + $0x68] sm:$0xff] %v7783_v28  ;;  %7912 = vst [vmem:[#allocation12 + $0x70] sm:$0xff] %v7784_v20  ;;  %v7799_v11 = vmax.f32 %v15728_v63, 0.0  ;;  %v7801_v34 = vmax.f32 %v15734_v4, 0.0  ;;  %v7802_v42 = vmax.f32 %v15737_v57, 0.0  ;;  %v17740_v19 = vld [vmem:[#allocation18_spill] sm:$0xff] }
 0xbee   :  { %7913 = vst [vmem:[#allocation12 + $0x78] sm:$0xff] %v7785_v30  ;;  %7914 = vst [vmem:[#allocation12 + $0x80] sm:$0xff] %v7786_v51  ;;  %v7803_v54 = vmax.f32 %v17740_v19, 0.0  ;;  %v17741_v58 = vld [vmem:[#allocation19_spill] sm:$0xff]  ;;  %v7805_v2 = vmax.f32 %v15746_v45, 0.0  ;;  %v17742_v47 = vld [vmem:[#allocation30_spill] sm:$0xff] }
 0xbef   :  { %7915 = vst [vmem:[#allocation12 + $0x88] sm:$0xff] %v7787_v25  ;;  %7916 = vst [vmem:[#allocation12 + $0x90] sm:$0xff] %v7788_v43  ;;  %v7804_v53 = vmax.f32 %v17741_v58, 0.0  ;;  %v7806_v63 = vmax.f32 %v17742_v47, 0.0  ;;  %v7807_v14 = vmax.f32 %v17743_v44, 0.0  ;;  %v7808_v61 = vmax.f32 %v17744_v17, 0.0 }
 0xbf0   :  { %7917 = vst [vmem:[#allocation12 + $0x98] sm:$0xff] %v7789_v22  ;;  %7919 = vst [vmem:[#allocation12 + $0xa8] sm:$0xff] %v7791_v40  ;;  %v17745_v4 = vld [vmem:[#allocation98_spill] sm:$0xff]  ;;  %v17746_v23 = vld [vmem:[#allocation101_spill] sm:$0xff]  ;;  %v7827_v58 = vmax.f32 %v15812_v36, 0.0 }
 0xbf1   :  { %7920 = vst [vmem:[#allocation12 + $0xb0] sm:$0xff] %v7792_v3  ;;  %7921 = vst [vmem:[#allocation12 + $0xb8] sm:$0xff] %v7793_v55  ;;  %v7809_v57 = vmax.f32 %v17745_v4, 0.0  ;;  %v7810_v46 = vmax.f32 %v17746_v23, 0.0  ;;  %v17747_v7 = vld [vmem:[#allocation102_spill] sm:$0xff]  ;;  %v17748_v26 = vld [vmem:[#allocation103_spill] sm:$0xff] }
 0xbf2   :  { %7922 = vst [vmem:[#allocation12 + $0xc0] sm:$0xff] %v7794_v24  ;;  %7923 = vst [vmem:[#allocation12 + $0xc8] sm:$0xff] %v7795_v62  ;;  %v7811_v31 = vmax.f32 %v17747_v7, 0.0  ;;  %v7812_v38 = vmax.f32 %v17748_v26, 0.0  ;;  %v17749_v45 = vld [vmem:[#allocation104_spill] sm:$0xff]  ;;  %v17750_v32 = vld [vmem:[#allocation105_spill] sm:$0xff] }
 0xbf3   :  { %7924 = vst [vmem:[#allocation12 + $0xd0] sm:$0xff] %v7796_v1  ;;  %7925 = vst [vmem:[#allocation12 + $0xd8] sm:$0xff] %v7797_v0  ;;  %v7813_v27 = vmax.f32 %v17749_v45, 0.0  ;;  %v7814_v52 = vmax.f32 %v17750_v32, 0.0  ;;  %v17751_v12 = vld [vmem:[#allocation106_spill] sm:$0xff]  ;;  %v17752_v28 = vld [vmem:[#allocation107_spill] sm:$0xff] }
 0xbf4   :  { %7926 = vst [vmem:[#allocation12 + $0xe0] sm:$0xff] %v7798_v8  ;;  %7927 = vst [vmem:[#allocation12 + $0xe8] sm:$0xff] %v7799_v11  ;;  %v7815_v16 = vmax.f32 %v17751_v12, 0.0  ;;  %v7816_v20 = vmax.f32 %v17752_v28, 0.0  ;;  %v17753_v30 = vld [vmem:[#allocation108_spill] sm:$0xff]  ;;  %v17754_v25 = vld [vmem:[#allocation109_spill] sm:$0xff] }
 0xbf5   :  { %7928 = vst [vmem:[#allocation12 + $0xf0] sm:$0xff] %v7800_v15  ;;  %7929 = vst [vmem:[#allocation12 + $0xf8] sm:$0xff] %v7801_v34  ;;  %v7817_v51 = vmax.f32 %v17753_v30, 0.0  ;;  %v7818_v43 = vmax.f32 %v17754_v25, 0.0  ;;  %v17755_v22 = vld [vmem:[#allocation110_spill] sm:$0xff]  ;;  %v17756_v40 = vld [vmem:[#allocation31_spill] sm:$0xff] }
 0xbf6   :  { %7930 = vst [vmem:[#allocation12 + $0x100] sm:$0xff] %v7802_v42  ;;  %7931 = vst [vmem:[#allocation12 + $0x108] sm:$0xff] %v7803_v54  ;;  %v7819_v9 = vmax.f32 %v17755_v22, 0.0  ;;  %v7820_v3 = vmax.f32 %v17756_v40, 0.0  ;;  %v17757_v55 = vld [vmem:[#allocation111_spill] sm:$0xff]  ;;  %v17758_v62 = vld [vmem:[#allocation33_spill] sm:$0xff] }
 0xbf7   :  { %7932 = vst [vmem:[#allocation12 + $0x110] sm:$0xff] %v7804_v53  ;;  %7933 = vst [vmem:[#allocation12 + $0x118] sm:$0xff] %v7805_v2  ;;  %v7821_v24 = vmax.f32 %v17757_v55, 0.0  ;;  %v7822_v1 = vmax.f32 %v17758_v62, 0.0  ;;  %v17759_v0 = vld [vmem:[#allocation112_spill] sm:$0xff]  ;;  %v17760_v11 = vld [vmem:[#allocation113_spill] sm:$0xff] }
 0xbf8   :  { %7934 = vst [vmem:[#allocation12 + $0x120] sm:$0xff] %v7806_v63  ;;  %7935 = vst [vmem:[#allocation12 + $0x128] sm:$0xff] %v7807_v14  ;;  %v7823_v8 = vmax.f32 %v17759_v0, 0.0  ;;  %v7824_v15 = vmax.f32 %v17760_v11, 0.0  ;;  %v17761_v34 = vld [vmem:[#allocation22_spill] sm:$0xff]  ;;  %v17763_v53 = vld [vmem:[#allocation25_spill] sm:$0xff] }
 0xbf9   :  { %7936 = vst [vmem:[#allocation12 + $0x130] sm:$0xff] %v7808_v61  ;;  %7937 = vst [vmem:[#allocation12 + $0x138] sm:$0xff] %v7809_v57  ;;  %v7825_v42 = vmax.f32 %v17761_v34, 0.0  ;;  %v17762_v19 = vld [vmem:[#allocation114_spill] sm:$0xff]  ;;  %v7828_v2 = vmax.f32 %v17763_v53, 0.0  ;;  %v17764_v47 = vld [vmem:[#allocation115_spill] sm:$0xff] }
 0xbfa   :  { %7938 = vst [vmem:[#allocation12 + $0x140] sm:$0xff] %v7810_v46  ;;  %7939 = vst [vmem:[#allocation12 + $0x148] sm:$0xff] %v7811_v31  ;;  %v7826_v54 = vmax.f32 %v17762_v19, 0.0  ;;  %v7829_v63 = vmax.f32 %v17764_v47, 0.0  ;;  %v17765_v44 = vld [vmem:[#allocation26_spill] sm:$0xff]  ;;  %v17766_v17 = vld [vmem:[#allocation116_spill] sm:$0xff] }
 0xbfb   :  { %7940 = vst [vmem:[#allocation12 + $0x150] sm:$0xff] %v7812_v38  ;;  %7941 = vst [vmem:[#allocation12 + $0x158] sm:$0xff] %v7813_v27  ;;  %v7830_v14 = vmax.f32 %v17765_v44, 0.0  ;;  %v7831_v61 = vmax.f32 %v17766_v17, 0.0  ;;  %v17767_v4 = vld [vmem:[#allocation45_spill] sm:$0xff]  ;;  %v17769_v46 = vld [vmem:[#allocation46_spill] sm:$0xff] }
 0xbfc   :  { %7942 = vst [vmem:[#allocation12 + $0x160] sm:$0xff] %v7814_v52  ;;  %7943 = vst [vmem:[#allocation12 + $0x168] sm:$0xff] %v7815_v16  ;;  %v7832_v57 = vmax.f32 %v17767_v4, 0.0  ;;  %v17768_v23 = vld [vmem:[#allocation117_spill] sm:$0xff]  ;;  %v7834_v7 = vmax.f32 %v17769_v46, 0.0  ;;  %v17770_v31 = vld [vmem:[#allocation118_spill] sm:$0xff] }
 0xbfd   :  { %7944 = vst [vmem:[#allocation12 + $0x170] sm:$0xff] %v7816_v20  ;;  %7945 = vst [vmem:[#allocation12 + $0x178] sm:$0xff] %v7817_v51  ;;  %v7833_v36 = vmax.f32 %v17768_v23, 0.0  ;;  %v7835_v26 = vmax.f32 %v17770_v31, 0.0  ;;  %v17771_v38 = vld [vmem:[#allocation51_spill] sm:$0xff]  ;;  %v17774_v16 = vld [vmem:[#allocation120_spill] sm:$0xff] }
 0xbfe   :  { %7946 = vst [vmem:[#allocation12 + $0x180] sm:$0xff] %v7818_v43  ;;  %7947 = vst [vmem:[#allocation12 + $0x188] sm:$0xff] %v7819_v9  ;;  %v7836_v45 = vmax.f32 %v17771_v38, 0.0  ;;  %v17772_v27 = vld [vmem:[#allocation119_spill] sm:$0xff]  ;;  %v7839_v28 = vmax.f32 %v17774_v16, 0.0  ;;  %v17775_v20 = vld [vmem:[#allocation73_spill] sm:$0xff] }
 0xbff   :  { %7948 = vst [vmem:[#allocation12 + $0x190] sm:$0xff] %v7820_v3  ;;  %7949 = vst [vmem:[#allocation12 + $0x198] sm:$0xff] %v7821_v24  ;;  %v7837_v32 = vmax.f32 %v17772_v27, 0.0  ;;  %v17773_v52 = vld [vmem:[#allocation23_spill] sm:$0xff]  ;;  %v7840_v30 = vmax.f32 %v17775_v20, 0.0  ;;  %v17776_v51 = vld [vmem:[#allocation121_spill] sm:$0xff] }
 0xc00   :  { %7950 = vst [vmem:[#allocation12 + $0x1a0] sm:$0xff] %v7822_v1  ;;  %7951 = vst [vmem:[#allocation12 + $0x1a8] sm:$0xff] %v7823_v8  ;;  %v7838_v12 = vmax.f32 %v17773_v52, 0.0  ;;  %v7841_v25 = vmax.f32 %v17776_v51, 0.0  ;;  %v17777_v43 = vld [vmem:[#allocation74_spill] sm:$0xff]  ;;  %v7843_v9 = vmax.f32 %v15860_v48, 0.0 }
 0xc01   :  { %7952 = vst [vmem:[#allocation12 + $0x1b0] sm:$0xff] %v7824_v15  ;;  %7953 = vst [vmem:[#allocation12 + $0x1b8] sm:$0xff] %v7825_v42  ;;  %v7842_v22 = vmax.f32 %v17777_v43, 0.0  ;;  %v17778_v40 = vld [vmem:[#allocation122_spill] sm:$0xff]  ;;  %v17779_v55 = vld [vmem:[#allocation75_spill] sm:$0xff]  ;;  %v7855_v17 = vmax.f32 %v15896_v37, 0.0 }
 0xc02   :  { %7954 = vst [vmem:[#allocation12 + $0x1c0] sm:$0xff] %v7826_v54  ;;  %7955 = vst [vmem:[#allocation12 + $0x1c8] sm:$0xff] %v7827_v58  ;;  %v7844_v3 = vmax.f32 %v17778_v40, 0.0  ;;  %v7845_v24 = vmax.f32 %v17779_v55, 0.0  ;;  %v17780_v62 = vld [vmem:[#allocation123_spill] sm:$0xff]  ;;  %v17781_v0 = vld [vmem:[#allocation124_spill] sm:$0xff] }
 0xc03   :  { %7956 = vst [vmem:[#allocation12 + $0x1d0] sm:$0xff] %v7828_v2  ;;  %7957 = vst [vmem:[#allocation12 + $0x1d8] sm:$0xff] %v7829_v63  ;;  %v7846_v1 = vmax.f32 %v17780_v62, 0.0  ;;  %v7847_v8 = vmax.f32 %v17781_v0, 0.0  ;;  %v17782_v11 = vld [vmem:[#allocation77_spill] sm:$0xff]  ;;  %v17784_v42 = vld [vmem:[#allocation78_spill] sm:$0xff] }
 0xc04   :  { %7958 = vst [vmem:[#allocation12 + $0x1e0] sm:$0xff] %v7830_v14  ;;  %7959 = vst [vmem:[#allocation12 + $0x1e8] sm:$0xff] %v7831_v61  ;;  %v7848_v15 = vmax.f32 %v17782_v11, 0.0  ;;  %v17783_v34 = vld [vmem:[#allocation125_spill] sm:$0xff]  ;;  %v7850_v19 = vmax.f32 %v17784_v42, 0.0  ;;  %v17785_v54 = vld [vmem:[#allocation126_spill] sm:$0xff] }
 0xc05   :  { %7960 = vst [vmem:[#allocation12 + $0x1f0] sm:$0xff] %v7832_v57  ;;  %7961 = vst [vmem:[#allocation12 + $0x1f8] sm:$0xff] %v7833_v36  ;;  %v7849_v48 = vmax.f32 %v17783_v34, 0.0  ;;  %v7851_v58 = vmax.f32 %v17785_v54, 0.0  ;;  %v17786_v53 = vld [vmem:[#allocation79_spill] sm:$0xff]  ;;  %v17788_v44 = vld [vmem:[#allocation80_spill] sm:$0xff] }
 0xc06   :  { %7962 = vst [vmem:[#allocation12 + $0x200] sm:$0xff] %v7834_v7  ;;  %7963 = vst [vmem:[#allocation12 + $0x208] sm:$0xff] %v7835_v26  ;;  %v7852_v2 = vmax.f32 %v17786_v53, 0.0  ;;  %v17787_v47 = vld [vmem:[#allocation127_spill] sm:$0xff]  ;;  %v7854_v14 = vmax.f32 %v17788_v44, 0.0  ;;  %v17789_v61 = vld [vmem:[#allocation128_spill] sm:$0xff] }
 0xc07   :  { %7964 = vst [vmem:[#allocation12 + $0x210] sm:$0xff] %v7836_v45  ;;  %7965 = vst [vmem:[#allocation12 + $0x218] sm:$0xff] %v7837_v32  ;;  %v7853_v63 = vmax.f32 %v17787_v47, 0.0  ;;  %v7856_v4 = vmax.f32 %v17789_v61, 0.0  ;;  %v7857_v57 = vmax.f32 %v15902_v5, 0.0  ;;  %v17790_v23 = vld [vmem:[#allocation81_spill] sm:$0xff] }
 0xc08   :  { %7966 = vst [vmem:[#allocation12 + $0x220] sm:$0xff] %v7838_v12  ;;  %7967 = vst [vmem:[#allocation12 + $0x228] sm:$0xff] %v7839_v28  ;;  %v7858_v36 = vmax.f32 %v17790_v23, 0.0  ;;  %v17791_v46 = vld [vmem:[#allocation129_spill] sm:$0xff]  ;;  %v17792_v31 = vld [vmem:[#allocation60_spill] sm:$0xff]  ;;  %v7861_v37 = vmax.f32 %v15914_v13, 0.0 }
 0xc09   :  { %7968 = vst [vmem:[#allocation12 + $0x230] sm:$0xff] %v7840_v30  ;;  %7969 = vst [vmem:[#allocation12 + $0x238] sm:$0xff] %v7841_v25  ;;  %v7859_v7 = vmax.f32 %v17791_v46, 0.0  ;;  %v7860_v26 = vmax.f32 %v17792_v31, 0.0  ;;  %v17793_v38 = vld [vmem:[#allocation130_spill] sm:$0xff]  ;;  %v17794_v27 = vld [vmem:[#allocation63_spill] sm:$0xff] }
 0xc0a   :  { %7970 = vst [vmem:[#allocation12 + $0x240] sm:$0xff] %v7842_v22  ;;  %7971 = vst [vmem:[#allocation12 + $0x248] sm:$0xff] %v7843_v9  ;;  %v7862_v45 = vmax.f32 %v17793_v38, 0.0  ;;  %v7863_v32 = vmax.f32 %v17794_v27, 0.0  ;;  %v17795_v52 = vld [vmem:[#allocation131_spill] sm:$0xff]  ;;  %v17796_v5 = vld [vmem:[#allocation132_spill] sm:$0xff] }
 0xc0b   :  { %7972 = vst [vmem:[#allocation12 + $0x250] sm:$0xff] %v7844_v3  ;;  %7973 = vst [vmem:[#allocation12 + $0x258] sm:$0xff] %v7845_v24  ;;  %v7864_v12 = vmax.f32 %v17795_v52, 0.0  ;;  %v7865_v16 = vmax.f32 %v17796_v5, 0.0  ;;  %v17797_v28 = vld [vmem:[#allocation83_spill] sm:$0xff]  ;;  %v17798_v30 = vld [vmem:[#allocation17_spill] sm:$0xff] }
 0xc0c   :  { %7974 = vst [vmem:[#allocation12 + $0x260] sm:$0xff] %v7846_v1  ;;  %7975 = vst [vmem:[#allocation12 + $0x268] sm:$0xff] %v7847_v8  ;;  %v7866_v20 = vmax.f32 %v17797_v28, 0.0  ;;  %v7867_v51 = vmax.f32 %v17798_v30, 0.0  ;;  %v17799_v25 = vld [vmem:[#allocation64_spill] sm:$0xff]  ;;  %v17803_v24 = vld [vmem:[#allocation85_spill] sm:$0xff] }
 0xc0d   :  { %7976 = vst [vmem:[#allocation12 + $0x270] sm:$0xff] %v7848_v15  ;;  %7977 = vst [vmem:[#allocation12 + $0x278] sm:$0xff] %v7849_v48  ;;  %v7868_v43 = vmax.f32 %v17799_v25, 0.0  ;;  %v17800_v13 = vld [vmem:[#allocation52_spill] sm:$0xff]  ;;  %v7872_v62 = vmax.f32 %v17803_v24, 0.0  ;;  %v17804_v1 = vld [vmem:[#allocation61_spill] sm:$0xff] }
 0xc0e   :  { %7978 = vst [vmem:[#allocation12 + $0x280] sm:$0xff] %v7850_v19  ;;  %7979 = vst [vmem:[#allocation12 + $0x288] sm:$0xff] %v7851_v58  ;;  %v7869_v22 = vmax.f32 %v17800_v13, 0.0  ;;  %v17801_v9 = vld [vmem:[#allocation84_spill] sm:$0xff]  ;;  %v7873_v0 = vmax.f32 %v17804_v1, 0.0  ;;  %v17805_v8 = vld [vmem:[#allocation86_spill] sm:$0xff] }
 0xc0f   :  { %7980 = vst [vmem:[#allocation12 + $0x290] sm:$0xff] %v7852_v2  ;;  %7981 = vst [vmem:[#allocation12 + $0x298] sm:$0xff] %v7853_v63  ;;  %v7870_v40 = vmax.f32 %v17801_v9, 0.0  ;;  %v17802_v3 = vld [vmem:[#allocation48_spill] sm:$0xff]  ;;  %v7874_v11 = vmax.f32 %v17805_v8, 0.0  ;;  %v17806_v15 = vld [vmem:[#allocation58_spill] sm:$0xff] }
 0xc10   :  { %7982 = vst [vmem:[#allocation12 + $0x2a0] sm:$0xff] %v7854_v14  ;;  %7983 = vst [vmem:[#allocation12 + $0x2a8] sm:$0xff] %v7855_v17  ;;  %v7871_v55 = vmax.f32 %v17802_v3, 0.0  ;;  %v7875_v34 = vmax.f32 %v17806_v15, 0.0  ;;  %v17807_v48 = vld [vmem:[#allocation70_spill] sm:$0xff]  ;;  %v17808_v19 = vld [vmem:[#allocation69_spill] sm:$0xff] }
 0xc11   :  { %7984 = vst [vmem:[#allocation12 + $0x2b0] sm:$0xff] %v7856_v4  ;;  %7985 = vst [vmem:[#allocation12 + $0x2b8] sm:$0xff] %v7857_v57  ;;  %v7876_v42 = vmax.f32 %v17807_v48, 0.0  ;;  %v7877_v54 = vmax.f32 %v17808_v19, 0.0  ;;  %v17809_v58 = vld [vmem:[#allocation89_spill] sm:$0xff]  ;;  %v7879_v2 = vmax.f32 %v15968_v21, 0.0 }
 0xc12   :  { %7986 = vst [vmem:[#allocation12 + $0x2c0] sm:$0xff] %v7858_v36  ;;  %7987 = vst [vmem:[#allocation12 + $0x2c8] sm:$0xff] %v7859_v7  ;;  %v7878_v53 = vmax.f32 %v17809_v58, 0.0  ;;  %v7880_v47 = vmax.f32 %v15971_v39, 0.0  ;;  %v7881_v63 = vmax.f32 %v15974_v29, 0.0  ;;  %v7882_v44 = vmax.f32 %v15977_v60, 0.0 }
 0xc13   :  { %7988 = vst [vmem:[#allocation12 + $0x2d0] sm:$0xff] %v7860_v26  ;;  %7989 = vst [vmem:[#allocation12 + $0x2d8] sm:$0xff] %v7861_v37  ;;  %v7883_v14 = vmax.f32 %v15980_v35, 0.0  ;;  %v7884_v17 = vmax.f32 %v15983_v50, 0.0  ;;  %v17810_v21 = vld [vmem:[#allocation37_spill] sm:$0xff]  ;;  %v17811_v61 = vld [vmem:[#allocation24_spill] sm:$0xff] }
 0xc14   :  { %7990 = vst [vmem:[#allocation12 + $0x2e0] sm:$0xff] %v7862_v45  ;;  %7991 = vst [vmem:[#allocation12 + $0x2e8] sm:$0xff] %v7863_v32  ;;  %v7885_v39 = vmax.f32 %v17810_v21, 0.0  ;;  %v7886_v4 = vmax.f32 %v17811_v61, 0.0  ;;  %v17812_v57 = vld [vmem:[#allocation91_spill] sm:$0xff]  ;;  %v7889_v60 = vmax.f32 %v15998_v59, 0.0 }
 0xc15   :  { %7992 = vst [vmem:[#allocation12 + $0x2f0] sm:$0xff] %v7864_v12  ;;  %7993 = vst [vmem:[#allocation12 + $0x2f8] sm:$0xff] %v7865_v16  ;;  %v7887_v23 = vmax.f32 %v17812_v57, 0.0  ;;  %v17813_v36 = vld [vmem:[#allocation35_spill] sm:$0xff]  ;;  %v7890_v35 = vmax.f32 %v16001_v56, 0.0  ;;  %v7891_v50 = vmax.f32 %v16004_v33, 0.0 }
 0xc16   :  { %7994 = vst [vmem:[#allocation12 + $0x300] sm:$0xff] %v7866_v20  ;;  %7995 = vst [vmem:[#allocation12 + $0x308] sm:$0xff] %v7867_v51  ;;  %v7888_v29 = vmax.f32 %v17813_v36, 0.0  ;;  %v7892_v46 = vmax.f32 %v16007_v6, 0.0  ;;  %v7893_v7 = vmax.f32 %v16010_v18, 0.0  ;;  %v7894_v31 = vmax.f32 %v16013_v41, 0.0 }
 0xc17   :  { %7996 = vst [vmem:[#allocation12 + $0x310] sm:$0xff] %v7868_v43  ;;  %7997 = vst [vmem:[#allocation12 + $0x318] sm:$0xff] %v7869_v22  ;;  %v7895_v26 = vmax.f32 %v16016_v10, 0.0  ;;  %v7896_v37 = vmax.f32 %v16019_v49, 0.0 }
 0xc18   :  { %7998 = vst [vmem:[#allocation12 + $0x320] sm:$0xff] %v7870_v40  ;;  %7999 = vst [vmem:[#allocation12 + $0x328] sm:$0xff] %v7871_v55 }
 0xc19   :  { %8000 = vst [vmem:[#allocation12 + $0x330] sm:$0xff] %v7872_v62  ;;  %8001 = vst [vmem:[#allocation12 + $0x338] sm:$0xff] %v7873_v0 }
 0xc1a   :  { %8002 = vst [vmem:[#allocation12 + $0x340] sm:$0xff] %v7874_v11  ;;  %8003 = vst [vmem:[#allocation12 + $0x348] sm:$0xff] %v7875_v34 }
 0xc1b   :  { %8004 = vst [vmem:[#allocation12 + $0x350] sm:$0xff] %v7876_v42  ;;  %8005 = vst [vmem:[#allocation12 + $0x358] sm:$0xff] %v7877_v54 }
 0xc1c   :  { %8006 = vst [vmem:[#allocation12 + $0x360] sm:$0xff] %v7878_v53  ;;  %8007 = vst [vmem:[#allocation12 + $0x368] sm:$0xff] %v7879_v2 }
 0xc1d   :  { %8008 = vst [vmem:[#allocation12 + $0x370] sm:$0xff] %v7880_v47  ;;  %8009 = vst [vmem:[#allocation12 + $0x378] sm:$0xff] %v7881_v63 }
 0xc1e   :  { %8010 = vst [vmem:[#allocation12 + $0x380] sm:$0xff] %v7882_v44  ;;  %8011 = vst [vmem:[#allocation12 + $0x388] sm:$0xff] %v7883_v14 }
 0xc1f   :  { %8012 = vst [vmem:[#allocation12 + $0x390] sm:$0xff] %v7884_v17  ;;  %8013 = vst [vmem:[#allocation12 + $0x398] sm:$0xff] %v7885_v39 }
 0xc20   :  { %8014 = vst [vmem:[#allocation12 + $0x3a0] sm:$0xff] %v7886_v4  ;;  %8015 = vst [vmem:[#allocation12 + $0x3a8] sm:$0xff] %v7887_v23 }
 0xc21   :  { %8016 = vst [vmem:[#allocation12 + $0x3b0] sm:$0xff] %v7888_v29  ;;  %8017 = vst [vmem:[#allocation12 + $0x3b8] sm:$0xff] %v7889_v60 }
 0xc22   :  { %8018 = vst [vmem:[#allocation12 + $0x3c0] sm:$0xff] %v7890_v35  ;;  %8019 = vst [vmem:[#allocation12 + $0x3c8] sm:$0xff] %v7891_v50 }
 0xc23   :  { %8020 = vst [vmem:[#allocation12 + $0x3d0] sm:$0xff] %v7892_v46  ;;  %8021 = vst [vmem:[#allocation12 + $0x3d8] sm:$0xff] %v7893_v7 }
 0xc24   :  { %8022 = vst [vmem:[#allocation12 + $0x3e0] sm:$0xff] %v7894_v31  ;;  %8023 = vst [vmem:[#allocation12 + $0x3e8] sm:$0xff] %v7895_v26 }
 0xc25   :  { %8024 = vst [vmem:[#allocation12 + $0x3f0] sm:$0xff] %v7896_v37 }
 0xc26   :  { %10154 = shalt.err (!%p10151_p2)
}
 0xc27   :  { %s10155_s28 = scalar_lea.hbm %s16170_s7, 16384 }
 0xc28   :  { %p10156_p3 = scmp.ne.s32.totalorder %s16170_s7, %s10155_s28  ;;  %p10159_p4 = scmp.lt.u32.totalorder %s10155_s28, %s16170_s7 }
 0xc2a   :  { %p10161_p5 = pnand %p10159_p4, %p10156_p3 }
 0xc2c   :  { %10164 = shalt.err (!%p10161_p5)
}
 0xc2d   :  { %8037 = dma.vmem_to_hbm [thread:$0]  %s8032_s1, 16384, %s16170_s7, [#allocation5], %s10180_s3, %s10180_s3, %s10181_s16  }
 0xc2e   :  { %10171 = dma.done.wait [#allocation5], 16384  }
 0xc2f   :  { %10172 = vsyncadd [#allocation5], 4294950912 }
 0xc30   :  { %8041 = vsyncpa [#allocation4], 1 }
 0xc31   :  { %8042 = vsyncpa [#allocation7], 1 }
 0xc32   :  { %8043 = vsyncpa [#allocation10], 1 }
 0xc33   :  { %8044 = vsyncpa [#allocation5], 1 }

</bundles_post_ra>
